<compile_context>
chip_gen: v7x
topology: tpu7x:2x2x1
jax: 0.10.0
libtpu: 0.0.40
codegen_flags: <defaults>
</compile_context>

<pallas_src>
import functools

import numpy as np
import jax
import jax.numpy as jnp
from jax import lax
from jax.experimental import pallas as pl
from jax.experimental.pallas import tpu as pltpu

# ----------------------------------------------------------------------------
# Mini YoloV3 "config" (stands in for parse_yolo_config of the .cfg file)
# ----------------------------------------------------------------------------
INP_DIM = 16           # net_info["height"]
IN_CHANNELS = 4
NUM_CLASSES = 2
NUM_ANCHORS = 3
BBOX_ATTRS = 5 + NUM_CLASSES          # x, y, w, h, obj, classes
HEAD_CH = NUM_ANCHORS * BBOX_ATTRS    # channels of a yolo head conv
LEAKY_SLOPE = 0.1
BN_EPS = 1e-5

CPAD = 128             # lane-width channel padding (everything lane-dense)
TILE_M = 256           # rows of the patch matrix per grid step

ANCHORS_HEAD1 = [(6.0, 8.0), (9.0, 12.0), (12.0, 6.0)]   # coarse grid (4x4)
ANCHORS_HEAD2 = [(2.0, 3.0), (3.0, 2.0), (4.0, 5.0)]     # fine grid  (16x16)

BLOCKS = [
    {"type": "net", "height": INP_DIM},
    # i = 0 .. 13 (module indices, like self.blocks[1:])
    {"type": "convolutional", "filters": 8,  "size": 3, "stride": 1, "pad": 1, "bn": True,  "act": "leaky"},   # 0: 16x16
    {"type": "convolutional", "filters": 16, "size": 3, "stride": 2, "pad": 1, "bn": True,  "act": "leaky"},   # 1: 8x8
    {"type": "convolutional", "filters": 16, "size": 1, "stride": 1, "pad": 0, "bn": True,  "act": "leaky"},   # 2: 8x8
    {"type": "shortcut", "from": -2},                                                                          # 3: 8x8
    {"type": "convolutional", "filters": 32, "size": 3, "stride": 2, "pad": 1, "bn": True,  "act": "leaky"},   # 4: 4x4
    {"type": "convolutional", "filters": HEAD_CH, "size": 1, "stride": 1, "pad": 0, "bn": False, "act": "linear"},  # 5
    {"type": "yolo", "anchors": ANCHORS_HEAD1, "classes": NUM_CLASSES},                                        # 6
    {"type": "route", "layers": "-4"},                                                                         # 7: -> 3
    {"type": "convolutional", "filters": 8,  "size": 1, "stride": 1, "pad": 0, "bn": True,  "act": "leaky"},   # 8: 8x8
    {"type": "upsample", "stride": 2},                                                                         # 9: 16x16
    {"type": "route", "layers": "-1, -10"},                                                                    # 10: cat(9, 0)
    {"type": "convolutional", "filters": 16, "size": 3, "stride": 1, "pad": 1, "bn": True,  "act": "leaky"},   # 11
    {"type": "convolutional", "filters": HEAD_CH, "size": 1, "stride": 1, "pad": 0, "bn": False, "act": "linear"},  # 12
    {"type": "yolo", "anchors": ANCHORS_HEAD2, "classes": NUM_CLASSES},                                        # 13
]


# ----------------------------------------------------------------------------
# In-kernel YOLO math (shared by the fused head-conv kernel and the fallback)
# ----------------------------------------------------------------------------
def _yolo_math(y, row0, code, anc, *, stride, ho, wo):
    """predict_transform applied to a (tm, 128) f32 slab.

    y    : raw head-conv activations; lane c = a*D + d holds anchor a, attr d
    row0 : first global row of this block; global row = (b*ho + h)*wo + w
    code : (1, 128) int32, attribute index d per lane (>=4 for padded lanes)
    anc  : (1, 128) f32, raw anchor w/h on lanes with d==2/3, else 0
    """
    rows = row0 + lax.broadcasted_iota(jnp.int32, y.shape, 0)
    if (wo & (wo - 1)) == 0 and (ho & (ho - 1)) == 0:     # powers of two: use masks/shifts
        wcol = (rows & (wo - 1)).astype(jnp.float32)
        hrow = ((rows >> (wo.bit_length() - 1)) & (ho - 1)).astype(jnp.float32)
    else:
        wcol = (rows % wo).astype(jnp.float32)
        hrow = ((rows // wo) % ho).astype(jnp.float32)
    sig = jax.nn.sigmoid(y)
    is_wh = jnp.logical_or(code == 2, code == 3)
    wh = jnp.exp(jnp.where(is_wh, y, 0.0)) * anc          # masked exp: no inf on other lanes
    off = jnp.where(code == 0, wcol, jnp.where(code == 1, hrow, 0.0))
    return jnp.where(code <= 1, (sig + off) * stride, jnp.where(is_wh, wh, sig))


def _yolo_channel_consts(anchors, num_classes):
    """Per-lane attribute code and raw anchor value for a head's 128 lanes."""
    A, D = len(anchors), 5 + num_classes
    code = np.full((1, CPAD), 5, np.int32)                # padded lanes -> sigmoid branch
    anc = np.zeros((1, CPAD), np.float32)
    for a in range(A):
        for d in range(D):
            c = a * D + d
            code[0, c] = d
            if d == 2:
                anc[0, c] = float(anchors[a][0])
            elif d == 3:
                anc[0, c] = float(anchors[a][1])
    return jnp.asarray(code), jnp.asarray(anc)


# ----------------------------------------------------------------------------
# Pallas kernels
# ----------------------------------------------------------------------------
def _conv_kernel(p_ref, w_ref, s_ref, b_ref, o_ref, *, leaky):
    """act((patches_bf16 @ W_bf16) * bn_scale + bn_bias) -> bf16, MXU + fused VPU epilogue."""
    acc = jnp.dot(p_ref[...], w_ref[...], preferred_element_type=jnp.float32)
    y = acc * s_ref[...] + b_ref[...]
    if leaky:
        y = jnp.where(y > 0, y, LEAKY_SLOPE * y)
    o_ref[...] = y.astype(o_ref.dtype)


def _conv_res_kernel(p_ref, w_ref, s_ref, b_ref, r_ref, o_ref, *, leaky):
    """Conv with the shortcut (residual) add fused into the epilogue."""
    acc = jnp.dot(p_ref[...], w_ref[...], preferred_element_type=jnp.float32)
    y = acc * s_ref[...] + b_ref[...]
    if leaky:
        y = jnp.where(y > 0, y, LEAKY_SLOPE * y)
    o_ref[...] = (y + r_ref[...].astype(jnp.float32)).astype(o_ref.dtype)


def _conv_yolo_kernel(p_ref, w_ref, s_ref, b_ref, code_ref, anc_ref, o_ref, *,
                      leaky, stride, ho, wo):
    """Head conv with the YOLO predict_transform fused into the epilogue."""
    acc = jnp.dot(p_ref[...], w_ref[...], preferred_element_type=jnp.float32)
    y = acc * s_ref[...] + b_ref[...]
    if leaky:
        y = jnp.where(y > 0, y, LEAKY_SLOPE * y)
    row0 = pl.program_id(0) * o_ref.shape[0]
    o_ref[...] = _yolo_math(y, row0, code_ref[...], anc_ref[...],
                            stride=stride, ho=ho, wo=wo)


def _yolo_kernel(x_ref, code_ref, anc_ref, o_ref, *, stride, ho, wo):
    """Standalone YOLO transform (fallback when fusion with the conv is unsafe)."""
    row0 = pl.program_id(0) * o_ref.shape[0]
    o_ref[...] = _yolo_math(x_ref[...].astype(jnp.float32), row0,
                            code_ref[...], anc_ref[...],
                            stride=stride, ho=ho, wo=wo)


def _add_kernel(a_ref, b_ref, o_ref):
    """Lane-dense 2D shortcut add (fallback when fusion with the conv is unsafe)."""
    o_ref[...] = (a_ref[...].astype(jnp.float32)
                  + b_ref[...].astype(jnp.float32)).astype(o_ref.dtype)


# ----------------------------------------------------------------------------
# Layer wrappers
# ----------------------------------------------------------------------------
def _tile_m(M):
    tm = min(TILE_M, M)
    assert M % tm == 0, (M, tm)
    return tm


def conv2d(x, p, k, stride, pad, leaky, residual=None, yolo=None):
    """x: (B, H, W, CPAD) bf16 NHWC with real channels in the leading lanes."""
    B, H, W, Cp = x.shape
    xp = jnp.pad(x, ((0, 0), (pad, pad), (pad, pad), (0, 0))) if pad else x
    Ho = (H + 2 * pad - k) // stride + 1
    Wo = (W + 2 * pad - k) // stride + 1
    cols = []
    for dy in range(k):
        for dx in range(k):
            cols.append(xp[:, dy:dy + stride * Ho:stride, dx:dx + stride * Wo:stride, :])
    patches = cols[0] if len(cols) == 1 else jnp.concatenate(cols, axis=-1)
    M, K = B * Ho * Wo, k * k * Cp
    # TODO(synk): at real YoloV3 sizes, build the patch block in-kernel (im2col in
    # VMEM) to avoid the k*k HBM read amplification of materializing `patches`.
    patches = patches.reshape(M, K).astype(jnp.bfloat16)

    tm = _tile_m(M)
    grid = (M // tm,)
    cparams = pltpu.CompilerParams(dimension_semantics=("parallel",))
    mat_specs = [pl.BlockSpec((tm, K), lambda i: (i, 0)),      # patch rows (tiled over M)
                 pl.BlockSpec((K, Cp), lambda i: (0, 0)),      # weights (K, 128)
                 pl.BlockSpec((1, Cp), lambda i: (0, 0)),      # folded-BN scale
                 pl.BlockSpec((1, Cp), lambda i: (0, 0))]      # folded-BN bias
    out_spec = pl.BlockSpec((tm, Cp), lambda i: (i, 0))

    if yolo is not None:                                       # conv + YOLO head, fused
        anchors, num_classes, inp_dim = yolo
        code, anc = _yolo_channel_consts(anchors, num_classes)
        kernel = functools.partial(_conv_yolo_kernel, leaky=leaky,
                                   stride=float(inp_dim // Ho), ho=Ho, wo=Wo)
        det = pl.pallas_call(
            kernel,
            out_shape=jax.ShapeDtypeStruct((M, Cp), jnp.float32),
            grid=grid,
            in_specs=mat_specs + [pl.BlockSpec((1, Cp), lambda i: (0, 0)),
                                  pl.BlockSpec((1, Cp), lambda i: (0, 0))],
            out_specs=out_spec,
            compiler_params=cparams,
        )(patches, p["w"], p["scale"], p["bias"], code, anc)
        A, D = len(anchors), 5 + num_classes
        return det.reshape(B, Ho, Wo, Cp)[..., :A * D].reshape(B, Ho * Wo * A, D)

    if residual is not None:                                   # conv + shortcut, fused
        kernel = functools.partial(_conv_res_kernel, leaky=leaky)
        out = pl.pallas_call(
            kernel,
            out_shape=jax.ShapeDtypeStruct((M, Cp), jnp.bfloat16),
            grid=grid,
            in_specs=mat_specs + [pl.BlockSpec((tm, Cp), lambda i: (i, 0))],
            out_specs=out_spec,
            compiler_params=cparams,
        )(patches, p["w"], p["scale"], p["bias"], residual.reshape(M, Cp))
    else:                                                      # plain conv
        kernel = functools.partial(_conv_kernel, leaky=leaky)
        out = pl.pallas_call(
            kernel,
            out_shape=jax.ShapeDtypeStruct((M, Cp), jnp.bfloat16),
            grid=grid,
            in_specs=mat_specs,
            out_specs=out_spec,
            compiler_params=cparams,
        )(patches, p["w"], p["scale"], p["bias"])
    return out.reshape(B, Ho, Wo, Cp)


def shortcut_add(a, b):
    """Fallback shortcut (residual) add, flattened to a lane-dense (M, 128) slab."""
    B, H, W, C = a.shape
    M = B * H * W
    tm = _tile_m(M)
    out = pl.pallas_call(
        _add_kernel,
        out_shape=jax.ShapeDtypeStruct((M, C), a.dtype),
        grid=(M // tm,),
        in_specs=[pl.BlockSpec((tm, C), lambda i: (i, 0)),
                  pl.BlockSpec((tm, C), lambda i: (i, 0))],
        out_specs=pl.BlockSpec((tm, C), lambda i: (i, 0)),
        compiler_params=pltpu.CompilerParams(dimension_semantics=("parallel",)),
    )(a.reshape(M, C), b.reshape(M, C))
    return out.reshape(B, H, W, C)


def predict_transform(x, inp_dim, anchors, num_classes):
    """Fallback standalone YOLO transform on an NHWC (B, G, G, CPAD) head-conv map."""
    B, G, _, Cp = x.shape
    A, D = len(anchors), 5 + num_classes
    code, anc = _yolo_channel_consts(anchors, num_classes)
    M = B * G * G
    tm = _tile_m(M)
    kernel = functools.partial(_yolo_kernel, stride=float(inp_dim // G), ho=G, wo=G)
    out = pl.pallas_call(
        kernel,
        out_shape=jax.ShapeDtypeStruct((M, Cp), jnp.float32),
        grid=(M // tm,),
        in_specs=[pl.BlockSpec((tm, Cp), lambda i: (i, 0)),
                  pl.BlockSpec((1, Cp), lambda i: (0, 0)),
                  pl.BlockSpec((1, Cp), lambda i: (0, 0))],
        out_specs=pl.BlockSpec((tm, Cp), lambda i: (i, 0)),
        compiler_params=pltpu.CompilerParams(dimension_semantics=("parallel",)),
    )(x.reshape(M, Cp), code, anc)
    return out.reshape(B, G, G, Cp)[..., :A * D].reshape(B, G * G * A, D)


# ----------------------------------------------------------------------------
# Deterministic parameter init (BatchNorm folded into per-channel scale/bias),
# stored in padded, MXU-friendly layouts: W (k*k*128, 128) bf16, scale/bias (1, 128) f32.
# ----------------------------------------------------------------------------
def init_conv_params(key, cin_real, cout_real, k, bn):
    kw, kb, kg, kbe, km, kv = jax.random.split(key, 6)
    w = 0.1 * jax.random.normal(kw, (cout_real, cin_real, k, k), jnp.float32)  # torch layout
    if bn:
        gamma = 1.0 + 0.1 * jax.random.normal(kg, (cout_real,), jnp.float32)
        beta = 0.1 * jax.random.normal(kbe, (cout_real,), jnp.float32)
        mean = 0.1 * jax.random.normal(km, (cout_real,), jnp.float32)
        var = 1.0 + 0.1 * jnp.abs(jax.random.normal(kv, (cout_real,), jnp.float32))
        scale = gamma / jnp.sqrt(var + BN_EPS)
        bias = beta - mean * scale
    else:
        scale = jnp.ones((cout_real,), jnp.float32)
        bias = 0.1 * jax.random.normal(kb, (cout_real,), jnp.float32)
    # (Cout,Cin,kh,kw) -> (kh,kw,Cin,Cout), pad Cin/Cout to 128 to match the padded im2col.
    w3 = jnp.transpose(w, (2, 3, 1, 0)).reshape(k * k, cin_real, cout_real)
    w3 = jnp.pad(w3, ((0, 0), (0, CPAD - cin_real), (0, CPAD - cout_real)))
    w_mat = w3.reshape(k * k * CPAD, CPAD).astype(jnp.bfloat16)
    scale_p = jnp.pad(scale, (0, CPAD - cout_real)).reshape(1, CPAD)   # padded lanes: 0
    bias_p = jnp.pad(bias, (0, CPAD - cout_real)).reshape(1, CPAD)     # padded lanes: 0
    return {"w": w_mat, "scale": scale_p, "bias": bias_p}


def init_params(key):
    params = {}
    modules = BLOCKS[1:]
    keys = jax.random.split(key, len(modules))
    prev = IN_CHANNELS
    out_filters = []
    for i, m in enumerate(modules):
        t = m["type"]
        if t == "convolutional":
            params[i] = init_conv_params(keys[i], prev, m["filters"], m["size"], m["bn"])
            filt = m["filters"]
        elif t == "route":
            parts = [int(v.strip()) for v in m["layers"].split(",")]
            filt = sum(out_filters[i + p if p < 0 else p] for p in parts)
        else:  # shortcut / upsample / yolo keep channel count of previous layer
            filt = out_filters[i - 1]
        out_filters.append(filt)
        prev = filt
    return params


# ----------------------------------------------------------------------------
# Forward pass (mirrors YoloV3.forward, inference path -> detections)
# ----------------------------------------------------------------------------
def _referenced_outputs(modules):
    """Module outputs referenced later by route layers / shortcut `from` targets."""
    ref = set()
    for i, m in enumerate(modules):
        if m["type"] == "route":
            for p_ in [int(v.strip()) for v in m["layers"].split(",")]:
                ref.add(i + p_ if p_ < 0 else p_)
        elif m["type"] == "shortcut":
            ref.add(i + int(m["from"]))
    return ref


def yolov3_forward(params, x_nchw):
    modules = BLOCKS[1:]
    inp_dim = BLOCKS[0]["height"]
    referenced = _referenced_outputs(modules)

    # NHWC, channels zero-padded to the 128-lane width, bf16 activations end-to-end.
    x = jnp.transpose(x_nchw, (0, 2, 3, 1))
    x = jnp.pad(x, ((0, 0), (0, 0), (0, 0), (0, CPAD - x.shape[-1]))).astype(jnp.bfloat16)

    outputs, real_c = {}, {}
    detections = None
    prev_real = IN_CHANNELS
    i = 0
    while i < len(modules):
        m = modules[i]
        t = m["type"]
        if t == "convolutional":
            nxt = modules[i + 1] if i + 1 < len(modules) else None
            fuse_short = (nxt is not None and nxt["type"] == "shortcut"
                          and i not in referenced)
            fuse_yolo = (nxt is not None and nxt["type"] == "yolo"
                         and i not in referenced)
            residual = outputs[i + 1 + int(nxt["from"])] if fuse_short else None
            yolo_cfg = (nxt["anchors"], nxt["classes"], inp_dim) if fuse_yolo else None
            x = conv2d(x, params[i], m["size"], m["stride"], m["pad"],
                       m["act"] == "leaky", residual=residual, yolo=yolo_cfg)
            real = m["filters"]
            if fuse_yolo:
                detections = x if detections is None else jnp.concatenate([detections, x], axis=1)
            if fuse_short or fuse_yolo:
                outputs[i] = outputs[i + 1] = x
                real_c[i] = real_c[i + 1] = real
                prev_real = real
                i += 2
                continue
        elif t == "upsample":
            s = m["stride"]
            x = jnp.repeat(jnp.repeat(x, s, axis=1), s, axis=2)   # nearest-neighbor upsample
            real = prev_real
        elif t == "route":
            parts = [int(v.strip()) for v in m["layers"].split(",")]
            idxs = [i + p_ if p_ < 0 else p_ for p_ in parts]
            if len(idxs) == 1:
                x = outputs[idxs[0]]
                real = real_c[idxs[0]]
            else:
                a, b = idxs
                cat = jnp.concatenate([outputs[a][..., :real_c[a]],
                                       outputs[b][..., :real_c[b]]], axis=-1)
                real = real_c[a] + real_c[b]
                x = jnp.pad(cat, ((0, 0), (0, 0), (0, 0), (0, CPAD - real)))
        elif t == "shortcut":     # only reached if fusion into the preceding conv was unsafe
            x = shortcut_add(outputs[i - 1], outputs[i + int(m["from"])])
            real = prev_real
        elif t == "yolo":         # only reached if fusion into the preceding conv was unsafe
            x = predict_transform(x, inp_dim, m["anchors"], m["classes"])
            detections = x if detections is None else jnp.concatenate([detections, x], axis=1)
            real = prev_real
        outputs[i] = x
        real_c[i] = real
        prev_real = real
        i += 1
    # TODO(synk): training-mode loss (calculate_loss) is not implemented; inference path only.
    return detections


# ----------------------------------------------------------------------------
if __name__ == "__main__":
    root = jax.random.PRNGKey(0)
    k_params, k_input = jax.random.split(root)
    params = init_params(k_params)
    x = jax.random.normal(k_input, (2, IN_CHANNELS, INP_DIM, INP_DIM), jnp.float32)  # NCHW like PyTorch

    fwd = jax.jit(yolov3_forward)
    detections = jax.block_until_ready(fwd(params, x))

    expected_boxes = (4 * 4 + 16 * 16) * NUM_ANCHORS   # 48 + 768 = 816
    assert detections.shape == (2, expected_boxes, BBOX_ATTRS), detections.shape
    assert bool(jnp.all(jnp.isfinite(detections)))
    print("KERNEL_OK")
</pallas_src>

<mosaic_0001>
module attributes {stable_mosaic.version = 11 : i64} {
  func.func @_conv_kernel(%arg0: i32, %arg1: memref<256x1152xbf16, #tpu.memory_space<vmem>>, %arg2: memref<1152x128xbf16, #tpu.memory_space<vmem>>, %arg3: memref<1x128xf32, #tpu.memory_space<vmem>>, %arg4: memref<1x128xf32, #tpu.memory_space<vmem>>, %arg5: memref<256x128xbf16, #tpu.memory_space<vmem>>) attributes {dimension_semantics = [#tpu.dimension_semantics<parallel>], iteration_bounds = array<i64: 2>, scalar_prefetch = 0 : i64, scratch_operands = 0 : i64, tpu.core_type = #tpu.core_type<tc>, window_params = [{transform_indices = @transform_0, window_bounds = array<i64: 256, 1152>}, {pipeline_mode = #tpu.pipeline_mode<synchronous>, transform_indices = @transform_1, window_bounds = array<i64: 1152, 128>}, {pipeline_mode = #tpu.pipeline_mode<synchronous>, transform_indices = @transform_2, window_bounds = array<i64: 1, 128>}, {pipeline_mode = #tpu.pipeline_mode<synchronous>, transform_indices = @transform_3, window_bounds = array<i64: 1, 128>}, {transform_indices = @transform_4, window_bounds = array<i64: 256, 128>}]} {
    %c0 = arith.constant 0 : index
    %c0_0 = arith.constant 0 : index
    %0 = vector.load %arg1[%c0, %c0_0] : memref<256x1152xbf16, #tpu.memory_space<vmem>>, vector<256x1152xbf16>
    %c0_1 = arith.constant 0 : index
    %c0_2 = arith.constant 0 : index
    %1 = vector.load %arg2[%c0_1, %c0_2] : memref<1152x128xbf16, #tpu.memory_space<vmem>>, vector<1152x128xbf16>
    %cst = arith.constant dense<0.000000e+00> : vector<256x128xf32>
    %2 = tpu.matmul %0, %1, %cst {dimension_numbers = #tpu.dot_dimension_numbers<[1], [0], [0], [1], [0, 0, 1, 1], [], []>} : vector<256x1152xbf16>, vector<1152x128xbf16>, vector<256x128xf32> -> vector<256x128xf32>
    %c0_3 = arith.constant 0 : index
    %c0_4 = arith.constant 0 : index
    %3 = vector.load %arg3[%c0_3, %c0_4] : memref<1x128xf32, #tpu.memory_space<vmem>>, vector<1x128xf32>
    %4 = vector.broadcast %3 : vector<1x128xf32> to vector<256x128xf32>
    %5 = arith.mulf %2, %4 : vector<256x128xf32>
    %c0_5 = arith.constant 0 : index
    %c0_6 = arith.constant 0 : index
    %6 = vector.load %arg4[%c0_5, %c0_6] : memref<1x128xf32, #tpu.memory_space<vmem>>, vector<1x128xf32>
    %7 = vector.broadcast %6 : vector<1x128xf32> to vector<256x128xf32>
    %8 = arith.addf %5, %7 : vector<256x128xf32>
    %cst_7 = arith.constant 0.000000e+00 : f32
    %9 = vector.broadcast %cst_7 : f32 to vector<256x128xf32>
    %10 = arith.cmpf ogt, %8, %9 : vector<256x128xf32>
    %cst_8 = arith.constant 1.000000e-01 : f32
    %11 = vector.broadcast %cst_8 : f32 to vector<256x128xf32>
    %12 = arith.mulf %11, %8 : vector<256x128xf32>
    %13 = arith.select %10, %8, %12 : vector<256x128xi1>, vector<256x128xf32>
    %14 = arith.truncf %13 : vector<256x128xf32> to vector<256x128xbf16>
    %c0_9 = arith.constant 0 : index
    %c0_10 = arith.constant 0 : index
    %15 = vector.load %arg5[%c0_9, %c0_10] : memref<256x128xbf16, #tpu.memory_space<vmem>>, vector<256x128xbf16>
    tpu.vector_store %arg5[%c0_9, %c0_10], %14 {strides = array<i32>} : memref<256x128xbf16, #tpu.memory_space<vmem>>, vector<256x128xbf16>,
    return
  }
  func.func @transform_0(%arg0: i32) -> (i32, i32) {
    %c0_i32 = arith.constant 0 : i32
    %c0_i32_0 = arith.constant 0 : i32
    return %arg0, %c0_i32 : i32, i32
  }
  func.func @transform_1(%arg0: i32) -> (i32, i32) {
    %c0_i32 = arith.constant 0 : i32
    %c0_i32_0 = arith.constant 0 : i32
    %c0_i32_1 = arith.constant 0 : i32
    return %c0_i32, %c0_i32_0 : i32, i32
  }
  func.func @transform_2(%arg0: i32) -> (i32, i32) {
    %c0_i32 = arith.constant 0 : i32
    %c0_i32_0 = arith.constant 0 : i32
    %c0_i32_1 = arith.constant 0 : i32
    return %c0_i32, %c0_i32_0 : i32, i32
  }
  func.func @transform_3(%arg0: i32) -> (i32, i32) {
    %c0_i32 = arith.constant 0 : i32
    %c0_i32_0 = arith.constant 0 : i32
    %c0_i32_1 = arith.constant 0 : i32
    return %c0_i32, %c0_i32_0 : i32, i32
  }
  func.func @transform_4(%arg0: i32) -> (i32, i32) {
    %c0_i32 = arith.constant 0 : i32
    %c0_i32_0 = arith.constant 0 : i32
    return %arg0, %c0_i32 : i32, i32
  }
}

module attributes {stable_mosaic.version = 11 : i64} {
  func.func @_conv_kernel(%arg0: i32, %arg1: memref<128x1152xbf16, #tpu.memory_space<vmem>>, %arg2: memref<1152x128xbf16, #tpu.memory_space<vmem>>, %arg3: memref<1x128xf32, #tpu.memory_space<vmem>>, %arg4: memref<1x128xf32, #tpu.memory_space<vmem>>, %arg5: memref<128x128xbf16, #tpu.memory_space<vmem>>) attributes {dimension_semantics = [#tpu.dimension_semantics<parallel>], iteration_bounds = array<i64: 1>, scalar_prefetch = 0 : i64, scratch_operands = 0 : i64, tpu.core_type = #tpu.core_type<tc>, window_params = [{transform_indices = @transform_0, window_bounds = array<i64: 128, 1152>}, {pipeline_mode = #tpu.pipeline_mode<synchronous>, transform_indices = @transform_1, window_bounds = array<i64: 1152, 128>}, {pipeline_mode = #tpu.pipeline_mode<synchronous>, transform_indices = @transform_2, window_bounds = array<i64: 1, 128>}, {pipeline_mode = #tpu.pipeline_mode<synchronous>, transform_indices = @transform_3, window_bounds = array<i64: 1, 128>}, {transform_indices = @transform_4, window_bounds = array<i64: 128, 128>}]} {
    %c0 = arith.constant 0 : index
    %c0_0 = arith.constant 0 : index
    %0 = vector.load %arg1[%c0, %c0_0] : memref<128x1152xbf16, #tpu.memory_space<vmem>>, vector<128x1152xbf16>
    %c0_1 = arith.constant 0 : index
    %c0_2 = arith.constant 0 : index
    %1 = vector.load %arg2[%c0_1, %c0_2] : memref<1152x128xbf16, #tpu.memory_space<vmem>>, vector<1152x128xbf16>
    %cst = arith.constant dense<0.000000e+00> : vector<128x128xf32>
    %2 = tpu.matmul %0, %1, %cst {dimension_numbers = #tpu.dot_dimension_numbers<[1], [0], [0], [1], [0, 0, 1, 1], [], []>} : vector<128x1152xbf16>, vector<1152x128xbf16>, vector<128x128xf32> -> vector<128x128xf32>
    %c0_3 = arith.constant 0 : index
    %c0_4 = arith.constant 0 : index
    %3 = vector.load %arg3[%c0_3, %c0_4] : memref<1x128xf32, #tpu.memory_space<vmem>>, vector<1x128xf32>
    %4 = vector.broadcast %3 : vector<1x128xf32> to vector<128x128xf32>
    %5 = arith.mulf %2, %4 : vector<128x128xf32>
    %c0_5 = arith.constant 0 : index
    %c0_6 = arith.constant 0 : index
    %6 = vector.load %arg4[%c0_5, %c0_6] : memref<1x128xf32, #tpu.memory_space<vmem>>, vector<1x128xf32>
    %7 = vector.broadcast %6 : vector<1x128xf32> to vector<128x128xf32>
    %8 = arith.addf %5, %7 : vector<128x128xf32>
    %cst_7 = arith.constant 0.000000e+00 : f32
    %9 = vector.broadcast %cst_7 : f32 to vector<128x128xf32>
    %10 = arith.cmpf ogt, %8, %9 : vector<128x128xf32>
    %cst_8 = arith.constant 1.000000e-01 : f32
    %11 = vector.broadcast %cst_8 : f32 to vector<128x128xf32>
    %12 = arith.mulf %11, %8 : vector<128x128xf32>
    %13 = arith.select %10, %8, %12 : vector<128x128xi1>, vector<128x128xf32>
    %14 = arith.truncf %13 : vector<128x128xf32> to vector<128x128xbf16>
    %c0_9 = arith.constant 0 : index
    %c0_10 = arith.constant 0 : index
    %15 = vector.load %arg5[%c0_9, %c0_10] : memref<128x128xbf16, #tpu.memory_space<vmem>>, vector<128x128xbf16>
    tpu.vector_store %arg5[%c0_9, %c0_10], %14 {strides = array<i32>} : memref<128x128xbf16, #tpu.memory_space<vmem>>, vector<128x128xbf16>,
    return
  }
  func.func @transform_0(%arg0: i32) -> (i32, i32) {
    %c0_i32 = arith.constant 0 : i32
    %c0_i32_0 = arith.constant 0 : i32
    return %arg0, %c0_i32 : i32, i32
  }
  func.func @transform_1(%arg0: i32) -> (i32, i32) {
    %c0_i32 = arith.constant 0 : i32
    %c0_i32_0 = arith.constant 0 : i32
    %c0_i32_1 = arith.constant 0 : i32
    return %c0_i32, %c0_i32_0 : i32, i32
  }
  func.func @transform_2(%arg0: i32) -> (i32, i32) {
    %c0_i32 = arith.constant 0 : i32
    %c0_i32_0 = arith.constant 0 : i32
    %c0_i32_1 = arith.constant 0 : i32
    return %c0_i32, %c0_i32_0 : i32, i32
  }
  func.func @transform_3(%arg0: i32) -> (i32, i32) {
    %c0_i32 = arith.constant 0 : i32
    %c0_i32_0 = arith.constant 0 : i32
    %c0_i32_1 = arith.constant 0 : i32
    return %c0_i32, %c0_i32_0 : i32, i32
  }
  func.func @transform_4(%arg0: i32) -> (i32, i32) {
    %c0_i32 = arith.constant 0 : i32
    %c0_i32_0 = arith.constant 0 : i32
    return %arg0, %c0_i32 : i32, i32
  }
}

module attributes {stable_mosaic.version = 11 : i64} {
  func.func @_conv_res_kernel(%arg0: i32, %arg1: memref<128x128xbf16, #tpu.memory_space<vmem>>, %arg2: memref<128x128xbf16, #tpu.memory_space<vmem>>, %arg3: memref<1x128xf32, #tpu.memory_space<vmem>>, %arg4: memref<1x128xf32, #tpu.memory_space<vmem>>, %arg5: memref<128x128xbf16, #tpu.memory_space<vmem>>, %arg6: memref<128x128xbf16, #tpu.memory_space<vmem>>) attributes {dimension_semantics = [#tpu.dimension_semantics<parallel>], iteration_bounds = array<i64: 1>, scalar_prefetch = 0 : i64, scratch_operands = 0 : i64, tpu.core_type = #tpu.core_type<tc>, window_params = [{transform_indices = @transform_0, window_bounds = array<i64: 128, 128>}, {pipeline_mode = #tpu.pipeline_mode<synchronous>, transform_indices = @transform_1, window_bounds = array<i64: 128, 128>}, {pipeline_mode = #tpu.pipeline_mode<synchronous>, transform_indices = @transform_2, window_bounds = array<i64: 1, 128>}, {pipeline_mode = #tpu.pipeline_mode<synchronous>, transform_indices = @transform_3, window_bounds = array<i64: 1, 128>}, {transform_indices = @transform_4, window_bounds = array<i64: 128, 128>}, {transform_indices = @transform_5, window_bounds = array<i64: 128, 128>}]} {
    %c0 = arith.constant 0 : index
    %c0_0 = arith.constant 0 : index
    %0 = vector.load %arg1[%c0, %c0_0] : memref<128x128xbf16, #tpu.memory_space<vmem>>, vector<128x128xbf16>
    %c0_1 = arith.constant 0 : index
    %c0_2 = arith.constant 0 : index
    %1 = vector.load %arg2[%c0_1, %c0_2] : memref<128x128xbf16, #tpu.memory_space<vmem>>, vector<128x128xbf16>
    %cst = arith.constant dense<0.000000e+00> : vector<128x128xf32>
    %2 = tpu.matmul %0, %1, %cst {dimension_numbers = #tpu.dot_dimension_numbers<[1], [0], [0], [1], [0, 0, 1, 1], [], []>} : vector<128x128xbf16>, vector<128x128xbf16>, vector<128x128xf32> -> vector<128x128xf32>
    %c0_3 = arith.constant 0 : index
    %c0_4 = arith.constant 0 : index
    %3 = vector.load %arg3[%c0_3, %c0_4] : memref<1x128xf32, #tpu.memory_space<vmem>>, vector<1x128xf32>
    %4 = vector.broadcast %3 : vector<1x128xf32> to vector<128x128xf32>
    %5 = arith.mulf %2, %4 : vector<128x128xf32>
    %c0_5 = arith.constant 0 : index
    %c0_6 = arith.constant 0 : index
    %6 = vector.load %arg4[%c0_5, %c0_6] : memref<1x128xf32, #tpu.memory_space<vmem>>, vector<1x128xf32>
    %7 = vector.broadcast %6 : vector<1x128xf32> to vector<128x128xf32>
    %8 = arith.addf %5, %7 : vector<128x128xf32>
    %cst_7 = arith.constant 0.000000e+00 : f32
    %9 = vector.broadcast %cst_7 : f32 to vector<128x128xf32>
    %10 = arith.cmpf ogt, %8, %9 : vector<128x128xf32>
    %cst_8 = arith.constant 1.000000e-01 : f32
    %11 = vector.broadcast %cst_8 : f32 to vector<128x128xf32>
    %12 = arith.mulf %11, %8 : vector<128x128xf32>
    %13 = arith.select %10, %8, %12 : vector<128x128xi1>, vector<128x128xf32>
    %c0_9 = arith.constant 0 : index
    %c0_10 = arith.constant 0 : index
    %14 = vector.load %arg5[%c0_9, %c0_10] : memref<128x128xbf16, #tpu.memory_space<vmem>>, vector<128x128xbf16>
    %15 = arith.extf %14 : vector<128x128xbf16> to vector<128x128xf32>
    %16 = arith.addf %13, %15 : vector<128x128xf32>
    %17 = arith.truncf %16 : vector<128x128xf32> to vector<128x128xbf16>
    %c0_11 = arith.constant 0 : index
    %c0_12 = arith.constant 0 : index
    %18 = vector.load %arg6[%c0_11, %c0_12] : memref<128x128xbf16, #tpu.memory_space<vmem>>, vector<128x128xbf16>
    tpu.vector_store %arg6[%c0_11, %c0_12], %17 {strides = array<i32>} : memref<128x128xbf16, #tpu.memory_space<vmem>>, vector<128x128xbf16>,
    return
  }
  func.func @transform_0(%arg0: i32) -> (i32, i32) {
    %c0_i32 = arith.constant 0 : i32
    %c0_i32_0 = arith.constant 0 : i32
    return %arg0, %c0_i32 : i32, i32
  }
  func.func @transform_1(%arg0: i32) -> (i32, i32) {
    %c0_i32 = arith.constant 0 : i32
    %c0_i32_0 = arith.constant 0 : i32
    %c0_i32_1 = arith.constant 0 : i32
    return %c0_i32, %c0_i32_0 : i32, i32
  }
  func.func @transform_2(%arg0: i32) -> (i32, i32) {
    %c0_i32 = arith.constant 0 : i32
    %c0_i32_0 = arith.constant 0 : i32
    %c0_i32_1 = arith.constant 0 : i32
    return %c0_i32, %c0_i32_0 : i32, i32
  }
  func.func @transform_3(%arg0: i32) -> (i32, i32) {
    %c0_i32 = arith.constant 0 : i32
    %c0_i32_0 = arith.constant 0 : i32
    %c0_i32_1 = arith.constant 0 : i32
    return %c0_i32, %c0_i32_0 : i32, i32
  }
  func.func @transform_4(%arg0: i32) -> (i32, i32) {
    %c0_i32 = arith.constant 0 : i32
    %c0_i32_0 = arith.constant 0 : i32
    return %arg0, %c0_i32 : i32, i32
  }
  func.func @transform_5(%arg0: i32) -> (i32, i32) {
    %c0_i32 = arith.constant 0 : i32
    %c0_i32_0 = arith.constant 0 : i32
    return %arg0, %c0_i32 : i32, i32
  }
}

module attributes {stable_mosaic.version = 11 : i64} {
  func.func @_conv_kernel(%arg0: i32, %arg1: memref<128x128xbf16, #tpu.memory_space<vmem>>, %arg2: memref<128x128xbf16, #tpu.memory_space<vmem>>, %arg3: memref<1x128xf32, #tpu.memory_space<vmem>>, %arg4: memref<1x128xf32, #tpu.memory_space<vmem>>, %arg5: memref<128x128xbf16, #tpu.memory_space<vmem>>) attributes {dimension_semantics = [#tpu.dimension_semantics<parallel>], iteration_bounds = array<i64: 1>, scalar_prefetch = 0 : i64, scratch_operands = 0 : i64, tpu.core_type = #tpu.core_type<tc>, window_params = [{transform_indices = @transform_0, window_bounds = array<i64: 128, 128>}, {pipeline_mode = #tpu.pipeline_mode<synchronous>, transform_indices = @transform_1, window_bounds = array<i64: 128, 128>}, {pipeline_mode = #tpu.pipeline_mode<synchronous>, transform_indices = @transform_2, window_bounds = array<i64: 1, 128>}, {pipeline_mode = #tpu.pipeline_mode<synchronous>, transform_indices = @transform_3, window_bounds = array<i64: 1, 128>}, {transform_indices = @transform_4, window_bounds = array<i64: 128, 128>}]} {
    %c0 = arith.constant 0 : index
    %c0_0 = arith.constant 0 : index
    %0 = vector.load %arg1[%c0, %c0_0] : memref<128x128xbf16, #tpu.memory_space<vmem>>, vector<128x128xbf16>
    %c0_1 = arith.constant 0 : index
    %c0_2 = arith.constant 0 : index
    %1 = vector.load %arg2[%c0_1, %c0_2] : memref<128x128xbf16, #tpu.memory_space<vmem>>, vector<128x128xbf16>
    %cst = arith.constant dense<0.000000e+00> : vector<128x128xf32>
    %2 = tpu.matmul %0, %1, %cst {dimension_numbers = #tpu.dot_dimension_numbers<[1], [0], [0], [1], [0, 0, 1, 1], [], []>} : vector<128x128xbf16>, vector<128x128xbf16>, vector<128x128xf32> -> vector<128x128xf32>
    %c0_3 = arith.constant 0 : index
    %c0_4 = arith.constant 0 : index
    %3 = vector.load %arg3[%c0_3, %c0_4] : memref<1x128xf32, #tpu.memory_space<vmem>>, vector<1x128xf32>
    %4 = vector.broadcast %3 : vector<1x128xf32> to vector<128x128xf32>
    %5 = arith.mulf %2, %4 : vector<128x128xf32>
    %c0_5 = arith.constant 0 : index
    %c0_6 = arith.constant 0 : index
    %6 = vector.load %arg4[%c0_5, %c0_6] : memref<1x128xf32, #tpu.memory_space<vmem>>, vector<1x128xf32>
    %7 = vector.broadcast %6 : vector<1x128xf32> to vector<128x128xf32>
    %8 = arith.addf %5, %7 : vector<128x128xf32>
    %cst_7 = arith.constant 0.000000e+00 : f32
    %9 = vector.broadcast %cst_7 : f32 to vector<128x128xf32>
    %10 = arith.cmpf ogt, %8, %9 : vector<128x128xf32>
    %cst_8 = arith.constant 1.000000e-01 : f32
    %11 = vector.broadcast %cst_8 : f32 to vector<128x128xf32>
    %12 = arith.mulf %11, %8 : vector<128x128xf32>
    %13 = arith.select %10, %8, %12 : vector<128x128xi1>, vector<128x128xf32>
    %14 = arith.truncf %13 : vector<128x128xf32> to vector<128x128xbf16>
    %c0_9 = arith.constant 0 : index
    %c0_10 = arith.constant 0 : index
    %15 = vector.load %arg5[%c0_9, %c0_10] : memref<128x128xbf16, #tpu.memory_space<vmem>>, vector<128x128xbf16>
    tpu.vector_store %arg5[%c0_9, %c0_10], %14 {strides = array<i32>} : memref<128x128xbf16, #tpu.memory_space<vmem>>, vector<128x128xbf16>,
    return
  }
  func.func @transform_0(%arg0: i32) -> (i32, i32) {
    %c0_i32 = arith.constant 0 : i32
    %c0_i32_0 = arith.constant 0 : i32
    return %arg0, %c0_i32 : i32, i32
  }
  func.func @transform_1(%arg0: i32) -> (i32, i32) {
    %c0_i32 = arith.constant 0 : i32
    %c0_i32_0 = arith.constant 0 : i32
    %c0_i32_1 = arith.constant 0 : i32
    return %c0_i32, %c0_i32_0 : i32, i32
  }
  func.func @transform_2(%arg0: i32) -> (i32, i32) {
    %c0_i32 = arith.constant 0 : i32
    %c0_i32_0 = arith.constant 0 : i32
    %c0_i32_1 = arith.constant 0 : i32
    return %c0_i32, %c0_i32_0 : i32, i32
  }
  func.func @transform_3(%arg0: i32) -> (i32, i32) {
    %c0_i32 = arith.constant 0 : i32
    %c0_i32_0 = arith.constant 0 : i32
    %c0_i32_1 = arith.constant 0 : i32
    return %c0_i32, %c0_i32_0 : i32, i32
  }
  func.func @transform_4(%arg0: i32) -> (i32, i32) {
    %c0_i32 = arith.constant 0 : i32
    %c0_i32_0 = arith.constant 0 : i32
    return %arg0, %c0_i32 : i32, i32
  }
}

module attributes {stable_mosaic.version = 11 : i64} {
  func.func @_conv_kernel(%arg0: i32, %arg1: memref<32x1152xbf16, #tpu.memory_space<vmem>>, %arg2: memref<1152x128xbf16, #tpu.memory_space<vmem>>, %arg3: memref<1x128xf32, #tpu.memory_space<vmem>>, %arg4: memref<1x128xf32, #tpu.memory_space<vmem>>, %arg5: memref<32x128xbf16, #tpu.memory_space<vmem>>) attributes {dimension_semantics = [#tpu.dimension_semantics<parallel>], iteration_bounds = array<i64: 1>, scalar_prefetch = 0 : i64, scratch_operands = 0 : i64, tpu.core_type = #tpu.core_type<tc>, window_params = [{transform_indices = @transform_0, window_bounds = array<i64: 32, 1152>}, {pipeline_mode = #tpu.pipeline_mode<synchronous>, transform_indices = @transform_1, window_bounds = array<i64: 1152, 128>}, {pipeline_mode = #tpu.pipeline_mode<synchronous>, transform_indices = @transform_2, window_bounds = array<i64: 1, 128>}, {pipeline_mode = #tpu.pipeline_mode<synchronous>, transform_indices = @transform_3, window_bounds = array<i64: 1, 128>}, {transform_indices = @transform_4, window_bounds = array<i64: 32, 128>}]} {
    %c0 = arith.constant 0 : index
    %c0_0 = arith.constant 0 : index
    %0 = vector.load %arg1[%c0, %c0_0] : memref<32x1152xbf16, #tpu.memory_space<vmem>>, vector<32x1152xbf16>
    %c0_1 = arith.constant 0 : index
    %c0_2 = arith.constant 0 : index
    %1 = vector.load %arg2[%c0_1, %c0_2] : memref<1152x128xbf16, #tpu.memory_space<vmem>>, vector<1152x128xbf16>
    %cst = arith.constant dense<0.000000e+00> : vector<32x128xf32>
    %2 = tpu.matmul %0, %1, %cst {dimension_numbers = #tpu.dot_dimension_numbers<[1], [0], [0], [1], [0, 0, 1, 1], [], []>} : vector<32x1152xbf16>, vector<1152x128xbf16>, vector<32x128xf32> -> vector<32x128xf32>
    %c0_3 = arith.constant 0 : index
    %c0_4 = arith.constant 0 : index
    %3 = vector.load %arg3[%c0_3, %c0_4] : memref<1x128xf32, #tpu.memory_space<vmem>>, vector<1x128xf32>
    %4 = vector.broadcast %3 : vector<1x128xf32> to vector<32x128xf32>
    %5 = arith.mulf %2, %4 : vector<32x128xf32>
    %c0_5 = arith.constant 0 : index
    %c0_6 = arith.constant 0 : index
    %6 = vector.load %arg4[%c0_5, %c0_6] : memref<1x128xf32, #tpu.memory_space<vmem>>, vector<1x128xf32>
    %7 = vector.broadcast %6 : vector<1x128xf32> to vector<32x128xf32>
    %8 = arith.addf %5, %7 : vector<32x128xf32>
    %cst_7 = arith.constant 0.000000e+00 : f32
    %9 = vector.broadcast %cst_7 : f32 to vector<32x128xf32>
    %10 = arith.cmpf ogt, %8, %9 : vector<32x128xf32>
    %cst_8 = arith.constant 1.000000e-01 : f32
    %11 = vector.broadcast %cst_8 : f32 to vector<32x128xf32>
    %12 = arith.mulf %11, %8 : vector<32x128xf32>
    %13 = arith.select %10, %8, %12 : vector<32x128xi1>, vector<32x128xf32>
    %14 = arith.truncf %13 : vector<32x128xf32> to vector<32x128xbf16>
    %c0_9 = arith.constant 0 : index
    %c0_10 = arith.constant 0 : index
    %15 = vector.load %arg5[%c0_9, %c0_10] : memref<32x128xbf16, #tpu.memory_space<vmem>>, vector<32x128xbf16>
    tpu.vector_store %arg5[%c0_9, %c0_10], %14 {strides = array<i32>} : memref<32x128xbf16, #tpu.memory_space<vmem>>, vector<32x128xbf16>,
    return
  }
  func.func @transform_0(%arg0: i32) -> (i32, i32) {
    %c0_i32 = arith.constant 0 : i32
    %c0_i32_0 = arith.constant 0 : i32
    return %arg0, %c0_i32 : i32, i32
  }
  func.func @transform_1(%arg0: i32) -> (i32, i32) {
    %c0_i32 = arith.constant 0 : i32
    %c0_i32_0 = arith.constant 0 : i32
    %c0_i32_1 = arith.constant 0 : i32
    return %c0_i32, %c0_i32_0 : i32, i32
  }
  func.func @transform_2(%arg0: i32) -> (i32, i32) {
    %c0_i32 = arith.constant 0 : i32
    %c0_i32_0 = arith.constant 0 : i32
    %c0_i32_1 = arith.constant 0 : i32
    return %c0_i32, %c0_i32_0 : i32, i32
  }
  func.func @transform_3(%arg0: i32) -> (i32, i32) {
    %c0_i32 = arith.constant 0 : i32
    %c0_i32_0 = arith.constant 0 : i32
    %c0_i32_1 = arith.constant 0 : i32
    return %c0_i32, %c0_i32_0 : i32, i32
  }
  func.func @transform_4(%arg0: i32) -> (i32, i32) {
    %c0_i32 = arith.constant 0 : i32
    %c0_i32_0 = arith.constant 0 : i32
    return %arg0, %c0_i32 : i32, i32
  }
}

module attributes {stable_mosaic.version = 11 : i64} {
  func.func @_conv_yolo_kernel(%arg0: i32, %arg1: memref<32x128xbf16, #tpu.memory_space<vmem>>, %arg2: memref<128x128xbf16, #tpu.memory_space<vmem>>, %arg3: memref<1x128xf32, #tpu.memory_space<vmem>>, %arg4: memref<1x128xf32, #tpu.memory_space<vmem>>, %arg5: memref<1x128xi32, #tpu.memory_space<vmem>>, %arg6: memref<1x128xf32, #tpu.memory_space<vmem>>, %arg7: memref<32x128xf32, #tpu.memory_space<vmem>>) attributes {dimension_semantics = [#tpu.dimension_semantics<parallel>], iteration_bounds = array<i64: 1>, scalar_prefetch = 0 : i64, scratch_operands = 0 : i64, tpu.core_type = #tpu.core_type<tc>, window_params = [{transform_indices = @transform_0, window_bounds = array<i64: 32, 128>}, {pipeline_mode = #tpu.pipeline_mode<synchronous>, transform_indices = @transform_1, window_bounds = array<i64: 128, 128>}, {pipeline_mode = #tpu.pipeline_mode<synchronous>, transform_indices = @transform_2, window_bounds = array<i64: 1, 128>}, {pipeline_mode = #tpu.pipeline_mode<synchronous>, transform_indices = @transform_3, window_bounds = array<i64: 1, 128>}, {pipeline_mode = #tpu.pipeline_mode<synchronous>, transform_indices = @transform_4, window_bounds = array<i64: 1, 128>}, {pipeline_mode = #tpu.pipeline_mode<synchronous>, transform_indices = @transform_5, window_bounds = array<i64: 1, 128>}, {transform_indices = @transform_6, window_bounds = array<i64: 32, 128>}]} {
    %c0 = arith.constant 0 : index
    %c0_0 = arith.constant 0 : index
    %0 = vector.load %arg1[%c0, %c0_0] : memref<32x128xbf16, #tpu.memory_space<vmem>>, vector<32x128xbf16>
    %c0_1 = arith.constant 0 : index
    %c0_2 = arith.constant 0 : index
    %1 = vector.load %arg2[%c0_1, %c0_2] : memref<128x128xbf16, #tpu.memory_space<vmem>>, vector<128x128xbf16>
    %cst = arith.constant dense<0.000000e+00> : vector<32x128xf32>
    %2 = tpu.matmul %0, %1, %cst {dimension_numbers = #tpu.dot_dimension_numbers<[1], [0], [0], [1], [0, 0, 1, 1], [], []>} : vector<32x128xbf16>, vector<128x128xbf16>, vector<32x128xf32> -> vector<32x128xf32>
    %c0_3 = arith.constant 0 : index
    %c0_4 = arith.constant 0 : index
    %3 = vector.load %arg3[%c0_3, %c0_4] : memref<1x128xf32, #tpu.memory_space<vmem>>, vector<1x128xf32>
    %4 = vector.broadcast %3 : vector<1x128xf32> to vector<32x128xf32>
    %5 = arith.mulf %2, %4 : vector<32x128xf32>
    %c0_5 = arith.constant 0 : index
    %c0_6 = arith.constant 0 : index
    %6 = vector.load %arg4[%c0_5, %c0_6] : memref<1x128xf32, #tpu.memory_space<vmem>>, vector<1x128xf32>
    %7 = vector.broadcast %6 : vector<1x128xf32> to vector<32x128xf32>
    %8 = arith.addf %5, %7 : vector<32x128xf32>
    %c32_i32 = arith.constant 32 : i32
    %9 = arith.muli %arg0, %c32_i32 : i32
    %c0_7 = arith.constant 0 : index
    %c0_8 = arith.constant 0 : index
    %10 = vector.load %arg5[%c0_7, %c0_8] : memref<1x128xi32, #tpu.memory_space<vmem>>, vector<1x128xi32>
    %c0_9 = arith.constant 0 : index
    %c0_10 = arith.constant 0 : index
    %11 = vector.load %arg6[%c0_9, %c0_10] : memref<1x128xf32, #tpu.memory_space<vmem>>, vector<1x128xf32>
    %12 = tpu.iota {dimensions = array<i32: 0>} : vector<32x128xi32>
    %13 = vector.broadcast %9 : i32 to vector<32x128xi32>
    %14 = arith.addi %13, %12 : vector<32x128xi32>
    %c3_i32 = arith.constant 3 : i32
    %15 = vector.broadcast %c3_i32 : i32 to vector<32x128xi32>
    %16 = arith.andi %14, %15 : vector<32x128xi32>
    %17 = arith.sitofp %16 : vector<32x128xi32> to vector<32x128xf32>
    %c2_i32 = arith.constant 2 : i32
    %18 = vector.broadcast %c2_i32 : i32 to vector<32x128xi32>
    %19 = arith.shrsi %14, %18 : vector<32x128xi32>
    %c3_i32_11 = arith.constant 3 : i32
    %20 = vector.broadcast %c3_i32_11 : i32 to vector<32x128xi32>
    %21 = arith.andi %19, %20 : vector<32x128xi32>
    %22 = arith.sitofp %21 : vector<32x128xi32> to vector<32x128xf32>
    %23 = arith.negf %8 : vector<32x128xf32>
    %24 = math.exp %23 : vector<32x128xf32>
    %cst_12 = arith.constant 1.000000e+00 : f32
    %25 = vector.broadcast %cst_12 : f32 to vector<32x128xf32>
    %26 = arith.addf %25, %24 : vector<32x128xf32>
    %27 = arith.divf %25, %26 : vector<32x128xf32>
    %c2_i32_13 = arith.constant 2 : i32
    %28 = vector.broadcast %c2_i32_13 : i32 to vector<1x128xi32>
    %29 = arith.cmpi eq, %10, %28 : vector<1x128xi32>
    %c3_i32_14 = arith.constant 3 : i32
    %30 = vector.broadcast %c3_i32_14 : i32 to vector<1x128xi32>
    %31 = arith.cmpi eq, %10, %30 : vector<1x128xi32>
    %32 = arith.ori %29, %31 : vector<1x128xi1>
    %cst_15 = arith.constant 0.000000e+00 : f32
    %33 = vector.shape_cast %32 : vector<1x128xi1> to vector<1x128xi1>
    %34 = vector.broadcast %33 : vector<1x128xi1> to vector<32x128xi1>
    %35 = vector.broadcast %cst_15 : f32 to vector<32x128xf32>
    %36 = arith.select %34, %8, %35 : vector<32x128xi1>, vector<32x128xf32>
    %37 = math.exp %36 : vector<32x128xf32>
    %38 = vector.broadcast %11 : vector<1x128xf32> to vector<32x128xf32>
    %39 = arith.mulf %37, %38 : vector<32x128xf32>
    %c0_i32 = arith.constant 0 : i32
    %40 = vector.broadcast %c0_i32 : i32 to vector<1x128xi32>
    %41 = arith.cmpi eq, %10, %40 : vector<1x128xi32>
    %c1_i32 = arith.constant 1 : i32
    %42 = vector.broadcast %c1_i32 : i32 to vector<1x128xi32>
    %43 = arith.cmpi eq, %10, %42 : vector<1x128xi32>
    %cst_16 = arith.constant 0.000000e+00 : f32
    %44 = vector.shape_cast %43 : vector<1x128xi1> to vector<1x128xi1>
    %45 = vector.broadcast %44 : vector<1x128xi1> to vector<32x128xi1>
    %46 = vector.broadcast %cst_16 : f32 to vector<32x128xf32>
    %47 = arith.select %45, %22, %46 : vector<32x128xi1>, vector<32x128xf32>
    %48 = vector.shape_cast %41 : vector<1x128xi1> to vector<1x128xi1>
    %49 = vector.broadcast %48 : vector<1x128xi1> to vector<32x128xi1>
    %50 = arith.select %49, %17, %47 : vector<32x128xi1>, vector<32x128xf32>
    %c1_i32_17 = arith.constant 1 : i32
    %51 = vector.broadcast %c1_i32_17 : i32 to vector<1x128xi32>
    %52 = arith.cmpi sle, %10, %51 : vector<1x128xi32>
    %53 = arith.addf %27, %50 : vector<32x128xf32>
    %cst_18 = arith.constant 4.000000e+00 : f32
    %54 = vector.broadcast %cst_18 : f32 to vector<32x128xf32>
    %55 = arith.mulf %53, %54 : vector<32x128xf32>
    %56 = vector.shape_cast %32 : vector<1x128xi1> to vector<1x128xi1>
    %57 = vector.broadcast %56 : vector<1x128xi1> to vector<32x128xi1>
    %58 = arith.select %57, %39, %27 : vector<32x128xi1>, vector<32x128xf32>
    %59 = vector.shape_cast %52 : vector<1x128xi1> to vector<1x128xi1>
    %60 = vector.broadcast %59 : vector<1x128xi1> to vector<32x128xi1>
    %61 = arith.select %60, %55, %58 : vector<32x128xi1>, vector<32x128xf32>
    %c0_19 = arith.constant 0 : index
    %c0_20 = arith.constant 0 : index
    %62 = vector.load %arg7[%c0_19, %c0_20] : memref<32x128xf32, #tpu.memory_space<vmem>>, vector<32x128xf32>
    tpu.vector_store %arg7[%c0_19, %c0_20], %61 {strides = array<i32>} : memref<32x128xf32, #tpu.memory_space<vmem>>, vector<32x128xf32>,
    return
  }
  func.func @transform_0(%arg0: i32) -> (i32, i32) {
    %c0_i32 = arith.constant 0 : i32
    %c0_i32_0 = arith.constant 0 : i32
    return %arg0, %c0_i32 : i32, i32
  }
  func.func @transform_1(%arg0: i32) -> (i32, i32) {
    %c0_i32 = arith.constant 0 : i32
    %c0_i32_0 = arith.constant 0 : i32
    %c0_i32_1 = arith.constant 0 : i32
    return %c0_i32, %c0_i32_0 : i32, i32
  }
  func.func @transform_2(%arg0: i32) -> (i32, i32) {
    %c0_i32 = arith.constant 0 : i32
    %c0_i32_0 = arith.constant 0 : i32
    %c0_i32_1 = arith.constant 0 : i32
    return %c0_i32, %c0_i32_0 : i32, i32
  }
  func.func @transform_3(%arg0: i32) -> (i32, i32) {
    %c0_i32 = arith.constant 0 : i32
    %c0_i32_0 = arith.constant 0 : i32
    %c0_i32_1 = arith.constant 0 : i32
    return %c0_i32, %c0_i32_0 : i32, i32
  }
  func.func @transform_4(%arg0: i32) -> (i32, i32) {
    %c0_i32 = arith.constant 0 : i32
    %c0_i32_0 = arith.constant 0 : i32
    %c0_i32_1 = arith.constant 0 : i32
    return %c0_i32, %c0_i32_0 : i32, i32
  }
  func.func @transform_5(%arg0: i32) -> (i32, i32) {
    %c0_i32 = arith.constant 0 : i32
    %c0_i32_0 = arith.constant 0 : i32
    %c0_i32_1 = arith.constant 0 : i32
    return %c0_i32, %c0_i32_0 : i32, i32
  }
  func.func @transform_6(%arg0: i32) -> (i32, i32) {
    %c0_i32 = arith.constant 0 : i32
    %c0_i32_0 = arith.constant 0 : i32
    return %arg0, %c0_i32 : i32, i32
  }
}

module attributes {stable_mosaic.version = 11 : i64} {
  func.func @_conv_yolo_kernel(%arg0: i32, %arg1: memref<256x128xbf16, #tpu.memory_space<vmem>>, %arg2: memref<128x128xbf16, #tpu.memory_space<vmem>>, %arg3: memref<1x128xf32, #tpu.memory_space<vmem>>, %arg4: memref<1x128xf32, #tpu.memory_space<vmem>>, %arg5: memref<1x128xi32, #tpu.memory_space<vmem>>, %arg6: memref<1x128xf32, #tpu.memory_space<vmem>>, %arg7: memref<256x128xf32, #tpu.memory_space<vmem>>) attributes {dimension_semantics = [#tpu.dimension_semantics<parallel>], iteration_bounds = array<i64: 2>, scalar_prefetch = 0 : i64, scratch_operands = 0 : i64, tpu.core_type = #tpu.core_type<tc>, window_params = [{transform_indices = @transform_0, window_bounds = array<i64: 256, 128>}, {pipeline_mode = #tpu.pipeline_mode<synchronous>, transform_indices = @transform_1, window_bounds = array<i64: 128, 128>}, {pipeline_mode = #tpu.pipeline_mode<synchronous>, transform_indices = @transform_2, window_bounds = array<i64: 1, 128>}, {pipeline_mode = #tpu.pipeline_mode<synchronous>, transform_indices = @transform_3, window_bounds = array<i64: 1, 128>}, {pipeline_mode = #tpu.pipeline_mode<synchronous>, transform_indices = @transform_4, window_bounds = array<i64: 1, 128>}, {pipeline_mode = #tpu.pipeline_mode<synchronous>, transform_indices = @transform_5, window_bounds = array<i64: 1, 128>}, {transform_indices = @transform_6, window_bounds = array<i64: 256, 128>}]} {
    %c0 = arith.constant 0 : index
    %c0_0 = arith.constant 0 : index
    %0 = vector.load %arg1[%c0, %c0_0] : memref<256x128xbf16, #tpu.memory_space<vmem>>, vector<256x128xbf16>
    %c0_1 = arith.constant 0 : index
    %c0_2 = arith.constant 0 : index
    %1 = vector.load %arg2[%c0_1, %c0_2] : memref<128x128xbf16, #tpu.memory_space<vmem>>, vector<128x128xbf16>
    %cst = arith.constant dense<0.000000e+00> : vector<256x128xf32>
    %2 = tpu.matmul %0, %1, %cst {dimension_numbers = #tpu.dot_dimension_numbers<[1], [0], [0], [1], [0, 0, 1, 1], [], []>} : vector<256x128xbf16>, vector<128x128xbf16>, vector<256x128xf32> -> vector<256x128xf32>
    %c0_3 = arith.constant 0 : index
    %c0_4 = arith.constant 0 : index
    %3 = vector.load %arg3[%c0_3, %c0_4] : memref<1x128xf32, #tpu.memory_space<vmem>>, vector<1x128xf32>
    %4 = vector.broadcast %3 : vector<1x128xf32> to vector<256x128xf32>
    %5 = arith.mulf %2, %4 : vector<256x128xf32>
    %c0_5 = arith.constant 0 : index
    %c0_6 = arith.constant 0 : index
    %6 = vector.load %arg4[%c0_5, %c0_6] : memref<1x128xf32, #tpu.memory_space<vmem>>, vector<1x128xf32>
    %7 = vector.broadcast %6 : vector<1x128xf32> to vector<256x128xf32>
    %8 = arith.addf %5, %7 : vector<256x128xf32>
    %c256_i32 = arith.constant 256 : i32
    %9 = arith.muli %arg0, %c256_i32 : i32
    %c0_7 = arith.constant 0 : index
    %c0_8 = arith.constant 0 : index
    %10 = vector.load %arg5[%c0_7, %c0_8] : memref<1x128xi32, #tpu.memory_space<vmem>>, vector<1x128xi32>
    %c0_9 = arith.constant 0 : index
    %c0_10 = arith.constant 0 : index
    %11 = vector.load %arg6[%c0_9, %c0_10] : memref<1x128xf32, #tpu.memory_space<vmem>>, vector<1x128xf32>
    %12 = tpu.iota {dimensions = array<i32: 0>} : vector<256x128xi32>
    %13 = vector.broadcast %9 : i32 to vector<256x128xi32>
    %14 = arith.addi %13, %12 : vector<256x128xi32>
    %c15_i32 = arith.constant 15 : i32
    %15 = vector.broadcast %c15_i32 : i32 to vector<256x128xi32>
    %16 = arith.andi %14, %15 : vector<256x128xi32>
    %17 = arith.sitofp %16 : vector<256x128xi32> to vector<256x128xf32>
    %c4_i32 = arith.constant 4 : i32
    %18 = vector.broadcast %c4_i32 : i32 to vector<256x128xi32>
    %19 = arith.shrsi %14, %18 : vector<256x128xi32>
    %c15_i32_11 = arith.constant 15 : i32
    %20 = vector.broadcast %c15_i32_11 : i32 to vector<256x128xi32>
    %21 = arith.andi %19, %20 : vector<256x128xi32>
    %22 = arith.sitofp %21 : vector<256x128xi32> to vector<256x128xf32>
    %23 = arith.negf %8 : vector<256x128xf32>
    %24 = math.exp %23 : vector<256x128xf32>
    %cst_12 = arith.constant 1.000000e+00 : f32
    %25 = vector.broadcast %cst_12 : f32 to vector<256x128xf32>
    %26 = arith.addf %25, %24 : vector<256x128xf32>
    %27 = arith.divf %25, %26 : vector<256x128xf32>
    %c2_i32 = arith.constant 2 : i32
    %28 = vector.broadcast %c2_i32 : i32 to vector<1x128xi32>
    %29 = arith.cmpi eq, %10, %28 : vector<1x128xi32>
    %c3_i32 = arith.constant 3 : i32
    %30 = vector.broadcast %c3_i32 : i32 to vector<1x128xi32>
    %31 = arith.cmpi eq, %10, %30 : vector<1x128xi32>
    %32 = arith.ori %29, %31 : vector<1x128xi1>
    %cst_13 = arith.constant 0.000000e+00 : f32
    %33 = vector.shape_cast %32 : vector<1x128xi1> to vector<1x128xi1>
    %34 = vector.broadcast %33 : vector<1x128xi1> to vector<256x128xi1>
    %35 = vector.broadcast %cst_13 : f32 to vector<256x128xf32>
    %36 = arith.select %34, %8, %35 : vector<256x128xi1>, vector<256x128xf32>
    %37 = math.exp %36 : vector<256x128xf32>
    %38 = vector.broadcast %11 : vector<1x128xf32> to vector<256x128xf32>
    %39 = arith.mulf %37, %38 : vector<256x128xf32>
    %c0_i32 = arith.constant 0 : i32
    %40 = vector.broadcast %c0_i32 : i32 to vector<1x128xi32>
    %41 = arith.cmpi eq, %10, %40 : vector<1x128xi32>
    %c1_i32 = arith.constant 1 : i32
    %42 = vector.broadcast %c1_i32 : i32 to vector<1x128xi32>
    %43 = arith.cmpi eq, %10, %42 : vector<1x128xi32>
    %cst_14 = arith.constant 0.000000e+00 : f32
    %44 = vector.shape_cast %43 : vector<1x128xi1> to vector<1x128xi1>
    %45 = vector.broadcast %44 : vector<1x128xi1> to vector<256x128xi1>
    %46 = vector.broadcast %cst_14 : f32 to vector<256x128xf32>
    %47 = arith.select %45, %22, %46 : vector<256x128xi1>, vector<256x128xf32>
    %48 = vector.shape_cast %41 : vector<1x128xi1> to vector<1x128xi1>
    %49 = vector.broadcast %48 : vector<1x128xi1> to vector<256x128xi1>
    %50 = arith.select %49, %17, %47 : vector<256x128xi1>, vector<256x128xf32>
    %c1_i32_15 = arith.constant 1 : i32
    %51 = vector.broadcast %c1_i32_15 : i32 to vector<1x128xi32>
    %52 = arith.cmpi sle, %10, %51 : vector<1x128xi32>
    %53 = arith.addf %27, %50 : vector<256x128xf32>
    %cst_16 = arith.constant 1.000000e+00 : f32
    %54 = vector.broadcast %cst_16 : f32 to vector<256x128xf32>
    %55 = arith.mulf %53, %54 : vector<256x128xf32>
    %56 = vector.shape_cast %32 : vector<1x128xi1> to vector<1x128xi1>
    %57 = vector.broadcast %56 : vector<1x128xi1> to vector<256x128xi1>
    %58 = arith.select %57, %39, %27 : vector<256x128xi1>, vector<256x128xf32>
    %59 = vector.shape_cast %52 : vector<1x128xi1> to vector<1x128xi1>
    %60 = vector.broadcast %59 : vector<1x128xi1> to vector<256x128xi1>
    %61 = arith.select %60, %55, %58 : vector<256x128xi1>, vector<256x128xf32>
    %c0_17 = arith.constant 0 : index
    %c0_18 = arith.constant 0 : index
    %62 = vector.load %arg7[%c0_17, %c0_18] : memref<256x128xf32, #tpu.memory_space<vmem>>, vector<256x128xf32>
    tpu.vector_store %arg7[%c0_17, %c0_18], %61 {strides = array<i32>} : memref<256x128xf32, #tpu.memory_space<vmem>>, vector<256x128xf32>,
    return
  }
  func.func @transform_0(%arg0: i32) -> (i32, i32) {
    %c0_i32 = arith.constant 0 : i32
    %c0_i32_0 = arith.constant 0 : i32
    return %arg0, %c0_i32 : i32, i32
  }
  func.func @transform_1(%arg0: i32) -> (i32, i32) {
    %c0_i32 = arith.constant 0 : i32
    %c0_i32_0 = arith.constant 0 : i32
    %c0_i32_1 = arith.constant 0 : i32
    return %c0_i32, %c0_i32_0 : i32, i32
  }
  func.func @transform_2(%arg0: i32) -> (i32, i32) {
    %c0_i32 = arith.constant 0 : i32
    %c0_i32_0 = arith.constant 0 : i32
    %c0_i32_1 = arith.constant 0 : i32
    return %c0_i32, %c0_i32_0 : i32, i32
  }
  func.func @transform_3(%arg0: i32) -> (i32, i32) {
    %c0_i32 = arith.constant 0 : i32
    %c0_i32_0 = arith.constant 0 : i32
    %c0_i32_1 = arith.constant 0 : i32
    return %c0_i32, %c0_i32_0 : i32, i32
  }
  func.func @transform_4(%arg0: i32) -> (i32, i32) {
    %c0_i32 = arith.constant 0 : i32
    %c0_i32_0 = arith.constant 0 : i32
    %c0_i32_1 = arith.constant 0 : i32
    return %c0_i32, %c0_i32_0 : i32, i32
  }
  func.func @transform_5(%arg0: i32) -> (i32, i32) {
    %c0_i32 = arith.constant 0 : i32
    %c0_i32_0 = arith.constant 0 : i32
    %c0_i32_1 = arith.constant 0 : i32
    return %c0_i32, %c0_i32_0 : i32, i32
  }
  func.func @transform_6(%arg0: i32) -> (i32, i32) {
    %c0_i32 = arith.constant 0 : i32
    %c0_i32_0 = arith.constant 0 : i32
    return %arg0, %c0_i32 : i32, i32
  }
}

</mosaic_0001>

<bundles_post_ra>
// kernel: yolov3_forward.8
= control target key start
LH: loop header
LB: loop body
LE: loop exit
PB: predicated region body
PF: predicated region fallthrough
CT: control target
= control target key end

     0   :  { %s4118_s15 = smov 0   ;;  %s4938_s0 = inlined_call_operand.vmem [shape: bf16[512,1152], index: 0, kind: input, shape index: {}]   ;;  %s4939_s1 = inlined_call_operand.vmem [shape: bf16[1152,128], index: 1, kind: input, shape index: {}]   ;;  %s4940_s2 = inlined_call_operand.vmem [shape: f32[1,128], index: 2, kind: input, shape index: {}]   ;;  %s4941_s3 = inlined_call_operand.vmem [shape: f32[1,128], index: 3, kind: input, shape index: {}]   ;;  %s4942_s4 = inlined_call_operand.vmem [shape: bf16[512,128], index: 4, kind: output, shape index: {}]  }
   0x1 LB: > { %s2872_s16 = sadd.s32 4294967295, %s4091_s15   ;;  %p2876_p0 = scmp.ge.s32.totalorder %s4091_s15, 1  ;;  %s4091_s15 = sphi %s4118_s15, %s14_s15  }
   0x2   : > { %p164_p1 = scmp.lt.s32.totalorder %s4091_s15, 3 }
   0x4   : > { %p165_p2 = pnand %p2876_p0, %p164_p1 }
   0x5   : > { %v3805_v0 = vld [vmem:[%s4939_s1 + $0x40] sm:$0xff] (!%p165_p2)   ;;  %s2877_s19 = sshll.u32 (!%p165_p2), %s2872_s16, 5  ;;  %v3807_v2 = vld [vmem:[%s4939_s1 + $0x48] sm:$0xff] (!%p165_p2)   ;;  %v3809_v4 = vld [vmem:[%s4939_s1 + $0x50] sm:$0xff] (!%p165_p2)  }
   0x6   : > { %168 = sbr.rel (%p165_p2) target bundleno = 550 (0x226), region = 36  ;;  %v3806_v1 = vld [vmem:[%s4939_s1] sm:$0xff] (!%p165_p2)   ;;  %3260 = vmatprep.subr.bf16.mxu0 (!%p165_p2), %v3805_v0  ;;  %3780 = vmatprep.subr.bf16.mxu1 (!%p165_p2), %v3805_v0  ;;  %p192_p3 = scmp.lt.s32.totalorder (!%p165_p2), %s2877_s19, 63  ;;  %v3808_v3 = vld [vmem:[%s4939_s1 + $0x8] sm:$0xff] (!%p165_p2)   ;;  %v3810_v5 = vld [vmem:[%s4939_s1 + $0x10] sm:$0xff] (!%p165_p2)  }
   0x7   : > { %3261 = vmatpush3.bf16.msra.mxu0 (!%p165_p2), %v3806_v1  ;;  %3788 = vmatpush3.bf16.msra.mxu1 (!%p165_p2), %v3806_v1  ;;  %v3811_v6 = vld [vmem:[%s4939_s1 + $0x58] sm:$0xff] (!%p165_p2)   ;;  %v3813_v8 = vld [vmem:[%s4939_s1 + $0x60] sm:$0xff] (!%p165_p2)   ;;  %v3815_v10 = vld [vmem:[%s4939_s1 + $0x68] sm:$0xff] (!%p165_p2)  }
   0x8   : > { %3262 = vmatprep.subr.bf16.mxu0 (!%p165_p2), %v3807_v2  ;;  %3781 = vmatprep.subr.bf16.mxu1 (!%p165_p2), %v3807_v2  ;;  %v3812_v7 = vld [vmem:[%s4939_s1 + $0x18] sm:$0xff] (!%p165_p2)   ;;  %v3814_v9 = vld [vmem:[%s4939_s1 + $0x20] sm:$0xff] (!%p165_p2)   ;;  %v3816_v13 = vld [vmem:[%s4939_s1 + $0x28] sm:$0xff] (!%p165_p2)  }
   0x9   : > { %v3817_v14 = vld [vmem:[%s4939_s1 + $0x70] sm:$0xff] (!%p165_p2)   ;;  %v3819_v16 = vld [vmem:[%s4939_s1 + $0x78] sm:$0xff] (!%p165_p2)   ;;  %v3827_v18 = vld [vmem:[%s4939_s1 + $0xc0] sm:$0xff] (!%p165_p2)  }
   0xa   : > { %v3818_v15 = vld [vmem:[%s4939_s1 + $0x30] sm:$0xff] (!%p165_p2)   ;;  %v3820_v17 = vld [vmem:[%s4939_s1 + $0x38] sm:$0xff] (!%p165_p2)   ;;  %v3830_v21 = vld [vmem:[%s4939_s1 + $0x140] sm:$0xff] (!%p165_p2)  }
   0xb   : > { %3263 = vmatpush3.bf16.msra.mxu0 (!%p165_p2), %v3808_v3  ;;  %3789 = vmatpush3.bf16.msra.mxu1 (!%p165_p2), %v3808_v3  ;;  %v3828_v22 = vld [vmem:[%s4939_s1 + $0x80] sm:$0xff] (!%p165_p2)   ;;  %v3829_v23 = vld [vmem:[%s4939_s1 + $0xc8] sm:$0xff] (!%p165_p2)   ;;  %v3839_v31 = vld [vmem:[%s4939_s1 + $0xd0] sm:$0xff] (!%p165_p2)  }
   0xc   : > { %3264 = vmatprep.subr.bf16.mxu0 (!%p165_p2), %v3809_v4  ;;  %3782 = vmatprep.subr.bf16.mxu1 (!%p165_p2), %v3809_v4  ;;  %v3832_v24 = vld [vmem:[%s4939_s1 + $0x100] sm:$0xff] (!%p165_p2)   ;;  %v3831_v27 = vld [vmem:[%s4939_s1 + $0x88] sm:$0xff] (!%p165_p2)   ;;  %v3840_v32 = vld [vmem:[%s4939_s1 + $0x90] sm:$0xff] (!%p165_p2)  }
   0xd   : > { %s4944_s19 = smov (!%p192_p3, %s2877_s19), 63  ;;  %v3850_v28 = vld [vmem:[%s4939_s1 + $0x148] sm:$0xff]   ;;  %v3841_v34 = vld [vmem:[%s4939_s1 + $0xd8] sm:$0xff]   ;;  %v3849_v40 = vld [vmem:[%s4939_s1 + $0xe0] sm:$0xff]  }
   0xe   : > { %s3796_s6 = smul.u32 36, %s4944_s19  ;;  %v3852_v33 = vld [vmem:[%s4939_s1 + $0x108] sm:$0xff]   ;;  %v3842_v37 = vld [vmem:[%s4939_s1 + $0x98] sm:$0xff]   ;;  %v3851_v41 = vld [vmem:[%s4939_s1 + $0xa0] sm:$0xff]   ;;  %s2880_s30 = sshll.u32 %s4944_s19, 2 }
   0xf   : > { %3265 = vmatpush3.bf16.msra.mxu0 %v3810_v5  ;;  %3790 = vmatpush3.bf16.msra.mxu1 %v3810_v5  ;;  %v3853_v42 = vld [vmem:[%s4939_s1 + $0xe8] sm:$0xff]   ;;  %v3864_v43 = vld [vmem:[%s4939_s1 + $0x150] sm:$0xff]   ;;  %v3863_v52 = vld [vmem:[%s4939_s1 + $0xf8] sm:$0xff]   ;;  %s4816_s19 = scalar_lea.vmem %s4942_s4, %s2880_s30 }
  0x10   : > { %3266 = vmatprep.subr.bf16.mxu0 %v3811_v6  ;;  %3783 = vmatprep.subr.bf16.mxu1 %v3811_v6  ;;  %s4159_s13 = scalar_lea.vmem %s4938_s0, %s3796_s6  ;;  %v3866_v46 = vld [vmem:[%s4939_s1 + $0x110] sm:$0xff]   ;;  %v3854_v47 = vld [vmem:[%s4939_s1 + $0xa8] sm:$0xff]   ;;  %v3881_v55 = vld [vmem:[%s4939_s1 + $0x158] sm:$0xff]  }
  0x11   : > { %v3823_v11 = vld [vmem:[%s4159_s13 + $0x4] ss:$36 sps:$4 sm:$0xff]   ;;  %v3833_v25 = vld [vmem:[%s4159_s13 + $0x4c] ss:$36 sps:$4 sm:$0xff]   ;;  %v3843_v35 = vld [vmem:[%s4159_s13 + $0x94] ss:$36 sps:$4 sm:$0xff]  }
  0x12   : > { %v3826_v12 = vld [vmem:[%s4159_s13 + $0x364] ss:$36 sps:$4 sm:$0xff]   ;;  %1709 = vmatprep.mubr.bf16.mxu0 %v3823_v11  ;;  %v3835_v26 = vld [vmem:[%s4159_s13 + $0x3ac] ss:$36 sps:$4 sm:$0xff]   ;;  %v3845_v36 = vld [vmem:[%s4159_s13 + $0x3f4] ss:$36 sps:$4 sm:$0xff]  }
  0x13   : > { %3267 = vmatpush3.bf16.msra.mxu0 %v3812_v7  ;;  %3791 = vmatpush3.bf16.msra.mxu1 %v3812_v7  ;;  %v3821_v19 = vld [vmem:[%s4159_s13] ss:$36 sps:$4 sm:$0xff]   ;;  %v3837_v29 = vld [vmem:[%s4159_s13 + $0x48] ss:$36 sps:$4 sm:$0xff]   ;;  %v3847_v38 = vld [vmem:[%s4159_s13 + $0x90] ss:$36 sps:$4 sm:$0xff]  }
  0x14   : > { %3268 = vmatprep.subr.bf16.mxu0 %v3813_v8  ;;  %3784 = vmatprep.subr.bf16.mxu1 %v3813_v8  ;;  %v3824_v20 = vld [vmem:[%s4159_s13 + $0x360] ss:$36 sps:$4 sm:$0xff]   ;;  %v3838_v30 = vld [vmem:[%s4159_s13 + $0x3a8] ss:$36 sps:$4 sm:$0xff]   ;;  %v3848_v39 = vld [vmem:[%s4159_s13 + $0x3f0] ss:$36 sps:$4 sm:$0xff]  }
  0x15   : > { %1805 = vmatprep.mubr.bf16.mxu1 %v3826_v12  ;;  %v3855_v44 = vld [vmem:[%s4159_s13 + $0xdc] ss:$36 sps:$4 sm:$0xff]   ;;  %v3861_v48 = vld [vmem:[%s4939_s1 + $0xf0] sm:$0xff]   ;;  %v3867_v53 = vld [vmem:[%s4159_s13 + $0x124] ss:$36 sps:$4 sm:$0xff]  }
  0x16   : > { %v3857_v45 = vld [vmem:[%s4159_s13 + $0x43c] ss:$36 sps:$4 sm:$0xff]   ;;  %v3862_v51 = vld [vmem:[%s4939_s1 + $0xb0] sm:$0xff]   ;;  %v3869_v58 = vld [vmem:[%s4159_s13 + $0x8] ss:$36 sps:$4 sm:$0xff]  }
  0x17   : > { %3269 = vmatpush3.bf16.msra.mxu0 %v3814_v9  ;;  %3792 = vmatpush3.bf16.msra.mxu1 %v3814_v9  ;;  %v3859_v49 = vld [vmem:[%s4159_s13 + $0xd8] ss:$36 sps:$4 sm:$0xff]   ;;  %v3871_v54 = vld [vmem:[%s4159_s13 + $0xc] ss:$36 sps:$4 sm:$0xff]   ;;  %v3872_v59 = vld [vmem:[%s4159_s13 + $0x120] ss:$36 sps:$4 sm:$0xff]  }
  0x18   : > { %3270 = vmatprep.subr.bf16.mxu0 %v3815_v10  ;;  %3785 = vmatprep.subr.bf16.mxu1 %v3815_v10  ;;  %v3860_v50 = vld [vmem:[%s4159_s13 + $0x438] ss:$36 sps:$4 sm:$0xff]   ;;  %v3873_v60 = vld [vmem:[%s4939_s1 + $0x1c0] sm:$0xff]   ;;  %v3875_v62 = vld [vmem:[%s4159_s13 + $0x16c] ss:$36 sps:$4 sm:$0xff]  }
  0x19   : > { %v3882_v56 = vld [vmem:[%s4939_s1 + $0x118] sm:$0xff]   ;;  %v3874_v61 = vld [vmem:[%s4939_s1 + $0x180] sm:$0xff]   ;;  %v3889_v1 = vld [vmem:[%s4939_s1 + $0x1c8] sm:$0xff]  }
  0x1a   : > { %v3865_v57 = vld [vmem:[%s4939_s1 + $0xb8] sm:$0xff]   ;;  %v3891_v0 = vld [vmem:[%s4939_s1 + $0x160] sm:$0xff]   ;;  %v3890_v3 = vld [vmem:[%s4939_s1 + $0x188] sm:$0xff]  }
  0x1b   : > { %3271 = vmatpush3.bf16.msra.mxu0 %v3816_v13  ;;  %3793 = vmatpush3.bf16.msra.mxu1 %v3816_v13  ;;  %v3877_v63 = vld [vmem:[%s4159_s13 + $0x54] ss:$36 sps:$4 sm:$0xff]   ;;  %v3892_v2 = vld [vmem:[%s4939_s1 + $0x120] sm:$0xff]   ;;  %v3879_v4 = vld [vmem:[%s4159_s13 + $0x168] ss:$36 sps:$4 sm:$0xff]  }
  0x1c   : > { %3272 = vmatprep.subr.bf16.mxu0 %v3817_v14  ;;  %3786 = vmatprep.subr.bf16.mxu1 %v3817_v14  ;;  %v3880_v5 = vld [vmem:[%s4159_s13 + $0x50] ss:$36 sps:$4 sm:$0xff]   ;;  %v3885_v7 = vld [vmem:[%s4159_s13 + $0x9c] ss:$36 sps:$4 sm:$0xff]   ;;  %v3905_v8 = vld [vmem:[%s4939_s1 + $0x168] sm:$0xff]  }
  0x1d   : > { %v3883_v6 = vld [vmem:[%s4159_s13 + $0x1b4] ss:$36 sps:$4 sm:$0xff]   ;;  %v3907_v10 = vld [vmem:[%s4939_s1 + $0x128] sm:$0xff]   ;;  %v3893_v14 = vld [vmem:[%s4159_s13 + $0x1fc] ss:$36 sps:$4 sm:$0xff]  }
  0x1e   : > { %v3906_v9 = vld [vmem:[%s4939_s1 + $0x1d0] sm:$0xff]   ;;  %v3888_v13 = vld [vmem:[%s4159_s13 + $0x98] ss:$36 sps:$4 sm:$0xff]  }
  0x1f   : > { %3273 = vmatpush3.bf16.msra.mxu0 %v3818_v15  ;;  %3794 = vmatpush3.bf16.msra.mxu1 %v3818_v15  ;;  %v3908_v11 = vld [vmem:[%s4939_s1 + $0x190] sm:$0xff]  }
  0x20   : > { %3274 = vmatprep.subr.bf16.mxu0 %v3819_v16  ;;  %3787 = vmatprep.subr.bf16.mxu1 %v3819_v16  ;;  %v3887_v12 = vld [vmem:[%s4159_s13 + $0x1b0] ss:$36 sps:$4 sm:$0xff]  }
  0x21   : > { %v3915_v15 = vld [vmem:[%s4939_s1 + $0x170] sm:$0xff]  }
  0x22   : > { %v3916_v16 = vld [vmem:[%s4939_s1 + $0x130] sm:$0xff]  }
  0x23   : > { %3275 = vmatpush3.bf16.msra.mxu0 %v3820_v17  ;;  %3795 = vmatpush3.bf16.msra.mxu1 %v3820_v17  ;;  %v3895_v17 = vld [vmem:[%s4159_s13 + $0xe4] ss:$36 sps:$4 sm:$0xff]  }
  0x24   : > { %3372 = vmatprep.subr.bf16.mxu1 %v3827_v18  ;;  %3484 = vmatprep.subr.bf16.mxu0 %v3830_v21  ;;  %v3923_v18 = vld [vmem:[%s4939_s1 + $0x1d8] sm:$0xff]   ;;  %v3898_v21 = vld [vmem:[%s4159_s13 + $0xe0] ss:$36 sps:$4 sm:$0xff]  }
  0x26   : > { %1710 = vmatmul.mubr.bf16.vlgmr.msra.gmra.mrb[0].mxu0 %v3821_v19  ;;  %1806 = vmatmul.mubr.bf16.vlgmr.msra.gmra.mrb[0].mxu1 %v3824_v20  ;;  %v3924_v19 = vld [vmem:[%s4939_s1 + $0x198] sm:$0xff]  }
  0x27   : > { %3373 = vmatpush3.bf16.msra.mxu1 %v3828_v22  ;;  %3485 = vmatpush3.bf16.msra.mxu0 %v3832_v24  ;;  %v3897_v20 = vld [vmem:[%s4159_s13 + $0x1f8] ss:$36 sps:$4 sm:$0xff]   ;;  %v3899_v22 = vld [vmem:[%s4159_s13 + $0x244] ss:$36 sps:$4 sm:$0xff]  }
  0x28   : > { %3374 = vmatprep.subr.bf16.mxu1 %v3829_v23  ;;  %1717 = vmatprep.mubr.bf16.mxu0 %v3833_v25  ;;  %v3901_v23 = vld [vmem:[%s4159_s13 + $0x12c] ss:$36 sps:$4 sm:$0xff]   ;;  %v3931_v24 = vld [vmem:[%s4939_s1 + $0x178] sm:$0xff]  }
  0x29   : > { %1813 = vmatprep.mubr.bf16.mxu1 %v3835_v26  ;;  %3486 = vmatprep.subr.bf16.mxu0 %v3850_v28  ;;  %v3932_v25 = vld [vmem:[%s4939_s1 + $0x138] sm:$0xff]   ;;  %v3939_v26 = vld [vmem:[%s4939_s1 + $0x1e0] sm:$0xff]  }
  0x2a   : > { %v3940_v28 = vld [vmem:[%s4939_s1 + $0x1a0] sm:$0xff]  }
  0x2b   : > { %3375 = vmatpush3.bf16.msra.mxu1 %v3831_v27  ;;  %3487 = vmatpush3.bf16.msra.mxu0 %v3852_v33  ;;  %v3903_v27 = vld [vmem:[%s4159_s13 + $0x240] ss:$36 sps:$4 sm:$0xff]   ;;  %v3954_v33 = vld [vmem:[%s4939_s1 + $0x1e8] sm:$0xff]  }
  0x2c   : > { %3376 = vmatprep.subr.bf16.mxu1 %v3839_v31  ;;  %3488 = vmatprep.subr.bf16.mxu0 %v3864_v43  ;;  %v3909_v31 = vld [vmem:[%s4159_s13 + $0x28c] ss:$36 sps:$4 sm:$0xff]   ;;  %v3925_v43 = vld [vmem:[%s4159_s13 + $0x31c] ss:$36 sps:$4 sm:$0xff]  }
  0x2e   : > { %1718 = vmatmul.mubr.bf16.gmra.mrb[4].mxu0 %v3837_v29  ;;  %1814 = vmatmul.mubr.bf16.gmra.mrb[4].mxu1 %v3838_v30  ;;  %v3941_v29 = vld [vmem:[%s4939_s1 + $0x200] sm:$0xff]   ;;  %v3904_v30 = vld [vmem:[%s4159_s13 + $0x128] ss:$36 sps:$4 sm:$0xff]  }
  0x2f   : > { %3377 = vmatpush3.bf16.msra.mxu1 %v3840_v32  ;;  %1725 = vmatprep.mubr.bf16.mxu0 %v3843_v35  ;;  %v3911_v32 = vld [vmem:[%s4159_s13 + $0x174] ss:$36 sps:$4 sm:$0xff]   ;;  %v3955_v35 = vld [vmem:[%s4939_s1 + $0x1a8] sm:$0xff]  }
  0x30   : > { %3378 = vmatprep.subr.bf16.mxu1 %v3841_v34  ;;  %1821 = vmatprep.mubr.bf16.mxu1 %v3845_v36  ;;  %v3913_v34 = vld [vmem:[%s4159_s13 + $0x288] ss:$36 sps:$4 sm:$0xff]   ;;  %v3914_v36 = vld [vmem:[%s4159_s13 + $0x170] ss:$36 sps:$4 sm:$0xff]  }
  0x31   : > { %3489 = vmatpush3.bf16.msra.mxu0 %v3866_v46  ;;  %v3930_v46 = vld [vmem:[%s4159_s13 + $0x200] ss:$36 sps:$4 sm:$0xff]  }
  0x32   : > { %3490 = vmatprep.subr.bf16.mxu0 %v3881_v55  ;;  %v3956_v55 = vld [vmem:[%s4939_s1 + $0x208] sm:$0xff]  }
  0x33   : > { %3379 = vmatpush3.bf16.msra.mxu1 %v3842_v37  ;;  %v3917_v37 = vld [vmem:[%s4159_s13 + $0x2d4] ss:$36 sps:$4 sm:$0xff]  }
  0x34   : > { %3380 = vmatprep.subr.bf16.mxu1 %v3849_v40  ;;  %v3922_v40 = vld [vmem:[%s4159_s13 + $0x1b8] ss:$36 sps:$4 sm:$0xff]  }
  0x35   : > { %3491 = vmatpush3.bf16.msra.mxu0 %v3882_v56  ;;  %v3971_v56 = vld [vmem:[%s4939_s1 + $0x210] sm:$0xff]  }
  0x36   : > { %1726 = vmatmul.mubr.bf16.gmra.mrb[8].mxu0 %v3847_v38  ;;  %1822 = vmatmul.mubr.bf16.gmra.mrb[8].mxu1 %v3848_v39  ;;  %v3919_v38 = vld [vmem:[%s4159_s13 + $0x1bc] ss:$36 sps:$4 sm:$0xff]   ;;  %v3921_v39 = vld [vmem:[%s4159_s13 + $0x2d0] ss:$36 sps:$4 sm:$0xff]  }
  0x37   : > { %3381 = vmatpush3.bf16.msra.mxu1 %v3851_v41  ;;  %1733 = vmatprep.mubr.bf16.mxu0 %v3855_v44  ;;  %v3969_v41 = vld [vmem:[%s4939_s1 + $0x1f0] sm:$0xff]   ;;  %v3927_v44 = vld [vmem:[%s4159_s13 + $0x204] ss:$36 sps:$4 sm:$0xff]  }
  0x38   : > { %3382 = vmatprep.subr.bf16.mxu1 %v3853_v42  ;;  %1829 = vmatprep.mubr.bf16.mxu1 %v3857_v45  ;;  %v3970_v42 = vld [vmem:[%s4939_s1 + $0x1b0] sm:$0xff]   ;;  %v3929_v45 = vld [vmem:[%s4159_s13 + $0x318] ss:$36 sps:$4 sm:$0xff]  }
  0x39   : > { %3492 = vmatprep.subr.bf16.mxu0 %v3891_v0  ;;  %v3953_v0 = vld [vmem:[%s4159_s13 + $0xa0] ss:$36 sps:$4 sm:$0xff]  }
  0x3a   : > { %3493 = vmatpush3.bf16.msra.mxu0 %v3892_v2  ;;  %v3959_v2 = vld [vmem:[%s4159_s13 + $0xec] ss:$36 sps:$4 sm:$0xff]  }
  0x3b   : > { %3383 = vmatpush3.bf16.msra.mxu1 %v3854_v47  ;;  %3494 = vmatprep.subr.bf16.mxu0 %v3905_v8  ;;  %v3984_v47 = vld [vmem:[%s4939_s1 + $0x1f8] sm:$0xff]  }
  0x3c   : > { %3384 = vmatprep.subr.bf16.mxu1 %v3861_v48  ;;  %v3985_v48 = vld [vmem:[%s4939_s1 + $0x1b8] sm:$0xff]  }
  0x3d   : > { %v3965_v8 = vld [vmem:[%s4159_s13 + $0x134] ss:$36 sps:$4 sm:$0xff]  }
  0x3e   : > { %1734 = vmatmul.mubr.bf16.gmra.mrb[12].mxu0 %v3859_v49  ;;  %1830 = vmatmul.mubr.bf16.gmra.mrb[12].mxu1 %v3860_v50  ;;  %v3933_v49 = vld [vmem:[%s4159_s13 + $0x24c] ss:$36 sps:$4 sm:$0xff]   ;;  %v3937_v50 = vld [vmem:[%s4159_s13 + $0x14] ss:$36 sps:$4 sm:$0xff]  }
  0x3f   : > { %3385 = vmatpush3.bf16.msra.mxu1 %v3862_v51  ;;  %1741 = vmatprep.mubr.bf16.mxu0 %v3867_v53  ;;  %v3935_v51 = vld [vmem:[%s4159_s13 + $0x10] ss:$36 sps:$4 sm:$0xff]  }
  0x40   : > { %3386 = vmatprep.subr.bf16.mxu1 %v3863_v52  ;;  %1870 = vmatprep.mubr.bf16.mxu1 %v3871_v54  ;;  %v3938_v52 = vld [vmem:[%s4159_s13 + $0x248] ss:$36 sps:$4 sm:$0xff]   ;;  %v3942_v53 = vld [vmem:[%s4159_s13 + $0x294] ss:$36 sps:$4 sm:$0xff]   ;;  %v3944_v54 = vld [vmem:[%s4159_s13 + $0x5c] ss:$36 sps:$4 sm:$0xff]  }
  0x41   : > { %3495 = vmatpush3.bf16.msra.mxu0 %v3907_v10  ;;  %v3967_v10 = vld [vmem:[%s4159_s13 + $0x368] ss:$36 sps:$4 sm:$0xff]  }
  0x42   : > { %3496 = vmatprep.subr.bf16.mxu0 %v3915_v15  ;;  %v3977_v15 = vld [vmem:[%s4159_s13 + $0x178] ss:$36 sps:$4 sm:$0xff]  }
  0x43   : > { %3387 = vmatpush3.bf16.msra.mxu1 %v3865_v57  ;;  %v3946_v57 = vld [vmem:[%s4159_s13 + $0x290] ss:$36 sps:$4 sm:$0xff]  }
  0x44   : > { %3596 = vmatprep.subr.bf16.mxu1 %v3873_v60  ;;  %v3950_v60 = vld [vmem:[%s4159_s13 + $0xa4] ss:$36 sps:$4 sm:$0xff]  }
  0x45   : > { %3497 = vmatpush3.bf16.msra.mxu0 %v3916_v16  ;;  %v3978_v16 = vld [vmem:[%s4159_s13 + $0x3fc] ss:$36 sps:$4 sm:$0xff]  }
  0x46   : > { %1742 = vmatmul.mubr.bf16.gmra.mrb[16].mxu0 %v3872_v59  ;;  %1871 = vmatmul.mubr.bf16.vlgmr.msra.gmra.mrb[16].mxu1 %v3869_v58  ;;  %v3947_v58 = vld [vmem:[%s4159_s13 + $0x58] ss:$36 sps:$4 sm:$0xff]  }
  0x47   : > { %3597 = vmatpush3.bf16.msra.mxu1 %v3874_v61  ;;  %1749 = vmatprep.mubr.bf16.mxu0 %v3875_v62  ;;  %v3948_v59 = vld [vmem:[%s4159_s13 + $0x2dc] ss:$36 sps:$4 sm:$0xff]  }
  0x48   : > { %1878 = vmatprep.mubr.bf16.mxu1 %v3877_v63  ;;  %3598 = vmatprep.subr.bf16.mxu1 %v3889_v1  ;;  %v3986_v61 = vld [vmem:[%s4939_s1 + $0x218] sm:$0xff]   ;;  %v3999_v62 = vld [vmem:[%s4939_s1 + $0x220] sm:$0xff]  }
  0x49   : > { %3498 = vmatprep.subr.bf16.mxu0 %v3931_v24  ;;  %v3952_v63 = vld [vmem:[%s4159_s13 + $0x2d8] ss:$36 sps:$4 sm:$0xff]   ;;  %v3957_v1 = vld [vmem:[%s4159_s13 + $0x324] ss:$36 sps:$4 sm:$0xff]  }
  0x4a   : > { %3499 = vmatpush3.bf16.msra.mxu0 %v3932_v25  ;;  %v3993_v24 = vld [vmem:[%s4159_s13 + $0x254] ss:$36 sps:$4 sm:$0xff]   ;;  %v3997_v25 = vld [vmem:[%s4159_s13 + $0x1c] ss:$36 sps:$4 sm:$0xff]  }
  0x4b   : > { %3599 = vmatpush3.bf16.msra.mxu1 %v3890_v3  ;;  %3732 = vmatprep.subr.bf16.mxu0 %v3941_v29  ;;  %v4012_v3 = vld [vmem:[%s4939_s1 + $0x228] sm:$0xff]  }
  0x4c   : > { %3600 = vmatprep.subr.bf16.mxu1 %v3906_v9  ;;  %v4038_v9 = vld [vmem:[%s4939_s1 + $0x238] sm:$0xff]  }
  0x4e   : > { %1750 = vmatmul.mubr.bf16.gmra.mrb[20].mxu0 %v3879_v4  ;;  %1879 = vmatmul.mubr.bf16.gmra.mrb[20].mxu1 %v3880_v5  ;;  %v3961_v4 = vld [vmem:[%s4159_s13 + $0x320] ss:$36 sps:$4 sm:$0xff]   ;;  %v3962_v5 = vld [vmem:[%s4159_s13 + $0xe8] ss:$36 sps:$4 sm:$0xff]  }
  0x4f   : > { %1757 = vmatprep.mubr.bf16.mxu0 %v3883_v6  ;;  %1886 = vmatprep.mubr.bf16.mxu1 %v3885_v7  ;;  %v4025_v6 = vld [vmem:[%s4939_s1 + $0x230] sm:$0xff]  }
  0x50   : > { %3601 = vmatpush3.bf16.msra.mxu1 %v3908_v11  ;;  %v3963_v7 = vld [vmem:[%s4159_s13 + $0x36c] ss:$36 sps:$4 sm:$0xff]  }
  0x51   : > { %3602 = vmatprep.subr.bf16.mxu1 %v3923_v18  ;;  %v3968_v11 = vld [vmem:[%s4159_s13 + $0x130] ss:$36 sps:$4 sm:$0xff]   ;;  %v3982_v18 = vld [vmem:[%s4159_s13 + $0x3f8] ss:$36 sps:$4 sm:$0xff]  }
  0x54   : > { %3603 = vmatpush3.bf16.msra.mxu1 %v3924_v19  ;;  %v3983_v19 = vld [vmem:[%s4159_s13 + $0x1c0] ss:$36 sps:$4 sm:$0xff]  }
  0x55   : > { %3604 = vmatprep.subr.bf16.mxu1 %v3939_v26  ;;  %v3995_v26 = vld [vmem:[%s4159_s13 + $0x18] ss:$36 sps:$4 sm:$0xff]  }
  0x56   : > { %1758 = vmatmul.mubr.bf16.gmra.mrb[24].mxu0 %v3887_v12  ;;  %1887 = vmatmul.mubr.bf16.gmra.mrb[24].mxu1 %v3888_v13  ;;  %v3972_v12 = vld [vmem:[%s4159_s13 + $0x3b4] ss:$36 sps:$4 sm:$0xff]   ;;  %v3974_v13 = vld [vmem:[%s4159_s13 + $0x17c] ss:$36 sps:$4 sm:$0xff]  }
  0x57   : > { %1765 = vmatprep.mubr.bf16.mxu0 %v3893_v14  ;;  %1894 = vmatprep.mubr.bf16.mxu1 %v3895_v17  ;;  %v3976_v14 = vld [vmem:[%s4159_s13 + $0x3b0] ss:$36 sps:$4 sm:$0xff]   ;;  %v3980_v17 = vld [vmem:[%s4159_s13 + $0x1c4] ss:$36 sps:$4 sm:$0xff]  }
  0x58   : > { %3605 = vmatpush3.bf16.msra.mxu1 %v3940_v28  ;;  %v4000_v28 = vld [vmem:[%s4159_s13 + $0x29c] ss:$36 sps:$4 sm:$0xff]  }
  0x59   : > { %3606 = vmatprep.subr.bf16.mxu1 %v3954_v33  ;;  %v4008_v33 = vld [vmem:[%s4159_s13 + $0xac] ss:$36 sps:$4 sm:$0xff]  }
  0x5c   : > { %3607 = vmatpush3.bf16.msra.mxu1 %v3955_v35  ;;  %v4011_v35 = vld [vmem:[%s4159_s13 + $0xa8] ss:$36 sps:$4 sm:$0xff]  }
  0x5d   : > { %3608 = vmatprep.subr.bf16.mxu1 %v3969_v41  ;;  %v4021_v41 = vld [vmem:[%s4159_s13 + $0x13c] ss:$36 sps:$4 sm:$0xff]  }
  0x5e   : > { %1766 = vmatmul.mubr.bf16.gmra.mrb[28].mxu0 %v3897_v20  ;;  %1895 = vmatmul.mubr.bf16.gmra.mrb[28].mxu1 %v3898_v21  ;;  %v3987_v20 = vld [vmem:[%s4159_s13 + $0x444] ss:$36 sps:$4 sm:$0xff]   ;;  %v3989_v21 = vld [vmem:[%s4159_s13 + $0x20c] ss:$36 sps:$4 sm:$0xff]  }
  0x5f   : > { %1773 = vmatprep.mubr.bf16.mxu0 %v3899_v22  ;;  %1902 = vmatprep.mubr.bf16.mxu1 %v3901_v23  ;;  %v3991_v22 = vld [vmem:[%s4159_s13 + $0x440] ss:$36 sps:$4 sm:$0xff]   ;;  %v3992_v23 = vld [vmem:[%s4159_s13 + $0x208] ss:$36 sps:$4 sm:$0xff]  }
  0x60   : > { %3609 = vmatpush3.bf16.msra.mxu1 %v3970_v42  ;;  %v4023_v42 = vld [vmem:[%s4159_s13 + $0x370] ss:$36 sps:$4 sm:$0xff]  }
  0x61   : > { %3610 = vmatprep.subr.bf16.mxu1 %v3984_v47  ;;  %v4031_v47 = vld [vmem:[%s4159_s13 + $0x180] ss:$36 sps:$4 sm:$0xff]  }
  0x64   : > { %3611 = vmatpush3.bf16.msra.mxu1 %v3985_v48  ;;  %v4032_v48 = vld [vmem:[%s4159_s13 + $0x404] ss:$36 sps:$4 sm:$0xff]  }
  0x66   : > { %1774 = vmatmul.mubr.bf16.gmra.mrb[32].mxu0 %v3903_v27  ;;  %1903 = vmatmul.mubr.bf16.gmra.mrb[32].mxu1 %v3904_v30  ;;  %v3998_v27 = vld [vmem:[%s4159_s13 + $0x250] ss:$36 sps:$4 sm:$0xff]   ;;  %v4004_v30 = vld [vmem:[%s4159_s13 + $0x298] ss:$36 sps:$4 sm:$0xff]  }
  0x67   : > { %1781 = vmatprep.mubr.bf16.mxu0 %v3909_v31  ;;  %1910 = vmatprep.mubr.bf16.mxu1 %v3911_v32  ;;  %v4005_v31 = vld [vmem:[%s4159_s13 + $0x60] ss:$36 sps:$4 sm:$0xff]  }
  0x68   : > { %v4006_v32 = vld [vmem:[%s4159_s13 + $0x2e4] ss:$36 sps:$4 sm:$0xff]  }
  0x6e   : > { %1782 = vmatmul.mubr.bf16.gmra.mrb[36].mxu0 %v3913_v34  ;;  %1911 = vmatmul.mubr.bf16.gmra.mrb[36].mxu1 %v3914_v36  ;;  %v4010_v34 = vld [vmem:[%s4159_s13 + $0x2e0] ss:$36 sps:$4 sm:$0xff]   ;;  %v4013_v36 = vld [vmem:[%s4159_s13 + $0x32c] ss:$36 sps:$4 sm:$0xff]  }
  0x6f   : > { %1789 = vmatprep.mubr.bf16.mxu0 %v3917_v37  ;;  %1918 = vmatprep.mubr.bf16.mxu1 %v3919_v38  ;;  %v4015_v37 = vld [vmem:[%s4159_s13 + $0xf4] ss:$36 sps:$4 sm:$0xff]   ;;  %v4017_v38 = vld [vmem:[%s4159_s13 + $0x328] ss:$36 sps:$4 sm:$0xff]  }
  0x76   : > { %1790 = vmatmul.mubr.bf16.gmra.mrb[40].mxu0 %v3921_v39  ;;  %1919 = vmatmul.mubr.bf16.gmra.mrb[40].mxu1 %v3922_v40  ;;  %v4018_v39 = vld [vmem:[%s4159_s13 + $0xf0] ss:$36 sps:$4 sm:$0xff]  }
  0x77   : > { %1797 = vmatprep.mubr.bf16.mxu0 %v3925_v43  ;;  %1926 = vmatprep.mubr.bf16.mxu1 %v3927_v44  ;;  %v4019_v40 = vld [vmem:[%s4159_s13 + $0x374] ss:$36 sps:$4 sm:$0xff]   ;;  %v4026_v44 = vld [vmem:[%s4159_s13 + $0x3bc] ss:$36 sps:$4 sm:$0xff]  }
  0x78   : > { %v4024_v43 = vld [vmem:[%s4159_s13 + $0x138] ss:$36 sps:$4 sm:$0xff]  }
  0x7e   : > { %1798 = vmatmul.mubr.bf16.gmra.mrb[44].mxu0 %v3929_v45  ;;  %1927 = vmatmul.mubr.bf16.gmra.mrb[44].mxu1 %v3930_v46  ;;  %v4028_v45 = vld [vmem:[%s4159_s13 + $0x184] ss:$36 sps:$4 sm:$0xff]   ;;  %v4030_v46 = vld [vmem:[%s4159_s13 + $0x3b8] ss:$36 sps:$4 sm:$0xff]  }
  0x7f   : > { %1934 = vmatprep.mubr.bf16.mxu1 %v3933_v49  ;;  %2031 = vmatprep.mubr.bf16.mxu0 %v3937_v50  ;;  %v4034_v49 = vld [vmem:[%s4159_s13 + $0x1cc] ss:$36 sps:$4 sm:$0xff]   ;;  %v4036_v50 = vld [vmem:[%s4159_s13 + $0x400] ss:$36 sps:$4 sm:$0xff]  }
  0x86   : > { %1935 = vmatmul.mubr.bf16.gmra.mrb[48].mxu1 %v3938_v52  ;;  %2032 = vmatmul.mubr.bf16.vlgmr.msra.gmra.mrb[48].mxu0 %v3935_v51  ;;  %v4037_v51 = vld [vmem:[%s4159_s13 + $0x1c8] ss:$36 sps:$4 sm:$0xff]  }
  0x87   : > { %3733 = vmatpush3.bf16.msra.mxu0 %v3941_v29  ;;  %1942 = vmatprep.mubr.bf16.mxu1 %v3942_v53  ;;  %v4002_v29 = vld [vmem:[%s4159_s13 + $0x64] ss:$36 sps:$4 sm:$0xff]   ;;  %v4039_v52 = vld [vmem:[%s4159_s13 + $0x44c] ss:$36 sps:$4 sm:$0xff]   ;;  %v4041_v53 = vld [vmem:[%s4159_s13 + $0x214] ss:$36 sps:$4 sm:$0xff]  }
  0x88   : > { %2039 = vmatprep.mubr.bf16.mxu0 %v3944_v54  ;;  %3734 = vmatprep.subr.bf16.mxu0 %v3956_v55 }
  0x8b   : > { %3735 = vmatpush3.bf16.msra.mxu0 %v3956_v55 }
  0x8c   : > { %3736 = vmatprep.subr.bf16.mxu0 %v3971_v56 }
  0x8e   : > { %1943 = vmatmul.mubr.bf16.gmra.mrb[52].mxu1 %v3946_v57  ;;  %2040 = vmatmul.mubr.bf16.gmra.mrb[52].mxu0 %v3947_v58  ;;  %v4043_v58 = vld [vmem:[%s4159_s13 + $0x448] ss:$36 sps:$4 sm:$0xff]  }
  0x8f   : > { %1950 = vmatprep.mubr.bf16.mxu1 %v3948_v59  ;;  %2047 = vmatprep.mubr.bf16.mxu0 %v3950_v60  ;;  %v4044_v59 = vld [vmem:[%s4159_s13 + $0x210] ss:$36 sps:$4 sm:$0xff]  }
  0x90   : > { %3737 = vmatpush3.bf16.msra.mxu0 %v3971_v56 }
  0x91   : > { %3738 = vmatprep.subr.bf16.mxu0 %v3986_v61 }
  0x94   : > { %3739 = vmatpush3.bf16.msra.mxu0 %v3986_v61 }
  0x95   : > { %3740 = vmatprep.subr.bf16.mxu0 %v3999_v62 }
  0x96   : > { %1951 = vmatmul.mubr.bf16.gmra.mrb[56].mxu1 %v3952_v63  ;;  %2048 = vmatmul.mubr.bf16.gmra.mrb[56].mxu0 %v3953_v0  ;;  %v4045_v0 = vld [vmem:[%s4159_s13 + $0x25c] ss:$36 sps:$4 sm:$0xff]  }
  0x97   : > { %1958 = vmatprep.mubr.bf16.mxu1 %v3957_v1  ;;  %2055 = vmatprep.mubr.bf16.mxu0 %v3959_v2  ;;  %v4047_v1 = vld [vmem:[%s4159_s13 + $0x20] ss:$36 sps:$4 sm:$0xff]  }
  0x98   : > { %3741 = vmatpush3.bf16.msra.mxu0 %v3999_v62 }
  0x99   : > { %3742 = vmatprep.subr.bf16.mxu0 %v4012_v3 }
  0x9c   : > { %3743 = vmatpush3.bf16.msra.mxu0 %v4012_v3 }
  0x9d   : > { %3744 = vmatprep.subr.bf16.mxu0 %v4025_v6 }
  0x9e   : > { %1959 = vmatmul.mubr.bf16.gmra.mrb[60].mxu1 %v3961_v4  ;;  %2056 = vmatmul.mubr.bf16.gmra.mrb[60].mxu0 %v3962_v5 }
  0x9f   : > { %1966 = vmatprep.mubr.bf16.mxu1 %v3963_v7  ;;  %2063 = vmatprep.mubr.bf16.mxu0 %v3965_v8 }
  0xa0   : > { %3745 = vmatpush3.bf16.msra.mxu0 %v4025_v6 }
  0xa1   : > { %3746 = vmatprep.subr.bf16.mxu0 %v4038_v9 }
  0xa4   : > { %3747 = vmatpush3.bf16.msra.mxu0 %v4038_v9 }
  0xa6   : > { %1967 = vmatmul.mubr.bf16.gmra.mrb[64].mxu1 %v3967_v10  ;;  %2064 = vmatmul.mubr.bf16.gmra.mrb[64].mxu0 %v3968_v11  ;;  %v4048_v10 = vld [vmem:[%s4159_s13 + $0x258] ss:$36 sps:$4 sm:$0xff]   ;;  %v4049_v11 = vld [vmem:[%s4159_s13 + $0x68] ss:$36 sps:$4 sm:$0xff]  }
  0xa7   : > { %1974 = vmatprep.mubr.bf16.mxu1 %v3972_v12  ;;  %2071 = vmatprep.mubr.bf16.mxu0 %v3974_v13 }
  0xae   : > { %1975 = vmatmul.mubr.bf16.gmra.mrb[68].mxu1 %v3976_v14  ;;  %2072 = vmatmul.mubr.bf16.gmra.mrb[68].mxu0 %v3977_v15 }
  0xaf   : > { %1982 = vmatprep.mubr.bf16.mxu1 %v3978_v16  ;;  %2079 = vmatprep.mubr.bf16.mxu0 %v3980_v17  ;;  %v4050_v16 = vld [vmem:[%s4159_s13 + $0x2a4] ss:$36 sps:$4 sm:$0xff]   ;;  %v4052_v17 = vld [vmem:[%s4159_s13 + $0xb0] ss:$36 sps:$4 sm:$0xff]  }
  0xb6   : > { %1983 = vmatmul.mubr.bf16.gmra.mrb[72].mxu1 %v3982_v18  ;;  %2080 = vmatmul.mubr.bf16.gmra.mrb[72].mxu0 %v3983_v19 }
  0xb7   : > { %1990 = vmatprep.mubr.bf16.mxu1 %v3987_v20  ;;  %2087 = vmatprep.mubr.bf16.mxu0 %v3989_v21 }
  0xbe   : > { %1991 = vmatmul.mubr.bf16.gmra.mrb[76].mxu1 %v3991_v22  ;;  %2088 = vmatmul.mubr.bf16.gmra.mrb[76].mxu0 %v3992_v23 }
  0xbf   : > { %2095 = vmatprep.mubr.bf16.mxu0 %v3993_v24  ;;  %2192 = vmatprep.mubr.bf16.mxu1 %v3997_v25 }
  0xc6   : > { %2096 = vmatmul.mubr.bf16.gmra.mrb[80].mxu0 %v3998_v27  ;;  %2193 = vmatmul.mubr.bf16.vlgmr.msra.gmra.mrb[80].mxu1 %v3995_v26  ;;  %v4053_v26 = vld [vmem:[%s4159_s13 + $0x2a0] ss:$36 sps:$4 sm:$0xff]   ;;  %v4054_v27 = vld [vmem:[%s4159_s13 + $0xf8] ss:$36 sps:$4 sm:$0xff]  }
  0xc7   : > { %2103 = vmatprep.mubr.bf16.mxu0 %v4000_v28  ;;  %2200 = vmatprep.mubr.bf16.mxu1 %v4002_v29 }
  0xce   : > { %2104 = vmatmul.mubr.bf16.gmra.mrb[84].mxu0 %v4004_v30  ;;  %2201 = vmatmul.mubr.bf16.gmra.mrb[84].mxu1 %v4005_v31 }
  0xcf   : > { %2111 = vmatprep.mubr.bf16.mxu0 %v4006_v32  ;;  %2208 = vmatprep.mubr.bf16.mxu1 %v4008_v33  ;;  %v4055_v32 = vld [vmem:[%s4159_s13 + $0x2ec] ss:$36 sps:$4 sm:$0xff]   ;;  %v4057_v33 = vld [vmem:[%s4159_s13 + $0x140] ss:$36 sps:$4 sm:$0xff]  }
  0xd6   : > { %2112 = vmatmul.mubr.bf16.gmra.mrb[88].mxu0 %v4010_v34  ;;  %2209 = vmatmul.mubr.bf16.gmra.mrb[88].mxu1 %v4011_v35 }
  0xd7   : > { %2119 = vmatprep.mubr.bf16.mxu0 %v4013_v36  ;;  %2216 = vmatprep.mubr.bf16.mxu1 %v4015_v37 }
  0xde   : > { %2120 = vmatmul.mubr.bf16.gmra.mrb[92].mxu0 %v4017_v38  ;;  %2217 = vmatmul.mubr.bf16.gmra.mrb[92].mxu1 %v4018_v39 }
  0xdf   : > { %2127 = vmatprep.mubr.bf16.mxu0 %v4019_v40  ;;  %2224 = vmatprep.mubr.bf16.mxu1 %v4021_v41 }
  0xe6   : > { %2128 = vmatmul.mubr.bf16.gmra.mrb[96].mxu0 %v4023_v42  ;;  %2225 = vmatmul.mubr.bf16.gmra.mrb[96].mxu1 %v4024_v43  ;;  %v4058_v42 = vld [vmem:[%s4159_s13 + $0x2e8] ss:$36 sps:$4 sm:$0xff]  }
  0xe7   : > { %2135 = vmatprep.mubr.bf16.mxu0 %v4026_v44  ;;  %2232 = vmatprep.mubr.bf16.mxu1 %v4028_v45  ;;  %v4059_v43 = vld [vmem:[%s4159_s13 + $0x188] ss:$36 sps:$4 sm:$0xff]  }
  0xee   : > { %2136 = vmatmul.mubr.bf16.gmra.mrb[100].mxu0 %v4030_v46  ;;  %2233 = vmatmul.mubr.bf16.gmra.mrb[100].mxu1 %v4031_v47 }
  0xef   : > { %2143 = vmatprep.mubr.bf16.mxu0 %v4032_v48  ;;  %2240 = vmatprep.mubr.bf16.mxu1 %v4034_v49  ;;  %v4060_v48 = vld [vmem:[%s4159_s13 + $0x334] ss:$36 sps:$4 sm:$0xff]  }
  0xf0   : > { %v4062_v49 = vld [vmem:[%s4159_s13 + $0x1d0] ss:$36 sps:$4 sm:$0xff]  }
  0xf6   : > { %2144 = vmatmul.mubr.bf16.gmra.mrb[104].mxu0 %v4036_v50  ;;  %2241 = vmatmul.mubr.bf16.gmra.mrb[104].mxu1 %v4037_v51 }
  0xf7   : > { %2151 = vmatprep.mubr.bf16.mxu0 %v4039_v52  ;;  %2248 = vmatprep.mubr.bf16.mxu1 %v4041_v53 }
  0xf9   : > { %v3348_v54 = vpop.f32.mrb[0].mxu1  ;;  %v3276_v55 = vpop.f32.mrb[0].mxu0 }
  0xfa   : > { %v3349_v56 = vpop.f32.mrb[1].mxu1  ;;  %v3277_v57 = vpop.f32.mrb[1].mxu0 }
  0xfb   : > { %v4462_v60 = vadd.f32 %v3349_v56, %v3348_v54  ;;  %v3351_v61 = vpop.f32.mrb[2].mxu1  ;;  %v4464_v62 = vadd.f32 %v3277_v57, %v3276_v55  ;;  %v3279_v63 = vpop.f32.mrb[2].mxu0 }
  0xfc   : > { %v3352_v2 = vpop.f32.mrb[3].mxu1  ;;  %v3280_v3 = vpop.f32.mrb[3].mxu0 }
  0xfd   : > { %v4468_v4 = vadd.f32 %v3352_v2, %v3351_v61  ;;  %v4470_v5 = vadd.f32 %v3280_v3, %v3279_v63  ;;  %v4065_v2 = vld [vmem:[%s4159_s13 + $0x37c] ss:$36 sps:$4 sm:$0xff]  }
  0xfe   : > { %2152 = vmatmul.mubr.bf16.gmra.mrb[108].mxu0 %v4043_v58  ;;  %2249 = vmatmul.mubr.bf16.gmra.mrb[108].mxu1 %v4044_v59  ;;  %v4063_v58 = vld [vmem:[%s4159_s13 + $0x330] ss:$36 sps:$4 sm:$0xff]   ;;  %v4064_v59 = vld [vmem:[%s4159_s13 + $0x218] ss:$36 sps:$4 sm:$0xff]   ;;  %v4067_v3 = vld [vmem:[%s4159_s13 + $0x260] ss:$36 sps:$4 sm:$0xff]  }
  0xff   : > { %2256 = vmatprep.mubr.bf16.mxu1 %v4045_v0  ;;  %3748 = vmatprep.mubr.bf16.mxu0 %v4047_v1 }
 0x101   : > { %v3354_v6 = vpop.f32.mrb[4].mxu1  ;;  %v3282_v7 = vpop.f32.mrb[4].mxu0 }
 0x102   : > { %v3355_v8 = vpop.f32.mrb[5].mxu1  ;;  %v3283_v9 = vpop.f32.mrb[5].mxu0 }
 0x103   : > { %v4474_v12 = vadd.f32 %v3355_v8, %v3354_v6  ;;  %v3357_v13 = vpop.f32.mrb[6].mxu1  ;;  %v4476_v14 = vadd.f32 %v3283_v9, %v3282_v7  ;;  %v3285_v15 = vpop.f32.mrb[6].mxu0 }
 0x104   : > { %v3358_v18 = vpop.f32.mrb[7].mxu1  ;;  %v3286_v19 = vpop.f32.mrb[7].mxu0 }
 0x105   : > { %v4480_v20 = vadd.f32 %v3358_v18, %v3357_v13  ;;  %v4482_v21 = vadd.f32 %v3286_v19, %v3285_v15  ;;  %v4068_v18 = vld [vmem:[%s4159_s13 + $0x378] ss:$36 sps:$4 sm:$0xff]   ;;  %v4069_v19 = vld [vmem:[%s4159_s13 + $0x2a8] ss:$36 sps:$4 sm:$0xff]  }
 0x106   : > { %2257 = vmatmul.mubr.bf16.gmra.mrb[112].mxu1 %v4048_v10  ;;  %3749 = vmatmul.mubr.bf16.vlgmr.msra.gmra.mrb[112].mxu0 %v4049_v11 }
 0x107   : > { %2264 = vmatprep.mubr.bf16.mxu1 %v4050_v16  ;;  %3752 = vmatprep.mubr.bf16.mxu0 %v4052_v17 }
 0x109   : > { %v3360_v22 = vpop.f32.mrb[8].mxu1  ;;  %v3288_v23 = vpop.f32.mrb[8].mxu0 }
 0x10a   : > { %v3361_v24 = vpop.f32.mrb[9].mxu1  ;;  %v3289_v25 = vpop.f32.mrb[9].mxu0 }
 0x10b   : > { %v4486_v28 = vadd.f32 %v3361_v24, %v3360_v22  ;;  %v3363_v29 = vpop.f32.mrb[10].mxu1  ;;  %v4488_v30 = vadd.f32 %v3289_v25, %v3288_v23  ;;  %v3291_v31 = vpop.f32.mrb[10].mxu0  ;;  %v4070_v25 = vld [vmem:[%s4159_s13 + $0x3c4] ss:$36 sps:$4 sm:$0xff]  }
 0x10c   : > { %v3364_v34 = vpop.f32.mrb[11].mxu1  ;;  %v3292_v35 = vpop.f32.mrb[11].mxu0 }
 0x10d   : > { %v4492_v36 = vadd.f32 %v3364_v34, %v3363_v29  ;;  %v4494_v37 = vadd.f32 %v3292_v35, %v3291_v31 }
 0x10e   : > { %2265 = vmatmul.mubr.bf16.gmra.mrb[116].mxu1 %v4053_v26  ;;  %3753 = vmatmul.mubr.bf16.gmra.mrb[116].mxu0 %v4054_v27  ;;  %v4072_v26 = vld [vmem:[%s4159_s13 + $0x2f0] ss:$36 sps:$4 sm:$0xff]  }
 0x10f   : > { %2272 = vmatprep.mubr.bf16.mxu1 %v4055_v32  ;;  %3756 = vmatprep.mubr.bf16.mxu0 %v4057_v33 }
 0x111   : > { %v3366_v38 = vpop.f32.mrb[12].mxu1  ;;  %v3294_v39 = vpop.f32.mrb[12].mxu0 }
 0x112   : > { %v3367_v40 = vpop.f32.mrb[13].mxu1  ;;  %v3295_v41 = vpop.f32.mrb[13].mxu0 }
 0x113   : > { %v4498_v44 = vadd.f32 %v3367_v40, %v3366_v38  ;;  %v3369_v45 = vpop.f32.mrb[14].mxu1  ;;  %v4500_v46 = vadd.f32 %v3295_v41, %v3294_v39  ;;  %v3297_v47 = vpop.f32.mrb[14].mxu0  ;;  %v4073_v40 = vld [vmem:[%s4159_s13 + $0x3c0] ss:$36 sps:$4 sm:$0xff]   ;;  %v4074_v41 = vld [vmem:[%s4159_s13 + $0x338] ss:$36 sps:$4 sm:$0xff]  }
 0x114   : > { %v3370_v50 = vpop.f32.mrb[15].mxu1  ;;  %v3298_v51 = vpop.f32.mrb[15].mxu0 }
 0x115   : > { %v4504_v52 = vadd.f32 %v3370_v50, %v3369_v45  ;;  %v4506_v53 = vadd.f32 %v3298_v51, %v3297_v47  ;;  %v4075_v47 = vld [vmem:[%s4159_s13 + $0x40c] ss:$36 sps:$4 sm:$0xff]  }
 0x116   : > { %2273 = vmatmul.mubr.bf16.gmra.mrb[120].mxu1 %v4058_v42  ;;  %3757 = vmatmul.mubr.bf16.gmra.mrb[120].mxu0 %v4059_v43 }
 0x117   : > { %2280 = vmatprep.mubr.bf16.mxu1 %v4060_v48  ;;  %3760 = vmatprep.mubr.bf16.mxu0 %v4062_v49  ;;  %v4077_v48 = vld [vmem:[%s4159_s13 + $0x380] ss:$36 sps:$4 sm:$0xff]  }
 0x119   : > { %v3388_v54 = vpop.f32.mrb[16].mxu1  ;;  %v3300_v55 = vpop.f32.mrb[16].mxu0 }
 0x11a   : > { %v3389_v56 = vpop.f32.mrb[17].mxu1  ;;  %v3301_v57 = vpop.f32.mrb[17].mxu0 }
 0x11b   : > { %v3390_v61 = vadd.f32 %v3389_v56, %v3388_v54  ;;  %v3391_v63 = vpop.f32.mrb[18].mxu1  ;;  %v4510_v0 = vadd.f32 %v3301_v57, %v3300_v55  ;;  %v3303_v1 = vpop.f32.mrb[18].mxu0 }
 0x11c   : > { %v3392_v6 = vpop.f32.mrb[19].mxu1  ;;  %v3304_v7 = vpop.f32.mrb[19].mxu0 }
 0x11d   : > { %v4515_v8 = vadd.f32 %v3390_v61, %v4464_v62  ;;  %v3393_v9 = vadd.f32 %v3392_v6, %v3391_v63  ;;  %v4517_v10 = vadd.f32 %v3304_v7, %v3303_v1  ;;  %v4078_v61 = vld [vmem:[%s4159_s13 + $0x408] ss:$36 sps:$4 sm:$0xff]   ;;  %v4080_v6 = vld [vmem:[%s4159_s13 + $0x454] ss:$36 sps:$4 sm:$0xff]  }
 0x11e   : > { %2281 = vmatmul.mubr.bf16.gmra.mrb[124].mxu1 %v4063_v58  ;;  %3761 = vmatmul.mubr.bf16.gmra.mrb[124].mxu0 %v4064_v59  ;;  %v4079_v63 = vld [vmem:[%s4159_s13 + $0x3c8] ss:$36 sps:$4 sm:$0xff]   ;;  %v4082_v7 = vld [vmem:[%s4159_s13 + $0x410] ss:$36 sps:$4 sm:$0xff]  }
 0x11f   : > { %v4520_v11 = vadd.f32 %v3393_v9, %v4470_v5  ;;  %2288 = vmatprep.mubr.bf16.mxu1 %v4065_v2  ;;  %3764 = vmatprep.mubr.bf16.mxu0 %v4067_v3 }
 0x121   : > { %v3394_v13 = vpop.f32.mrb[20].mxu1  ;;  %v3306_v15 = vpop.f32.mrb[20].mxu0 }
 0x122   : > { %v3395_v16 = vpop.f32.mrb[21].mxu1  ;;  %v3307_v17 = vpop.f32.mrb[21].mxu0 }
 0x123   : > { %v3396_v62 = vadd.f32 %v3395_v16, %v3394_v13  ;;  %v3397_v22 = vpop.f32.mrb[22].mxu1  ;;  %v4524_v23 = vadd.f32 %v3307_v17, %v3306_v15  ;;  %v3309_v24 = vpop.f32.mrb[22].mxu0 }
 0x124   : > { %v3398_v27 = vpop.f32.mrb[23].mxu1  ;;  %v3310_v5 = vpop.f32.mrb[23].mxu0 }
 0x125   : > { %v4529_v29 = vadd.f32 %v3396_v62, %v4476_v14  ;;  %v3399_v31 = vadd.f32 %v3398_v27, %v3397_v22  ;;  %v4531_v32 = vadd.f32 %v3310_v5, %v3309_v24  ;;  %v4083_v24 = vld [vmem:[%s4159_s13 + $0x450] ss:$36 sps:$4 sm:$0xff]  }
 0x126   : > { %2289 = vmatmul.mubr.bf16.gmra.mrb[128].mxu1 %v4068_v18  ;;  %3765 = vmatmul.mubr.bf16.gmra.mrb[128].mxu0 %v4069_v19 }
 0x127   : > { %v4534_v33 = vadd.f32 %v3399_v31, %v4482_v21  ;;  %2296 = vmatprep.mubr.bf16.mxu1 %v4070_v25  ;;  %3768 = vmatprep.mubr.bf16.mxu0 %v4072_v26  ;;  %v4084_v25 = vld [vmem:[%s4159_s13 + $0x458] ss:$36 sps:$4 sm:$0xff]  }
 0x129   : > { %v3400_v34 = vpop.f32.mrb[24].mxu1  ;;  %v3312_v35 = vpop.f32.mrb[24].mxu0 }
 0x12a   : > { %v3401_v38 = vpop.f32.mrb[25].mxu1  ;;  %v3313_v39 = vpop.f32.mrb[25].mxu0 }
 0x12b   : > { %v3402_v14 = vadd.f32 %v3401_v38, %v3400_v34  ;;  %v3403_v42 = vpop.f32.mrb[26].mxu1  ;;  %v4538_v43 = vadd.f32 %v3313_v39, %v3312_v35  ;;  %v3315_v45 = vpop.f32.mrb[26].mxu0 }
 0x12c   : > { %v3404_v49 = vpop.f32.mrb[27].mxu1  ;;  %v3316_v21 = vpop.f32.mrb[27].mxu0 }
 0x12d   : > { %v4543_v50 = vadd.f32 %v3402_v14, %v4488_v30  ;;  %v3405_v51 = vadd.f32 %v3404_v49, %v3403_v42  ;;  %v4545_v54 = vadd.f32 %v3316_v21, %v3315_v45 }
 0x12e   : > { %2297 = vmatmul.mubr.bf16.gmra.mrb[132].mxu1 %v4073_v40  ;;  %3769 = vmatmul.mubr.bf16.gmra.mrb[132].mxu0 %v4074_v41 }
 0x12f   : > { %v4548_v55 = vadd.f32 %v3405_v51, %v4494_v37  ;;  %2304 = vmatprep.mubr.bf16.mxu1 %v4075_v47  ;;  %3772 = vmatprep.mubr.bf16.mxu0 %v4077_v48 }
 0x131   : > { %v3406_v56 = vpop.f32.mrb[28].mxu1  ;;  %v3318_v57 = vpop.f32.mrb[28].mxu0 }
 0x132   : > { %v3407_v58 = vpop.f32.mrb[29].mxu1  ;;  %v3319_v59 = vpop.f32.mrb[29].mxu0 }
 0x133   : > { %v3408_v30 = vadd.f32 %v3407_v58, %v3406_v56  ;;  %v3409_v1 = vpop.f32.mrb[30].mxu1  ;;  %v4552_v2 = vadd.f32 %v3319_v59, %v3318_v57  ;;  %v3321_v3 = vpop.f32.mrb[30].mxu0 }
 0x134   : > { %v3410_v9 = vpop.f32.mrb[31].mxu1  ;;  %v3322_v37 = vpop.f32.mrb[31].mxu0 }
 0x135   : > { %v4557_v13 = vadd.f32 %v3408_v30, %v4500_v46  ;;  %v3411_v15 = vadd.f32 %v3410_v9, %v3409_v1  ;;  %v4559_v16 = vadd.f32 %v3322_v37, %v3321_v3 }
 0x136   : > { %2305 = vmatmul.mubr.bf16.gmra.mrb[136].mxu1 %v4078_v61  ;;  %3773 = vmatmul.mubr.bf16.gmra.mrb[136].mxu0 %v4079_v63 }
 0x137   : > { %v4562_v17 = vadd.f32 %v3411_v15, %v4506_v53  ;;  %2312 = vmatprep.mubr.bf16.mxu1 %v4080_v6  ;;  %3776 = vmatprep.mubr.bf16.mxu0 %v4082_v7 }
 0x139   : > { %v3412_v18 = vpop.f32.mrb[32].mxu1  ;;  %v3324_v19 = vpop.f32.mrb[32].mxu0 }
 0x13a   : > { %v3413_v62 = vpop.f32.mrb[33].mxu1  ;;  %v3325_v22 = vpop.f32.mrb[33].mxu0 }
 0x13b   : > { %v3414_v26 = vadd.f32 %v3413_v62, %v3412_v18  ;;  %v3415_v27 = vpop.f32.mrb[34].mxu1  ;;  %v3326_v46 = vadd.f32 %v3325_v22, %v3324_v19  ;;  %v3327_v5 = vpop.f32.mrb[34].mxu0 }
 0x13c   : > { %v3416_v31 = vpop.f32.mrb[35].mxu1  ;;  %v3328_v34 = vpop.f32.mrb[35].mxu0 }
 0x13d   : > { %v4567_v35 = vadd.f32 %v3414_v26, %v4510_v0  ;;  %v3417_v38 = vadd.f32 %v3416_v31, %v3415_v27  ;;  %v3329_v53 = vadd.f32 %v3328_v34, %v3327_v5 }
 0x13e   : > { %2313 = vmatmul.mubr.bf16.gmra.mrb[140].mxu1 %v4083_v24  ;;  %3777 = vmatmul.mubr.bf16.gmra.mrb[140].mxu0 %v4084_v25 }
 0x13f   : > { %v4570_v39 = vadd.f32 %v3417_v38, %v4517_v10 }
 0x141   : > { %v3418_v40 = vpop.f32.mrb[36].mxu1  ;;  %v3330_v41 = vpop.f32.mrb[36].mxu0 }
 0x142   : > { %v3419_v14 = vpop.f32.mrb[37].mxu1  ;;  %v3331_v42 = vpop.f32.mrb[37].mxu0 }
 0x143   : > { %v3420_v45 = vadd.f32 %v3419_v14, %v3418_v40  ;;  %v3421_v47 = vpop.f32.mrb[38].mxu1  ;;  %v3332_v48 = vadd.f32 %v3331_v42, %v3330_v41  ;;  %v3333_v49 = vpop.f32.mrb[38].mxu0 }
 0x144   : > { %v3422_v21 = vpop.f32.mrb[39].mxu1  ;;  %v3334_v51 = vpop.f32.mrb[39].mxu0 }
 0x145   : > { %v4573_v0 = vadd.f32 %v3420_v45, %v4524_v23  ;;  %v3423_v56 = vadd.f32 %v3422_v21, %v3421_v47  ;;  %v3335_v57 = vadd.f32 %v3334_v51, %v3333_v49 }
 0x147   : > { %v4576_v58 = vadd.f32 %v3423_v56, %v4531_v32 }
 0x149   : > { %v3424_v10 = vpop.f32.mrb[40].mxu1  ;;  %v3336_v59 = vpop.f32.mrb[40].mxu0 }
 0x14a   : > { %v3425_v61 = vpop.f32.mrb[41].mxu1  ;;  %v3337_v63 = vpop.f32.mrb[41].mxu0 }
 0x14b   : > { %v3426_v30 = vadd.f32 %v3425_v61, %v3424_v10  ;;  %v3427_v1 = vpop.f32.mrb[42].mxu1  ;;  %v4578_v3 = vadd.f32 %v3337_v63, %v3336_v59  ;;  %v3339_v6 = vpop.f32.mrb[42].mxu0 }
 0x14c   : > { %v3428_v7 = vpop.f32.mrb[43].mxu1  ;;  %v3340_v9 = vpop.f32.mrb[43].mxu0 }
 0x14d   : > { %v4581_v37 = vadd.f32 %v3426_v30, %v4538_v43  ;;  %v3429_v23 = vadd.f32 %v3428_v7, %v3427_v1  ;;  %v3341_v15 = vadd.f32 %v3340_v9, %v3339_v6 }
 0x14f   : > { %v4584_v18 = vadd.f32 %v3429_v23, %v4545_v54 }
 0x151   : > { %v3430_v32 = vpop.f32.mrb[44].mxu1  ;;  %v3342_v19 = vpop.f32.mrb[44].mxu0 }
 0x152   : > { %v3431_v62 = vpop.f32.mrb[45].mxu1  ;;  %v3343_v22 = vpop.f32.mrb[45].mxu0 }
 0x153   : > { %v3432_v24 = vadd.f32 %v3431_v62, %v3430_v32  ;;  %v3433_v25 = vpop.f32.mrb[46].mxu1  ;;  %v4586_v26 = vadd.f32 %v3343_v22, %v3342_v19  ;;  %v3345_v27 = vpop.f32.mrb[46].mxu0 }
 0x154   : > { %v3434_v5 = vpop.f32.mrb[47].mxu1  ;;  %v3346_v31 = vpop.f32.mrb[47].mxu0 }
 0x155   : > { %v4589_v34 = vadd.f32 %v3432_v24, %v4552_v2  ;;  %v3435_v43 = vadd.f32 %v3434_v5, %v3433_v25  ;;  %v4591_v38 = vadd.f32 %v3346_v31, %v3345_v27 }
 0x157   : > { %v4594_v54 = vadd.f32 %v3435_v43, %v4559_v16 }
 0x159   : > { %v3436_v40 = vpop.f32.mrb[48].mxu1  ;;  %v3500_v41 = vpop.f32.mrb[48].mxu0 }
 0x15a   : > { %v3437_v14 = vpop.f32.mrb[49].mxu1  ;;  %v3501_v42 = vpop.f32.mrb[49].mxu0 }
 0x15b   : > { %v3438_v45 = vadd.f32 %v3437_v14, %v3436_v40  ;;  %v3502_v47 = vadd.f32 %v3501_v42, %v3500_v41  ;;  %v3439_v49 = vpop.f32.mrb[50].mxu1  ;;  %v3503_v21 = vpop.f32.mrb[50].mxu0 }
 0x15c   : > { %v3440_v51 = vpop.f32.mrb[51].mxu1  ;;  %v3504_v56 = vpop.f32.mrb[51].mxu0 }
 0x15d   : > { %v4596_v10 = vadd.f32 %v3438_v45, %v3326_v46  ;;  %v4599_v2 = vadd.f32 %v3502_v47, %v4515_v8  ;;  %v3441_v59 = vadd.f32 %v3440_v51, %v3439_v49  ;;  %v3505_v61 = vadd.f32 %v3504_v56, %v3503_v21 }
 0x15f   : > { %v4601_v63 = vadd.f32 %v3441_v59, %v3329_v53  ;;  %v4604_v16 = vadd.f32 %v3505_v61, %v4520_v11 }
 0x161   : > { %v3442_v30 = vpop.f32.mrb[52].mxu1  ;;  %v3506_v1 = vpop.f32.mrb[52].mxu0 }
 0x162   : > { %v3443_v6 = vpop.f32.mrb[53].mxu1  ;;  %v3507_v7 = vpop.f32.mrb[53].mxu0 }
 0x163   : > { %v3444_v9 = vadd.f32 %v3443_v6, %v3442_v30  ;;  %v3508_v23 = vadd.f32 %v3507_v7, %v3506_v1  ;;  %v3445_v32 = vpop.f32.mrb[54].mxu1  ;;  %v3509_v19 = vpop.f32.mrb[54].mxu0 }
 0x164   : > { %v3446_v46 = vpop.f32.mrb[55].mxu1  ;;  %v3510_v62 = vpop.f32.mrb[55].mxu0 }
 0x165   : > { %v4606_v22 = vadd.f32 %v3444_v9, %v3332_v48  ;;  %v4609_v8 = vadd.f32 %v3508_v23, %v4529_v29  ;;  %v3447_v53 = vadd.f32 %v3446_v46, %v3445_v32  ;;  %v3511_v24 = vadd.f32 %v3510_v62, %v3509_v19 }
 0x167   : > { %v4611_v25 = vadd.f32 %v3447_v53, %v3335_v57  ;;  %v4614_v11 = vadd.f32 %v3511_v24, %v4534_v33 }
 0x169   : > { %v3448_v27 = vpop.f32.mrb[56].mxu1  ;;  %v3512_v5 = vpop.f32.mrb[56].mxu0 }
 0x16a   : > { %v3449_v31 = vpop.f32.mrb[57].mxu1  ;;  %v3513_v43 = vpop.f32.mrb[57].mxu0 }
 0x16b   : > { %v3450_v40 = vadd.f32 %v3449_v31, %v3448_v27  ;;  %v3514_v41 = vadd.f32 %v3513_v43, %v3512_v5  ;;  %v3451_v14 = vpop.f32.mrb[58].mxu1  ;;  %v3515_v42 = vpop.f32.mrb[58].mxu0 }
 0x16c   : > { %v3452_v48 = vpop.f32.mrb[59].mxu1  ;;  %v3516_v45 = vpop.f32.mrb[59].mxu0 }
 0x16d   : > { %v4617_v29 = vadd.f32 %v3450_v40, %v4578_v3  ;;  %v4620_v47 = vadd.f32 %v3514_v41, %v4543_v50  ;;  %v3453_v57 = vadd.f32 %v3452_v48, %v3451_v14  ;;  %v3517_v49 = vadd.f32 %v3516_v45, %v3515_v42 }
 0x16f   : > { %v4622_v33 = vadd.f32 %v3453_v57, %v3341_v15  ;;  %v4625_v21 = vadd.f32 %v3517_v49, %v4548_v55 }
 0x171   : > { %v3454_v51 = vpop.f32.mrb[60].mxu1  ;;  %v3518_v56 = vpop.f32.mrb[60].mxu0 }
 0x172   : > { %v3455_v59 = vpop.f32.mrb[61].mxu1  ;;  %v3519_v61 = vpop.f32.mrb[61].mxu0 }
 0x173   : > { %v3456_v30 = vadd.f32 %v3455_v59, %v3454_v51  ;;  %v3520_v1 = vadd.f32 %v3519_v61, %v3518_v56  ;;  %v3457_v6 = vpop.f32.mrb[62].mxu1  ;;  %v3521_v7 = vpop.f32.mrb[62].mxu0 }
 0x174   : > { %v3458_v3 = vpop.f32.mrb[63].mxu1  ;;  %v3522_v9 = vpop.f32.mrb[63].mxu0 }
 0x175   : > { %v4628_v50 = vadd.f32 %v3456_v30, %v4586_v26  ;;  %v4631_v23 = vadd.f32 %v3520_v1, %v4557_v13  ;;  %v3459_v15 = vadd.f32 %v3458_v3, %v3457_v6  ;;  %v3523_v32 = vadd.f32 %v3522_v9, %v3521_v7 }
 0x177   : > { %v4634_v55 = vadd.f32 %v3459_v15, %v4591_v38  ;;  %v4637_v19 = vadd.f32 %v3523_v32, %v4562_v17 }
 0x179   : > { %v3460_v46 = vpop.f32.mrb[64].mxu1  ;;  %v3524_v62 = vpop.f32.mrb[64].mxu0 }
 0x17a   : > { %v3461_v53 = vpop.f32.mrb[65].mxu1  ;;  %v3525_v24 = vpop.f32.mrb[65].mxu0 }
 0x17b   : > { %v3462_v27 = vadd.f32 %v3461_v53, %v3460_v46  ;;  %v3526_v5 = vadd.f32 %v3525_v24, %v3524_v62  ;;  %v3463_v31 = vpop.f32.mrb[66].mxu1  ;;  %v3527_v26 = vpop.f32.mrb[66].mxu0 }
 0x17c   : > { %v3464_v43 = vpop.f32.mrb[67].mxu1  ;;  %v3528_v40 = vpop.f32.mrb[67].mxu0 }
 0x17d   : > { %v4640_v13 = vadd.f32 %v3462_v27, %v4462_v60  ;;  %v4643_v41 = vadd.f32 %v3526_v5, %v4567_v35  ;;  %v3465_v38 = vadd.f32 %v3464_v43, %v3463_v31  ;;  %v3529_v14 = vadd.f32 %v3528_v40, %v3527_v26 }
 0x17f   : > { %v4646_v17 = vadd.f32 %v3465_v38, %v4468_v4  ;;  %v4649_v42 = vadd.f32 %v3529_v14, %v4570_v39 }
 0x181   : > { %v3466_v48 = vpop.f32.mrb[68].mxu1  ;;  %v3530_v45 = vpop.f32.mrb[68].mxu0 }
 0x182   : > { %v3467_v57 = vpop.f32.mrb[69].mxu1  ;;  %v3531_v49 = vpop.f32.mrb[69].mxu0 }
 0x183   : > { %v3468_v51 = vadd.f32 %v3467_v57, %v3466_v48  ;;  %v3532_v56 = vadd.f32 %v3531_v49, %v3530_v45  ;;  %v3469_v59 = vpop.f32.mrb[70].mxu1  ;;  %v3533_v60 = vpop.f32.mrb[70].mxu0 }
 0x184   : > { %v3470_v61 = vpop.f32.mrb[71].mxu1  ;;  %v3534_v30 = vpop.f32.mrb[71].mxu0 }
 0x185   : > { %v4652_v35 = vadd.f32 %v3468_v51, %v4474_v12  ;;  %v4655_v1 = vadd.f32 %v3532_v56, %v4573_v0  ;;  %v3471_v4 = vadd.f32 %v3470_v61, %v3469_v59  ;;  %v3535_v6 = vadd.f32 %v3534_v30, %v3533_v60 }
 0x187   : > { %v4658_v39 = vadd.f32 %v3471_v4, %v4480_v20  ;;  %v4661_v7 = vadd.f32 %v3535_v6, %v4576_v58 }
 0x189   : > { %v3472_v3 = vpop.f32.mrb[72].mxu1  ;;  %v3536_v9 = vpop.f32.mrb[72].mxu0 }
 0x18a   : > { %v3473_v15 = vpop.f32.mrb[73].mxu1  ;;  %v3537_v32 = vpop.f32.mrb[73].mxu0 }
 0x18b   : > { %v3474_v46 = vadd.f32 %v3473_v15, %v3472_v3  ;;  %v3538_v62 = vadd.f32 %v3537_v32, %v3536_v9  ;;  %v3475_v53 = vpop.f32.mrb[74].mxu1  ;;  %v3539_v12 = vpop.f32.mrb[74].mxu0 }
 0x18c   : > { %v3476_v24 = vpop.f32.mrb[75].mxu1  ;;  %v3540_v27 = vpop.f32.mrb[75].mxu0 }
 0x18d   : > { %v4664_v0 = vadd.f32 %v3474_v46, %v4486_v28  ;;  %v4667_v5 = vadd.f32 %v3538_v62, %v4581_v37  ;;  %v3477_v20 = vadd.f32 %v3476_v24, %v3475_v53  ;;  %v3541_v31 = vadd.f32 %v3540_v27, %v3539_v12 }
 0x18f   : > { %v4670_v58 = vadd.f32 %v3477_v20, %v4492_v36  ;;  %v4673_v26 = vadd.f32 %v3541_v31, %v4584_v18 }
 0x191   : > { %v3478_v43 = vpop.f32.mrb[76].mxu1  ;;  %v3542_v40 = vpop.f32.mrb[76].mxu0 }
 0x192   : > { %v3479_v38 = vpop.f32.mrb[77].mxu1  ;;  %v3543_v14 = vpop.f32.mrb[77].mxu0 }
 0x193   : > { %v3480_v48 = vadd.f32 %v3479_v38, %v3478_v43  ;;  %v3544_v45 = vadd.f32 %v3543_v14, %v3542_v40  ;;  %v3481_v57 = vpop.f32.mrb[78].mxu1  ;;  %v3545_v28 = vpop.f32.mrb[78].mxu0 }
 0x194   : > { %v3482_v49 = vpop.f32.mrb[79].mxu1  ;;  %v3546_v51 = vpop.f32.mrb[79].mxu0 }
 0x195   : > { %v4676_v37 = vadd.f32 %v3480_v48, %v4498_v44  ;;  %v4679_v56 = vadd.f32 %v3544_v45, %v4589_v34  ;;  %v3483_v36 = vadd.f32 %v3482_v49, %v3481_v57  ;;  %v3547_v59 = vadd.f32 %v3546_v51, %v3545_v28 }
 0x197   : > { %v4682_v18 = vadd.f32 %v3483_v36, %v4504_v52  ;;  %v4685_v60 = vadd.f32 %v3547_v59, %v4594_v54 }
 0x199   : > { %v3548_v61 = vpop.f32.mrb[80].mxu0  ;;  %v3612_v30 = vpop.f32.mrb[80].mxu1 }
 0x19a   : > { %v3549_v4 = vpop.f32.mrb[81].mxu0  ;;  %v3613_v6 = vpop.f32.mrb[81].mxu1 }
 0x19b   : > { %v3550_v3 = vadd.f32 %v3549_v4, %v3548_v61  ;;  %v3614_v9 = vadd.f32 %v3613_v6, %v3612_v30  ;;  %v3551_v15 = vpop.f32.mrb[82].mxu0  ;;  %v3615_v44 = vpop.f32.mrb[82].mxu1 }
 0x19c   : > { %v3552_v32 = vpop.f32.mrb[83].mxu0  ;;  %v3616_v46 = vpop.f32.mrb[83].mxu1 }
 0x19d   : > { %v4688_v34 = vadd.f32 %v3550_v3, %v4596_v10  ;;  %v3553_v62 = vadd.f32 %v3552_v32, %v3551_v15  ;;  %v3617_v53 = vadd.f32 %v3616_v46, %v3615_v44  ;;  %v4691_v52 = vadd.f32 %v3614_v9, %v4599_v2 }
 0x19f   : > { %v4694_v54 = vadd.f32 %v3553_v62, %v4601_v63  ;;  %v4697_v12 = vadd.f32 %v3617_v53, %v4604_v16 }
 0x1a1   : > { %v3554_v24 = vpop.f32.mrb[84].mxu0  ;;  %v3618_v27 = vpop.f32.mrb[84].mxu1 }
 0x1a2   : > { %v3555_v20 = vpop.f32.mrb[85].mxu0  ;;  %v3619_v31 = vpop.f32.mrb[85].mxu1 }
 0x1a3   : > { %v3556_v43 = vadd.f32 %v3555_v20, %v3554_v24  ;;  %v3620_v40 = vadd.f32 %v3619_v31, %v3618_v27  ;;  %v3557_v38 = vpop.f32.mrb[86].mxu0  ;;  %v3621_v10 = vpop.f32.mrb[86].mxu1 }
 0x1a4   : > { %v3558_v14 = vpop.f32.mrb[87].mxu0  ;;  %v3622_v48 = vpop.f32.mrb[87].mxu1 }
 0x1a5   : > { %v4700_v45 = vadd.f32 %v3556_v43, %v4606_v22  ;;  %v3559_v2 = vadd.f32 %v3558_v14, %v3557_v38  ;;  %v3623_v57 = vadd.f32 %v3622_v48, %v3621_v10  ;;  %v4703_v63 = vadd.f32 %v3620_v40, %v4609_v8 }
 0x1a7   : > { %v4706_v16 = vadd.f32 %v3559_v2, %v4611_v25  ;;  %v4709_v28 = vadd.f32 %v3623_v57, %v4614_v11 }
 0x1a9   : > { %v3560_v49 = vpop.f32.mrb[88].mxu0  ;;  %v3624_v51 = vpop.f32.mrb[88].mxu1 }
 0x1aa   : > { %v3561_v36 = vpop.f32.mrb[89].mxu0  ;;  %v3625_v59 = vpop.f32.mrb[89].mxu1 }
 0x1ab   : > { %v3562_v61 = vadd.f32 %v3561_v36, %v3560_v49  ;;  %v3626_v30 = vadd.f32 %v3625_v59, %v3624_v51  ;;  %v3563_v4 = vpop.f32.mrb[90].mxu0  ;;  %v3627_v22 = vpop.f32.mrb[90].mxu1 }
 0x1ac   : > { %v3564_v6 = vpop.f32.mrb[91].mxu0  ;;  %v3628_v3 = vpop.f32.mrb[91].mxu1 }
 0x1ad   : > { %v4712_v9 = vadd.f32 %v3562_v61, %v4617_v29  ;;  %v3565_v8 = vadd.f32 %v3564_v6, %v3563_v4  ;;  %v3629_v15 = vadd.f32 %v3628_v3, %v3627_v22  ;;  %v4715_v25 = vadd.f32 %v3626_v30, %v4620_v47 }
 0x1af   : > { %v4718_v11 = vadd.f32 %v3565_v8, %v4622_v33  ;;  %v4721_v44 = vadd.f32 %v3629_v15, %v4625_v21 }
 0x1b1   : > { %v3566_v32 = vpop.f32.mrb[92].mxu0  ;;  %v3630_v46 = vpop.f32.mrb[92].mxu1 }
 0x1b2   : > { %v3567_v62 = vpop.f32.mrb[93].mxu0  ;;  %v3631_v53 = vpop.f32.mrb[93].mxu1 }
 0x1b3   : > { %v3568_v24 = vadd.f32 %v3567_v62, %v3566_v32  ;;  %v3632_v27 = vadd.f32 %v3631_v53, %v3630_v46  ;;  %v3569_v20 = vpop.f32.mrb[94].mxu0  ;;  %v3633_v29 = vpop.f32.mrb[94].mxu1 }
 0x1b4   : > { %v3570_v31 = vpop.f32.mrb[95].mxu0  ;;  %v3634_v43 = vpop.f32.mrb[95].mxu1 }
 0x1b5   : > { %v4724_v40 = vadd.f32 %v3568_v24, %v4628_v50  ;;  %v3571_v47 = vadd.f32 %v3570_v31, %v3569_v20  ;;  %v3635_v38 = vadd.f32 %v3634_v43, %v3633_v29  ;;  %v4727_v33 = vadd.f32 %v3632_v27, %v4631_v23 }
 0x1b7   : > { %v4730_v21 = vadd.f32 %v3571_v47, %v4634_v55  ;;  %v4733_v10 = vadd.f32 %v3635_v38, %v4637_v19 }
 0x1b9   : > { %v3572_v14 = vpop.f32.mrb[96].mxu0  ;;  %v3636_v48 = vpop.f32.mrb[96].mxu1 }
 0x1ba   : > { %v3573_v2 = vpop.f32.mrb[97].mxu0  ;;  %v3637_v57 = vpop.f32.mrb[97].mxu1 }
 0x1bb   : > { %v3574_v49 = vadd.f32 %v3573_v2, %v3572_v14  ;;  %v3638_v51 = vadd.f32 %v3637_v57, %v3636_v48  ;;  %v3575_v36 = vpop.f32.mrb[98].mxu0  ;;  %v3639_v50 = vpop.f32.mrb[98].mxu1 }
 0x1bc   : > { %v3576_v59 = vpop.f32.mrb[99].mxu0  ;;  %v3640_v61 = vpop.f32.mrb[99].mxu1 }
 0x1bd   : > { %v4736_v30 = vadd.f32 %v3574_v49, %v4640_v13  ;;  %v3577_v23 = vadd.f32 %v3576_v59, %v3575_v36  ;;  %v3641_v4 = vadd.f32 %v3640_v61, %v3639_v50  ;;  %v4739_v55 = vadd.f32 %v3638_v51, %v4643_v41 }
 0x1bf   : > { %v4742_v19 = vadd.f32 %v3577_v23, %v4646_v17  ;;  %v4745_v22 = vadd.f32 %v3641_v4, %v4649_v42 }
 0x1c1   : > { %v3578_v6 = vpop.f32.mrb[100].mxu0  ;;  %v3642_v3 = vpop.f32.mrb[100].mxu1 }
 0x1c2   : > { %v3579_v8 = vpop.f32.mrb[101].mxu0  ;;  %v3643_v15 = vpop.f32.mrb[101].mxu1 }
 0x1c3   : > { %v3580_v32 = vadd.f32 %v3579_v8, %v3578_v6  ;;  %v3644_v46 = vadd.f32 %v3643_v15, %v3642_v3  ;;  %v3581_v62 = vpop.f32.mrb[102].mxu0  ;;  %v3645_v13 = vpop.f32.mrb[102].mxu1 }
 0x1c4   : > { %v3582_v53 = vpop.f32.mrb[103].mxu0  ;;  %v3646_v24 = vpop.f32.mrb[103].mxu1 }
 0x1c5   : > { %v4748_v27 = vadd.f32 %v3580_v32, %v4652_v35  ;;  %v3583_v41 = vadd.f32 %v3582_v53, %v3581_v62  ;;  %v3647_v20 = vadd.f32 %v3646_v24, %v3645_v13  ;;  %v4751_v17 = vadd.f32 %v3644_v46, %v4655_v1 }
 0x1c7   : > { %v4754_v42 = vadd.f32 %v3583_v41, %v4658_v39  ;;  %v4757_v29 = vadd.f32 %v3647_v20, %v4661_v7  ;;  %v4786_v41 = vld [vmem:[%s4940_s2] ss:$0 sm:$0xff] }
 0x1c9   : > { %v3584_v31 = vpop.f32.mrb[104].mxu0  ;;  %v3648_v43 = vpop.f32.mrb[104].mxu1 }
 0x1ca   : > { %v3585_v47 = vpop.f32.mrb[105].mxu0  ;;  %v3649_v38 = vpop.f32.mrb[105].mxu1 }
 0x1cb   : > { %v3586_v14 = vadd.f32 %v3585_v47, %v3584_v31  ;;  %v3650_v48 = vadd.f32 %v3649_v38, %v3648_v43  ;;  %v3587_v2 = vpop.f32.mrb[106].mxu0  ;;  %v3651_v35 = vpop.f32.mrb[106].mxu1 }
 0x1cc   : > { %v3588_v57 = vpop.f32.mrb[107].mxu0  ;;  %v3652_v49 = vpop.f32.mrb[107].mxu1 }
 0x1cd   : > { %v4760_v51 = vadd.f32 %v3586_v14, %v4664_v0  ;;  %v3589_v1 = vadd.f32 %v3588_v57, %v3587_v2  ;;  %v3653_v36 = vadd.f32 %v3652_v49, %v3651_v35  ;;  %v4763_v39 = vadd.f32 %v3650_v48, %v4667_v5 }
 0x1cf   : > { %v4766_v7 = vadd.f32 %v3589_v1, %v4670_v58  ;;  %v4769_v50 = vadd.f32 %v3653_v36, %v4673_v26 }
 0x1d1   : > { %v3590_v59 = vpop.f32.mrb[108].mxu0  ;;  %v3654_v61 = vpop.f32.mrb[108].mxu1 }
 0x1d2   : > { %v3591_v23 = vpop.f32.mrb[109].mxu0  ;;  %v3655_v4 = vpop.f32.mrb[109].mxu1 }
 0x1d3   : > { %v3592_v6 = vadd.f32 %v3591_v23, %v3590_v59  ;;  %v3656_v3 = vadd.f32 %v3655_v4, %v3654_v61  ;;  %v3593_v8 = vpop.f32.mrb[110].mxu0  ;;  %v3657_v0 = vpop.f32.mrb[110].mxu1 }
 0x1d4   : > { %v3594_v15 = vpop.f32.mrb[111].mxu0  ;;  %v3658_v32 = vpop.f32.mrb[111].mxu1 }
 0x1d5   : > { %v4772_v46 = vadd.f32 %v3592_v6, %v4676_v37  ;;  %v3595_v5 = vadd.f32 %v3594_v15, %v3593_v8  ;;  %v3659_v62 = vadd.f32 %v3658_v32, %v3657_v0  ;;  %v4775_v58 = vadd.f32 %v3656_v3, %v4679_v56  ;;  %v4792_v56 = vld [vmem:[%s4941_s3] ss:$0 sm:$0xff] }
 0x1d7   : > { %v4778_v26 = vadd.f32 %v3595_v5, %v4682_v18  ;;  %v4781_v13 = vadd.f32 %v3659_v62, %v4685_v60 }
 0x1d9   : > { %v3660_v53 = vpop.f32.mrb[112].mxu1  ;;  %v3750_v24 = vpop.f32.mrb[112].mxu0 }
 0x1da   : > { %v2364_v37 = vadd.f32 %v3750_v24, %v4703_v63  ;;  %v3661_v20 = vpop.f32.mrb[113].mxu1  ;;  %v2355_v31 = vpop.f32.mrb[113].mxu0 }
 0x1db   : > { %v3662_v18 = vadd.f32 %v3661_v20, %v3660_v53  ;;  %v2356_v60 = vadd.f32 %v2355_v31, %v4691_v52  ;;  %v3663_v43 = vpop.f32.mrb[114].mxu1  ;;  %v3751_v47 = vpop.f32.mrb[114].mxu0 }
 0x1dc   : > { %v2491_v38 = vmul.f32 %v4786_v41, %v2364_v37  ;;  %v2367_v14 = vadd.f32 %v3751_v47, %v4709_v28  ;;  %v3664_v48 = vpop.f32.mrb[115].mxu1  ;;  %v2358_v2 = vpop.f32.mrb[115].mxu0 }
 0x1dd   : > { %v2489_v63 = vmul.f32 %v4786_v41, %v2356_v60  ;;  %v3665_v35 = vadd.f32 %v3664_v48, %v3663_v43  ;;  %v2359_v57 = vadd.f32 %v2358_v2, %v4697_v12  ;;  %v4800_v49 = vadd.f32 %v3662_v18, %v4688_v34 }
 0x1de   : > { %v2530_v1 = vadd.f32 %v4792_v56, %v2491_v38  ;;  %v2492_v52 = vmul.f32 %v4786_v41, %v2367_v14 }
 0x1df   : > { %v2528_v36 = vadd.f32 %v4792_v56, %v2489_v63  ;;  %v2490_v59 = vmul.f32 %v4786_v41, %v2359_v57  ;;  %v4807_v28 = vadd.f32 %v3665_v35, %v4694_v54 }
 0x1e0   : > { %vm2562_vm0 = vcmp.gt.f32.partialorder %v2530_v1, 0.0  ;;  %v2594_v61 = vmul.f32 0.1, %v2530_v1  ;;  %v2531_v23 = vadd.f32 %v4792_v56, %v2492_v52 }
 0x1e1   : > { %vm2560_vm1 = vcmp.gt.f32.partialorder %v2528_v36, 0.0  ;;  %v2592_v12 = vmul.f32 0.1, %v2528_v36  ;;  %v2529_v34 = vadd.f32 %v4792_v56, %v2490_v59  ;;  %v3666_v4 = vpop.f32.mrb[116].mxu1  ;;  %v3754_v6 = vpop.f32.mrb[116].mxu0 }
 0x1e2   : > { %v2626_v3 = vsel %vm2562_vm0, %v2530_v1, %v2594_v61  ;;  %vm2563_vm2 = vcmp.gt.f32.partialorder %v2531_v23, 0.0  ;;  %v2595_v8 = vmul.f32 0.1, %v2531_v23  ;;  %v2380_v0 = vadd.f32 %v3754_v6, %v4727_v33  ;;  %v3667_v15 = vpop.f32.mrb[117].mxu1  ;;  %v2371_v32 = vpop.f32.mrb[117].mxu0 }
 0x1e3   : > { %v2624_v54 = vsel %vm2560_vm1, %v2528_v36, %v2592_v12  ;;  %vm2561_vm3 = vcmp.gt.f32.partialorder %v2529_v34, 0.0  ;;  %v2593_v5 = vmul.f32 0.1, %v2529_v34  ;;  %v3668_v62 = vadd.f32 %v3667_v15, %v3666_v4  ;;  %v3669_v53 = vpop.f32.mrb[118].mxu1  ;;  %v3755_v24 = vpop.f32.mrb[118].mxu0 }
 0x1e4   : > { %v2627_v37 = vsel %vm2563_vm2, %v2531_v23, %v2595_v8  ;;  %v2495_v20 = vmul.f32 %v4786_v41, %v2380_v0  ;;  %v2372_v31 = vadd.f32 %v2371_v32, %v4715_v25  ;;  %v2383_v33 = vadd.f32 %v3755_v24, %v4733_v10  ;;  %v3670_v18 = vpop.f32.mrb[119].mxu1  ;;  %v2374_v60 = vpop.f32.mrb[119].mxu0 }
 0x1e5   : > { %v3173_v43 = vpack.c.bf16 %v2627_v37, %v2626_v3  ;;  %v2625_v47 = vsel %vm2561_vm3, %v2529_v34, %v2593_v5  ;;  %v3671_v38 = vadd.f32 %v3670_v18, %v3669_v53  ;;  %v2375_v14 = vadd.f32 %v2374_v60, %v4721_v44 }
 0x1e6   : > { %v3168_v48 = vpack.c.bf16 %v2625_v47, %v2624_v54  ;;  %v2534_v2 = vadd.f32 %v4792_v56, %v2495_v20  ;;  %v2493_v63 = vmul.f32 %v4786_v41, %v2372_v31  ;;  %v2496_v35 = vmul.f32 %v4786_v41, %v2383_v33 }
 0x1e7   : > { %3245 = vst [vmem:[%s4816_s19 + $0x8] sm:$0xff] %v3173_v43   ;;  %v2494_v25 = vmul.f32 %v4786_v41, %v2375_v14  ;;  %v4828_v57 = vadd.f32 %v3668_v62, %v4700_v45  ;;  %v4831_v10 = vadd.f32 %v3671_v38, %v4706_v16 }
 0x1e8   : > { %3169 = vst [vmem:[%s4816_s19] sm:$0xff] %v3168_v48   ;;  %v2598_v1 = vmul.f32 0.1, %v2534_v2  ;;  %v2532_v44 = vadd.f32 %v4792_v56, %v2493_v63  ;;  %v2535_v52 = vadd.f32 %v4792_v56, %v2496_v35  ;;  %vm2566_vm4 = vcmp.gt.f32.partialorder %v2534_v2, 0.0 }
 0x1e9   : > { %v2533_v36 = vadd.f32 %v4792_v56, %v2494_v25  ;;  %v3672_v59 = vpop.f32.mrb[120].mxu1  ;;  %v3758_v61 = vpop.f32.mrb[120].mxu0 }
 0x1ea   : > { %vm2564_vm5 = vcmp.gt.f32.partialorder %v2532_v44, 0.0  ;;  %v2596_v23 = vmul.f32 0.1, %v2532_v44  ;;  %vm2567_vm6 = vcmp.gt.f32.partialorder %v2535_v52, 0.0  ;;  %v3673_v12 = vpop.f32.mrb[121].mxu1  ;;  %v2387_v45 = vpop.f32.mrb[121].mxu0  ;;  %v2396_v4 = vadd.f32 %v3758_v61, %v4751_v17 }
 0x1eb   : > { %v2599_v34 = vmul.f32 0.1, %v2535_v52  ;;  %vm2565_vm7 = vcmp.gt.f32.partialorder %v2533_v36, 0.0  ;;  %v2597_v16 = vmul.f32 0.1, %v2533_v36  ;;  %v3675_v6 = vpop.f32.mrb[122].mxu1  ;;  %v2630_v3 = vsel %vm2566_vm4, %v2534_v2, %v2598_v1 }
 0x1ec   : > { %v2628_v8 = vsel %vm2564_vm5, %v2532_v44, %v2596_v23  ;;  %v3674_v0 = vadd.f32 %v3673_v12, %v3672_v59  ;;  %v2388_v15 = vadd.f32 %v2387_v45, %v4739_v55  ;;  %v3759_v32 = vpop.f32.mrb[122].mxu0  ;;  %v3676_v54 = vpop.f32.mrb[123].mxu1  ;;  %v2499_v53 = vmul.f32 %v4786_v41, %v2396_v4 }
 0x1ed   : > { %v2631_v5 = vsel %vm2567_vm6, %v2535_v52, %v2599_v34  ;;  %v2629_v62 = vsel %vm2565_vm7, %v2533_v36, %v2597_v16  ;;  %v2399_v24 = vadd.f32 %v3759_v32, %v4757_v29  ;;  %v2390_v37 = vpop.f32.mrb[123].mxu0  ;;  %v3677_v33 = vadd.f32 %v3676_v54, %v3675_v6 }
 0x1ee   : > { %v3183_v20 = vpack.c.bf16 %v2631_v5, %v2630_v3  ;;  %v3178_v31 = vpack.c.bf16 %v2629_v62, %v2628_v8  ;;  %v2497_v17 = vmul.f32 %v4786_v41, %v2388_v15  ;;  %v2538_v18 = vadd.f32 %v4792_v56, %v2499_v53 }
 0x1ef   : > { %v2500_v55 = vmul.f32 %v4786_v41, %v2399_v24  ;;  %v2391_v60 = vadd.f32 %v2390_v37, %v4745_v22  ;;  %v4846_v43 = vadd.f32 %v3674_v0, %v4712_v9  ;;  %v4852_v29 = vadd.f32 %v3677_v33, %v4718_v11 }
 0x1f0   : > { %3247 = vst [vmem:[%s4816_s19 + $0x18] sm:$0xff] %v3183_v20   ;;  %3246 = vst [vmem:[%s4816_s19 + $0x10] sm:$0xff] %v3178_v31   ;;  %v2536_v47 = vadd.f32 %v4792_v56, %v2497_v17  ;;  %vm2570_vm8 = vcmp.gt.f32.partialorder %v2538_v18, 0.0  ;;  %v2602_v38 = vmul.f32 0.1, %v2538_v18 }
 0x1f1   : > { %v2539_v14 = vadd.f32 %v4792_v56, %v2500_v55  ;;  %v2498_v48 = vmul.f32 %v4786_v41, %v2391_v60  ;;  %v3678_v2 = vpop.f32.mrb[124].mxu1  ;;  %v3762_v63 = vpop.f32.mrb[124].mxu0 }
 0x1f2   : > { %vm2568_vm9 = vcmp.gt.f32.partialorder %v2536_v47, 0.0  ;;  %v2600_v22 = vmul.f32 0.1, %v2536_v47  ;;  %v2412_v9 = vadd.f32 %v3762_v63, %v4775_v58  ;;  %v3679_v35 = vpop.f32.mrb[125].mxu1  ;;  %v2403_v25 = vpop.f32.mrb[125].mxu0  ;;  %v2634_v1 = vsel %vm2570_vm8, %v2538_v18, %v2602_v38 }
 0x1f3   : > { %vm2571_vm10 = vcmp.gt.f32.partialorder %v2539_v14, 0.0  ;;  %v2603_v44 = vmul.f32 0.1, %v2539_v14  ;;  %v2537_v11 = vadd.f32 %v4792_v56, %v2498_v48  ;;  %v3681_v52 = vpop.f32.mrb[126].mxu1  ;;  %v3763_v36 = vpop.f32.mrb[126].mxu0  ;;  %v3680_v23 = vadd.f32 %v3679_v35, %v3678_v2 }
 0x1f4   : > { %v2632_v59 = vsel %vm2568_vm9, %v2536_v47, %v2600_v22  ;;  %v2503_v61 = vmul.f32 %v4786_v41, %v2412_v9  ;;  %v2404_v12 = vadd.f32 %v2403_v25, %v4763_v39  ;;  %v3682_v45 = vpop.f32.mrb[127].mxu1  ;;  %v2406_v34 = vpop.f32.mrb[127].mxu0  ;;  %v2415_v4 = vadd.f32 %v3763_v36, %v4781_v13 }
 0x1f5   : > { %v2635_v16 = vsel %vm2571_vm10, %v2539_v14, %v2603_v44  ;;  %vm2569_vm11 = vcmp.gt.f32.partialorder %v2537_v11, 0.0  ;;  %v2601_v58 = vmul.f32 0.1, %v2537_v11  ;;  %v3683_v0 = vadd.f32 %v3682_v45, %v3681_v52 }
 0x1f6   : > { %v3193_v6 = vpack.c.bf16 %v2635_v16, %v2634_v1  ;;  %v2542_v3 = vadd.f32 %v4792_v56, %v2503_v61  ;;  %v2501_v8 = vmul.f32 %v4786_v41, %v2404_v12  ;;  %v2504_v32 = vmul.f32 %v4786_v41, %v2415_v4 }
 0x1f7   : > { %v2633_v15 = vsel %vm2569_vm11, %v2537_v11, %v2601_v58  ;;  %v2407_v54 = vadd.f32 %v2406_v34, %v4769_v50  ;;  %v2283_v39 = vadd.f32 %v3680_v23, %v4724_v40  ;;  %v2286_v31 = vadd.f32 %v3683_v0, %v4730_v21 }
 0x1f8   : > { %3249 = vst [vmem:[%s4816_s19 + $0x28] sm:$0xff] %v3193_v6   ;;  %v3188_v5 = vpack.c.bf16 %v2633_v15, %v2632_v59  ;;  %vm2574_vm12 = vcmp.gt.f32.partialorder %v2542_v3, 0.0  ;;  %v2606_v62 = vmul.f32 0.1, %v2542_v3  ;;  %v2540_v13 = vadd.f32 %v4792_v56, %v2501_v8 }
 0x1f9   : > { %v2543_v53 = vadd.f32 %v4792_v56, %v2504_v32  ;;  %v2502_v24 = vmul.f32 %v4786_v41, %v2407_v54  ;;  %v3684_v37 = vpop.f32.mrb[128].mxu1  ;;  %v3766_v20 = vpop.f32.mrb[128].mxu0 }
 0x1fa   : > { %3248 = vst [vmem:[%s4816_s19 + $0x20] sm:$0xff] %v3188_v5   ;;  %v2638_v17 = vsel %vm2574_vm12, %v2542_v3, %v2606_v62  ;;  %vm2572_vm13 = vcmp.gt.f32.partialorder %v2540_v13, 0.0  ;;  %v2604_v50 = vmul.f32 0.1, %v2540_v13  ;;  %v2428_v40 = vadd.f32 %v3766_v20, %v4828_v57  ;;  %v3685_v33 = vpop.f32.mrb[129].mxu1  ;;  %v2419_v18 = vpop.f32.mrb[129].mxu0 }
 0x1fb   : > { %vm2575_vm14 = vcmp.gt.f32.partialorder %v2543_v53, 0.0  ;;  %v2607_v55 = vmul.f32 0.1, %v2543_v53  ;;  %v2541_v60 = vadd.f32 %v4792_v56, %v2502_v24  ;;  %v3686_v47 = vadd.f32 %v3685_v33, %v3684_v37  ;;  %v3687_v38 = vpop.f32.mrb[130].mxu1  ;;  %v3767_v14 = vpop.f32.mrb[130].mxu0 }
 0x1fc   : > { %v2636_v48 = vsel %vm2572_vm13, %v2540_v13, %v2604_v50  ;;  %v2507_v2 = vmul.f32 %v4786_v41, %v2428_v40  ;;  %v2420_v21 = vadd.f32 %v2419_v18, %v4800_v49  ;;  %v2431_v63 = vadd.f32 %v3767_v14, %v4831_v10  ;;  %v3688_v22 = vpop.f32.mrb[131].mxu1  ;;  %v2422_v9 = vpop.f32.mrb[131].mxu0 }
 0x1fd   : > { %v2639_v57 = vsel %vm2575_vm14, %v2543_v53, %v2607_v55  ;;  %vm2573_vm15 = vcmp.gt.f32.partialorder %v2541_v60, 0.0  ;;  %v2605_v35 = vmul.f32 0.1, %v2541_v60  ;;  %v3689_v25 = vadd.f32 %v3688_v22, %v3687_v38 }
 0x1fe   : > { %v3203_v1 = vpack.c.bf16 %v2639_v57, %v2638_v17  ;;  %v2546_v44 = vadd.f32 %v4792_v56, %v2507_v2  ;;  %v2505_v11 = vmul.f32 %v4786_v41, %v2420_v21  ;;  %v2508_v52 = vmul.f32 %v4786_v41, %v2431_v63 }
 0x1ff   : > { %v2637_v36 = vsel %vm2573_vm15, %v2541_v60, %v2605_v35  ;;  %v2423_v49 = vadd.f32 %v2422_v9, %v4807_v28  ;;  %v4882_v59 = vadd.f32 %v3686_v47, %v4736_v30  ;;  %v4885_v10 = vadd.f32 %v3689_v25, %v4742_v19 }
 0x200   : > { %3251 = vst [vmem:[%s4816_s19 + $0x38] sm:$0xff] %v3203_v1   ;;  %v3198_v61 = vpack.c.bf16 %v2637_v36, %v2636_v48  ;;  %vm2578_vm0 = vcmp.gt.f32.partialorder %v2546_v44, 0.0  ;;  %v2610_v23 = vmul.f32 0.1, %v2546_v44  ;;  %v2544_v12 = vadd.f32 %v4792_v56, %v2505_v11 }
 0x201   : > { %v2547_v45 = vadd.f32 %v4792_v56, %v2508_v52  ;;  %v2506_v34 = vmul.f32 %v4786_v41, %v2423_v49  ;;  %v3690_v16 = vpop.f32.mrb[132].mxu1  ;;  %v3770_v58 = vpop.f32.mrb[132].mxu0 }
 0x202   : > { %3250 = vst [vmem:[%s4816_s19 + $0x30] sm:$0xff] %v3198_v61   ;;  %v2642_v28 = vsel %vm2578_vm0, %v2546_v44, %v2610_v23  ;;  %vm2576_vm1 = vcmp.gt.f32.partialorder %v2544_v12, 0.0  ;;  %v2608_v30 = vmul.f32 0.1, %v2544_v12  ;;  %v2444_v4 = vadd.f32 %v3770_v58, %v2283_v39  ;;  %v3691_v6 = vpop.f32.mrb[133].mxu1  ;;  %v2435_v19 = vpop.f32.mrb[133].mxu0 }
 0x203   : > { %vm2579_vm2 = vcmp.gt.f32.partialorder %v2547_v45, 0.0  ;;  %v2611_v3 = vmul.f32 0.1, %v2547_v45  ;;  %v2545_v8 = vadd.f32 %v4792_v56, %v2506_v34  ;;  %v3692_v0 = vadd.f32 %v3691_v6, %v3690_v16  ;;  %v3693_v15 = vpop.f32.mrb[134].mxu1  ;;  %v3771_v32 = vpop.f32.mrb[134].mxu0 }
 0x204   : > { %v2640_v54 = vsel %vm2576_vm1, %v2544_v12, %v2608_v30  ;;  %v2511_v5 = vmul.f32 %v4786_v41, %v2444_v4  ;;  %v2436_v62 = vadd.f32 %v2435_v19, %v4846_v43  ;;  %v2447_v13 = vadd.f32 %v3771_v32, %v2286_v31  ;;  %v3694_v53 = vpop.f32.mrb[135].mxu1  ;;  %v2438_v24 = vpop.f32.mrb[135].mxu0 }
 0x205   : > { %v2643_v37 = vsel %vm2579_vm2, %v2547_v45, %v2611_v3  ;;  %vm2577_vm3 = vcmp.gt.f32.partialorder %v2545_v8, 0.0  ;;  %v2609_v39 = vmul.f32 0.1, %v2545_v8  ;;  %v3695_v20 = vadd.f32 %v3694_v53, %v3693_v15 }
 0x206   : > { %v3213_v17 = vpack.c.bf16 %v2643_v37, %v2642_v28  ;;  %v2550_v50 = vadd.f32 %v4792_v56, %v2511_v5  ;;  %v2509_v40 = vmul.f32 %v4786_v41, %v2436_v62  ;;  %v2512_v33 = vmul.f32 %v4786_v41, %v2447_v13 }
 0x207   : > { %v2641_v18 = vsel %vm2577_vm3, %v2545_v8, %v2609_v39  ;;  %v2439_v55 = vadd.f32 %v2438_v24, %v4852_v29  ;;  %v2299_v43 = vadd.f32 %v3692_v0, %v4748_v27  ;;  %v2302_v31 = vadd.f32 %v3695_v20, %v4754_v42 }
 0x208   : > { %3253 = vst [vmem:[%s4816_s19 + $0x48] sm:$0xff] %v3213_v17   ;;  %v3208_v60 = vpack.c.bf16 %v2641_v18, %v2640_v54  ;;  %vm2582_vm4 = vcmp.gt.f32.partialorder %v2550_v50, 0.0  ;;  %v2614_v47 = vmul.f32 0.1, %v2550_v50  ;;  %v2548_v38 = vadd.f32 %v4792_v56, %v2509_v40 }
 0x209   : > { %v2551_v14 = vadd.f32 %v4792_v56, %v2512_v33  ;;  %v2510_v48 = vmul.f32 %v4786_v41, %v2439_v55  ;;  %v3696_v2 = vpop.f32.mrb[136].mxu1  ;;  %v3774_v21 = vpop.f32.mrb[136].mxu0 }
 0x20a   : > { %3252 = vst [vmem:[%s4816_s19 + $0x40] sm:$0xff] %v3208_v60   ;;  %v2646_v63 = vsel %vm2582_vm4, %v2550_v50, %v2614_v47  ;;  %vm2580_vm5 = vcmp.gt.f32.partialorder %v2548_v38, 0.0  ;;  %v2612_v29 = vmul.f32 0.1, %v2548_v38  ;;  %v2460_v22 = vadd.f32 %v3774_v21, %v2299_v43  ;;  %v3697_v27 = vpop.f32.mrb[137].mxu1  ;;  %v2451_v9 = vpop.f32.mrb[137].mxu0 }
 0x20b   : > { %vm2583_vm6 = vcmp.gt.f32.partialorder %v2551_v14, 0.0  ;;  %v2615_v42 = vmul.f32 0.1, %v2551_v14  ;;  %v2549_v57 = vadd.f32 %v4792_v56, %v2510_v48  ;;  %v3698_v35 = vadd.f32 %v3697_v27, %v3696_v2  ;;  %v3699_v25 = vpop.f32.mrb[138].mxu1  ;;  %v3775_v1 = vpop.f32.mrb[138].mxu0 }
 0x20c   : > { %v2644_v44 = vsel %vm2580_vm5, %v2548_v38, %v2612_v29  ;;  %v2515_v11 = vmul.f32 %v4786_v41, %v2460_v22  ;;  %v2452_v52 = vadd.f32 %v2451_v9, %v4882_v59  ;;  %v2463_v36 = vadd.f32 %v3775_v1, %v2302_v31  ;;  %v3700_v49 = vpop.f32.mrb[139].mxu1  ;;  %v2454_v61 = vpop.f32.mrb[139].mxu0 }
 0x20d   : > { %v2647_v23 = vsel %vm2583_vm6, %v2551_v14, %v2615_v42  ;;  %vm2581_vm7 = vcmp.gt.f32.partialorder %v2549_v57, 0.0  ;;  %v2613_v12 = vmul.f32 0.1, %v2549_v57  ;;  %v3701_v45 = vadd.f32 %v3700_v49, %v3699_v25 }
 0x20e   : > { %v3223_v34 = vpack.c.bf16 %v2647_v23, %v2646_v63  ;;  %v2554_v16 = vadd.f32 %v4792_v56, %v2515_v11  ;;  %v2513_v58 = vmul.f32 %v4786_v41, %v2452_v52  ;;  %v2516_v28 = vmul.f32 %v4786_v41, %v2463_v36 }
 0x20f   : > { %v2645_v30 = vsel %vm2581_vm7, %v2549_v57, %v2613_v12  ;;  %v2455_v4 = vadd.f32 %v2454_v61, %v4885_v10  ;;  %v2307_v59 = vadd.f32 %v3698_v35, %v4760_v51  ;;  %v2310_v6 = vadd.f32 %v3701_v45, %v4766_v7 }
 0x210   : > { %3255 = vst [vmem:[%s4816_s19 + $0x58] sm:$0xff] %v3223_v34   ;;  %v3218_v19 = vpack.c.bf16 %v2645_v30, %v2644_v44  ;;  %v2618_v3 = vmul.f32 0.1, %v2554_v16  ;;  %v2552_v8 = vadd.f32 %v4792_v56, %v2513_v58  ;;  %vm2586_vm8 = vcmp.gt.f32.partialorder %v2554_v16, 0.0 }
 0x211   : > { %v2555_v0 = vadd.f32 %v4792_v56, %v2516_v28  ;;  %v2514_v15 = vmul.f32 %v4786_v41, %v2455_v4  ;;  %v3702_v32 = vpop.f32.mrb[140].mxu1  ;;  %v3778_v54 = vpop.f32.mrb[140].mxu0 }
 0x212   : > { %3254 = vst [vmem:[%s4816_s19 + $0x50] sm:$0xff] %v3218_v19   ;;  %v2616_v5 = vmul.f32 0.1, %v2552_v8  ;;  %v3703_v62 = vpop.f32.mrb[141].mxu1  ;;  %v2467_v10 = vpop.f32.mrb[141].mxu0  ;;  %v2650_v37 = vsel %vm2586_vm8, %v2554_v16, %v2618_v3  ;;  %vm2584_vm10 = vcmp.gt.f32.partialorder %v2552_v8, 0.0 }
 0x213   : > { %vm2587_vm9 = vcmp.gt.f32.partialorder %v2555_v0, 0.0  ;;  %v2619_v51 = vmul.f32 0.1, %v2555_v0  ;;  %v2553_v7 = vadd.f32 %v4792_v56, %v2514_v15  ;;  %v3704_v13 = vadd.f32 %v3703_v62, %v3702_v32  ;;  %v3705_v53 = vpop.f32.mrb[142].mxu1  ;;  %v3779_v24 = vpop.f32.mrb[142].mxu0 }
 0x214   : > { %v2468_v39 = vadd.f32 %v2467_v10, %v2307_v59  ;;  %v3706_v20 = vpop.f32.mrb[143].mxu1  ;;  %v2470_v17 = vpop.f32.mrb[143].mxu0  ;;  %v2648_v60 = vsel %vm2584_vm10, %v2552_v8, %v2616_v5 }
 0x215   : > { %v2651_v50 = vsel %vm2587_vm9, %v2555_v0, %v2619_v51  ;;  %vm2585_vm11 = vcmp.gt.f32.partialorder %v2553_v7, 0.0  ;;  %v2617_v40 = vmul.f32 0.1, %v2553_v7  ;;  %v2315_v33 = vadd.f32 %v3704_v13, %v4772_v46 }
 0x216   : > { %v3233_v18 = vpack.c.bf16 %v2651_v50, %v2650_v37  ;;  %v2517_v55 = vmul.f32 %v4786_v41, %v2468_v39  ;;  %v3707_v43 = vadd.f32 %v3706_v20, %v3705_v53  ;;  %v2471_v31 = vadd.f32 %v2470_v17, %v2310_v6 }
 0x217   : > { %v2649_v47 = vsel %vm2585_vm11, %v2553_v7, %v2617_v40  ;;  %v2476_v38 = vadd.f32 %v3778_v54, %v2315_v33 }
 0x218   : > { %3257 = vst [vmem:[%s4816_s19 + $0x68] sm:$0xff] %v3233_v18   ;;  %v3228_v14 = vpack.c.bf16 %v2649_v47, %v2648_v60  ;;  %v2556_v48 = vadd.f32 %v4792_v56, %v2517_v55  ;;  %v2318_v2 = vadd.f32 %v3707_v43, %v4778_v26  ;;  %v2518_v21 = vmul.f32 %v4786_v41, %v2471_v31 }
 0x219   : > { %v2519_v63 = vmul.f32 %v4786_v41, %v2476_v38 }
 0x21a   : > { %3256 = vst [vmem:[%s4816_s19 + $0x60] sm:$0xff] %v3228_v14   ;;  %v2620_v46 = vmul.f32 0.1, %v2556_v48  ;;  %v2479_v29 = vadd.f32 %v3779_v24, %v2318_v2  ;;  %v2557_v22 = vadd.f32 %v4792_v56, %v2518_v21  ;;  %vm2588_vm12 = vcmp.gt.f32.partialorder %v2556_v48, 0.0 }
 0x21b   : > { %v2558_v27 = vadd.f32 %v4792_v56, %v2519_v63 }
 0x21c   : > { %v2520_v9 = vmul.f32 %v4786_v41, %v2479_v29  ;;  %vm2589_vm13 = vcmp.gt.f32.partialorder %v2557_v22, 0.0  ;;  %v2621_v42 = vmul.f32 0.1, %v2557_v22  ;;  %v2652_v26 = vsel %vm2588_vm12, %v2556_v48, %v2620_v46 }
 0x21d   : > { %v2622_v57 = vmul.f32 0.1, %v2558_v27  ;;  %vm2590_vm14 = vcmp.gt.f32.partialorder %v2558_v27, 0.0 }
 0x21e   : > { %v2559_v35 = vadd.f32 %v4792_v56, %v2520_v9  ;;  %v2653_v25 = vsel %vm2589_vm13, %v2557_v22, %v2621_v42 }
 0x21f   : > { %v3238_v1 = vpack.c.bf16 %v2653_v25, %v2652_v26  ;;  %v2654_v11 = vsel %vm2590_vm14, %v2558_v27, %v2622_v57 }
 0x220   : > { %vm2591_vm15 = vcmp.gt.f32.partialorder %v2559_v35, 0.0  ;;  %v2623_v44 = vmul.f32 0.1, %v2559_v35 }
 0x221   : > { %3258 = vst [vmem:[%s4816_s19 + $0x70] sm:$0xff] %v3238_v1  }
 0x222   : > { %v2655_v52 = vsel %vm2591_vm15, %v2559_v35, %v2623_v44 }
 0x223   : > { %v3243_v36 = vpack.c.bf16 %v2655_v52, %v2654_v11 }
 0x225   : > { %3259 = vst [vmem:[%s4816_s19 + $0x78] sm:$0xff] %v3243_v36  }
 0x226 PF: > { %s14_s15 = sadd.s32 1, %s4091_s15  }
 0x227   : > { %p11_p4 = scmp.ge.s32.totalorder %s14_s15, 4  }
 0x229   :  { %13 = sbr.rel (!%p11_p4) target bundleno = 1 (0x1), region = 66 }

// kernel: yolov3_forward.10
= control target key start
LH: loop header
LB: loop body
LE: loop exit
PB: predicated region body
PF: predicated region fallthrough
CT: control target
= control target key end

     0   :  { %s903_s1 = inlined_call_operand.vmem [shape: bf16[128,128], index: 1, kind: input, shape index: {}]   ;;  %s904_s0 = inlined_call_operand.vmem [shape: bf16[128,128], index: 0, kind: input, shape index: {}, may-alias: {0,4}]   ;;  %s905_s4 = inlined_call_operand.vmem [shape: bf16[128,128], index: 4, kind: input, shape index: {}, may-alias: {0,4}]   ;;  %s906_s2 = inlined_call_operand.vmem [shape: f32[1,128], index: 2, kind: input, shape index: {}]   ;;  %s907_s3 = inlined_call_operand.vmem [shape: f32[1,128], index: 3, kind: input, shape index: {}]   ;;  %s908_s5 = inlined_call_operand.vmem [shape: bf16[128,128], index: 5, kind: output, shape index: {}]  }
   0x1   :  { %v672_v0 = vld [vmem:[%s903_s1] sm:$0xff]   ;;  %v673_v1 = vld [vmem:[%s903_s1 + $0x8] sm:$0xff]   ;;  %v674_v2 = vld [vmem:[%s903_s1 + $0x10] sm:$0xff]  }
   0x2   :  { %624 = vmatprep.subr.bf16.mxu0 %v672_v0  ;;  %656 = vmatprep.subr.bf16.mxu1 %v672_v0  ;;  %v675_v3 = vld [vmem:[%s903_s1 + $0x18] sm:$0xff]   ;;  %v680_v4 = vld [vmem:[%s904_s0] sm:$0xff]   ;;  %v677_v7 = vld [vmem:[%s903_s1 + $0x28] sm:$0xff]  }
   0x3   :  { %625 = vmatpush3.bf16.msra.mxu0 %v672_v0  ;;  %664 = vmatpush3.bf16.msra.mxu1 %v672_v0  ;;  %v681_v5 = vld [vmem:[%s904_s0 + $0x20] sm:$0xff]   ;;  %v678_v8 = vld [vmem:[%s903_s1 + $0x30] sm:$0xff]   ;;  %v679_v9 = vld [vmem:[%s903_s1 + $0x38] sm:$0xff]  }
   0x4   :  { %626 = vmatprep.subr.bf16.mxu0 %v673_v1  ;;  %657 = vmatprep.subr.bf16.mxu1 %v673_v1  ;;  %v676_v6 = vld [vmem:[%s903_s1 + $0x20] sm:$0xff]   ;;  %v682_v10 = vld [vmem:[%s904_s0 + $0x8] sm:$0xff]   ;;  %v684_v12 = vld [vmem:[%s904_s0 + $0x10] sm:$0xff]  }
   0x5   :  { %640 = vmatprep.mubr.bf16.mxu0 %v680_v4  ;;  %648 = vmatprep.mubr.bf16.mxu1 %v681_v5  ;;  %v683_v11 = vld [vmem:[%s904_s0 + $0x28] sm:$0xff]   ;;  %v685_v13 = vld [vmem:[%s904_s0 + $0x30] sm:$0xff]   ;;  %v686_v14 = vld [vmem:[%s904_s0 + $0x18] sm:$0xff]  }
   0x6   :  { %v687_v15 = vld [vmem:[%s904_s0 + $0x38] sm:$0xff]   ;;  %v769_v16 = vld [vmem:[%s905_s4 + $0x8] sm:$0xff]   ;;  %v779_v18 = vld [vmem:[%s905_s4] sm:$0xff]  }
   0x7   :  { %627 = vmatpush3.bf16.msra.mxu0 %v673_v1  ;;  %665 = vmatpush3.bf16.msra.mxu1 %v673_v1  ;;  %v774_v17 = vld [vmem:[%s905_s4 + $0x28] sm:$0xff]   ;;  %v784_v19 = vld [vmem:[%s905_s4 + $0x20] sm:$0xff]   ;;  %v528_v21 = vunpack.c.l.bf16 %v769_v16  ;;  %v795_v22 = vld [vmem:[%s905_s4 + $0x18] sm:$0xff]   ;;  %v524_v27 = vunpack.c.l.bf16 %v779_v18  ;;  %v529_v29 = vunpack.c.h.bf16 %v769_v16  ;;  %v525_v35 = vunpack.c.h.bf16 %v779_v18 }
   0x8   :  { %628 = vmatprep.subr.bf16.mxu0 %v674_v2  ;;  %658 = vmatprep.subr.bf16.mxu1 %v674_v2  ;;  %v789_v20 = vld [vmem:[%s906_s2] ss:$0 sm:$0xff]  ;;  %v544_v26 = vunpack.c.l.bf16 %v774_v17  ;;  %v540_v28 = vunpack.c.l.bf16 %v784_v19  ;;  %v545_v34 = vunpack.c.h.bf16 %v774_v17  ;;  %v541_v40 = vunpack.c.h.bf16 %v784_v19  ;;  %v825_v52 = vld [vmem:[%s905_s4 + $0x38] sm:$0xff]   ;;  %v830_v53 = vld [vmem:[%s905_s4 + $0x10] sm:$0xff]  }
   0x9   :  { %v800_v24 = vld [vmem:[%s907_s3] ss:$0 sm:$0xff]  ;;  %v536_v41 = vunpack.c.l.bf16 %v795_v22  ;;  %v533_v19 = vunpack.c.h.bf16 %v830_v53 }
   0xb   :  { %629 = vmatpush3.bf16.msra.mxu0 %v674_v2  ;;  %666 = vmatpush3.bf16.msra.mxu1 %v674_v2  ;;  %v552_v2 = vunpack.c.l.bf16 %v825_v52 }
   0xc   :  { %630 = vmatprep.subr.bf16.mxu0 %v675_v3  ;;  %659 = vmatprep.subr.bf16.mxu1 %v675_v3 }
   0xf   :  { %631 = vmatpush3.bf16.msra.mxu0 %v675_v3  ;;  %667 = vmatpush3.bf16.msra.mxu1 %v675_v3  ;;  %v532_v3 = vunpack.c.l.bf16 %v830_v53 }
  0x10   :  { %632 = vmatprep.subr.bf16.mxu0 %v676_v6  ;;  %660 = vmatprep.subr.bf16.mxu1 %v676_v6 }
  0x13   :  { %633 = vmatpush3.bf16.msra.mxu0 %v676_v6  ;;  %668 = vmatpush3.bf16.msra.mxu1 %v676_v6 }
  0x14   :  { %634 = vmatprep.subr.bf16.mxu0 %v677_v7  ;;  %661 = vmatprep.subr.bf16.mxu1 %v677_v7 }
  0x17   :  { %635 = vmatpush3.bf16.msra.mxu0 %v677_v7  ;;  %669 = vmatpush3.bf16.msra.mxu1 %v677_v7 }
  0x18   :  { %636 = vmatprep.subr.bf16.mxu0 %v678_v8  ;;  %662 = vmatprep.subr.bf16.mxu1 %v678_v8 }
  0x1b   :  { %637 = vmatpush3.bf16.msra.mxu0 %v678_v8  ;;  %670 = vmatpush3.bf16.msra.mxu1 %v678_v8 }
  0x1c   :  { %638 = vmatprep.subr.bf16.mxu0 %v679_v9  ;;  %663 = vmatprep.subr.bf16.mxu1 %v679_v9 }
  0x1f   :  { %639 = vmatpush3.bf16.msra.mxu0 %v679_v9  ;;  %671 = vmatpush3.bf16.msra.mxu1 %v679_v9 }
  0x22   :  { %641 = vmatmul.mubr.bf16.vlgmr.msra.gmra.mrb[0].mxu0 %v682_v10  ;;  %649 = vmatmul.mubr.bf16.vlgmr.msra.gmra.mrb[0].mxu1 %v683_v11 }
  0x23   :  { %644 = vmatprep.mubr.bf16.mxu0 %v684_v12  ;;  %652 = vmatprep.mubr.bf16.mxu1 %v685_v13 }
  0x2a   :  { %645 = vmatmul.mubr.bf16.gmra.mrb[4].mxu0 %v686_v14  ;;  %653 = vmatmul.mubr.bf16.gmra.mrb[4].mxu1 %v687_v15 }
  0xf5   :  { %v642_v23 = vpop.f32.mrb[0].mxu0  ;;  %v650_v25 = vpop.f32.mrb[0].mxu1 }
  0xf6   :  { %v255_v30 = vmul.f32 %v642_v23, %v789_v20  ;;  %v263_v31 = vmul.f32 %v650_v25, %v789_v20  ;;  %v183_v32 = vpop.f32.mrb[1].mxu0  ;;  %v215_v33 = vpop.f32.mrb[1].mxu1 }
  0xf7   :  { %v253_v36 = vmul.f32 %v789_v20, %v183_v32  ;;  %v261_v37 = vmul.f32 %v789_v20, %v215_v33  ;;  %v643_v38 = vpop.f32.mrb[2].mxu0  ;;  %v651_v39 = vpop.f32.mrb[2].mxu1 }
  0xf8   :  { %v278_v42 = vadd.f32 %v800_v24, %v255_v30  ;;  %v286_v43 = vadd.f32 %v800_v24, %v263_v31  ;;  %v256_v44 = vmul.f32 %v643_v38, %v789_v20  ;;  %v264_v45 = vmul.f32 %v651_v39, %v789_v20  ;;  %v186_v46 = vpop.f32.mrb[3].mxu0  ;;  %v218_v47 = vpop.f32.mrb[3].mxu1 }
  0xf9   :  { %v276_v48 = vadd.f32 %v800_v24, %v253_v36  ;;  %v284_v49 = vadd.f32 %v800_v24, %v261_v37  ;;  %v254_v50 = vmul.f32 %v789_v20, %v186_v46  ;;  %v262_v51 = vmul.f32 %v789_v20, %v218_v47  ;;  %v845_v36 = vld [vmem:[%s905_s4 + $0x30] sm:$0xff]  }
  0xfa   :  { %vm294_vm0 = vcmp.gt.f32.partialorder %v278_v42, 0.0  ;;  %v310_v54 = vmul.f32 0.1, %v278_v42  ;;  %vm302_vm1 = vcmp.gt.f32.partialorder %v286_v43, 0.0  ;;  %v318_v55 = vmul.f32 0.1, %v286_v43 }
  0xfb   :  { %vm292_vm2 = vcmp.gt.f32.partialorder %v276_v48, 0.0  ;;  %v308_v56 = vmul.f32 0.1, %v276_v48  ;;  %vm300_vm3 = vcmp.gt.f32.partialorder %v284_v49, 0.0  ;;  %v316_v57 = vmul.f32 0.1, %v284_v49 }
  0xfc   :  { %v326_v58 = vsel %vm294_vm0, %v278_v42, %v310_v54  ;;  %v334_v59 = vsel %vm302_vm1, %v286_v43, %v318_v55  ;;  %v279_v60 = vadd.f32 %v800_v24, %v256_v44  ;;  %v287_v61 = vadd.f32 %v800_v24, %v264_v45 }
  0xfd   :  { %v374_v62 = vadd.f32 %v528_v21, %v326_v58  ;;  %v382_v63 = vadd.f32 %v544_v26, %v334_v59  ;;  %v646_v0 = vpop.f32.mrb[4].mxu0  ;;  %v654_v1 = vpop.f32.mrb[4].mxu1  ;;  %v324_v4 = vsel %vm292_vm2, %v276_v48, %v308_v56  ;;  %v332_v5 = vsel %vm300_vm3, %v284_v49, %v316_v57 }
  0xfe   :  { %vm295_vm4 = vcmp.gt.f32.partialorder %v279_v60, 0.0  ;;  %v311_v6 = vmul.f32 0.1, %v279_v60  ;;  %v199_v7 = vpop.f32.mrb[5].mxu0  ;;  %v231_v8 = vpop.f32.mrb[5].mxu1  ;;  %vm303_vm5 = vcmp.gt.f32.partialorder %v287_v61, 0.0  ;;  %v277_v10 = vadd.f32 %v800_v24, %v254_v50 }
  0xff   :  { %v319_v9 = vmul.f32 0.1, %v287_v61  ;;  %v285_v11 = vadd.f32 %v800_v24, %v262_v51  ;;  %v647_v12 = vpop.f32.mrb[6].mxu0  ;;  %v655_v13 = vpop.f32.mrb[6].mxu1  ;;  %v259_v15 = vmul.f32 %v646_v0, %v789_v20  ;;  %v267_v16 = vmul.f32 %v654_v1, %v789_v20 }
 0x100   :  { %v327_v14 = vsel %vm295_vm4, %v279_v60, %v311_v6  ;;  %v257_v17 = vmul.f32 %v789_v20, %v199_v7  ;;  %v202_v21 = vpop.f32.mrb[7].mxu0  ;;  %v234_v23 = vpop.f32.mrb[7].mxu1  ;;  %vm293_vm6 = vcmp.gt.f32.partialorder %v277_v10, 0.0  ;;  %v309_v30 = vmul.f32 0.1, %v277_v10 }
 0x101   :  { %v375_v25 = vadd.f32 %v529_v29, %v327_v14  ;;  %v335_v26 = vsel %vm303_vm5, %v287_v61, %v319_v9  ;;  %vm301_vm7 = vcmp.gt.f32.partialorder %v285_v11, 0.0  ;;  %v317_v32 = vmul.f32 0.1, %v285_v11 }
 0x102   :  { %v383_v31 = vadd.f32 %v545_v34, %v335_v26  ;;  %v282_v33 = vadd.f32 %v800_v24, %v259_v15  ;;  %v372_v37 = vadd.f32 %v524_v27, %v324_v4  ;;  %v325_v39 = vsel %vm293_vm6, %v277_v10, %v309_v30 }
 0x103   :  { %v562_v38 = vpack.c.bf16 %v375_v25, %v374_v62  ;;  %v290_v29 = vadd.f32 %v800_v24, %v267_v16  ;;  %v373_v34 = vadd.f32 %v525_v35, %v325_v39  ;;  %v333_v43 = vsel %vm301_vm7, %v285_v11, %v317_v32 }
 0x104   :  { %v582_v42 = vpack.c.bf16 %v383_v31, %v382_v63  ;;  %v280_v44 = vadd.f32 %v800_v24, %v257_v17  ;;  %v380_v45 = vadd.f32 %v540_v28, %v332_v5  ;;  %v381_v27 = vadd.f32 %v541_v40, %v333_v43 }
 0x105   :  { %601 = vst [vmem:[%s908_s5 + $0x8] sm:$0xff] %v562_v38   ;;  %v314_v46 = vmul.f32 0.1, %v282_v33  ;;  %v548_v47 = vunpack.c.l.bf16 %v845_v36  ;;  %v557_v18 = vpack.c.bf16 %v373_v34, %v372_v37  ;;  %vm298_vm8 = vcmp.gt.f32.partialorder %v282_v33, 0.0 }
 0x106   :  { %605 = vst [vmem:[%s908_s5 + $0x28] sm:$0xff] %v582_v42   ;;  %v265_v35 = vmul.f32 %v789_v20, %v231_v8  ;;  %v537_v28 = vunpack.c.h.bf16 %v795_v22  ;;  %v577_v48 = vpack.c.bf16 %v381_v27, %v380_v45  ;;  %v260_v49 = vmul.f32 %v647_v12, %v789_v20 }
 0x107   :  { %v553_v50 = vunpack.c.h.bf16 %v825_v52  ;;  %558 = vst [vmem:[%s908_s5] sm:$0xff] %v557_v18   ;;  %vm306_vm9 = vcmp.gt.f32.partialorder %v290_v29, 0.0  ;;  %v322_v40 = vmul.f32 0.1, %v290_v29  ;;  %v312_v51 = vmul.f32 0.1, %v280_v44 }
 0x108   :  { %v288_v54 = vadd.f32 %v800_v24, %v265_v35  ;;  %604 = vst [vmem:[%s908_s5 + $0x20] sm:$0xff] %v577_v48   ;;  %v330_v55 = vsel %vm298_vm8, %v282_v33, %v314_v46  ;;  %v283_v56 = vadd.f32 %v800_v24, %v260_v49  ;;  %v268_v57 = vmul.f32 %v655_v13, %v789_v20 }
 0x109   :  { %v258_v58 = vmul.f32 %v789_v20, %v202_v21  ;;  %vm296_vm10 = vcmp.gt.f32.partialorder %v280_v44, 0.0  ;;  %v266_v60 = vmul.f32 %v789_v20, %v234_v23  ;;  %v549_v61 = vunpack.c.h.bf16 %v845_v36 }
 0x10a   :  { %v320_v59 = vmul.f32 0.1, %v288_v54  ;;  %vm299_vm11 = vcmp.gt.f32.partialorder %v283_v56, 0.0  ;;  %v315_v62 = vmul.f32 0.1, %v283_v56  ;;  %v291_v63 = vadd.f32 %v800_v24, %v268_v57 }
 0x10b   :  { %v281_v0 = vadd.f32 %v800_v24, %v258_v58  ;;  %v378_v1 = vadd.f32 %v536_v41, %v330_v55  ;;  %v338_v4 = vsel %vm306_vm9, %v290_v29, %v322_v40  ;;  %vm304_vm12 = vcmp.gt.f32.partialorder %v288_v54, 0.0 }
 0x10c   :  { %v289_v5 = vadd.f32 %v800_v24, %v266_v60  ;;  %v328_v6 = vsel %vm296_vm10, %v280_v44, %v312_v51  ;;  %v331_v7 = vsel %vm299_vm11, %v283_v56, %v315_v62  ;;  %vm307_vm13 = vcmp.gt.f32.partialorder %v291_v63, 0.0 }
 0x10d   :  { %v323_v20 = vmul.f32 0.1, %v291_v63  ;;  %v379_v8 = vadd.f32 %v537_v28, %v331_v7  ;;  %vm297_vm14 = vcmp.gt.f32.partialorder %v281_v0, 0.0  ;;  %v313_v9 = vmul.f32 0.1, %v281_v0 }
 0x10e   :  { %vm305_vm15 = vcmp.gt.f32.partialorder %v289_v5, 0.0  ;;  %v336_v10 = vsel %vm304_vm12, %v288_v54, %v320_v59  ;;  %v321_v12 = vmul.f32 0.1, %v289_v5  ;;  %v386_v22 = vadd.f32 %v552_v2, %v338_v4 }
 0x10f   :  { %v339_v11 = vsel %vm307_vm13, %v291_v63, %v323_v20  ;;  %v572_v41 = vpack.c.bf16 %v379_v8, %v378_v1  ;;  %v329_v14 = vsel %vm297_vm14, %v281_v0, %v313_v9  ;;  %v376_v24 = vadd.f32 %v532_v3, %v328_v6 }
 0x110   :  { %v387_v13 = vadd.f32 %v553_v50, %v339_v11  ;;  %v377_v15 = vadd.f32 %v533_v19, %v329_v14  ;;  %v337_v16 = vsel %vm305_vm15, %v289_v5, %v321_v12  ;;  %v384_v17 = vadd.f32 %v548_v47, %v336_v10 }
 0x111   :  { %603 = vst [vmem:[%s908_s5 + $0x18] sm:$0xff] %v572_v41   ;;  %v385_v23 = vadd.f32 %v549_v61, %v337_v16 }
 0x112   :  { %v592_v21 = vpack.c.bf16 %v387_v13, %v386_v22  ;;  %v567_v25 = vpack.c.bf16 %v377_v15, %v376_v24 }
 0x113   :  { %v587_v52 = vpack.c.bf16 %v385_v23, %v384_v17 }
 0x114   :  { %607 = vst [vmem:[%s908_s5 + $0x38] sm:$0xff] %v592_v21   ;;  %602 = vst [vmem:[%s908_s5 + $0x10] sm:$0xff] %v567_v25  }
 0x115   :  { %606 = vst [vmem:[%s908_s5 + $0x30] sm:$0xff] %v587_v52  }

// kernel: yolov3_forward.9
= control target key start
LH: loop header
LB: loop body
LE: loop exit
PB: predicated region body
PF: predicated region fallthrough
CT: control target
= control target key end

     0   :  { %s3038_s1 = inlined_call_operand.vmem [shape: bf16[1152,128], index: 1, kind: input, shape index: {}]   ;;  %s3039_s0 = inlined_call_operand.vmem [shape: bf16[128,1152], index: 0, kind: input, shape index: {}]   ;;  %s3040_s2 = inlined_call_operand.vmem [shape: f32[1,128], index: 2, kind: input, shape index: {}]   ;;  %s3041_s3 = inlined_call_operand.vmem [shape: f32[1,128], index: 3, kind: input, shape index: {}]   ;;  %s3042_s4 = inlined_call_operand.vmem [shape: bf16[128,128], index: 4, kind: output, shape index: {}]  }
   0x1   :  { %v2250_v0 = vld [vmem:[%s3038_s1 + $0x40] sm:$0xff]   ;;  %v2254_v4 = vld [vmem:[%s3038_s1 + $0x48] sm:$0xff]   ;;  %v2258_v8 = vld [vmem:[%s3038_s1 + $0x50] sm:$0xff]  }
   0x2   :  { %v2251_v1 = vld [vmem:[%s3038_s1 + $0xc0] sm:$0xff]   ;;  %1930 = vmatprep.subr.bf16.mxu0 %v2250_v0  ;;  %v2255_v5 = vld [vmem:[%s3038_s1 + $0xc8] sm:$0xff]   ;;  %v2259_v9 = vld [vmem:[%s3038_s1 + $0xd0] sm:$0xff]  }
   0x3   :  { %v2252_v2 = vld [vmem:[%s3038_s1] sm:$0xff]   ;;  %1994 = vmatprep.subr.bf16.mxu1 %v2251_v1  ;;  %v2256_v6 = vld [vmem:[%s3038_s1 + $0x8] sm:$0xff]   ;;  %v2260_v10 = vld [vmem:[%s3038_s1 + $0x10] sm:$0xff]  }
   0x4   :  { %v2253_v3 = vld [vmem:[%s3038_s1 + $0x80] sm:$0xff]   ;;  %1931 = vmatpush3.bf16.msra.mxu0 %v2252_v2  ;;  %v2257_v7 = vld [vmem:[%s3038_s1 + $0x88] sm:$0xff]   ;;  %v2261_v11 = vld [vmem:[%s3038_s1 + $0x90] sm:$0xff]  }
   0x5   :  { %1995 = vmatpush3.bf16.msra.mxu1 %v2253_v3  ;;  %1932 = vmatprep.subr.bf16.mxu0 %v2254_v4  ;;  %v2262_v12 = vld [vmem:[%s3038_s1 + $0x58] sm:$0xff]   ;;  %v2266_v16 = vld [vmem:[%s3038_s1 + $0x60] sm:$0xff]   ;;  %v2270_v20 = vld [vmem:[%s3038_s1 + $0x68] sm:$0xff]  }
   0x6   :  { %1996 = vmatprep.subr.bf16.mxu1 %v2255_v5  ;;  %v2263_v13 = vld [vmem:[%s3038_s1 + $0xd8] sm:$0xff]   ;;  %v2267_v17 = vld [vmem:[%s3038_s1 + $0xe0] sm:$0xff]   ;;  %v2271_v21 = vld [vmem:[%s3038_s1 + $0xe8] sm:$0xff]  }
   0x7   :  { %v2264_v14 = vld [vmem:[%s3038_s1 + $0x18] sm:$0xff]   ;;  %v2268_v18 = vld [vmem:[%s3038_s1 + $0x20] sm:$0xff]   ;;  %v2272_v22 = vld [vmem:[%s3038_s1 + $0x28] sm:$0xff]  }
   0x8   :  { %1933 = vmatpush3.bf16.msra.mxu0 %v2256_v6  ;;  %v2265_v15 = vld [vmem:[%s3038_s1 + $0x98] sm:$0xff]   ;;  %v2269_v19 = vld [vmem:[%s3038_s1 + $0xa0] sm:$0xff]   ;;  %v2273_v23 = vld [vmem:[%s3038_s1 + $0xa8] sm:$0xff]  }
   0x9   :  { %1997 = vmatpush3.bf16.msra.mxu1 %v2257_v7  ;;  %1934 = vmatprep.subr.bf16.mxu0 %v2258_v8  ;;  %v2274_v24 = vld [vmem:[%s3038_s1 + $0x70] sm:$0xff]   ;;  %v2278_v28 = vld [vmem:[%s3038_s1 + $0x78] sm:$0xff]   ;;  %v2282_v32 = vld [vmem:[%s3039_s0] ss:$36 sps:$4 sm:$0xff]  }
   0xa   :  { %1998 = vmatprep.subr.bf16.mxu1 %v2259_v9  ;;  %v2275_v25 = vld [vmem:[%s3038_s1 + $0xf0] sm:$0xff]   ;;  %v2279_v29 = vld [vmem:[%s3038_s1 + $0xf8] sm:$0xff]   ;;  %v2284_v33 = vld [vmem:[%s3039_s0 + $0x4] ss:$36 sps:$4 sm:$0xff]  }
   0xb   :  { %v2276_v26 = vld [vmem:[%s3038_s1 + $0x30] sm:$0xff]   ;;  %v2280_v30 = vld [vmem:[%s3038_s1 + $0x38] sm:$0xff]   ;;  %v2285_v34 = vld [vmem:[%s3039_s0 + $0x8] ss:$36 sps:$4 sm:$0xff]   ;;  %1074 = vmatprep.mubr.bf16.mxu0 %v2284_v33 }
   0xc   :  { %1935 = vmatpush3.bf16.msra.mxu0 %v2260_v10  ;;  %v2277_v27 = vld [vmem:[%s3038_s1 + $0xb0] sm:$0xff]   ;;  %v2281_v31 = vld [vmem:[%s3038_s1 + $0xb8] sm:$0xff]   ;;  %v2288_v36 = vld [vmem:[%s3038_s1 + $0x140] sm:$0xff]  }
   0xd   :  { %1999 = vmatpush3.bf16.msra.mxu1 %v2261_v11  ;;  %1936 = vmatprep.subr.bf16.mxu0 %v2262_v12  ;;  %v2287_v35 = vld [vmem:[%s3039_s0 + $0xc] ss:$36 sps:$4 sm:$0xff]   ;;  %v2289_v37 = vld [vmem:[%s3038_s1 + $0x1c0] sm:$0xff]   ;;  %v2294_v41 = vld [vmem:[%s3039_s0 + $0x54] ss:$36 sps:$4 sm:$0xff]  }
   0xe   :  { %2000 = vmatprep.subr.bf16.mxu1 %v2263_v13  ;;  %1171 = vmatprep.mubr.bf16.mxu1 %v2287_v35  ;;  %v2290_v38 = vld [vmem:[%s3038_s1 + $0x100] sm:$0xff]   ;;  %v2292_v40 = vld [vmem:[%s3039_s0 + $0x4c] ss:$36 sps:$4 sm:$0xff]   ;;  %v2302_v48 = vld [vmem:[%s3039_s0 + $0x94] ss:$36 sps:$4 sm:$0xff]  }
   0xf   :  { %v2291_v39 = vld [vmem:[%s3038_s1 + $0x180] sm:$0xff]   ;;  %v2296_v42 = vld [vmem:[%s3039_s0 + $0x48] ss:$36 sps:$4 sm:$0xff]   ;;  %v2297_v43 = vld [vmem:[%s3039_s0 + $0x50] ss:$36 sps:$4 sm:$0xff]  }
  0x10   :  { %1937 = vmatpush3.bf16.msra.mxu0 %v2264_v14  ;;  %v2298_v44 = vld [vmem:[%s3038_s1 + $0x148] sm:$0xff]   ;;  %v2304_v49 = vld [vmem:[%s3039_s0 + $0x9c] ss:$36 sps:$4 sm:$0xff]   ;;  %v2306_v50 = vld [vmem:[%s3039_s0 + $0x90] ss:$36 sps:$4 sm:$0xff]  }
  0x11   :  { %2001 = vmatpush3.bf16.msra.mxu1 %v2265_v15  ;;  %1938 = vmatprep.subr.bf16.mxu0 %v2266_v16  ;;  %v2299_v45 = vld [vmem:[%s3038_s1 + $0x1c8] sm:$0xff]   ;;  %v2307_v51 = vld [vmem:[%s3039_s0 + $0x98] ss:$36 sps:$4 sm:$0xff]   ;;  %v2308_v52 = vld [vmem:[%s3038_s1 + $0x150] sm:$0xff]  }
  0x12   :  { %2002 = vmatprep.subr.bf16.mxu1 %v2267_v17  ;;  %v2300_v46 = vld [vmem:[%s3038_s1 + $0x108] sm:$0xff]   ;;  %v2309_v53 = vld [vmem:[%s3038_s1 + $0x1d0] sm:$0xff]   ;;  %v2312_v56 = vld [vmem:[%s3039_s0 + $0xdc] ss:$36 sps:$4 sm:$0xff]  }
  0x13   :  { %v2301_v47 = vld [vmem:[%s3038_s1 + $0x188] sm:$0xff]   ;;  %v2310_v54 = vld [vmem:[%s3038_s1 + $0x110] sm:$0xff]   ;;  %v2316_v58 = vld [vmem:[%s3039_s0 + $0xd8] ss:$36 sps:$4 sm:$0xff]  }
  0x14   :  { %1939 = vmatpush3.bf16.msra.mxu0 %v2268_v18  ;;  %v2311_v55 = vld [vmem:[%s3038_s1 + $0x190] sm:$0xff]   ;;  %v2314_v57 = vld [vmem:[%s3039_s0 + $0xe4] ss:$36 sps:$4 sm:$0xff]   ;;  %v2318_v60 = vld [vmem:[%s3038_s1 + $0x158] sm:$0xff]  }
  0x15   :  { %2003 = vmatpush3.bf16.msra.mxu1 %v2269_v19  ;;  %1940 = vmatprep.subr.bf16.mxu0 %v2270_v20  ;;  %v2317_v59 = vld [vmem:[%s3039_s0 + $0xe0] ss:$36 sps:$4 sm:$0xff]   ;;  %v2319_v61 = vld [vmem:[%s3038_s1 + $0x1d8] sm:$0xff]   ;;  %v2324_v1 = vld [vmem:[%s3039_s0 + $0x12c] ss:$36 sps:$4 sm:$0xff]  }
  0x16   :  { %2004 = vmatprep.subr.bf16.mxu1 %v2271_v21  ;;  %v2320_v62 = vld [vmem:[%s3038_s1 + $0x118] sm:$0xff]   ;;  %v2322_v0 = vld [vmem:[%s3039_s0 + $0x124] ss:$36 sps:$4 sm:$0xff]   ;;  %v2332_v8 = vld [vmem:[%s3039_s0 + $0x16c] ss:$36 sps:$4 sm:$0xff]  }
  0x17   :  { %v2321_v63 = vld [vmem:[%s3038_s1 + $0x198] sm:$0xff]   ;;  %v2326_v2 = vld [vmem:[%s3039_s0 + $0x120] ss:$36 sps:$4 sm:$0xff]   ;;  %v2327_v4 = vld [vmem:[%s3039_s0 + $0x128] ss:$36 sps:$4 sm:$0xff]  }
  0x18   :  { %1941 = vmatpush3.bf16.msra.mxu0 %v2272_v22  ;;  %v2328_v3 = vld [vmem:[%s3038_s1 + $0x160] sm:$0xff]   ;;  %v2334_v9 = vld [vmem:[%s3039_s0 + $0x174] ss:$36 sps:$4 sm:$0xff]   ;;  %v2338_v10 = vld [vmem:[%s3038_s1 + $0x168] sm:$0xff]  }
  0x19   :  { %2005 = vmatpush3.bf16.msra.mxu1 %v2273_v23  ;;  %1942 = vmatprep.subr.bf16.mxu0 %v2274_v24  ;;  %v2329_v5 = vld [vmem:[%s3038_s1 + $0x1e0] sm:$0xff]   ;;  %v2339_v11 = vld [vmem:[%s3038_s1 + $0x1e8] sm:$0xff]   ;;  %v2337_v15 = vld [vmem:[%s3039_s0 + $0x170] ss:$36 sps:$4 sm:$0xff]  }
  0x1a   :  { %2006 = vmatprep.subr.bf16.mxu1 %v2275_v25  ;;  %v2330_v6 = vld [vmem:[%s3038_s1 + $0x120] sm:$0xff]   ;;  %v2336_v12 = vld [vmem:[%s3039_s0 + $0x168] ss:$36 sps:$4 sm:$0xff]   ;;  %v2342_v16 = vld [vmem:[%s3039_s0 + $0x1b4] ss:$36 sps:$4 sm:$0xff]  }
  0x1b   :  { %v2331_v7 = vld [vmem:[%s3038_s1 + $0x1a0] sm:$0xff]   ;;  %v2340_v13 = vld [vmem:[%s3038_s1 + $0x128] sm:$0xff]   ;;  %v2348_v18 = vld [vmem:[%s3038_s1 + $0x170] sm:$0xff]  }
  0x1c   :  { %1943 = vmatpush3.bf16.msra.mxu0 %v2276_v26  ;;  %v2341_v14 = vld [vmem:[%s3038_s1 + $0x1a8] sm:$0xff]   ;;  %v2344_v17 = vld [vmem:[%s3039_s0 + $0x1bc] ss:$36 sps:$4 sm:$0xff]   ;;  %v2349_v19 = vld [vmem:[%s3038_s1 + $0x1f0] sm:$0xff]  }
  0x1d   :  { %2007 = vmatpush3.bf16.msra.mxu1 %v2277_v27  ;;  %1944 = vmatprep.subr.bf16.mxu0 %v2278_v28  ;;  %v2350_v20 = vld [vmem:[%s3038_s1 + $0x130] sm:$0xff]   ;;  %v2347_v23 = vld [vmem:[%s3039_s0 + $0x1b8] ss:$36 sps:$4 sm:$0xff]   ;;  %v2354_v25 = vld [vmem:[%s3039_s0 + $0x204] ss:$36 sps:$4 sm:$0xff]  }
  0x1e   :  { %2008 = vmatprep.subr.bf16.mxu1 %v2279_v29  ;;  %v2351_v21 = vld [vmem:[%s3038_s1 + $0x1b0] sm:$0xff]   ;;  %v2352_v24 = vld [vmem:[%s3039_s0 + $0x1fc] ss:$36 sps:$4 sm:$0xff]  }
  0x1f   :  { %v2346_v22 = vld [vmem:[%s3039_s0 + $0x1b0] ss:$36 sps:$4 sm:$0xff]   ;;  %v2358_v26 = vld [vmem:[%s3038_s1 + $0x178] sm:$0xff]  }
  0x20   :  { %1945 = vmatpush3.bf16.msra.mxu0 %v2280_v30  ;;  %v2359_v27 = vld [vmem:[%s3038_s1 + $0x1f8] sm:$0xff]   ;;  %v2362_v35 = vld [vmem:[%s3039_s0 + $0x10] ss:$36 sps:$4 sm:$0xff]  }
  0x21   :  { %2009 = vmatpush3.bf16.msra.mxu1 %v2281_v31  ;;  %2058 = vmatprep.subr.bf16.mxu0 %v2288_v36  ;;  %v2360_v28 = vld [vmem:[%s3038_s1 + $0x138] sm:$0xff]   ;;  %v2357_v31 = vld [vmem:[%s3039_s0 + $0x200] ss:$36 sps:$4 sm:$0xff]  }
  0x22   :  { %2122 = vmatprep.subr.bf16.mxu1 %v2289_v37  ;;  %v2361_v29 = vld [vmem:[%s3038_s1 + $0x1b8] sm:$0xff]  }
  0x23   :  { %1075 = vmatmul.mubr.bf16.vlgmr.msra.gmra.mrb[0].mxu0 %v2282_v32  ;;  %v2356_v30 = vld [vmem:[%s3039_s0 + $0x1f8] ss:$36 sps:$4 sm:$0xff]   ;;  %v2368_v32 = vld [vmem:[%s3038_s1 + $0x200] sm:$0xff]  }
  0x24   :  { %1172 = vmatmul.mubr.bf16.vlgmr.msra.gmra.mrb[0].mxu1 %v2285_v34  ;;  %2059 = vmatpush3.bf16.msra.mxu0 %v2290_v38  ;;  %v2364_v33 = vld [vmem:[%s3039_s0 + $0x14] ss:$36 sps:$4 sm:$0xff]   ;;  %v2367_v34 = vld [vmem:[%s3039_s0 + $0x1c] ss:$36 sps:$4 sm:$0xff]   ;;  %v2371_v38 = vld [vmem:[%s3039_s0 + $0x64] ss:$36 sps:$4 sm:$0xff]  }
  0x25   :  { %2123 = vmatpush3.bf16.msra.mxu1 %v2291_v39  ;;  %1082 = vmatprep.mubr.bf16.mxu0 %v2292_v40  ;;  %v2365_v36 = vld [vmem:[%s3039_s0 + $0x18] ss:$36 sps:$4 sm:$0xff]   ;;  %v2375_v39 = vld [vmem:[%s3038_s1 + $0x208] sm:$0xff]   ;;  %v2382_v40 = vld [vmem:[%s3038_s1 + $0x210] sm:$0xff]  }
  0x26   :  { %1179 = vmatprep.mubr.bf16.mxu1 %v2294_v41  ;;  %2060 = vmatprep.subr.bf16.mxu0 %v2298_v44  ;;  %v2369_v37 = vld [vmem:[%s3039_s0 + $0x5c] ss:$36 sps:$4 sm:$0xff]   ;;  %v2378_v44 = vld [vmem:[%s3039_s0 + $0xac] ss:$36 sps:$4 sm:$0xff]  }
  0x27   :  { %2124 = vmatprep.subr.bf16.mxu1 %v2299_v45  ;;  %v2373_v41 = vld [vmem:[%s3039_s0 + $0x58] ss:$36 sps:$4 sm:$0xff]  }
  0x28   :  { %2061 = vmatpush3.bf16.msra.mxu0 %v2300_v46  ;;  %v2389_v45 = vld [vmem:[%s3038_s1 + $0x218] sm:$0xff]   ;;  %v2396_v46 = vld [vmem:[%s3038_s1 + $0x220] sm:$0xff]  }
  0x29   :  { %2125 = vmatpush3.bf16.msra.mxu1 %v2301_v47  ;;  %2062 = vmatprep.subr.bf16.mxu0 %v2308_v52  ;;  %v2380_v47 = vld [vmem:[%s3039_s0 + $0xa0] ss:$36 sps:$4 sm:$0xff]   ;;  %v2387_v52 = vld [vmem:[%s3039_s0 + $0xe8] ss:$36 sps:$4 sm:$0xff]  }
  0x2a   :  { %2126 = vmatprep.subr.bf16.mxu1 %v2309_v53  ;;  %v2410_v53 = vld [vmem:[%s3038_s1 + $0x230] sm:$0xff]  }
  0x2b   :  { %1083 = vmatmul.mubr.bf16.gmra.mrb[4].mxu0 %v2296_v42  ;;  %v2374_v42 = vld [vmem:[%s3039_s0 + $0x60] ss:$36 sps:$4 sm:$0xff]  }
  0x2c   :  { %1180 = vmatmul.mubr.bf16.gmra.mrb[4].mxu1 %v2297_v43  ;;  %1090 = vmatprep.mubr.bf16.mxu0 %v2302_v48  ;;  %v2376_v43 = vld [vmem:[%s3039_s0 + $0xa4] ss:$36 sps:$4 sm:$0xff]  }
  0x2d   :  { %1187 = vmatprep.mubr.bf16.mxu1 %v2304_v49  ;;  %2063 = vmatpush3.bf16.msra.mxu0 %v2310_v54  ;;  %v2381_v48 = vld [vmem:[%s3039_s0 + $0xa8] ss:$36 sps:$4 sm:$0xff]   ;;  %v2388_v54 = vld [vmem:[%s3039_s0 + $0xf0] ss:$36 sps:$4 sm:$0xff]  }
  0x2e   :  { %2127 = vmatpush3.bf16.msra.mxu1 %v2311_v55  ;;  %2064 = vmatprep.subr.bf16.mxu0 %v2318_v60  ;;  %v2383_v49 = vld [vmem:[%s3039_s0 + $0xec] ss:$36 sps:$4 sm:$0xff]   ;;  %v2390_v55 = vld [vmem:[%s3039_s0 + $0x134] ss:$36 sps:$4 sm:$0xff]   ;;  %v2397_v60 = vld [vmem:[%s3039_s0 + $0x17c] ss:$36 sps:$4 sm:$0xff]  }
  0x2f   :  { %2128 = vmatprep.subr.bf16.mxu1 %v2319_v61  ;;  %v2399_v61 = vld [vmem:[%s3039_s0 + $0x184] ss:$36 sps:$4 sm:$0xff]  }
  0x31   :  { %2065 = vmatpush3.bf16.msra.mxu0 %v2320_v62  ;;  %v2401_v62 = vld [vmem:[%s3039_s0 + $0x178] ss:$36 sps:$4 sm:$0xff]  }
  0x32   :  { %2129 = vmatpush3.bf16.msra.mxu1 %v2321_v63  ;;  %2066 = vmatprep.subr.bf16.mxu0 %v2328_v3  ;;  %v2402_v63 = vld [vmem:[%s3039_s0 + $0x180] ss:$36 sps:$4 sm:$0xff]   ;;  %v2409_v3 = vld [vmem:[%s3039_s0 + $0x1c8] ss:$36 sps:$4 sm:$0xff]  }
  0x33   :  { %1091 = vmatmul.mubr.bf16.gmra.mrb[8].mxu0 %v2306_v50  ;;  %2130 = vmatprep.subr.bf16.mxu1 %v2329_v5  ;;  %v2385_v50 = vld [vmem:[%s3039_s0 + $0xf4] ss:$36 sps:$4 sm:$0xff]  }
  0x34   :  { %1188 = vmatmul.mubr.bf16.gmra.mrb[8].mxu1 %v2307_v51  ;;  %1098 = vmatprep.mubr.bf16.mxu0 %v2312_v56  ;;  %v2403_v51 = vld [vmem:[%s3038_s1 + $0x228] sm:$0xff]   ;;  %v2392_v56 = vld [vmem:[%s3039_s0 + $0x13c] ss:$36 sps:$4 sm:$0xff]   ;;  %v2413_v5 = vld [vmem:[%s3039_s0 + $0x214] ss:$36 sps:$4 sm:$0xff]  }
  0x35   :  { %1195 = vmatprep.mubr.bf16.mxu1 %v2314_v57  ;;  %2067 = vmatpush3.bf16.msra.mxu0 %v2330_v6  ;;  %v2417_v57 = vld [vmem:[%s3038_s1 + $0x238] sm:$0xff]   ;;  %v2415_v6 = vld [vmem:[%s3039_s0 + $0x208] ss:$36 sps:$4 sm:$0xff]  }
  0x36   :  { %2131 = vmatpush3.bf16.msra.mxu1 %v2331_v7  ;;  %2068 = vmatprep.subr.bf16.mxu0 %v2338_v10  ;;  %v2416_v7 = vld [vmem:[%s3039_s0 + $0x210] ss:$36 sps:$4 sm:$0xff]   ;;  %v2420_v10 = vld [vmem:[%s3039_s0 + $0x68] ss:$36 sps:$4 sm:$0xff]  }
  0x37   :  { %2132 = vmatprep.subr.bf16.mxu1 %v2339_v11  ;;  %v2421_v11 = vld [vmem:[%s3039_s0 + $0x188] ss:$36 sps:$4 sm:$0xff]  }
  0x39   :  { %2069 = vmatpush3.bf16.msra.mxu0 %v2340_v13  ;;  %v2423_v13 = vld [vmem:[%s3039_s0 + $0x1d0] ss:$36 sps:$4 sm:$0xff]  }
  0x3a   :  { %2133 = vmatpush3.bf16.msra.mxu1 %v2341_v14  ;;  %2070 = vmatprep.subr.bf16.mxu0 %v2348_v18  ;;  %v2424_v14 = vld [vmem:[%s3039_s0 + $0xf8] ss:$36 sps:$4 sm:$0xff]  }
  0x3b   :  { %1099 = vmatmul.mubr.bf16.gmra.mrb[12].mxu0 %v2316_v58  ;;  %2134 = vmatprep.subr.bf16.mxu1 %v2349_v19  ;;  %v2394_v58 = vld [vmem:[%s3039_s0 + $0x130] ss:$36 sps:$4 sm:$0xff]  }
  0x3c   :  { %1196 = vmatmul.mubr.bf16.gmra.mrb[12].mxu1 %v2317_v59  ;;  %1106 = vmatprep.mubr.bf16.mxu0 %v2322_v0  ;;  %v2395_v59 = vld [vmem:[%s3039_s0 + $0x138] ss:$36 sps:$4 sm:$0xff]   ;;  %v2404_v0 = vld [vmem:[%s3039_s0 + $0x1c4] ss:$36 sps:$4 sm:$0xff]  }
  0x3d   :  { %1203 = vmatprep.mubr.bf16.mxu1 %v2324_v1  ;;  %2071 = vmatpush3.bf16.msra.mxu0 %v2350_v20  ;;  %v2406_v1 = vld [vmem:[%s3039_s0 + $0x1cc] ss:$36 sps:$4 sm:$0xff]  }
  0x3e   :  { %2135 = vmatpush3.bf16.msra.mxu1 %v2351_v21  ;;  %2072 = vmatprep.subr.bf16.mxu0 %v2358_v26 }
  0x3f   :  { %2136 = vmatprep.subr.bf16.mxu1 %v2359_v27 }
  0x41   :  { %2073 = vmatpush3.bf16.msra.mxu0 %v2360_v28 }
  0x42   :  { %2137 = vmatpush3.bf16.msra.mxu1 %v2361_v29  ;;  %2202 = vmatprep.subr.bf16.mxu0 %v2368_v32 }
  0x43   :  { %1107 = vmatmul.mubr.bf16.gmra.mrb[16].mxu0 %v2326_v2  ;;  %2234 = vmatprep.subr.bf16.mxu1 %v2368_v32  ;;  %v2408_v2 = vld [vmem:[%s3039_s0 + $0x1c0] ss:$36 sps:$4 sm:$0xff]  }
  0x44   :  { %1204 = vmatmul.mubr.bf16.gmra.mrb[16].mxu1 %v2327_v4  ;;  %1114 = vmatprep.mubr.bf16.mxu0 %v2332_v8  ;;  %v2411_v4 = vld [vmem:[%s3039_s0 + $0x20c] ss:$36 sps:$4 sm:$0xff]   ;;  %v2418_v8 = vld [vmem:[%s3039_s0 + $0x20] ss:$36 sps:$4 sm:$0xff]  }
  0x45   :  { %1211 = vmatprep.mubr.bf16.mxu1 %v2334_v9  ;;  %v2419_v9 = vld [vmem:[%s3039_s0 + $0x140] ss:$36 sps:$4 sm:$0xff]  }
  0x4b   :  { %1115 = vmatmul.mubr.bf16.gmra.mrb[20].mxu0 %v2336_v12  ;;  %v2422_v12 = vld [vmem:[%s3039_s0 + $0xb0] ss:$36 sps:$4 sm:$0xff]  }
  0x4c   :  { %1212 = vmatmul.mubr.bf16.gmra.mrb[20].mxu1 %v2337_v15  ;;  %1122 = vmatprep.mubr.bf16.mxu0 %v2342_v16  ;;  %v2425_v15 = vld [vmem:[%s3039_s0 + $0x218] ss:$36 sps:$4 sm:$0xff]  }
  0x4d   :  { %1219 = vmatprep.mubr.bf16.mxu1 %v2344_v17 }
  0x53   :  { %1123 = vmatmul.mubr.bf16.gmra.mrb[24].mxu0 %v2346_v22 }
  0x54   :  { %1220 = vmatmul.mubr.bf16.gmra.mrb[24].mxu1 %v2347_v23  ;;  %1130 = vmatprep.mubr.bf16.mxu0 %v2352_v24 }
  0x55   :  { %1227 = vmatprep.mubr.bf16.mxu1 %v2354_v25 }
  0x5b   :  { %1131 = vmatmul.mubr.bf16.gmra.mrb[28].mxu0 %v2356_v30 }
  0x5c   :  { %1228 = vmatmul.mubr.bf16.gmra.mrb[28].mxu1 %v2357_v31  ;;  %1268 = vmatprep.mubr.bf16.mxu0 %v2364_v33 }
  0x5d   :  { %1365 = vmatprep.mubr.bf16.mxu1 %v2367_v34 }
  0x63   :  { %1269 = vmatmul.mubr.bf16.vlgmr.msra.gmra.mrb[32].mxu0 %v2362_v35 }
  0x64   :  { %1366 = vmatmul.mubr.bf16.vlgmr.msra.gmra.mrb[32].mxu1 %v2365_v36  ;;  %2203 = vmatpush3.bf16.msra.mxu0 %v2368_v32 }
  0x65   :  { %2242 = vmatpush3.bf16.msra.mxu1 %v2368_v32  ;;  %1276 = vmatprep.mubr.bf16.mxu0 %v2369_v37 }
  0x66   :  { %1373 = vmatprep.mubr.bf16.mxu1 %v2371_v38  ;;  %2204 = vmatprep.subr.bf16.mxu0 %v2375_v39 }
  0x67   :  { %2235 = vmatprep.subr.bf16.mxu1 %v2375_v39 }
  0x68   :  { %2205 = vmatpush3.bf16.msra.mxu0 %v2375_v39 }
  0x69   :  { %2243 = vmatpush3.bf16.msra.mxu1 %v2375_v39  ;;  %2206 = vmatprep.subr.bf16.mxu0 %v2382_v40 }
  0x6a   :  { %2236 = vmatprep.subr.bf16.mxu1 %v2382_v40 }
  0x6b   :  { %1277 = vmatmul.mubr.bf16.gmra.mrb[36].mxu0 %v2373_v41 }
  0x6c   :  { %1374 = vmatmul.mubr.bf16.gmra.mrb[36].mxu1 %v2374_v42  ;;  %1284 = vmatprep.mubr.bf16.mxu0 %v2376_v43 }
  0x6d   :  { %1381 = vmatprep.mubr.bf16.mxu1 %v2378_v44  ;;  %2207 = vmatpush3.bf16.msra.mxu0 %v2382_v40 }
  0x6e   :  { %2244 = vmatpush3.bf16.msra.mxu1 %v2382_v40  ;;  %2208 = vmatprep.subr.bf16.mxu0 %v2389_v45 }
  0x6f   :  { %2237 = vmatprep.subr.bf16.mxu1 %v2389_v45 }
  0x71   :  { %2209 = vmatpush3.bf16.msra.mxu0 %v2389_v45 }
  0x72   :  { %2245 = vmatpush3.bf16.msra.mxu1 %v2389_v45  ;;  %2210 = vmatprep.subr.bf16.mxu0 %v2396_v46 }
  0x73   :  { %1285 = vmatmul.mubr.bf16.gmra.mrb[40].mxu0 %v2380_v47  ;;  %2238 = vmatprep.subr.bf16.mxu1 %v2396_v46 }
  0x74   :  { %1382 = vmatmul.mubr.bf16.gmra.mrb[40].mxu1 %v2381_v48  ;;  %1292 = vmatprep.mubr.bf16.mxu0 %v2383_v49 }
  0x75   :  { %1389 = vmatprep.mubr.bf16.mxu1 %v2385_v50  ;;  %2211 = vmatpush3.bf16.msra.mxu0 %v2396_v46 }
  0x76   :  { %2246 = vmatpush3.bf16.msra.mxu1 %v2396_v46  ;;  %2212 = vmatprep.subr.bf16.mxu0 %v2403_v51 }
  0x77   :  { %2239 = vmatprep.subr.bf16.mxu1 %v2403_v51 }
  0x79   :  { %2213 = vmatpush3.bf16.msra.mxu0 %v2403_v51 }
  0x7a   :  { %2247 = vmatpush3.bf16.msra.mxu1 %v2403_v51  ;;  %2214 = vmatprep.subr.bf16.mxu0 %v2410_v53 }
  0x7b   :  { %1293 = vmatmul.mubr.bf16.gmra.mrb[44].mxu0 %v2387_v52  ;;  %2240 = vmatprep.subr.bf16.mxu1 %v2410_v53 }
  0x7c   :  { %1390 = vmatmul.mubr.bf16.gmra.mrb[44].mxu1 %v2388_v54  ;;  %1300 = vmatprep.mubr.bf16.mxu0 %v2390_v55 }
  0x7d   :  { %1397 = vmatprep.mubr.bf16.mxu1 %v2392_v56  ;;  %2215 = vmatpush3.bf16.msra.mxu0 %v2410_v53 }
  0x7e   :  { %2248 = vmatpush3.bf16.msra.mxu1 %v2410_v53  ;;  %2216 = vmatprep.subr.bf16.mxu0 %v2417_v57 }
  0x7f   :  { %2241 = vmatprep.subr.bf16.mxu1 %v2417_v57 }
  0x81   :  { %2217 = vmatpush3.bf16.msra.mxu0 %v2417_v57 }
  0x82   :  { %2249 = vmatpush3.bf16.msra.mxu1 %v2417_v57 }
  0x83   :  { %1301 = vmatmul.mubr.bf16.gmra.mrb[48].mxu0 %v2394_v58 }
  0x84   :  { %1398 = vmatmul.mubr.bf16.gmra.mrb[48].mxu1 %v2395_v59  ;;  %1308 = vmatprep.mubr.bf16.mxu0 %v2397_v60 }
  0x85   :  { %1405 = vmatprep.mubr.bf16.mxu1 %v2399_v61 }
  0x8b   :  { %1309 = vmatmul.mubr.bf16.gmra.mrb[52].mxu0 %v2401_v62 }
  0x8c   :  { %1406 = vmatmul.mubr.bf16.gmra.mrb[52].mxu1 %v2402_v63  ;;  %1316 = vmatprep.mubr.bf16.mxu0 %v2404_v0 }
  0x8d   :  { %1413 = vmatprep.mubr.bf16.mxu1 %v2406_v1 }
  0x93   :  { %1317 = vmatmul.mubr.bf16.gmra.mrb[56].mxu0 %v2408_v2 }
  0x94   :  { %1414 = vmatmul.mubr.bf16.gmra.mrb[56].mxu1 %v2409_v3  ;;  %1324 = vmatprep.mubr.bf16.mxu0 %v2411_v4 }
  0x95   :  { %1421 = vmatprep.mubr.bf16.mxu1 %v2413_v5 }
  0x9b   :  { %1325 = vmatmul.mubr.bf16.gmra.mrb[60].mxu0 %v2415_v6 }
  0x9c   :  { %1422 = vmatmul.mubr.bf16.gmra.mrb[60].mxu1 %v2416_v7  ;;  %2218 = vmatprep.mubr.bf16.mxu0 %v2418_v8 }
  0x9d   :  { %2226 = vmatprep.mubr.bf16.mxu1 %v2419_v9 }
  0xa3   :  { %2219 = vmatmul.mubr.bf16.vlgmr.msra.gmra.mrb[64].mxu0 %v2420_v10 }
  0xa4   :  { %2227 = vmatmul.mubr.bf16.vlgmr.msra.gmra.mrb[64].mxu1 %v2421_v11  ;;  %2222 = vmatprep.mubr.bf16.mxu0 %v2422_v12 }
  0xa5   :  { %2230 = vmatprep.mubr.bf16.mxu1 %v2423_v13 }
  0xab   :  { %2223 = vmatmul.mubr.bf16.gmra.mrb[68].mxu0 %v2424_v14 }
  0xac   :  { %2231 = vmatmul.mubr.bf16.gmra.mrb[68].mxu1 %v2425_v15 }
  0xf6   :  { %v1946_v16 = vpop.f32.mrb[0].mxu0 }
  0xf7   :  { %v2010_v17 = vpop.f32.mrb[0].mxu1  ;;  %v1947_v18 = vpop.f32.mrb[1].mxu0 }
  0xf8   :  { %v1948_v19 = vadd.f32 %v1947_v18, %v1946_v16  ;;  %v2011_v20 = vpop.f32.mrb[1].mxu1  ;;  %v1949_v21 = vpop.f32.mrb[2].mxu0 }
  0xf9   :  { %v2012_v22 = vadd.f32 %v2011_v20, %v2010_v17  ;;  %v2013_v23 = vpop.f32.mrb[2].mxu1  ;;  %v1950_v24 = vpop.f32.mrb[3].mxu0 }
  0xfa   :  { %v1951_v25 = vadd.f32 %v1950_v24, %v1949_v21  ;;  %v2014_v26 = vpop.f32.mrb[3].mxu1 }
  0xfb   :  { %v2883_v27 = vadd.f32 %v2012_v22, %v1948_v19  ;;  %v2015_v28 = vadd.f32 %v2014_v26, %v2013_v23 }
  0xfd   :  { %v2885_v29 = vadd.f32 %v2015_v28, %v1951_v25 }
  0xfe   :  { %v1952_v30 = vpop.f32.mrb[4].mxu0 }
  0xff   :  { %v2016_v31 = vpop.f32.mrb[4].mxu1  ;;  %v1953_v32 = vpop.f32.mrb[5].mxu0 }
 0x100   :  { %v1954_v33 = vadd.f32 %v1953_v32, %v1952_v30  ;;  %v2017_v34 = vpop.f32.mrb[5].mxu1  ;;  %v1955_v35 = vpop.f32.mrb[6].mxu0 }
 0x101   :  { %v2018_v36 = vadd.f32 %v2017_v34, %v2016_v31  ;;  %v2019_v37 = vpop.f32.mrb[6].mxu1  ;;  %v1956_v38 = vpop.f32.mrb[7].mxu0 }
 0x102   :  { %v1957_v39 = vadd.f32 %v1956_v38, %v1955_v35  ;;  %v2020_v40 = vpop.f32.mrb[7].mxu1 }
 0x103   :  { %v2887_v41 = vadd.f32 %v2018_v36, %v1954_v33  ;;  %v2021_v42 = vadd.f32 %v2020_v40, %v2019_v37 }
 0x105   :  { %v2889_v43 = vadd.f32 %v2021_v42, %v1957_v39 }
 0x106   :  { %v1958_v44 = vpop.f32.mrb[8].mxu0 }
 0x107   :  { %v2022_v45 = vpop.f32.mrb[8].mxu1  ;;  %v1959_v46 = vpop.f32.mrb[9].mxu0 }
 0x108   :  { %v1960_v47 = vadd.f32 %v1959_v46, %v1958_v44  ;;  %v2023_v48 = vpop.f32.mrb[9].mxu1  ;;  %v1961_v49 = vpop.f32.mrb[10].mxu0 }
 0x109   :  { %v2024_v50 = vadd.f32 %v2023_v48, %v2022_v45  ;;  %v2025_v51 = vpop.f32.mrb[10].mxu1  ;;  %v1962_v52 = vpop.f32.mrb[11].mxu0 }
 0x10a   :  { %v1963_v53 = vadd.f32 %v1962_v52, %v1961_v49  ;;  %v2026_v54 = vpop.f32.mrb[11].mxu1 }
 0x10b   :  { %v2891_v55 = vadd.f32 %v2024_v50, %v1960_v47  ;;  %v2027_v56 = vadd.f32 %v2026_v54, %v2025_v51 }
 0x10d   :  { %v2893_v57 = vadd.f32 %v2027_v56, %v1963_v53 }
 0x10e   :  { %v1964_v58 = vpop.f32.mrb[12].mxu0 }
 0x10f   :  { %v2028_v59 = vpop.f32.mrb[12].mxu1  ;;  %v1965_v60 = vpop.f32.mrb[13].mxu0 }
 0x110   :  { %v1966_v61 = vadd.f32 %v1965_v60, %v1964_v58  ;;  %v2029_v62 = vpop.f32.mrb[13].mxu1  ;;  %v1967_v63 = vpop.f32.mrb[14].mxu0 }
 0x111   :  { %v2030_v0 = vadd.f32 %v2029_v62, %v2028_v59  ;;  %v2031_v1 = vpop.f32.mrb[14].mxu1  ;;  %v1968_v2 = vpop.f32.mrb[15].mxu0 }
 0x112   :  { %v1969_v3 = vadd.f32 %v1968_v2, %v1967_v63  ;;  %v2032_v4 = vpop.f32.mrb[15].mxu1 }
 0x113   :  { %v2895_v5 = vadd.f32 %v2030_v0, %v1966_v61  ;;  %v2033_v6 = vadd.f32 %v2032_v4, %v2031_v1 }
 0x115   :  { %v2897_v7 = vadd.f32 %v2033_v6, %v1969_v3 }
 0x116   :  { %v1970_v8 = vpop.f32.mrb[16].mxu0 }
 0x117   :  { %v2034_v9 = vpop.f32.mrb[16].mxu1  ;;  %v1971_v10 = vpop.f32.mrb[17].mxu0 }
 0x118   :  { %v1972_v11 = vadd.f32 %v1971_v10, %v1970_v8  ;;  %v2035_v12 = vpop.f32.mrb[17].mxu1  ;;  %v1973_v13 = vpop.f32.mrb[18].mxu0 }
 0x119   :  { %v2036_v14 = vadd.f32 %v2035_v12, %v2034_v9  ;;  %v2037_v15 = vpop.f32.mrb[18].mxu1  ;;  %v1974_v16 = vpop.f32.mrb[19].mxu0 }
 0x11a   :  { %v1975_v17 = vadd.f32 %v1974_v16, %v1973_v13  ;;  %v2038_v18 = vpop.f32.mrb[19].mxu1 }
 0x11b   :  { %v2899_v19 = vadd.f32 %v2036_v14, %v1972_v11  ;;  %v2039_v20 = vadd.f32 %v2038_v18, %v2037_v15 }
 0x11d   :  { %v2901_v21 = vadd.f32 %v2039_v20, %v1975_v17 }
 0x11e   :  { %v1976_v22 = vpop.f32.mrb[20].mxu0 }
 0x11f   :  { %v2040_v23 = vpop.f32.mrb[20].mxu1  ;;  %v1977_v24 = vpop.f32.mrb[21].mxu0 }
 0x120   :  { %v1978_v25 = vadd.f32 %v1977_v24, %v1976_v22  ;;  %v2041_v26 = vpop.f32.mrb[21].mxu1  ;;  %v1979_v28 = vpop.f32.mrb[22].mxu0 }
 0x121   :  { %v2042_v30 = vadd.f32 %v2041_v26, %v2040_v23  ;;  %v2043_v31 = vpop.f32.mrb[22].mxu1  ;;  %v1980_v32 = vpop.f32.mrb[23].mxu0 }
 0x122   :  { %v1981_v33 = vadd.f32 %v1980_v32, %v1979_v28  ;;  %v2044_v34 = vpop.f32.mrb[23].mxu1 }
 0x123   :  { %v2903_v35 = vadd.f32 %v2042_v30, %v1978_v25  ;;  %v2045_v36 = vadd.f32 %v2044_v34, %v2043_v31 }
 0x125   :  { %v2905_v37 = vadd.f32 %v2045_v36, %v1981_v33 }
 0x126   :  { %v1982_v38 = vpop.f32.mrb[24].mxu0 }
 0x127   :  { %v2046_v39 = vpop.f32.mrb[24].mxu1  ;;  %v1983_v40 = vpop.f32.mrb[25].mxu0 }
 0x128   :  { %v1984_v42 = vadd.f32 %v1983_v40, %v1982_v38  ;;  %v2047_v44 = vpop.f32.mrb[25].mxu1  ;;  %v1985_v45 = vpop.f32.mrb[26].mxu0 }
 0x129   :  { %v2048_v46 = vadd.f32 %v2047_v44, %v2046_v39  ;;  %v2049_v47 = vpop.f32.mrb[26].mxu1  ;;  %v1986_v48 = vpop.f32.mrb[27].mxu0 }
 0x12a   :  { %v1987_v49 = vadd.f32 %v1986_v48, %v1985_v45  ;;  %v2050_v50 = vpop.f32.mrb[27].mxu1 }
 0x12b   :  { %v2907_v51 = vadd.f32 %v2048_v46, %v1984_v42  ;;  %v2051_v52 = vadd.f32 %v2050_v50, %v2049_v47 }
 0x12d   :  { %v2909_v53 = vadd.f32 %v2051_v52, %v1987_v49 }
 0x12e   :  { %v1988_v54 = vpop.f32.mrb[28].mxu0 }
 0x12f   :  { %v2052_v56 = vpop.f32.mrb[28].mxu1  ;;  %v1989_v58 = vpop.f32.mrb[29].mxu0 }
 0x130   :  { %v1990_v59 = vadd.f32 %v1989_v58, %v1988_v54  ;;  %v2053_v60 = vpop.f32.mrb[29].mxu1  ;;  %v1991_v61 = vpop.f32.mrb[30].mxu0 }
 0x131   :  { %v2054_v62 = vadd.f32 %v2053_v60, %v2052_v56  ;;  %v2055_v63 = vpop.f32.mrb[30].mxu1  ;;  %v1992_v0 = vpop.f32.mrb[31].mxu0 }
 0x132   :  { %v1993_v1 = vadd.f32 %v1992_v0, %v1991_v61  ;;  %v2056_v2 = vpop.f32.mrb[31].mxu1 }
 0x133   :  { %v2911_v3 = vadd.f32 %v2054_v62, %v1990_v59  ;;  %v2057_v4 = vadd.f32 %v2056_v2, %v2055_v63 }
 0x135   :  { %v2913_v6 = vadd.f32 %v2057_v4, %v1993_v1 }
 0x136   :  { %v2074_v8 = vpop.f32.mrb[32].mxu0 }
 0x137   :  { %v2138_v9 = vpop.f32.mrb[32].mxu1  ;;  %v2075_v10 = vpop.f32.mrb[33].mxu0 }
 0x138   :  { %v2076_v11 = vadd.f32 %v2075_v10, %v2074_v8  ;;  %v2139_v12 = vpop.f32.mrb[33].mxu1  ;;  %v2077_v13 = vpop.f32.mrb[34].mxu0 }
 0x139   :  { %v2140_v14 = vadd.f32 %v2139_v12, %v2138_v9  ;;  %v2141_v15 = vpop.f32.mrb[34].mxu1  ;;  %v2078_v16 = vpop.f32.mrb[35].mxu0 }
 0x13a   :  { %v1271_v17 = vadd.f32 %v2076_v11, %v2883_v27  ;;  %v2079_v18 = vadd.f32 %v2078_v16, %v2077_v13  ;;  %v2142_v20 = vpop.f32.mrb[35].mxu1 }
 0x13b   :  { %v2143_v22 = vadd.f32 %v2142_v20, %v2141_v15 }
 0x13c   :  { %v1274_v23 = vadd.f32 %v2079_v18, %v2885_v29  ;;  %v2917_v24 = vadd.f32 %v2140_v14, %v1271_v17 }
 0x13e   :  { %v2080_v25 = vpop.f32.mrb[36].mxu0  ;;  %v2919_v26 = vadd.f32 %v2143_v22, %v1274_v23 }
 0x13f   :  { %v2144_v28 = vpop.f32.mrb[36].mxu1  ;;  %v2081_v30 = vpop.f32.mrb[37].mxu0 }
 0x140   :  { %v2082_v31 = vadd.f32 %v2081_v30, %v2080_v25  ;;  %v2145_v32 = vpop.f32.mrb[37].mxu1  ;;  %v2083_v33 = vpop.f32.mrb[38].mxu0 }
 0x141   :  { %v2146_v34 = vadd.f32 %v2145_v32, %v2144_v28  ;;  %v2147_v36 = vpop.f32.mrb[38].mxu1  ;;  %v2084_v38 = vpop.f32.mrb[39].mxu0 }
 0x142   :  { %v1279_v27 = vadd.f32 %v2082_v31, %v2887_v41  ;;  %v2085_v39 = vadd.f32 %v2084_v38, %v2083_v33  ;;  %v2148_v40 = vpop.f32.mrb[39].mxu1 }
 0x143   :  { %v2149_v42 = vadd.f32 %v2148_v40, %v2147_v36 }
 0x144   :  { %v1282_v29 = vadd.f32 %v2085_v39, %v2889_v43  ;;  %v2923_v44 = vadd.f32 %v2146_v34, %v1279_v27 }
 0x146   :  { %v2086_v45 = vpop.f32.mrb[40].mxu0  ;;  %v2925_v46 = vadd.f32 %v2149_v42, %v1282_v29 }
 0x147   :  { %v2150_v47 = vpop.f32.mrb[40].mxu1  ;;  %v2087_v48 = vpop.f32.mrb[41].mxu0 }
 0x148   :  { %v2088_v49 = vadd.f32 %v2087_v48, %v2086_v45  ;;  %v2151_v50 = vpop.f32.mrb[41].mxu1  ;;  %v2089_v52 = vpop.f32.mrb[42].mxu0 }
 0x149   :  { %v2152_v54 = vadd.f32 %v2151_v50, %v2150_v47  ;;  %v2153_v56 = vpop.f32.mrb[42].mxu1  ;;  %v2090_v58 = vpop.f32.mrb[43].mxu0 }
 0x14a   :  { %v1287_v41 = vadd.f32 %v2088_v49, %v2891_v55  ;;  %v2091_v59 = vadd.f32 %v2090_v58, %v2089_v52  ;;  %v2154_v60 = vpop.f32.mrb[43].mxu1 }
 0x14b   :  { %v2155_v61 = vadd.f32 %v2154_v60, %v2153_v56 }
 0x14c   :  { %v1290_v43 = vadd.f32 %v2091_v59, %v2893_v57  ;;  %v2929_v62 = vadd.f32 %v2152_v54, %v1287_v41 }
 0x14e   :  { %v2092_v63 = vpop.f32.mrb[44].mxu0  ;;  %v2931_v0 = vadd.f32 %v2155_v61, %v1290_v43 }
 0x14f   :  { %v2156_v1 = vpop.f32.mrb[44].mxu1  ;;  %v2093_v2 = vpop.f32.mrb[45].mxu0 }
 0x150   :  { %v2094_v4 = vadd.f32 %v2093_v2, %v2092_v63  ;;  %v2157_v8 = vpop.f32.mrb[45].mxu1  ;;  %v2095_v9 = vpop.f32.mrb[46].mxu0 }
 0x151   :  { %v2158_v10 = vadd.f32 %v2157_v8, %v2156_v1  ;;  %v2159_v11 = vpop.f32.mrb[46].mxu1  ;;  %v2096_v12 = vpop.f32.mrb[47].mxu0 }
 0x152   :  { %v1295_v55 = vadd.f32 %v2094_v4, %v2895_v5  ;;  %v2097_v13 = vadd.f32 %v2096_v12, %v2095_v9  ;;  %v2160_v14 = vpop.f32.mrb[47].mxu1 }
 0x153   :  { %v2161_v15 = vadd.f32 %v2160_v14, %v2159_v11 }
 0x154   :  { %v1298_v57 = vadd.f32 %v2097_v13, %v2897_v7  ;;  %v2935_v16 = vadd.f32 %v2158_v10, %v1295_v55 }
 0x156   :  { %v2098_v17 = vpop.f32.mrb[48].mxu0  ;;  %v2937_v18 = vadd.f32 %v2161_v15, %v1298_v57 }
 0x157   :  { %v2162_v20 = vpop.f32.mrb[48].mxu1  ;;  %v2099_v22 = vpop.f32.mrb[49].mxu0 }
 0x158   :  { %v2100_v23 = vadd.f32 %v2099_v22, %v2098_v17  ;;  %v2163_v25 = vpop.f32.mrb[49].mxu1  ;;  %v2101_v28 = vpop.f32.mrb[50].mxu0 }
 0x159   :  { %v2164_v30 = vadd.f32 %v2163_v25, %v2162_v20  ;;  %v2165_v31 = vpop.f32.mrb[50].mxu1  ;;  %v2102_v32 = vpop.f32.mrb[51].mxu0 }
 0x15a   :  { %v1303_v5 = vadd.f32 %v2100_v23, %v2899_v19  ;;  %v2103_v33 = vadd.f32 %v2102_v32, %v2101_v28  ;;  %v2166_v34 = vpop.f32.mrb[51].mxu1 }
 0x15b   :  { %v2167_v36 = vadd.f32 %v2166_v34, %v2165_v31 }
 0x15c   :  { %v1306_v7 = vadd.f32 %v2103_v33, %v2901_v21  ;;  %v2941_v38 = vadd.f32 %v2164_v30, %v1303_v5  ;;  %v2958_v33 = vld [vmem:[%s3040_s2] ss:$0 sm:$0xff] }
 0x15e   :  { %v2104_v27 = vpop.f32.mrb[52].mxu0  ;;  %v2943_v39 = vadd.f32 %v2167_v36, %v1306_v7 }
 0x15f   :  { %v2168_v40 = vpop.f32.mrb[52].mxu1  ;;  %v2105_v42 = vpop.f32.mrb[53].mxu0 }
 0x160   :  { %v2106_v29 = vadd.f32 %v2105_v42, %v2104_v27  ;;  %v2169_v45 = vpop.f32.mrb[53].mxu1  ;;  %v2107_v47 = vpop.f32.mrb[54].mxu0 }
 0x161   :  { %v2170_v48 = vadd.f32 %v2169_v45, %v2168_v40  ;;  %v2171_v49 = vpop.f32.mrb[54].mxu1  ;;  %v2108_v50 = vpop.f32.mrb[55].mxu0 }
 0x162   :  { %v1311_v19 = vadd.f32 %v2106_v29, %v2903_v35  ;;  %v2109_v52 = vadd.f32 %v2108_v50, %v2107_v47  ;;  %v2172_v54 = vpop.f32.mrb[55].mxu1 }
 0x163   :  { %v2173_v56 = vadd.f32 %v2172_v54, %v2171_v49 }
 0x164   :  { %v1314_v21 = vadd.f32 %v2109_v52, %v2905_v37  ;;  %v1408_v58 = vadd.f32 %v2170_v48, %v1311_v19 }
 0x166   :  { %v2110_v41 = vpop.f32.mrb[56].mxu0  ;;  %v1411_v59 = vadd.f32 %v2173_v56, %v1314_v21 }
 0x167   :  { %v2174_v60 = vpop.f32.mrb[56].mxu1  ;;  %v2111_v61 = vpop.f32.mrb[57].mxu0 }
 0x168   :  { %v2112_v43 = vadd.f32 %v2111_v61, %v2110_v41  ;;  %v2175_v63 = vpop.f32.mrb[57].mxu1  ;;  %v2113_v1 = vpop.f32.mrb[58].mxu0 }
 0x169   :  { %v2176_v2 = vadd.f32 %v2175_v63, %v2174_v60  ;;  %v2177_v4 = vpop.f32.mrb[58].mxu1  ;;  %v2114_v8 = vpop.f32.mrb[59].mxu0 }
 0x16a   :  { %v1319_v9 = vadd.f32 %v2112_v43, %v2907_v51  ;;  %v2115_v10 = vadd.f32 %v2114_v8, %v2113_v1  ;;  %v2178_v35 = vpop.f32.mrb[59].mxu1 }
 0x16b   :  { %v2179_v11 = vadd.f32 %v2178_v35, %v2177_v4 }
 0x16c   :  { %v1322_v12 = vadd.f32 %v2115_v10, %v2909_v53  ;;  %v2949_v55 = vadd.f32 %v2176_v2, %v1319_v9 }
 0x16e   :  { %v2116_v37 = vpop.f32.mrb[60].mxu0  ;;  %v2951_v13 = vadd.f32 %v2179_v11, %v1322_v12 }
 0x16f   :  { %v2180_v14 = vpop.f32.mrb[60].mxu1  ;;  %v2117_v15 = vpop.f32.mrb[61].mxu0 }
 0x170   :  { %v2118_v57 = vadd.f32 %v2117_v15, %v2116_v37  ;;  %v2181_v17 = vpop.f32.mrb[61].mxu1  ;;  %v2119_v20 = vpop.f32.mrb[62].mxu0 }
 0x171   :  { %v2182_v22 = vadd.f32 %v2181_v17, %v2180_v14  ;;  %v2183_v23 = vpop.f32.mrb[62].mxu1  ;;  %v2120_v25 = vpop.f32.mrb[63].mxu0 }
 0x172   :  { %v1327_v51 = vadd.f32 %v2118_v57, %v2911_v3  ;;  %v2121_v28 = vadd.f32 %v2120_v25, %v2119_v20  ;;  %v2184_v30 = vpop.f32.mrb[63].mxu1  ;;  %v2966_v3 = vld [vmem:[%s3041_s3] ss:$0 sm:$0xff] }
 0x173   :  { %v2185_v31 = vadd.f32 %v2184_v30, %v2183_v23 }
 0x174   :  { %v1330_v53 = vadd.f32 %v2121_v28, %v2913_v6  ;;  %v1424_v32 = vadd.f32 %v2182_v22, %v1327_v51 }
 0x176   :  { %v2220_v5 = vpop.f32.mrb[64].mxu0  ;;  %v2960_v34 = vadd.f32 %v2185_v31, %v1330_v53 }
 0x177   :  { %v1473_v36 = vadd.f32 %v2220_v5, %v2923_v44  ;;  %v2228_v7 = vpop.f32.mrb[64].mxu1  ;;  %v1464_v27 = vpop.f32.mrb[65].mxu0 }
 0x178   :  { %v1505_v40 = vadd.f32 %v2228_v7, %v1408_v58  ;;  %v1465_v6 = vadd.f32 %v1464_v27, %v2917_v24  ;;  %v1496_v42 = vpop.f32.mrb[65].mxu1  ;;  %v2221_v29 = vpop.f32.mrb[66].mxu0 }
 0x179   :  { %v1536_v45 = vmul.f32 %v2958_v33, %v1473_v36  ;;  %v1497_v47 = vadd.f32 %v1496_v42, %v2941_v38  ;;  %v1476_v48 = vadd.f32 %v2221_v29, %v2925_v46  ;;  %v2229_v49 = vpop.f32.mrb[66].mxu1  ;;  %v1467_v44 = vpop.f32.mrb[67].mxu0 }
 0x17a   :  { %v1544_v50 = vmul.f32 %v2958_v33, %v1505_v40  ;;  %v1534_v19 = vmul.f32 %v2958_v33, %v1465_v6  ;;  %v1508_v52 = vadd.f32 %v2229_v49, %v1411_v59  ;;  %v1468_v54 = vadd.f32 %v1467_v44, %v2919_v26  ;;  %v1499_v56 = vpop.f32.mrb[67].mxu1 }
 0x17b   :  { %v1559_v24 = vadd.f32 %v2966_v3, %v1536_v45  ;;  %v1542_v21 = vmul.f32 %v2958_v33, %v1497_v47  ;;  %v1537_v58 = vmul.f32 %v2958_v33, %v1476_v48  ;;  %v1500_v38 = vadd.f32 %v1499_v56, %v2943_v39 }
 0x17c   :  { %v1567_v46 = vadd.f32 %v2966_v3, %v1544_v50  ;;  %v1557_v41 = vadd.f32 %v2966_v3, %v1534_v19  ;;  %v1545_v60 = vmul.f32 %v2958_v33, %v1508_v52  ;;  %v1535_v61 = vmul.f32 %v2958_v33, %v1468_v54 }
 0x17d   :  { %vm1575_vm0 = vcmp.gt.f32.partialorder %v1559_v24, 0.0  ;;  %v1591_v59 = vmul.f32 0.1, %v1559_v24  ;;  %v1565_v26 = vadd.f32 %v2966_v3, %v1542_v21  ;;  %v1560_v43 = vadd.f32 %v2966_v3, %v1537_v58 }
 0x17e   :  { %vm1583_vm1 = vcmp.gt.f32.partialorder %v1567_v46, 0.0  ;;  %v1599_v63 = vmul.f32 0.1, %v1567_v46  ;;  %vm1573_vm2 = vcmp.gt.f32.partialorder %v1557_v41, 0.0  ;;  %v1589_v1 = vmul.f32 0.1, %v1557_v41 }
 0x17f   :  { %v1607_v2 = vsel %vm1575_vm0, %v1559_v24, %v1591_v59  ;;  %vm1581_vm3 = vcmp.gt.f32.partialorder %v1565_v26, 0.0  ;;  %v1597_v39 = vmul.f32 0.1, %v1565_v26  ;;  %vm1576_vm4 = vcmp.gt.f32.partialorder %v1560_v43, 0.0  ;;  %v2224_v4 = vpop.f32.mrb[68].mxu0  ;;  %v2232_v8 = vpop.f32.mrb[68].mxu1 }
 0x180   :  { %v1615_v9 = vsel %vm1583_vm1, %v1567_v46, %v1599_v63  ;;  %v1605_v10 = vsel %vm1573_vm2, %v1557_v41, %v1589_v1  ;;  %v1592_v35 = vmul.f32 0.1, %v1560_v43  ;;  %v1568_v11 = vadd.f32 %v2966_v3, %v1545_v60  ;;  %v1480_v12 = vpop.f32.mrb[69].mxu0  ;;  %v1512_v37 = vpop.f32.mrb[69].mxu1 }
 0x181   :  { %v1613_v14 = vsel %vm1581_vm3, %v1565_v26, %v1597_v39  ;;  %v1558_v15 = vadd.f32 %v2966_v3, %v1535_v61  ;;  %v1543_v57 = vmul.f32 %v2958_v33, %v1500_v38  ;;  %v1489_v17 = vadd.f32 %v2224_v4, %v2935_v16  ;;  %v2225_v20 = vpop.f32.mrb[70].mxu0  ;;  %v2233_v22 = vpop.f32.mrb[70].mxu1 }
 0x182   :  { %v1608_v23 = vsel %vm1576_vm4, %v1560_v43, %v1592_v35  ;;  %vm1584_vm5 = vcmp.gt.f32.partialorder %v1568_v11, 0.0  ;;  %v1600_v25 = vmul.f32 0.1, %v1568_v11  ;;  %v1521_v51 = vadd.f32 %v2232_v8, %v1424_v32  ;;  %v1483_v28 = vpop.f32.mrb[71].mxu0  ;;  %v1515_v30 = vpop.f32.mrb[71].mxu1 }
 0x183   :  { %v1891_v31 = vpack.c.bf16 %v1608_v23, %v1607_v2  ;;  %vm1574_vm6 = vcmp.gt.f32.partialorder %v1558_v15, 0.0  ;;  %v1590_v53 = vmul.f32 0.1, %v1558_v15  ;;  %v1566_v5 = vadd.f32 %v2966_v3, %v1543_v57 }
 0x184   :  { %v1616_v36 = vsel %vm1584_vm5, %v1568_v11, %v1600_v25  ;;  %v1540_v7 = vmul.f32 %v2958_v33, %v1489_v17  ;;  %v1548_v27 = vmul.f32 %v2958_v33, %v1521_v51  ;;  %v1481_v16 = vadd.f32 %v1480_v12, %v2929_v62 }
 0x185   :  { %1923 = vst [vmem:[%s3042_s4 + $0x8] sm:$0xff] %v1891_v31   ;;  %v1911_v40 = vpack.c.bf16 %v1616_v36, %v1615_v9  ;;  %v1606_v32 = vsel %vm1574_vm6, %v1558_v15, %v1590_v53  ;;  %vm1582_vm7 = vcmp.gt.f32.partialorder %v1566_v5, 0.0  ;;  %v1598_v6 = vmul.f32 0.1, %v1566_v5 }
 0x186   :  { %v1886_v42 = vpack.c.bf16 %v1606_v32, %v1605_v10  ;;  %v1563_v29 = vadd.f32 %v2966_v3, %v1540_v7  ;;  %v1571_v45 = vadd.f32 %v2966_v3, %v1548_v27  ;;  %v1538_v47 = vmul.f32 %v2958_v33, %v1481_v16 }
 0x187   :  { %1927 = vst [vmem:[%s3042_s4 + $0x28] sm:$0xff] %v1911_v40   ;;  %v1614_v62 = vsel %vm1582_vm7, %v1566_v5, %v1598_v6  ;;  %v1513_v48 = vadd.f32 %v1512_v37, %v2949_v55  ;;  %v1492_v49 = vadd.f32 %v2225_v20, %v2937_v18  ;;  %v1524_v44 = vadd.f32 %v2233_v22, %v2960_v34 }
 0x188   :  { %1887 = vst [vmem:[%s3042_s4] sm:$0xff] %v1886_v42   ;;  %v1906_v50 = vpack.c.bf16 %v1614_v62, %v1613_v14  ;;  %vm1579_vm8 = vcmp.gt.f32.partialorder %v1563_v29, 0.0  ;;  %v1595_v19 = vmul.f32 0.1, %v1563_v29  ;;  %v1603_v52 = vmul.f32 0.1, %v1571_v45 }
 0x189   :  { %v1546_v54 = vmul.f32 %v2958_v33, %v1513_v48  ;;  %v1541_v56 = vmul.f32 %v2958_v33, %v1492_v49  ;;  %vm1587_vm9 = vcmp.gt.f32.partialorder %v1571_v45, 0.0  ;;  %v1549_v18 = vmul.f32 %v2958_v33, %v1524_v44 }
 0x18a   :  { %1926 = vst [vmem:[%s3042_s4 + $0x20] sm:$0xff] %v1906_v50   ;;  %v1484_v55 = vadd.f32 %v1483_v28, %v2931_v0  ;;  %v1516_v34 = vadd.f32 %v1515_v30, %v2951_v13  ;;  %v1561_v24 = vadd.f32 %v2966_v3, %v1538_v47  ;;  %v1611_v60 = vsel %vm1579_vm8, %v1563_v29, %v1595_v19 }
 0x18b   :  { %v1569_v21 = vadd.f32 %v2966_v3, %v1546_v54  ;;  %v1564_v58 = vadd.f32 %v2966_v3, %v1541_v56  ;;  %v1572_v38 = vadd.f32 %v2966_v3, %v1549_v18  ;;  %v1619_v61 = vsel %vm1587_vm9, %v1571_v45, %v1603_v52 }
 0x18c   :  { %v1539_v46 = vmul.f32 %v2958_v33, %v1484_v55  ;;  %v1547_v41 = vmul.f32 %v2958_v33, %v1516_v34  ;;  %vm1577_vm12 = vcmp.gt.f32.partialorder %v1561_v24, 0.0  ;;  %v1593_v13 = vmul.f32 0.1, %v1561_v24 }
 0x18d   :  { %vm1580_vm10 = vcmp.gt.f32.partialorder %v1564_v58, 0.0  ;;  %v1596_v59 = vmul.f32 0.1, %v1564_v58  ;;  %vm1588_vm11 = vcmp.gt.f32.partialorder %v1572_v38, 0.0  ;;  %v1604_v0 = vmul.f32 0.1, %v1572_v38 }
 0x18e   :  { %v1562_v26 = vadd.f32 %v2966_v3, %v1539_v46  ;;  %v1570_v43 = vadd.f32 %v2966_v3, %v1547_v41  ;;  %vm1585_vm13 = vcmp.gt.f32.partialorder %v1569_v21, 0.0  ;;  %v1601_v63 = vmul.f32 0.1, %v1569_v21 }
 0x18f   :  { %v1612_v1 = vsel %vm1580_vm10, %v1564_v58, %v1596_v59  ;;  %v1620_v2 = vsel %vm1588_vm11, %v1572_v38, %v1604_v0  ;;  %v1609_v9 = vsel %vm1577_vm12, %v1561_v24, %v1593_v13 }
 0x190   :  { %v1901_v39 = vpack.c.bf16 %v1612_v1, %v1611_v60  ;;  %v1921_v4 = vpack.c.bf16 %v1620_v2, %v1619_v61  ;;  %vm1578_vm14 = vcmp.gt.f32.partialorder %v1562_v26, 0.0  ;;  %v1594_v33 = vmul.f32 0.1, %v1562_v26 }
 0x191   :  { %vm1586_vm15 = vcmp.gt.f32.partialorder %v1570_v43, 0.0  ;;  %v1602_v8 = vmul.f32 0.1, %v1570_v43  ;;  %v1617_v10 = vsel %vm1585_vm13, %v1569_v21, %v1601_v63 }
 0x192   :  { %1925 = vst [vmem:[%s3042_s4 + $0x18] sm:$0xff] %v1901_v39   ;;  %1929 = vst [vmem:[%s3042_s4 + $0x38] sm:$0xff] %v1921_v4   ;;  %v1610_v3 = vsel %vm1578_vm14, %v1562_v26, %v1594_v33 }
 0x193   :  { %v1896_v35 = vpack.c.bf16 %v1610_v3, %v1609_v9  ;;  %v1618_v11 = vsel %vm1586_vm15, %v1570_v43, %v1602_v8 }
 0x194   :  { %v1916_v12 = vpack.c.bf16 %v1618_v11, %v1617_v10 }
 0x195   :  { %1924 = vst [vmem:[%s3042_s4 + $0x10] sm:$0xff] %v1896_v35  }
 0x196   :  { %1928 = vst [vmem:[%s3042_s4 + $0x30] sm:$0xff] %v1916_v12  }

// kernel: yolov3_forward.13
= control target key start
LH: loop header
LB: loop body
LE: loop exit
PB: predicated region body
PF: predicated region fallthrough
CT: control target
= control target key end

     0   :  { %s737_s1 = inlined_call_operand.vmem [shape: bf16[128,128], index: 1, kind: input, shape index: {}]   ;;  %s738_s0 = inlined_call_operand.vmem [shape: bf16[128,128], index: 0, kind: input, shape index: {}]   ;;  %s739_s2 = inlined_call_operand.vmem [shape: f32[1,128], index: 2, kind: input, shape index: {}]   ;;  %s740_s3 = inlined_call_operand.vmem [shape: f32[1,128], index: 3, kind: input, shape index: {}]   ;;  %s741_s4 = inlined_call_operand.vmem [shape: bf16[128,128], index: 4, kind: output, shape index: {}]  }
   0x1   :  { %v582_v0 = vld [vmem:[%s737_s1] sm:$0xff]   ;;  %v583_v1 = vld [vmem:[%s737_s1 + $0x8] sm:$0xff]   ;;  %v584_v2 = vld [vmem:[%s737_s1 + $0x10] sm:$0xff]  }
   0x2   :  { %534 = vmatprep.subr.bf16.mxu0 %v582_v0  ;;  %566 = vmatprep.subr.bf16.mxu1 %v582_v0  ;;  %v585_v3 = vld [vmem:[%s737_s1 + $0x18] sm:$0xff]   ;;  %v590_v4 = vld [vmem:[%s738_s0] sm:$0xff]   ;;  %v587_v7 = vld [vmem:[%s737_s1 + $0x28] sm:$0xff]  }
   0x3   :  { %535 = vmatpush3.bf16.msra.mxu0 %v582_v0  ;;  %574 = vmatpush3.bf16.msra.mxu1 %v582_v0  ;;  %v591_v5 = vld [vmem:[%s738_s0 + $0x20] sm:$0xff]   ;;  %v588_v8 = vld [vmem:[%s737_s1 + $0x30] sm:$0xff]   ;;  %v589_v9 = vld [vmem:[%s737_s1 + $0x38] sm:$0xff]  }
   0x4   :  { %536 = vmatprep.subr.bf16.mxu0 %v583_v1  ;;  %567 = vmatprep.subr.bf16.mxu1 %v583_v1  ;;  %v586_v6 = vld [vmem:[%s737_s1 + $0x20] sm:$0xff]   ;;  %v592_v10 = vld [vmem:[%s738_s0 + $0x8] sm:$0xff]   ;;  %v594_v12 = vld [vmem:[%s738_s0 + $0x10] sm:$0xff]  }
   0x5   :  { %550 = vmatprep.mubr.bf16.mxu0 %v590_v4  ;;  %558 = vmatprep.mubr.bf16.mxu1 %v591_v5  ;;  %v593_v11 = vld [vmem:[%s738_s0 + $0x28] sm:$0xff]   ;;  %v595_v13 = vld [vmem:[%s738_s0 + $0x30] sm:$0xff]   ;;  %v596_v14 = vld [vmem:[%s738_s0 + $0x18] sm:$0xff]  }
   0x6   :  { %v597_v15 = vld [vmem:[%s738_s0 + $0x38] sm:$0xff]   ;;  %v674_v16 = vld [vmem:[%s739_s2] ss:$0 sm:$0xff] }
   0x7   :  { %537 = vmatpush3.bf16.msra.mxu0 %v583_v1  ;;  %575 = vmatpush3.bf16.msra.mxu1 %v583_v1  ;;  %v679_v18 = vld [vmem:[%s740_s3] ss:$0 sm:$0xff] }
   0x8   :  { %538 = vmatprep.subr.bf16.mxu0 %v584_v2  ;;  %568 = vmatprep.subr.bf16.mxu1 %v584_v2 }
   0xb   :  { %539 = vmatpush3.bf16.msra.mxu0 %v584_v2  ;;  %576 = vmatpush3.bf16.msra.mxu1 %v584_v2 }
   0xc   :  { %540 = vmatprep.subr.bf16.mxu0 %v585_v3  ;;  %569 = vmatprep.subr.bf16.mxu1 %v585_v3 }
   0xf   :  { %541 = vmatpush3.bf16.msra.mxu0 %v585_v3  ;;  %577 = vmatpush3.bf16.msra.mxu1 %v585_v3 }
  0x10   :  { %542 = vmatprep.subr.bf16.mxu0 %v586_v6  ;;  %570 = vmatprep.subr.bf16.mxu1 %v586_v6 }
  0x13   :  { %543 = vmatpush3.bf16.msra.mxu0 %v586_v6  ;;  %578 = vmatpush3.bf16.msra.mxu1 %v586_v6 }
  0x14   :  { %544 = vmatprep.subr.bf16.mxu0 %v587_v7  ;;  %571 = vmatprep.subr.bf16.mxu1 %v587_v7 }
  0x17   :  { %545 = vmatpush3.bf16.msra.mxu0 %v587_v7  ;;  %579 = vmatpush3.bf16.msra.mxu1 %v587_v7 }
  0x18   :  { %546 = vmatprep.subr.bf16.mxu0 %v588_v8  ;;  %572 = vmatprep.subr.bf16.mxu1 %v588_v8 }
  0x1b   :  { %547 = vmatpush3.bf16.msra.mxu0 %v588_v8  ;;  %580 = vmatpush3.bf16.msra.mxu1 %v588_v8 }
  0x1c   :  { %548 = vmatprep.subr.bf16.mxu0 %v589_v9  ;;  %573 = vmatprep.subr.bf16.mxu1 %v589_v9 }
  0x1f   :  { %549 = vmatpush3.bf16.msra.mxu0 %v589_v9  ;;  %581 = vmatpush3.bf16.msra.mxu1 %v589_v9 }
  0x22   :  { %551 = vmatmul.mubr.bf16.vlgmr.msra.gmra.mrb[0].mxu0 %v592_v10  ;;  %559 = vmatmul.mubr.bf16.vlgmr.msra.gmra.mrb[0].mxu1 %v593_v11 }
  0x23   :  { %554 = vmatprep.mubr.bf16.mxu0 %v594_v12  ;;  %562 = vmatprep.mubr.bf16.mxu1 %v595_v13 }
  0x2a   :  { %555 = vmatmul.mubr.bf16.gmra.mrb[4].mxu0 %v596_v14  ;;  %563 = vmatmul.mubr.bf16.gmra.mrb[4].mxu1 %v597_v15 }
  0xf5   :  { %v552_v17 = vpop.f32.mrb[0].mxu0  ;;  %v560_v19 = vpop.f32.mrb[0].mxu1 }
  0xf6   :  { %v252_v20 = vmul.f32 %v552_v17, %v674_v16  ;;  %v260_v21 = vmul.f32 %v560_v19, %v674_v16  ;;  %v180_v22 = vpop.f32.mrb[1].mxu0  ;;  %v212_v23 = vpop.f32.mrb[1].mxu1 }
  0xf7   :  { %v250_v24 = vmul.f32 %v674_v16, %v180_v22  ;;  %v258_v25 = vmul.f32 %v674_v16, %v212_v23  ;;  %v553_v26 = vpop.f32.mrb[2].mxu0  ;;  %v561_v27 = vpop.f32.mrb[2].mxu1 }
  0xf8   :  { %v275_v28 = vadd.f32 %v679_v18, %v252_v20  ;;  %v283_v29 = vadd.f32 %v679_v18, %v260_v21  ;;  %v253_v30 = vmul.f32 %v553_v26, %v674_v16  ;;  %v261_v31 = vmul.f32 %v561_v27, %v674_v16  ;;  %v183_v32 = vpop.f32.mrb[3].mxu0  ;;  %v215_v33 = vpop.f32.mrb[3].mxu1 }
  0xf9   :  { %v273_v34 = vadd.f32 %v679_v18, %v250_v24  ;;  %v281_v35 = vadd.f32 %v679_v18, %v258_v25  ;;  %v251_v36 = vmul.f32 %v674_v16, %v183_v32  ;;  %v259_v37 = vmul.f32 %v674_v16, %v215_v33 }
  0xfa   :  { %vm291_vm0 = vcmp.gt.f32.partialorder %v275_v28, 0.0  ;;  %v307_v38 = vmul.f32 0.1, %v275_v28  ;;  %vm299_vm1 = vcmp.gt.f32.partialorder %v283_v29, 0.0  ;;  %v315_v39 = vmul.f32 0.1, %v283_v29 }
  0xfb   :  { %vm289_vm2 = vcmp.gt.f32.partialorder %v273_v34, 0.0  ;;  %v305_v40 = vmul.f32 0.1, %v273_v34  ;;  %vm297_vm3 = vcmp.gt.f32.partialorder %v281_v35, 0.0  ;;  %v313_v41 = vmul.f32 0.1, %v281_v35 }
  0xfc   :  { %v323_v42 = vsel %vm291_vm0, %v275_v28, %v307_v38  ;;  %v331_v43 = vsel %vm299_vm1, %v283_v29, %v315_v39  ;;  %v276_v44 = vadd.f32 %v679_v18, %v253_v30  ;;  %v284_v45 = vadd.f32 %v679_v18, %v261_v31 }
  0xfd   :  { %v321_v46 = vsel %vm289_vm2, %v273_v34, %v305_v40  ;;  %v329_v47 = vsel %vm297_vm3, %v281_v35, %v313_v41  ;;  %v274_v48 = vadd.f32 %v679_v18, %v251_v36  ;;  %v282_v49 = vadd.f32 %v679_v18, %v259_v37  ;;  %v556_v50 = vpop.f32.mrb[4].mxu0  ;;  %v564_v51 = vpop.f32.mrb[4].mxu1 }
  0xfe   :  { %vm292_vm4 = vcmp.gt.f32.partialorder %v276_v44, 0.0  ;;  %v308_v52 = vmul.f32 0.1, %v276_v44  ;;  %vm300_vm5 = vcmp.gt.f32.partialorder %v284_v45, 0.0  ;;  %v316_v53 = vmul.f32 0.1, %v284_v45 }
  0xff   :  { %vm290_vm6 = vcmp.gt.f32.partialorder %v274_v48, 0.0  ;;  %v306_v54 = vmul.f32 0.1, %v274_v48  ;;  %vm298_vm7 = vcmp.gt.f32.partialorder %v282_v49, 0.0  ;;  %v314_v55 = vmul.f32 0.1, %v282_v49 }
 0x100   :  { %v324_v56 = vsel %vm292_vm4, %v276_v44, %v308_v52  ;;  %v332_v57 = vsel %vm300_vm5, %v284_v45, %v316_v53  ;;  %v256_v58 = vmul.f32 %v556_v50, %v674_v16  ;;  %v264_v59 = vmul.f32 %v564_v51, %v674_v16  ;;  %v196_v60 = vpop.f32.mrb[5].mxu0  ;;  %v228_v61 = vpop.f32.mrb[5].mxu1 }
 0x101   :  { %v479_v62 = vpack.c.bf16 %v324_v56, %v323_v42  ;;  %v499_v63 = vpack.c.bf16 %v332_v57, %v331_v43  ;;  %v322_v0 = vsel %vm290_vm6, %v274_v48, %v306_v54  ;;  %v330_v1 = vsel %vm298_vm7, %v282_v49, %v314_v55  ;;  %v557_v2 = vpop.f32.mrb[6].mxu0  ;;  %v565_v3 = vpop.f32.mrb[6].mxu1 }
 0x102   :  { %v474_v4 = vpack.c.bf16 %v322_v0, %v321_v46  ;;  %v494_v5 = vpack.c.bf16 %v330_v1, %v329_v47  ;;  %v279_v6 = vadd.f32 %v679_v18, %v256_v58  ;;  %v287_v7 = vadd.f32 %v679_v18, %v264_v59  ;;  %v199_v8 = vpop.f32.mrb[7].mxu0  ;;  %v231_v9 = vpop.f32.mrb[7].mxu1 }
 0x103   :  { %511 = vst [vmem:[%s741_s4 + $0x8] sm:$0xff] %v479_v62   ;;  %515 = vst [vmem:[%s741_s4 + $0x28] sm:$0xff] %v499_v63   ;;  %v254_v10 = vmul.f32 %v674_v16, %v196_v60  ;;  %v262_v11 = vmul.f32 %v674_v16, %v228_v61  ;;  %v257_v12 = vmul.f32 %v557_v2, %v674_v16 }
 0x104   :  { %v265_v13 = vmul.f32 %v565_v3, %v674_v16  ;;  %475 = vst [vmem:[%s741_s4] sm:$0xff] %v474_v4   ;;  %514 = vst [vmem:[%s741_s4 + $0x20] sm:$0xff] %v494_v5   ;;  %vm295_vm8 = vcmp.gt.f32.partialorder %v279_v6, 0.0  ;;  %v311_v14 = vmul.f32 0.1, %v279_v6  ;;  %vm303_vm9 = vcmp.gt.f32.partialorder %v287_v7, 0.0 }
 0x105   :  { %v319_v15 = vmul.f32 0.1, %v287_v7  ;;  %v277_v17 = vadd.f32 %v679_v18, %v254_v10  ;;  %v280_v19 = vadd.f32 %v679_v18, %v257_v12  ;;  %v285_v21 = vadd.f32 %v679_v18, %v262_v11 }
 0x106   :  { %v288_v20 = vadd.f32 %v679_v18, %v265_v13  ;;  %v255_v22 = vmul.f32 %v674_v16, %v199_v8  ;;  %v263_v23 = vmul.f32 %v674_v16, %v231_v9  ;;  %v327_v24 = vsel %vm295_vm8, %v279_v6, %v311_v14 }
 0x107   :  { %v335_v25 = vsel %vm303_vm9, %v287_v7, %v319_v15  ;;  %vm296_vm10 = vcmp.gt.f32.partialorder %v280_v19, 0.0  ;;  %v312_v26 = vmul.f32 0.1, %v280_v19  ;;  %vm293_vm12 = vcmp.gt.f32.partialorder %v277_v17, 0.0 }
 0x108   :  { %vm304_vm11 = vcmp.gt.f32.partialorder %v288_v20, 0.0  ;;  %v320_v27 = vmul.f32 0.1, %v288_v20  ;;  %v309_v28 = vmul.f32 0.1, %v277_v17  ;;  %v278_v29 = vadd.f32 %v679_v18, %v255_v22 }
 0x109   :  { %v286_v30 = vadd.f32 %v679_v18, %v263_v23  ;;  %vm301_vm13 = vcmp.gt.f32.partialorder %v285_v21, 0.0  ;;  %v317_v31 = vmul.f32 0.1, %v285_v21  ;;  %v328_v32 = vsel %vm296_vm10, %v280_v19, %v312_v26 }
 0x10a   :  { %v336_v33 = vsel %vm304_vm11, %v288_v20, %v320_v27  ;;  %v489_v34 = vpack.c.bf16 %v328_v32, %v327_v24  ;;  %vm294_vm14 = vcmp.gt.f32.partialorder %v278_v29, 0.0  ;;  %v310_v16 = vmul.f32 0.1, %v278_v29 }
 0x10b   :  { %v509_v35 = vpack.c.bf16 %v336_v33, %v335_v25  ;;  %vm302_vm15 = vcmp.gt.f32.partialorder %v286_v30, 0.0  ;;  %v318_v36 = vmul.f32 0.1, %v286_v30  ;;  %v325_v37 = vsel %vm293_vm12, %v277_v17, %v309_v28 }
 0x10c   :  { %513 = vst [vmem:[%s741_s4 + $0x18] sm:$0xff] %v489_v34   ;;  %v326_v18 = vsel %vm294_vm14, %v278_v29, %v310_v16  ;;  %v333_v38 = vsel %vm301_vm13, %v285_v21, %v317_v31 }
 0x10d   :  { %517 = vst [vmem:[%s741_s4 + $0x38] sm:$0xff] %v509_v35   ;;  %v484_v39 = vpack.c.bf16 %v326_v18, %v325_v37  ;;  %v334_v40 = vsel %vm302_vm15, %v286_v30, %v318_v36 }
 0x10e   :  { %v504_v41 = vpack.c.bf16 %v334_v40, %v333_v38 }
 0x10f   :  { %512 = vst [vmem:[%s741_s4 + $0x10] sm:$0xff] %v484_v39  }
 0x110   :  { %516 = vst [vmem:[%s741_s4 + $0x30] sm:$0xff] %v504_v41  }

// kernel: yolov3_forward.11
= control target key start
LH: loop header
LB: loop body
LE: loop exit
PB: predicated region body
PF: predicated region fallthrough
CT: control target
= control target key end

     0   :  { %s1667_s1 = inlined_call_operand.vmem [shape: bf16[1152,128], index: 1, kind: input, shape index: {}]   ;;  %s1668_s0 = inlined_call_operand.vmem [shape: bf16[32,1152], index: 0, kind: input, shape index: {}]   ;;  %s1669_s2 = inlined_call_operand.vmem [shape: f32[1,128], index: 2, kind: input, shape index: {}]   ;;  %s1670_s3 = inlined_call_operand.vmem [shape: f32[1,128], index: 3, kind: input, shape index: {}]   ;;  %s1671_s4 = inlined_call_operand.vmem [shape: bf16[32,128], index: 4, kind: output, shape index: {}]  }
   0x1   :  { %v1262_v0 = vld [vmem:[%s1667_s1 + $0x40] sm:$0xff]   ;;  %v1266_v4 = vld [vmem:[%s1667_s1 + $0x48] sm:$0xff]   ;;  %v1270_v8 = vld [vmem:[%s1667_s1 + $0x50] sm:$0xff]  }
   0x2   :  { %v1263_v1 = vld [vmem:[%s1667_s1 + $0xc0] sm:$0xff]   ;;  %1120 = vmatprep.subr.bf16.mxu0 %v1262_v0  ;;  %v1267_v5 = vld [vmem:[%s1667_s1 + $0xc8] sm:$0xff]   ;;  %v1271_v9 = vld [vmem:[%s1667_s1 + $0xd0] sm:$0xff]  }
   0x3   :  { %v1264_v2 = vld [vmem:[%s1667_s1] sm:$0xff]   ;;  %1148 = vmatprep.subr.bf16.mxu1 %v1263_v1  ;;  %v1268_v6 = vld [vmem:[%s1667_s1 + $0x8] sm:$0xff]   ;;  %v1272_v10 = vld [vmem:[%s1667_s1 + $0x10] sm:$0xff]  }
   0x4   :  { %v1265_v3 = vld [vmem:[%s1667_s1 + $0x80] sm:$0xff]   ;;  %1121 = vmatpush3.bf16.msra.mxu0 %v1264_v2  ;;  %v1269_v7 = vld [vmem:[%s1667_s1 + $0x88] sm:$0xff]   ;;  %v1273_v11 = vld [vmem:[%s1667_s1 + $0x90] sm:$0xff]  }
   0x5   :  { %1149 = vmatpush3.bf16.msra.mxu1 %v1265_v3  ;;  %1122 = vmatprep.subr.bf16.mxu0 %v1266_v4  ;;  %v1274_v12 = vld [vmem:[%s1667_s1 + $0x58] sm:$0xff]   ;;  %v1278_v16 = vld [vmem:[%s1667_s1 + $0x60] sm:$0xff]   ;;  %v1282_v20 = vld [vmem:[%s1667_s1 + $0x68] sm:$0xff]  }
   0x6   :  { %1150 = vmatprep.subr.bf16.mxu1 %v1267_v5  ;;  %v1275_v13 = vld [vmem:[%s1667_s1 + $0xd8] sm:$0xff]   ;;  %v1279_v17 = vld [vmem:[%s1667_s1 + $0xe0] sm:$0xff]   ;;  %v1283_v21 = vld [vmem:[%s1667_s1 + $0xe8] sm:$0xff]  }
   0x7   :  { %v1276_v14 = vld [vmem:[%s1667_s1 + $0x18] sm:$0xff]   ;;  %v1280_v18 = vld [vmem:[%s1667_s1 + $0x20] sm:$0xff]   ;;  %v1284_v22 = vld [vmem:[%s1667_s1 + $0x28] sm:$0xff]  }
   0x8   :  { %1123 = vmatpush3.bf16.msra.mxu0 %v1268_v6  ;;  %v1277_v15 = vld [vmem:[%s1667_s1 + $0x98] sm:$0xff]   ;;  %v1281_v19 = vld [vmem:[%s1667_s1 + $0xa0] sm:$0xff]   ;;  %v1285_v23 = vld [vmem:[%s1667_s1 + $0xa8] sm:$0xff]  }
   0x9   :  { %1151 = vmatpush3.bf16.msra.mxu1 %v1269_v7  ;;  %1124 = vmatprep.subr.bf16.mxu0 %v1270_v8  ;;  %v1286_v24 = vld [vmem:[%s1667_s1 + $0x70] sm:$0xff]   ;;  %v1290_v28 = vld [vmem:[%s1667_s1 + $0x78] sm:$0xff]   ;;  %v1294_v32 = vld [vmem:[%s1668_s0] ss:$36 sps:$4 sm:$0xff]  }
   0xa   :  { %1152 = vmatprep.subr.bf16.mxu1 %v1271_v9  ;;  %v1287_v25 = vld [vmem:[%s1667_s1 + $0xf0] sm:$0xff]   ;;  %v1291_v29 = vld [vmem:[%s1667_s1 + $0xf8] sm:$0xff]   ;;  %v1296_v33 = vld [vmem:[%s1668_s0 + $0x4] ss:$36 sps:$4 sm:$0xff]  }
   0xb   :  { %v1288_v26 = vld [vmem:[%s1667_s1 + $0x30] sm:$0xff]   ;;  %v1292_v30 = vld [vmem:[%s1667_s1 + $0x38] sm:$0xff]   ;;  %v1297_v34 = vld [vmem:[%s1668_s0 + $0x8] ss:$36 sps:$4 sm:$0xff]   ;;  %738 = vmatprep.mubr.bf16.mxu0 %v1296_v33 }
   0xc   :  { %1125 = vmatpush3.bf16.msra.mxu0 %v1272_v10  ;;  %v1289_v27 = vld [vmem:[%s1667_s1 + $0xb0] sm:$0xff]   ;;  %v1293_v31 = vld [vmem:[%s1667_s1 + $0xb8] sm:$0xff]   ;;  %v1300_v36 = vld [vmem:[%s1667_s1 + $0x140] sm:$0xff]  }
   0xd   :  { %1153 = vmatpush3.bf16.msra.mxu1 %v1273_v11  ;;  %1126 = vmatprep.subr.bf16.mxu0 %v1274_v12  ;;  %v1299_v35 = vld [vmem:[%s1668_s0 + $0xc] ss:$36 sps:$4 sm:$0xff]   ;;  %v1301_v37 = vld [vmem:[%s1667_s1 + $0x100] sm:$0xff]   ;;  %v1312_v48 = vld [vmem:[%s1667_s1 + $0x158] sm:$0xff]  }
   0xe   :  { %1154 = vmatprep.subr.bf16.mxu1 %v1275_v13  ;;  %787 = vmatprep.mubr.bf16.mxu1 %v1299_v35  ;;  %v1302_v38 = vld [vmem:[%s1667_s1 + $0x1c0] sm:$0xff]   ;;  %v1304_v40 = vld [vmem:[%s1667_s1 + $0x148] sm:$0xff]   ;;  %v1308_v44 = vld [vmem:[%s1667_s1 + $0x150] sm:$0xff]  }
   0xf   :  { %v1303_v39 = vld [vmem:[%s1667_s1 + $0x180] sm:$0xff]   ;;  %v1305_v41 = vld [vmem:[%s1667_s1 + $0x108] sm:$0xff]   ;;  %v1309_v45 = vld [vmem:[%s1667_s1 + $0x110] sm:$0xff]  }
  0x10   :  { %1127 = vmatpush3.bf16.msra.mxu0 %v1276_v14  ;;  %v1306_v42 = vld [vmem:[%s1667_s1 + $0x1c8] sm:$0xff]   ;;  %v1310_v46 = vld [vmem:[%s1667_s1 + $0x1d0] sm:$0xff]   ;;  %v1313_v49 = vld [vmem:[%s1667_s1 + $0x118] sm:$0xff]  }
  0x11   :  { %1155 = vmatpush3.bf16.msra.mxu1 %v1277_v15  ;;  %1128 = vmatprep.subr.bf16.mxu0 %v1278_v16  ;;  %v1307_v43 = vld [vmem:[%s1667_s1 + $0x188] sm:$0xff]   ;;  %v1311_v47 = vld [vmem:[%s1667_s1 + $0x190] sm:$0xff]   ;;  %v1314_v50 = vld [vmem:[%s1667_s1 + $0x1d8] sm:$0xff]  }
  0x12   :  { %1156 = vmatprep.subr.bf16.mxu1 %v1279_v17  ;;  %v1315_v51 = vld [vmem:[%s1667_s1 + $0x198] sm:$0xff]   ;;  %v1316_v52 = vld [vmem:[%s1667_s1 + $0x160] sm:$0xff]   ;;  %v1320_v56 = vld [vmem:[%s1667_s1 + $0x168] sm:$0xff]  }
  0x13   :  { %v1317_v53 = vld [vmem:[%s1667_s1 + $0x120] sm:$0xff]   ;;  %v1321_v57 = vld [vmem:[%s1668_s0 + $0x4c] ss:$36 sps:$4 sm:$0xff]   ;;  %v1323_v58 = vld [vmem:[%s1668_s0 + $0x54] ss:$36 sps:$4 sm:$0xff]  }
  0x14   :  { %1129 = vmatpush3.bf16.msra.mxu0 %v1280_v18  ;;  %v1318_v54 = vld [vmem:[%s1667_s1 + $0x1e0] sm:$0xff]   ;;  %v1325_v59 = vld [vmem:[%s1667_s1 + $0x128] sm:$0xff]   ;;  %v1327_v61 = vld [vmem:[%s1668_s0 + $0x50] ss:$36 sps:$4 sm:$0xff]  }
  0x15   :  { %1157 = vmatpush3.bf16.msra.mxu1 %v1281_v19  ;;  %1130 = vmatprep.subr.bf16.mxu0 %v1282_v20  ;;  %v1319_v55 = vld [vmem:[%s1667_s1 + $0x1a0] sm:$0xff]   ;;  %v1326_v60 = vld [vmem:[%s1668_s0 + $0x48] ss:$36 sps:$4 sm:$0xff]   ;;  %v1330_v0 = vld [vmem:[%s1667_s1 + $0x170] sm:$0xff]  }
  0x16   :  { %1158 = vmatprep.subr.bf16.mxu1 %v1283_v21  ;;  %v1328_v62 = vld [vmem:[%s1667_s1 + $0x1e8] sm:$0xff]   ;;  %v1331_v1 = vld [vmem:[%s1667_s1 + $0x130] sm:$0xff]   ;;  %v1334_v4 = vld [vmem:[%s1667_s1 + $0x178] sm:$0xff]  }
  0x17   :  { %v1329_v63 = vld [vmem:[%s1667_s1 + $0x1a8] sm:$0xff]   ;;  %v1332_v2 = vld [vmem:[%s1667_s1 + $0x1f0] sm:$0xff]   ;;  %v1335_v5 = vld [vmem:[%s1667_s1 + $0x138] sm:$0xff]  }
  0x18   :  { %1131 = vmatpush3.bf16.msra.mxu0 %v1284_v22  ;;  %v1333_v3 = vld [vmem:[%s1667_s1 + $0x1b0] sm:$0xff]   ;;  %v1336_v6 = vld [vmem:[%s1667_s1 + $0x1f8] sm:$0xff]   ;;  %v1341_v10 = vld [vmem:[%s1667_s1 + $0x200] sm:$0xff]  }
  0x19   :  { %1159 = vmatpush3.bf16.msra.mxu1 %v1285_v23  ;;  %1132 = vmatprep.subr.bf16.mxu0 %v1286_v24  ;;  %v1337_v7 = vld [vmem:[%s1668_s0 + $0x10] ss:$36 sps:$4 sm:$0xff]   ;;  %v1340_v9 = vld [vmem:[%s1667_s1 + $0x1b8] sm:$0xff]   ;;  %v1345_v13 = vld [vmem:[%s1667_s1 + $0x208] sm:$0xff]  }
  0x1a   :  { %1160 = vmatprep.subr.bf16.mxu1 %v1287_v25  ;;  %v1339_v8 = vld [vmem:[%s1668_s0 + $0x14] ss:$36 sps:$4 sm:$0xff]   ;;  %v1344_v12 = vld [vmem:[%s1668_s0 + $0x1c] ss:$36 sps:$4 sm:$0xff]   ;;  %v1350_v17 = vld [vmem:[%s1668_s0 + $0x64] ss:$36 sps:$4 sm:$0xff]  }
  0x1b   :  { %v1342_v11 = vld [vmem:[%s1668_s0 + $0x18] ss:$36 sps:$4 sm:$0xff]   ;;  %v1349_v16 = vld [vmem:[%s1667_s1 + $0x210] sm:$0xff]   ;;  %v1352_v18 = vld [vmem:[%s1668_s0 + $0x60] ss:$36 sps:$4 sm:$0xff]  }
  0x1c   :  { %1133 = vmatpush3.bf16.msra.mxu0 %v1288_v26  ;;  %v1346_v14 = vld [vmem:[%s1668_s0 + $0x5c] ss:$36 sps:$4 sm:$0xff]   ;;  %v1355_v22 = vld [vmem:[%s1667_s1 + $0x228] sm:$0xff]   ;;  %v1356_v23 = vld [vmem:[%s1667_s1 + $0x230] sm:$0xff]  }
  0x1d   :  { %1161 = vmatpush3.bf16.msra.mxu1 %v1289_v27  ;;  %1134 = vmatprep.subr.bf16.mxu0 %v1290_v28  ;;  %v1348_v15 = vld [vmem:[%s1668_s0 + $0x58] ss:$36 sps:$4 sm:$0xff]   ;;  %v1354_v20 = vld [vmem:[%s1667_s1 + $0x220] sm:$0xff]   ;;  %v1359_v25 = vld [vmem:[%s1668_s0 + $0x68] ss:$36 sps:$4 sm:$0xff]  }
  0x1e   :  { %1162 = vmatprep.subr.bf16.mxu1 %v1291_v29  ;;  %v1353_v19 = vld [vmem:[%s1667_s1 + $0x218] sm:$0xff]   ;;  %v1358_v21 = vld [vmem:[%s1668_s0 + $0x20] ss:$36 sps:$4 sm:$0xff]  }
  0x1f   :  { %v1357_v24 = vld [vmem:[%s1667_s1 + $0x238] sm:$0xff]  }
  0x20   :  { %1135 = vmatpush3.bf16.msra.mxu0 %v1292_v30 }
  0x21   :  { %1163 = vmatpush3.bf16.msra.mxu1 %v1293_v31  ;;  %1176 = vmatprep.subr.bf16.mxu0 %v1300_v36 }
  0x22   :  { %1204 = vmatprep.subr.bf16.mxu1 %v1302_v38 }
  0x23   :  { %739 = vmatmul.mubr.bf16.vlgmr.msra.gmra.mrb[0].mxu0 %v1294_v32 }
  0x24   :  { %788 = vmatmul.mubr.bf16.vlgmr.msra.gmra.mrb[0].mxu1 %v1297_v34  ;;  %1177 = vmatpush3.bf16.msra.mxu0 %v1301_v37 }
  0x25   :  { %1205 = vmatpush3.bf16.msra.mxu1 %v1303_v39  ;;  %1178 = vmatprep.subr.bf16.mxu0 %v1304_v40 }
  0x26   :  { %1206 = vmatprep.subr.bf16.mxu1 %v1306_v42  ;;  %746 = vmatprep.mubr.bf16.mxu0 %v1321_v57 }
  0x27   :  { %795 = vmatprep.mubr.bf16.mxu1 %v1323_v58 }
  0x28   :  { %1179 = vmatpush3.bf16.msra.mxu0 %v1305_v41 }
  0x29   :  { %1207 = vmatpush3.bf16.msra.mxu1 %v1307_v43  ;;  %1180 = vmatprep.subr.bf16.mxu0 %v1308_v44 }
  0x2a   :  { %1208 = vmatprep.subr.bf16.mxu1 %v1310_v46 }
  0x2b   :  { %747 = vmatmul.mubr.bf16.gmra.mrb[4].mxu0 %v1326_v60 }
  0x2c   :  { %1181 = vmatpush3.bf16.msra.mxu0 %v1309_v45  ;;  %796 = vmatmul.mubr.bf16.gmra.mrb[4].mxu1 %v1327_v61 }
  0x2d   :  { %1209 = vmatpush3.bf16.msra.mxu1 %v1311_v47  ;;  %1182 = vmatprep.subr.bf16.mxu0 %v1312_v48 }
  0x2e   :  { %1210 = vmatprep.subr.bf16.mxu1 %v1314_v50  ;;  %836 = vmatprep.mubr.bf16.mxu0 %v1339_v8 }
  0x2f   :  { %885 = vmatprep.mubr.bf16.mxu1 %v1344_v12 }
  0x30   :  { %1183 = vmatpush3.bf16.msra.mxu0 %v1313_v49 }
  0x31   :  { %1211 = vmatpush3.bf16.msra.mxu1 %v1315_v51  ;;  %1184 = vmatprep.subr.bf16.mxu0 %v1316_v52 }
  0x32   :  { %1212 = vmatprep.subr.bf16.mxu1 %v1318_v54 }
  0x34   :  { %1185 = vmatpush3.bf16.msra.mxu0 %v1317_v53 }
  0x35   :  { %1213 = vmatpush3.bf16.msra.mxu1 %v1319_v55  ;;  %1186 = vmatprep.subr.bf16.mxu0 %v1320_v56 }
  0x36   :  { %1214 = vmatprep.subr.bf16.mxu1 %v1328_v62 }
  0x38   :  { %1187 = vmatpush3.bf16.msra.mxu0 %v1325_v59 }
  0x39   :  { %1215 = vmatpush3.bf16.msra.mxu1 %v1329_v63  ;;  %1188 = vmatprep.subr.bf16.mxu0 %v1330_v0 }
  0x3a   :  { %1216 = vmatprep.subr.bf16.mxu1 %v1332_v2 }
  0x3c   :  { %1189 = vmatpush3.bf16.msra.mxu0 %v1331_v1 }
  0x3d   :  { %1217 = vmatpush3.bf16.msra.mxu1 %v1333_v3  ;;  %1190 = vmatprep.subr.bf16.mxu0 %v1334_v4 }
  0x3e   :  { %1218 = vmatprep.subr.bf16.mxu1 %v1336_v6 }
  0x40   :  { %1191 = vmatpush3.bf16.msra.mxu0 %v1335_v5 }
  0x41   :  { %1219 = vmatpush3.bf16.msra.mxu1 %v1340_v9  ;;  %1242 = vmatprep.subr.bf16.mxu0 %v1341_v10 }
  0x43   :  { %837 = vmatmul.mubr.bf16.vlgmr.msra.gmra.mrb[8].mxu0 %v1337_v7 }
  0x44   :  { %1243 = vmatpush3.bf16.msra.mxu0 %v1341_v10  ;;  %886 = vmatmul.mubr.bf16.vlgmr.msra.gmra.mrb[8].mxu1 %v1342_v11 }
  0x45   :  { %1244 = vmatprep.subr.bf16.mxu0 %v1345_v13  ;;  %844 = vmatprep.mubr.bf16.mxu0 %v1346_v14 }
  0x46   :  { %893 = vmatprep.mubr.bf16.mxu1 %v1350_v17 }
  0x48   :  { %1245 = vmatpush3.bf16.msra.mxu0 %v1345_v13 }
  0x49   :  { %1246 = vmatprep.subr.bf16.mxu0 %v1349_v16 }
  0x4b   :  { %845 = vmatmul.mubr.bf16.gmra.mrb[12].mxu0 %v1348_v15 }
  0x4c   :  { %1247 = vmatpush3.bf16.msra.mxu0 %v1349_v16  ;;  %894 = vmatmul.mubr.bf16.gmra.mrb[12].mxu1 %v1352_v18 }
  0x4d   :  { %1248 = vmatprep.subr.bf16.mxu0 %v1353_v19  ;;  %1258 = vmatprep.mubr.bf16.mxu0 %v1358_v21 }
  0x50   :  { %1249 = vmatpush3.bf16.msra.mxu0 %v1353_v19 }
  0x51   :  { %1250 = vmatprep.subr.bf16.mxu0 %v1354_v20 }
  0x54   :  { %1251 = vmatpush3.bf16.msra.mxu0 %v1354_v20 }
  0x55   :  { %1252 = vmatprep.subr.bf16.mxu0 %v1355_v22 }
  0x58   :  { %1253 = vmatpush3.bf16.msra.mxu0 %v1355_v22 }
  0x59   :  { %1254 = vmatprep.subr.bf16.mxu0 %v1356_v23 }
  0x5c   :  { %1255 = vmatpush3.bf16.msra.mxu0 %v1356_v23  ;;  %v1099_v23 = vld [vmem:[%s1669_s2] ss:$0 sm:$0xff] }
  0x5d   :  { %1256 = vmatprep.subr.bf16.mxu0 %v1357_v24 }
  0x60   :  { %1257 = vmatpush3.bf16.msra.mxu0 %v1357_v24 }
  0x63   :  { %1259 = vmatmul.mubr.bf16.vlgmr.msra.gmra.mrb[16].mxu0 %v1359_v25 }
  0xf6   :  { %v1136_v26 = vpop.f32.mrb[0].mxu0 }
  0xf7   :  { %v1164_v27 = vpop.f32.mrb[0].mxu1  ;;  %v1137_v28 = vpop.f32.mrb[1].mxu0 }
  0xf8   :  { %v1138_v29 = vadd.f32 %v1137_v28, %v1136_v26  ;;  %v1165_v30 = vpop.f32.mrb[1].mxu1  ;;  %v1139_v31 = vpop.f32.mrb[2].mxu0  ;;  %v1100_v26 = vld [vmem:[%s1670_s3] ss:$0 sm:$0xff] }
  0xf9   :  { %v1166_v32 = vadd.f32 %v1165_v30, %v1164_v27  ;;  %v1167_v33 = vpop.f32.mrb[2].mxu1  ;;  %v1140_v34 = vpop.f32.mrb[3].mxu0 }
  0xfa   :  { %v1141_v35 = vadd.f32 %v1140_v34, %v1139_v31  ;;  %v1168_v36 = vpop.f32.mrb[3].mxu1 }
  0xfb   :  { %v790_v37 = vadd.f32 %v1166_v32, %v1138_v29  ;;  %v1169_v38 = vadd.f32 %v1168_v36, %v1167_v33 }
  0xfd   :  { %v793_v39 = vadd.f32 %v1169_v38, %v1141_v35 }
  0xfe   :  { %v1142_v40 = vpop.f32.mrb[4].mxu0 }
  0xff   :  { %v1170_v41 = vpop.f32.mrb[4].mxu1  ;;  %v1143_v42 = vpop.f32.mrb[5].mxu0 }
 0x100   :  { %v1171_v43 = vpop.f32.mrb[5].mxu1  ;;  %v1144_v44 = vadd.f32 %v1143_v42, %v1142_v40  ;;  %v1145_v46 = vpop.f32.mrb[6].mxu0 }
 0x101   :  { %v1172_v45 = vadd.f32 %v1171_v43, %v1170_v41  ;;  %v1173_v47 = vpop.f32.mrb[6].mxu1  ;;  %v1146_v48 = vpop.f32.mrb[7].mxu0 }
 0x102   :  { %v1174_v49 = vpop.f32.mrb[7].mxu1  ;;  %v1147_v51 = vadd.f32 %v1146_v48, %v1145_v46 }
 0x103   :  { %v798_v50 = vadd.f32 %v1172_v45, %v1144_v44  ;;  %v1175_v52 = vadd.f32 %v1174_v49, %v1173_v47 }
 0x105   :  { %v801_v53 = vadd.f32 %v1175_v52, %v1147_v51 }
 0x116   :  { %v1192_v54 = vpop.f32.mrb[8].mxu0 }
 0x117   :  { %v1193_v55 = vpop.f32.mrb[9].mxu0  ;;  %v1220_v58 = vpop.f32.mrb[8].mxu1 }
 0x118   :  { %v1194_v56 = vadd.f32 %v1193_v55, %v1192_v54  ;;  %v1195_v57 = vpop.f32.mrb[10].mxu0  ;;  %v1221_v62 = vpop.f32.mrb[9].mxu1 }
 0x119   :  { %v1196_v59 = vpop.f32.mrb[11].mxu0  ;;  %v1222_v63 = vadd.f32 %v1221_v62, %v1220_v58  ;;  %v1223_v0 = vpop.f32.mrb[10].mxu1 }
 0x11a   :  { %v839_v60 = vadd.f32 %v1194_v56, %v790_v37  ;;  %v1197_v61 = vadd.f32 %v1196_v59, %v1195_v57  ;;  %v1224_v2 = vpop.f32.mrb[11].mxu1 }
 0x11b   :  { %v1225_v3 = vadd.f32 %v1224_v2, %v1223_v0 }
 0x11c   :  { %v842_v1 = vadd.f32 %v1197_v61, %v793_v39  ;;  %v888_v4 = vadd.f32 %v1222_v63, %v839_v60 }
 0x11e   :  { %v1198_v5 = vpop.f32.mrb[12].mxu0  ;;  %v891_v7 = vadd.f32 %v1225_v3, %v842_v1 }
 0x11f   :  { %v1199_v6 = vpop.f32.mrb[13].mxu0  ;;  %v1226_v10 = vpop.f32.mrb[12].mxu1 }
 0x120   :  { %v1200_v8 = vadd.f32 %v1199_v6, %v1198_v5  ;;  %v1201_v9 = vpop.f32.mrb[14].mxu0  ;;  %v1227_v14 = vpop.f32.mrb[13].mxu1 }
 0x121   :  { %v1202_v11 = vpop.f32.mrb[15].mxu0  ;;  %v1228_v15 = vadd.f32 %v1227_v14, %v1226_v10  ;;  %v1229_v16 = vpop.f32.mrb[14].mxu1 }
 0x122   :  { %v847_v12 = vadd.f32 %v1200_v8, %v798_v50  ;;  %v1203_v13 = vadd.f32 %v1202_v11, %v1201_v9  ;;  %v1230_v18 = vpop.f32.mrb[15].mxu1 }
 0x123   :  { %v1231_v19 = vadd.f32 %v1230_v18, %v1229_v16 }
 0x124   :  { %v850_v17 = vadd.f32 %v1203_v13, %v801_v53  ;;  %v896_v20 = vadd.f32 %v1228_v15, %v847_v12 }
 0x126   :  { %v899_v21 = vadd.f32 %v1231_v19, %v850_v17 }
 0x136   :  { %v1260_v22 = vpop.f32.mrb[16].mxu0 }
 0x137   :  { %v945_v24 = vadd.f32 %v1260_v22, %v896_v20  ;;  %v936_v25 = vpop.f32.mrb[17].mxu0 }
 0x138   :  { %v937_v27 = vadd.f32 %v936_v25, %v888_v4  ;;  %v1261_v28 = vpop.f32.mrb[18].mxu0 }
 0x139   :  { %v960_v29 = vmul.f32 %v1099_v23, %v945_v24  ;;  %v948_v30 = vadd.f32 %v1261_v28, %v899_v21  ;;  %v939_v31 = vpop.f32.mrb[19].mxu0 }
 0x13a   :  { %v958_v32 = vmul.f32 %v1099_v23, %v937_v27  ;;  %v940_v33 = vadd.f32 %v939_v31, %v891_v7 }
 0x13b   :  { %v971_v34 = vadd.f32 %v1100_v26, %v960_v29  ;;  %v961_v35 = vmul.f32 %v1099_v23, %v948_v30 }
 0x13c   :  { %v969_v36 = vadd.f32 %v1100_v26, %v958_v32  ;;  %v959_v37 = vmul.f32 %v1099_v23, %v940_v33 }
 0x13d   :  { %v979_v38 = vmul.f32 0.1, %v971_v34  ;;  %v972_v39 = vadd.f32 %v1100_v26, %v961_v35  ;;  %vm975_vm0 = vcmp.gt.f32.partialorder %v971_v34, 0.0 }
 0x13e   :  { %v977_v40 = vmul.f32 0.1, %v969_v36  ;;  %v970_v41 = vadd.f32 %v1100_v26, %v959_v37  ;;  %vm973_vm1 = vcmp.gt.f32.partialorder %v969_v36, 0.0 }
 0x13f   :  { %vm976_vm2 = vcmp.gt.f32.partialorder %v972_v39, 0.0  ;;  %v980_v42 = vmul.f32 0.1, %v972_v39  ;;  %v983_v44 = vsel %vm975_vm0, %v971_v34, %v979_v38 }
 0x140   :  { %vm974_vm3 = vcmp.gt.f32.partialorder %v970_v41, 0.0  ;;  %v978_v43 = vmul.f32 0.1, %v970_v41  ;;  %v981_v46 = vsel %vm973_vm1, %v969_v36, %v977_v40 }
 0x141   :  { %v984_v45 = vsel %vm976_vm2, %v972_v39, %v980_v42 }
 0x142   :  { %v1117_v47 = vpack.c.bf16 %v984_v45, %v983_v44  ;;  %v982_v48 = vsel %vm974_vm3, %v970_v41, %v978_v43 }
 0x143   :  { %v1112_v49 = vpack.c.bf16 %v982_v48, %v981_v46 }
 0x144   :  { %1119 = vst [vmem:[%s1671_s4 + $0x8] sm:$0xff] %v1117_v47  }
 0x145   :  { %1113 = vst [vmem:[%s1671_s4] sm:$0xff] %v1112_v49  }

// kernel: yolov3_forward.12
= control target key start
LH: loop header
LB: loop body
LE: loop exit
PB: predicated region body
PF: predicated region fallthrough
CT: control target
= control target key end

     0   :  { %v178_v11 = vlaneseq  ;;  %v398_v19 = vmov 0   ;;  %s571_s1 = inlined_call_operand.vmem [shape: bf16[128,128], index: 1, kind: input, shape index: {}]   ;;  %s572_s0 = inlined_call_operand.vmem [shape: bf16[32,128], index: 0, kind: input, shape index: {}]   ;;  %s573_s4 = inlined_call_operand.vmem [shape: s32[1,128], index: 4, kind: input, shape index: {}]   ;;  %s574_s2 = inlined_call_operand.vmem [shape: f32[1,128], index: 2, kind: input, shape index: {}]   ;;  %s575_s3 = inlined_call_operand.vmem [shape: f32[1,128], index: 3, kind: input, shape index: {}]   ;;  %s576_s5 = inlined_call_operand.vmem [shape: f32[1,128], index: 5, kind: input, shape index: {}]   ;;  %s577_s6 = inlined_call_operand.vmem [shape: f32[32,128], index: 6, kind: output, shape index: {}]  }
   0x1   :  { %v364_v0 = vld [vmem:[%s571_s1] sm:$0xff]   ;;  %v365_v1 = vld [vmem:[%s571_s1 + $0x8] sm:$0xff]   ;;  %v366_v2 = vld [vmem:[%s571_s1 + $0x10] sm:$0xff]  }
   0x2   :  { %343 = vmatprep.subr.bf16.mxu0 %v364_v0  ;;  %v367_v3 = vld [vmem:[%s571_s1 + $0x18] sm:$0xff]   ;;  %v372_v4 = vld [vmem:[%s572_s0] sm:$0xff]   ;;  %v369_v6 = vld [vmem:[%s571_s1 + $0x28] sm:$0xff]   ;;  %v471_v12 = vshrl.u32 %v178_v11, 7 }
   0x3   :  { %344 = vmatpush3.bf16.msra.mxu0 %v364_v0  ;;  %359 = vmatprep.mubr.bf16.mxu0 %v372_v4  ;;  %v368_v5 = vld [vmem:[%s571_s1 + $0x20] sm:$0xff]   ;;  %v370_v7 = vld [vmem:[%s571_s1 + $0x30] sm:$0xff]   ;;  %v371_v8 = vld [vmem:[%s571_s1 + $0x38] sm:$0xff]  }
   0x4   :  { %345 = vmatprep.subr.bf16.mxu0 %v365_v1  ;;  %v373_v9 = vld [vmem:[%s572_s0 + $0x8] sm:$0xff]   ;;  %v467_v10 = vld [vmem:[%s573_s4] sm:$0x1]  ;;  %v480_v17 = vsub.s32 0, %v471_v12  ;;  %v181_v34 = vadd.s32 16, %v471_v12  ;;  %v182_v39 = vadd.s32 24, %v471_v12 }
   0x5   :  { %vm232_vm0 = vcmp.eq.s32.totalorder %v467_v10, 2  ;;  %vm233_vm1 = vcmp.eq.s32.totalorder %v467_v10, 3  ;;  %v326_v13 = vld [vmem:[%s574_s2] ss:$0 sm:$0xff]  ;;  %vm264_vm4 = vcmp.eq.s32.totalorder %v467_v10, 1  ;;  %vm263_vm5 = vcmp.eq.s32.totalorder %v467_v10, 0 }
   0x6   :  { %vm234_vm2 = vmor %vm232_vm0, %vm233_vm1  ;;  %v327_v15 = vld [vmem:[%s575_s3] ss:$0 sm:$0xff]  ;;  %v198_v37 = vshra.s32 %v181_v34, 2  ;;  %v265_v42 = vsel %vm264_vm4, 1, %v398_v19  ;;  %v196_v43 = vshra.s32 %v471_v12, 2  ;;  %v180_v44 = vadd.s32 8, %v471_v12 }
   0x7   :  { %346 = vmatpush3.bf16.msra.mxu0 %v365_v1  ;;  %v235_v20 = vsel %vm234_vm2, 1, %v398_v19  ;;  %v275_v48 = vsel %vm263_vm5, 1, %v398_v19  ;;  %v199_v50 = vshra.s32 %v182_v39, 2  ;;  %v190_v51 = vand.u32 3, %v181_v34 }
   0x8   :  { %347 = vmatprep.subr.bf16.mxu0 %v366_v2  ;;  %v239_v29 = vrot.slane %v235_v20, %v480_v17  ;;  %v202_v45 = vand.u32 3, %v198_v37  ;;  %v269_v53 = vrot.slane %v265_v42, %v480_v17  ;;  %v200_v56 = vand.u32 3, %v196_v43 }
   0x9   :  { %v197_v58 = vshra.s32 %v180_v44, 2  ;;  %v279_v60 = vrot.slane %v275_v48, %v480_v17  ;;  %vm285_vm6 = vcmp.le.s32.totalorder %v467_v10, 1  ;;  %v203_v63 = vand.u32 3, %v199_v50  ;;  %v332_v10 = vld [vmem:[%s576_s5] ss:$0 sm:$0xff] }
   0xa   :  { %vm485_vm3 = vcmp.eq.s32.totalorder %v239_v29, 1  ;;  %v206_v59 = vcvt.s32.f32 %v202_v45  ;;  %vm507_vm7 = vcmp.eq.s32.totalorder %v269_v53, 1 }
   0xb   :  { %348 = vmatpush3.bf16.msra.mxu0 %v366_v2  ;;  %v188_v2 = vand.u32 3, %v471_v12  ;;  %vm512_vm8 = vcmp.eq.s32.totalorder %v279_v60, 1  ;;  %v298_v12 = vsel %vm285_vm6, 1, %v398_v19 }
   0xc   :  { %349 = vmatprep.subr.bf16.mxu0 %v367_v3 }
   0xf   :  { %350 = vmatpush3.bf16.msra.mxu0 %v367_v3 }
  0x10   :  { %351 = vmatprep.subr.bf16.mxu0 %v368_v5 }
  0x13   :  { %352 = vmatpush3.bf16.msra.mxu0 %v368_v5  ;;  %v194_v5 = vcvt.s32.f32 %v190_v51 }
  0x14   :  { %353 = vmatprep.subr.bf16.mxu0 %v369_v6 }
  0x17   :  { %354 = vmatpush3.bf16.msra.mxu0 %v369_v6  ;;  %v204_v6 = vcvt.s32.f32 %v200_v56 }
  0x18   :  { %355 = vmatprep.subr.bf16.mxu0 %v370_v7 }
  0x1b   :  { %356 = vmatpush3.bf16.msra.mxu0 %v370_v7  ;;  %v201_v7 = vand.u32 3, %v197_v58 }
  0x1c   :  { %357 = vmatprep.subr.bf16.mxu0 %v371_v8 }
  0x1d   :  { %v205_v20 = vcvt.s32.f32 %v201_v7 }
  0x1f   :  { %358 = vmatpush3.bf16.msra.mxu0 %v371_v8 }
  0x22   :  { %360 = vmatmul.mubr.bf16.vlgmr.msra.gmra.mrb[0].mxu0 %v373_v9  ;;  %v191_v9 = vand.u32 3, %v182_v39 }
  0xf5   :  { %v361_v14 = vpop.f32.mrb[0].mxu0 }
  0xf6   :  { %v162_v16 = vmul.f32 %v361_v14, %v326_v13  ;;  %v138_v18 = vpop.f32.mrb[1].mxu0  ;;  %v207_v14 = vcvt.s32.f32 %v203_v63 }
  0xf7   :  { %v160_v21 = vmul.f32 %v326_v13, %v138_v18  ;;  %v362_v22 = vpop.f32.mrb[2].mxu0  ;;  %v271_v18 = vsel %vm507_vm7, %v204_v6, 0.0 }
  0xf8   :  { %v173_v23 = vadd.f32 %v327_v15, %v162_v16  ;;  %v163_v24 = vmul.f32 %v362_v22, %v326_v13  ;;  %v141_v25 = vpop.f32.mrb[3].mxu0  ;;  %v189_v16 = vand.u32 3, %v180_v44  ;;  %v302_v22 = vrot.slane %v298_v12, %v480_v17 }
  0xf9   :  { %v171_v26 = vadd.f32 %v327_v15, %v160_v21  ;;  %v161_v27 = vmul.f32 %v326_v13, %v141_v25  ;;  %v273_v13 = vsel %vm507_vm7, %v206_v59, 0.0  ;;  %v274_v19 = vsel %vm507_vm7, %v207_v14, 0.0 }
  0xfa   :  { %v330_v28 = vmul.f32 -1.442695, %v173_v23  ;;  %v174_v30 = vadd.f32 %v327_v15, %v163_v24  ;;  %v243_v38 = vsel %vm485_vm3, %v173_v23, 0.0  ;;  %v283_v21 = vsel %vm512_vm8, %v194_v5, %v273_v13 }
  0xfb   :  { %v328_v31 = vmul.f32 -1.442695, %v171_v26  ;;  %v172_v32 = vadd.f32 %v327_v15, %v161_v27  ;;  %v241_v40 = vsel %vm485_vm3, %v171_v26, 0.0  ;;  %v249_v41 = vmul.f32 1.442695, %v243_v38 }
  0xfc   :  { %374 = vpow2.f32 %v330_v28  ;;  %v331_v33 = vmul.f32 -1.442695, %v174_v30  ;;  %v244_v46 = vsel %vm485_vm3, %v174_v30, 0.0  ;;  %v245_v49 = vmul.f32 1.442695, %v241_v40 }
  0xfd   :  { %376 = vpow2.f32 %v328_v31  ;;  %v329_v36 = vmul.f32 -1.442695, %v172_v32  ;;  %v242_v54 = vsel %vm485_vm3, %v172_v32, 0.0  ;;  %v251_v57 = vmul.f32 1.442695, %v244_v46 }
  0xfe   :  { %378 = vpow2.f32 %v331_v33  ;;  %v247_v0 = vmul.f32 1.442695, %v242_v54  ;;  %v192_v15 = vcvt.s32.f32 %v188_v2  ;;  %v195_v23 = vcvt.s32.f32 %v191_v9 }
  0xff   :  { %380 = vpow2.f32 %v329_v36  ;;  %v193_v27 = vcvt.s32.f32 %v189_v16  ;;  %v272_v30 = vsel %vm507_vm7, %v205_v20, 0.0  ;;  %vm535_vm9 = vcmp.eq.s32.totalorder %v302_v22, 1 }
 0x100   :  { %382 = vpow2.f32 %v249_v41  ;;  %v281_v26 = vsel %vm512_vm8, %v192_v15, %v271_v18  ;;  %v284_v33 = vsel %vm512_vm8, %v195_v23, %v274_v19 }
 0x101   :  { %v282_v41 = vsel %vm512_vm8, %v193_v27, %v272_v30 }
 0x106   :  { %v375_v47 = vpop.eup %374 }
 0x107   :  { %v222_v52 = vadd.f32 1.0, %v375_v47  ;;  %v377_v55 = vpop.eup %376 }
 0x108   :  { %v220_v61 = vadd.f32 1.0, %v377_v55  ;;  %v379_v62 = vpop.eup %378 }
 0x109   :  { %384 = vrcp.f32 %v222_v52  ;;  %v223_v3 = vadd.f32 1.0, %v379_v62  ;;  %v381_v4 = vpop.eup %380 }
 0x10a   :  { %386 = vpow2.f32 %v245_v49  ;;  %v221_v11 = vadd.f32 1.0, %v381_v4  ;;  %v383_v24 = vpop.eup %382 }
 0x10b   :  { %388 = vrcp.f32 %v220_v61  ;;  %v261_v31 = vmul.f32 %v383_v24, %v332_v10 }
 0x10c   :  { %390 = vpow2.f32 %v251_v57 }
 0x10d   :  { %392 = vrcp.f32 %v223_v3 }
 0x10e   :  { %394 = vpow2.f32 %v247_v0 }
 0x10f   :  { %396 = vrcp.f32 %v221_v11 }
 0x113   :  { %v385_v25 = vpop.eup %384 }
 0x114   :  { %v387_v28 = vpop.eup %386  ;;  %v288_v29 = vadd.f32 %v385_v25, %v283_v21  ;;  %v296_v39 = vsel %vm485_vm3, %v261_v31, %v385_v25 }
 0x115   :  { %v389_v17 = vpop.eup %388  ;;  %v259_v40 = vmul.f32 %v387_v28, %v332_v10 }
 0x116   :  { %v391_v34 = vpop.eup %390  ;;  %v292_v36 = vmul.f32 4.0, %v288_v29  ;;  %v286_v37 = vadd.f32 %v389_v17, %v281_v26 }
 0x117   :  { %v393_v38 = vpop.eup %392  ;;  %v294_v47 = vsel %vm485_vm3, %v259_v40, %v389_v17  ;;  %v262_v48 = vmul.f32 %v391_v34, %v332_v10 }
 0x118   :  { %v395_v42 = vpop.eup %394  ;;  %v306_v43 = vsel %vm535_vm9, %v292_v36, %v296_v39  ;;  %v290_v44 = vmul.f32 4.0, %v286_v37  ;;  %v289_v45 = vadd.f32 %v393_v38, %v284_v33 }
 0x119   :  { %v397_v46 = vpop.eup %396  ;;  %310 = vst [vmem:[%s577_s6 + $0x10] sm:$0xff] %v306_v43  ;;  %v297_v52 = vsel %vm485_vm3, %v262_v48, %v393_v38  ;;  %v260_v53 = vmul.f32 %v395_v42, %v332_v10 }
 0x11a   :  { %v304_v49 = vsel %vm535_vm9, %v290_v44, %v294_v47  ;;  %v293_v50 = vmul.f32 4.0, %v289_v45  ;;  %v287_v51 = vadd.f32 %v397_v46, %v282_v41 }
 0x11b   :  { %308 = vst [vmem:[%s577_s6] sm:$0xff] %v304_v49  ;;  %v295_v56 = vsel %vm485_vm3, %v260_v53, %v397_v46 }
 0x11c   :  { %v307_v54 = vsel %vm535_vm9, %v293_v50, %v297_v52  ;;  %v291_v55 = vmul.f32 4.0, %v287_v51 }
 0x11d   :  { %311 = vst [vmem:[%s577_s6 + $0x18] sm:$0xff] %v307_v54 }
 0x11e   :  { %v305_v57 = vsel %vm535_vm9, %v291_v55, %v295_v56 }
 0x11f   :  { %309 = vst [vmem:[%s577_s6 + $0x8] sm:$0xff] %v305_v57 }

// kernel: yolov3_forward.15
= control target key start
LH: loop header
LB: loop body
LE: loop exit
PB: predicated region body
PF: predicated region fallthrough
CT: control target
= control target key end

     0   :  { %s1948_s21 = smov 0   ;;  %s2994_s0 = inlined_call_operand.vmem [shape: bf16[512,128], index: 0, kind: input, shape index: {}]   ;;  %s2995_s1 = inlined_call_operand.vmem [shape: bf16[128,128], index: 1, kind: input, shape index: {}]   ;;  %s2996_s2 = inlined_call_operand.vmem [shape: f32[1,128], index: 2, kind: input, shape index: {}]   ;;  %s2997_s3 = inlined_call_operand.vmem [shape: f32[1,128], index: 3, kind: input, shape index: {}]   ;;  %s2998_s4 = inlined_call_operand.vmem [shape: s32[1,128], index: 4, kind: input, shape index: {}]   ;;  %s2999_s5 = inlined_call_operand.vmem [shape: f32[1,128], index: 5, kind: input, shape index: {}]   ;;  %s3000_s6 = inlined_call_operand.vmem [shape: f32[512,128], index: 6, kind: output, shape index: {}]  }
   0x1 LB: > { %s1520_s22 = sadd.s32 4294967295, %s1910_s21   ;;  %p1524_p0 = scmp.ge.s32.totalorder %s1910_s21, 1  ;;  %s1910_s21 = sphi %s1948_s21, %s16_s21  }
   0x2   : > { %p213_p1 = scmp.lt.s32.totalorder %s1910_s21, 3 }
   0x4   : > { %p214_p2 = pnand %p1524_p0, %p213_p1 }
   0x6   : > { %217 = sbr.rel (%p214_p2) target bundleno = 389 (0x185), region = 44 }
   0xd   : > { %v1688_v0 = vld [vmem:[%s2995_s1] sm:$0xff]   ;;  %s1525_s25 = sshll.u32 %s1520_s22, 5  ;;  %v1689_v1 = vld [vmem:[%s2995_s1 + $0x8] sm:$0xff]   ;;  %v1690_v2 = vld [vmem:[%s2995_s1 + $0x10] sm:$0xff]   ;;  %v690_v24 = vlaneseq  ;;  %s1555_s20 = sshll.u32 %s1520_s22, 8  ;;  %v1912_v33 = vmov 0  }
   0xe   : > { %p244_p3 = scmp.lt.s32.totalorder %s1525_s25, 63  ;;  %1615 = vmatprep.subr.bf16.mxu0 %v1688_v0  ;;  %1663 = vmatprep.subr.bf16.mxu1 %v1688_v0  ;;  %v1691_v3 = vld [vmem:[%s2995_s1 + $0x18] sm:$0xff]   ;;  %v1692_v6 = vld [vmem:[%s2995_s1 + $0x20] sm:$0xff]   ;;  %v1693_v7 = vld [vmem:[%s2995_s1 + $0x28] sm:$0xff]   ;;  %v2011_v27 = vstv %s1555_s20  ;;  %v3046_v51 = vmov 0 }
   0xf   : > { %1616 = vmatpush3.bf16.msra.mxu0 %v1688_v0  ;;  %1671 = vmatpush3.bf16.msra.mxu1 %v1688_v0  ;;  %v1694_v8 = vld [vmem:[%s2995_s1 + $0x30] sm:$0xff]   ;;  %v1695_v9 = vld [vmem:[%s2995_s1 + $0x38] sm:$0xff]   ;;  %v2008_v25 = vshrl.u32 %v690_v24, 7  ;;  %3045 = vst [vmem:[#allocation3_spill] sm:$0xff] %v2011_v27  ;;  %v688_v30 = vld [vmem:[%s2998_s4] sm:$0x1] }
  0x10   : > { %s3186_s25 = smov (!%p244_p3, %s1525_s25), 63  ;;  %1617 = vmatprep.subr.bf16.mxu0 %v1689_v1  ;;  %1664 = vmatprep.subr.bf16.mxu1 %v1689_v1  ;;  %vm1252_vm0 = vcmp.eq.s32.totalorder %v688_v30, 1  ;;  %vm1251_vm1 = vcmp.eq.s32.totalorder %v688_v30, 0  ;;  %vm1108_vm2 = vcmp.eq.s32.totalorder %v688_v30, 2  ;;  %vm1109_vm3 = vcmp.eq.s32.totalorder %v688_v30, 3 }
  0x11   : > { %s1526_s30 = sshll.u32 %s3186_s25, 2  ;;  %3044 = vst [vmem:[#allocation2_spill] sm:$0xff] %v2008_v25  ;;  %v693_v26 = vadd.s32 16, %v2008_v25  ;;  %v709_v29 = vadd.s32 144, %v2008_v25  ;;  %v1253_v34 = vsel %vm1252_vm0, 1, %v1912_v33  ;;  %v707_v35 = vadd.s32 128, %v2008_v25  ;;  %vm1110_vm4 = vmor %vm1108_vm2, %vm1109_vm3 }
  0x12   : > { %s1973_s9 = scalar_lea.vmem %s2994_s0, %s1526_s30  ;;  %v2021_v36 = vsub.s32 0, %v2008_v25  ;;  %v1291_v38 = vsel %vm1251_vm1, 1, %v1912_v33  ;;  %v724_v41 = vadd.s32 %v2011_v27, %v2008_v25  ;;  %v694_v42 = vadd.s32 24, %v2008_v25  ;;  %s1528_s7 = sshll.u32 %s3186_s25, 3 }
  0x13   : > { %1618 = vmatpush3.bf16.msra.mxu0 %v1689_v1  ;;  %1672 = vmatpush3.bf16.msra.mxu1 %v1689_v1  ;;  %v1696_v4 = vld [vmem:[%s1973_s9] sm:$0xff]   ;;  %v1698_v10 = vld [vmem:[%s1973_s9 + $0x8] sm:$0xff]   ;;  %v1700_v12 = vld [vmem:[%s1973_s9 + $0x10] sm:$0xff]   ;;  %v726_v28 = vadd.s32 %v2011_v27, %v693_v26  ;;  %v742_v32 = vadd.s32 %v2011_v27, %v709_v29  ;;  %v710_v43 = vadd.s32 152, %v2008_v25  ;;  %v740_v44 = vadd.s32 %v2011_v27, %v707_v35 }
  0x14   : > { %1619 = vmatprep.subr.bf16.mxu0 %v1690_v2  ;;  %1665 = vmatprep.subr.bf16.mxu1 %v1690_v2  ;;  %v1697_v5 = vld [vmem:[%s1973_s9 + $0x40] sm:$0xff]   ;;  %v1699_v11 = vld [vmem:[%s1973_s9 + $0x48] sm:$0xff]   ;;  %v1701_v13 = vld [vmem:[%s1973_s9 + $0x50] sm:$0xff]   ;;  %v1257_v40 = vrot.slane %v1253_v34, %v2021_v36  ;;  %v692_v45 = vadd.s32 8, %v2008_v25  ;;  %v2030_v48 = vsel %vm1110_vm4, 1, %v1912_v33  ;;  %v1295_v49 = vrot.slane %v1291_v38, %v2021_v36 }
  0x15   : > { %1631 = vmatprep.mubr.bf16.mxu0 %v1696_v4  ;;  %1647 = vmatprep.mubr.bf16.mxu1 %v1697_v5  ;;  %v1702_v14 = vld [vmem:[%s1973_s9 + $0x18] sm:$0xff]   ;;  %v1704_v16 = vld [vmem:[%s1973_s9 + $0x20] sm:$0xff]   ;;  %v1706_v18 = vld [vmem:[%s1973_s9 + $0x28] sm:$0xff]   ;;  %v822_v31 = vshra.s32 %v726_v28, 4  ;;  %v838_v39 = vshra.s32 %v742_v32, 4  ;;  %v758_v46 = vand.u32 15, %v726_v28  ;;  %v727_v53 = vadd.s32 %v2011_v27, %v694_v42 }
  0x16   : > { %v1703_v15 = vld [vmem:[%s1973_s9 + $0x58] sm:$0xff]   ;;  %v1705_v17 = vld [vmem:[%s1973_s9 + $0x60] sm:$0xff]   ;;  %v1707_v19 = vld [vmem:[%s1973_s9 + $0x68] sm:$0xff]   ;;  %vm2033_vm5 = vcmp.eq.s32.totalorder %v1257_v40, 1  ;;  %v820_v52 = vshra.s32 %v724_v41, 4  ;;  %v743_v54 = vadd.s32 %v2011_v27, %v710_v43  ;;  %vm1329_vm6 = vcmp.le.s32.totalorder %v688_v30, 1 }
  0x17   : > { %1620 = vmatpush3.bf16.msra.mxu0 %v1690_v2  ;;  %1673 = vmatpush3.bf16.msra.mxu1 %v1690_v2  ;;  %v1708_v20 = vld [vmem:[%s1973_s9 + $0x30] sm:$0xff]   ;;  %v1710_v22 = vld [vmem:[%s1973_s9 + $0x38] sm:$0xff]   ;;  %v854_v37 = vand.u32 15, %v822_v31  ;;  %v870_v50 = vand.u32 15, %v838_v39  ;;  %v3047_v51 = vsel %vm2033_vm5, 4294967295, %v3046_v51  ;;  %v836_v55 = vshra.s32 %v740_v44, 4 }
  0x18   : > { %1621 = vmatprep.subr.bf16.mxu0 %v1691_v3  ;;  %1666 = vmatprep.subr.bf16.mxu1 %v1691_v3  ;;  %v1709_v21 = vld [vmem:[%s1973_s9 + $0x70] sm:$0xff]   ;;  %v1711_v23 = vld [vmem:[%s1973_s9 + $0x78] sm:$0xff]   ;;  %3048 = vst [vmem:[#allocation4_spill] sm:$0xff] %v3047_v51  ;;  %v725_v56 = vadd.s32 %v2011_v27, %v692_v45  ;;  %v708_v57 = vadd.s32 136, %v2008_v25  ;;  %v2041_v58 = vcvt.s32.f32 %v758_v46  ;;  %v774_v59 = vand.u32 15, %v742_v32  ;;  %s2529_s9 = scalar_lea.vmem %s3000_s6, %s1528_s7 }
  0x19   : > { %v886_v47 = vcvt.s32.f32 %v854_v37  ;;  %vm2049_vm7 = vcmp.eq.s32.totalorder %v1295_v49, 1  ;;  %v902_v63 = vcvt.s32.f32 %v870_v50  ;;  %v2053_v0 = vsel %vm1329_vm6, 1, %v1912_v33 }
  0x1a   : > { %v852_v1 = vand.u32 15, %v820_v52  ;;  %v823_v2 = vshra.s32 %v727_v53, 4  ;;  %v756_v4 = vand.u32 15, %v724_v41  ;;  %v868_v5 = vand.u32 15, %v836_v55 }
  0x1b   : > { %1622 = vmatpush3.bf16.msra.mxu0 %v1691_v3  ;;  %1674 = vmatpush3.bf16.msra.mxu1 %v1691_v3  ;;  %v2047_v61 = vsel %vm2033_vm5, %v886_v47, 0.0  ;;  %v839_v3 = vshra.s32 %v743_v54, 4  ;;  %v698_v29 = vadd.s32 56, %v2008_v25  ;;  %v759_v31 = vand.u32 15, %v727_v53 }
  0x1c   : > { %1623 = vmatprep.subr.bf16.mxu0 %v1692_v6  ;;  %1667 = vmatprep.subr.bf16.mxu1 %v1692_v6  ;;  %v775_v32 = vand.u32 15, %v743_v54  ;;  %v757_v37 = vand.u32 15, %v725_v56  ;;  %v714_v42 = vadd.s32 184, %v2008_v25  ;;  %v703_v60 = vadd.s32 96, %v2008_v25 }
  0x1d   : > { %v731_v46 = vadd.s32 %v2011_v27, %v698_v29  ;;  %v2095_v47 = vcvt.s32.f32 %v759_v31 }
  0x1e   : > { %v2097_v49 = vcvt.s32.f32 %v775_v32  ;;  %v2107_v55 = vcvt.s32.f32 %v757_v37  ;;  %v701_v32 = vadd.s32 80, %v2008_v25 }
  0x1f   : > { %1624 = vmatpush3.bf16.msra.mxu0 %v1692_v6  ;;  %1675 = vmatpush3.bf16.msra.mxu1 %v1692_v6  ;;  %v821_v6 = vshra.s32 %v725_v56, 4 }
  0x20   : > { %1625 = vmatprep.subr.bf16.mxu0 %v1693_v7  ;;  %1668 = vmatprep.subr.bf16.mxu1 %v1693_v7 }
  0x23   : > { %1626 = vmatpush3.bf16.msra.mxu0 %v1693_v7  ;;  %1676 = vmatpush3.bf16.msra.mxu1 %v1693_v7  ;;  %v741_v7 = vadd.s32 %v2011_v27, %v708_v57 }
  0x24   : > { %1627 = vmatprep.subr.bf16.mxu0 %v1694_v8  ;;  %1669 = vmatprep.subr.bf16.mxu1 %v1694_v8 }
  0x25   : > { %v773_v50 = vand.u32 15, %v741_v7 }
  0x27   : > { %1628 = vmatpush3.bf16.msra.mxu0 %v1694_v8  ;;  %1677 = vmatpush3.bf16.msra.mxu1 %v1694_v8 }
  0x28   : > { %1629 = vmatprep.subr.bf16.mxu0 %v1695_v9  ;;  %1670 = vmatprep.subr.bf16.mxu1 %v1695_v9 }
  0x2b   : > { %1630 = vmatpush3.bf16.msra.mxu0 %v1695_v9  ;;  %1678 = vmatpush3.bf16.msra.mxu1 %v1695_v9  ;;  %v2060_v9 = vcvt.s32.f32 %v774_v59 }
  0x2e   : > { %1632 = vmatmul.mubr.bf16.vlgmr.msra.gmra.mrb[0].mxu0 %v1698_v10  ;;  %1648 = vmatmul.mubr.bf16.vlgmr.msra.gmra.mrb[0].mxu1 %v1699_v11  ;;  %v697_v10 = vadd.s32 48, %v2008_v25  ;;  %v713_v11 = vadd.s32 176, %v2008_v25 }
  0x2f   : > { %1635 = vmatprep.mubr.bf16.mxu0 %v1700_v12  ;;  %1651 = vmatprep.mubr.bf16.mxu1 %v1701_v13  ;;  %v2068_v13 = vsel %vm2033_vm5, %v902_v63, 0.0 }
  0x30   : > { %v730_v26 = vadd.s32 %v2011_v27, %v697_v10  ;;  %v746_v28 = vadd.s32 %v2011_v27, %v713_v11  ;;  %v2130_v10 = vcvt.s32.f32 %v773_v50  ;;  %v763_v50 = vand.u32 15, %v731_v46 }
  0x32   : > { %v842_v45 = vshra.s32 %v746_v28, 4 }
  0x36   : > { %1636 = vmatmul.mubr.bf16.gmra.mrb[4].mxu0 %v1702_v14  ;;  %1652 = vmatmul.mubr.bf16.gmra.mrb[4].mxu1 %v1703_v15  ;;  %v772_v14 = vand.u32 15, %v740_v44  ;;  %v695_v15 = vadd.s32 32, %v2008_v25  ;;  %v826_v44 = vshra.s32 %v730_v26, 4 }
  0x37   : > { %1639 = vmatprep.mubr.bf16.mxu0 %v1704_v16  ;;  %1655 = vmatprep.mubr.bf16.mxu1 %v1705_v17  ;;  %v884_v16 = vcvt.s32.f32 %v852_v1  ;;  %v855_v17 = vand.u32 15, %v823_v2  ;;  %v747_v1 = vadd.s32 %v2011_v27, %v714_v42 }
  0x38   : > { %v2081_v30 = vcvt.s32.f32 %v772_v14  ;;  %v728_v33 = vadd.s32 %v2011_v27, %v695_v15 }
  0x39   : > { %v887_v34 = vcvt.s32.f32 %v855_v17  ;;  %v2087_v39 = vsel %vm2033_vm5, %v884_v16, 0.0  ;;  %v696_v16 = vadd.s32 40, %v2008_v25  ;;  %v712_v17 = vadd.s32 168, %v2008_v25 }
  0x3a   : > { %v824_v52 = vshra.s32 %v728_v33, 4 }
  0x3b   : > { %v2101_v53 = vsel %vm2033_vm5, %v887_v34, 0.0  ;;  %v760_v34 = vand.u32 15, %v728_v33 }
  0x3c   : > { %v856_v11 = vand.u32 15, %v824_v52 }
  0x3e   : > { %1640 = vmatmul.mubr.bf16.gmra.mrb[8].mxu0 %v1706_v18  ;;  %1656 = vmatmul.mubr.bf16.gmra.mrb[8].mxu1 %v1707_v19  ;;  %v871_v18 = vand.u32 15, %v839_v3  ;;  %v711_v19 = vadd.s32 160, %v2008_v25  ;;  %v858_v3 = vand.u32 15, %v826_v44 }
  0x3f   : > { %1643 = vmatprep.mubr.bf16.mxu0 %v1708_v20  ;;  %1659 = vmatprep.mubr.bf16.mxu1 %v1709_v21  ;;  %v2072_v20 = vcvt.s32.f32 %v756_v4  ;;  %v900_v21 = vcvt.s32.f32 %v868_v5  ;;  %v874_v4 = vand.u32 15, %v842_v45  ;;  %v827_v5 = vshra.s32 %v731_v46, 4 }
  0x40   : > { %v903_v35 = vcvt.s32.f32 %v871_v18  ;;  %v744_v38 = vadd.s32 %v2011_v27, %v711_v19  ;;  %v762_v19 = vand.u32 15, %v730_v26  ;;  %v729_v26 = vadd.s32 %v2011_v27, %v696_v16 }
  0x41   : > { %v2092_v43 = vsel %vm2033_vm5, %v900_v21, 0.0  ;;  %v778_v21 = vand.u32 15, %v746_v28  ;;  %v906_v29 = vcvt.s32.f32 %v874_v4  ;;  %v859_v31 = vand.u32 15, %v827_v5 }
  0x42   : > { %v2105_v54 = vsel %vm2033_vm5, %v903_v35, 0.0  ;;  %v840_v56 = vshra.s32 %v744_v38, 4  ;;  %v888_v35 = vcvt.s32.f32 %v856_v11  ;;  %v776_v37 = vand.u32 15, %v744_v38 }
  0x43   : > { %v745_v28 = vadd.s32 %v2011_v27, %v712_v17  ;;  %v2150_v44 = vcvt.s32.f32 %v762_v19  ;;  %v2152_v45 = vcvt.s32.f32 %v778_v21  ;;  %v2160_v52 = vsel %vm2033_vm5, %v906_v29, 0.0 }
  0x44   : > { %v872_v15 = vand.u32 15, %v840_v56  ;;  %v891_v56 = vcvt.s32.f32 %v859_v31  ;;  %v2167_v4 = vsel %vm2033_vm5, %v888_v35, 0.0  ;;  %v2169_v5 = vcvt.s32.f32 %v776_v37 }
  0x45   : > { %3052 = vst [vmem:[#allocation6_spill] sm:$0xff] %v2167_v4  ;;  %v825_v16 = vshra.s32 %v729_v26, 4  ;;  %v841_v17 = vshra.s32 %v745_v28, 4  ;;  %v2180_v21 = vcvt.s32.f32 %v763_v50  ;;  %v761_v31 = vand.u32 15, %v729_v26 }
  0x46   : > { %1644 = vmatmul.mubr.bf16.gmra.mrb[12].mxu0 %v1710_v22  ;;  %1660 = vmatmul.mubr.bf16.gmra.mrb[12].mxu1 %v1711_v23  ;;  %v853_v22 = vand.u32 15, %v821_v6  ;;  %v837_v23 = vshra.s32 %v741_v7, 4  ;;  %v904_v42 = vcvt.s32.f32 %v872_v15  ;;  %3053 = vst [vmem:[#allocation7_spill] sm:$0xff] %v2169_v5  ;;  %v779_v15 = vand.u32 15, %v747_v1 }
  0x47   : > { %3055 = vst [vmem:[#allocation9_spill] sm:$0xff] %v2180_v21  ;;  %v857_v50 = vand.u32 15, %v825_v16  ;;  %v702_v26 = vadd.s32 88, %v2008_v25  ;;  %v718_v29 = vadd.s32 216, %v2008_v25  ;;  %v2213_v19 = vcvt.s32.f32 %v761_v31 }
  0x48   : > { %v885_v40 = vcvt.s32.f32 %v853_v22  ;;  %v869_v41 = vand.u32 15, %v837_v23  ;;  %v843_v22 = vshra.s32 %v747_v1, 4  ;;  %v890_v23 = vcvt.s32.f32 %v858_v3 }
  0x49   : > { %v2163_v3 = vcvt.s32.f32 %v760_v34  ;;  %v2174_v11 = vsel %vm2033_vm5, %v904_v42, 0.0  ;;  %v2189_v1 = vsel %vm2033_vm5, %v891_v56, 0.0  ;;  %v2200_v42 = vcvt.s32.f32 %v779_v15  ;;  %3059 = vst [vmem:[#allocation13_spill] sm:$0xff] %v2213_v19 }
  0x4a   : > { %v2115_v59 = vsel %vm2033_vm5, %v885_v40, 0.0  ;;  %v901_v63 = vcvt.s32.f32 %v869_v41  ;;  %v717_v40 = vadd.s32 208, %v2008_v25  ;;  %v875_v33 = vand.u32 15, %v843_v22  ;;  %3054 = vst [vmem:[#allocation8_spill] sm:$0xff] %v2174_v11  ;;  %3056 = vst [vmem:[#allocation10_spill] sm:$0xff] %v2189_v1 }
  0x4b   : > { %v2156_v38 = vsel %vm2033_vm5, %v890_v23, 0.0  ;;  %3051 = vst [vmem:[#allocation5_spill] sm:$0xff] %v2163_v3  ;;  %v699_v23 = vadd.s32 64, %v2008_v25  ;;  %3057 = vst [vmem:[#allocation11_spill] sm:$0xff] %v2200_v42  ;;  %v777_v15 = vand.u32 15, %v745_v28  ;;  %v716_v7 = vadd.s32 200, %v2008_v25 }
  0x4c   : > { %v2140_v18 = vsel %vm2033_vm5, %v901_v63, 0.0  ;;  %v734_v63 = vadd.s32 %v2011_v27, %v701_v32  ;;  %v750_v46 = vadd.s32 %v2011_v27, %v717_v40  ;;  %v907_v22 = vcvt.s32.f32 %v875_v33 }
  0x4d   : > { %v715_v40 = vadd.s32 192, %v2008_v25  ;;  %v873_v33 = vand.u32 15, %v841_v17  ;;  %v732_v35 = vadd.s32 %v2011_v27, %v699_v23  ;;  %v700_v17 = vadd.s32 72, %v2008_v25 }
  0x4e   : > { %v830_v32 = vshra.s32 %v734_v63, 4  ;;  %v846_v37 = vshra.s32 %v750_v46, 4  ;;  %v2209_v34 = vsel %vm2033_vm5, %v907_v22, 0.0  ;;  %v705_v56 = vadd.s32 112, %v2008_v25 }
  0x4f   : > { %3058 = vst [vmem:[#allocation12_spill] sm:$0xff] %v2209_v34  ;;  %v748_v14 = vadd.s32 %v2011_v27, %v715_v40  ;;  %v889_v6 = vcvt.s32.f32 %v857_v50  ;;  %v905_v22 = vcvt.s32.f32 %v873_v33  ;;  %v766_v2 = vand.u32 15, %v734_v63 }
  0x50   : > { %v862_v16 = vand.u32 15, %v830_v32  ;;  %v878_v41 = vand.u32 15, %v846_v37  ;;  %v735_v23 = vadd.s32 %v2011_v27, %v702_v26  ;;  %v782_v57 = vand.u32 15, %v750_v46 }
  0x51   : > { %v828_v24 = vshra.s32 %v732_v35, 4  ;;  %v751_v31 = vadd.s32 %v2011_v27, %v718_v29  ;;  %v721_v28 = vadd.s32 240, %v2008_v25  ;;  %v2226_v37 = vcvt.s32.f32 %v777_v15 }
  0x52   : > { %v894_v40 = vcvt.s32.f32 %v862_v16  ;;  %v733_v50 = vadd.s32 %v2011_v27, %v700_v17  ;;  %v910_v33 = vcvt.s32.f32 %v878_v41  ;;  %v844_v63 = vshra.s32 %v748_v14, 4 }
  0x53   : > { %3060 = vst [vmem:[#allocation14_spill] sm:$0xff] %v2226_v37  ;;  %v749_v26 = vadd.s32 %v2011_v27, %v716_v7  ;;  %v738_v46 = vadd.s32 %v2011_v27, %v705_v56  ;;  %v2233_v29 = vsel %vm2033_vm5, %v889_v6, 0.0  ;;  %v2237_v8 = vsel %vm2033_vm5, %v905_v22, 0.0 }
  0x54   : > { %3061 = vst [vmem:[#allocation15_spill] sm:$0xff] %v2233_v29  ;;  %3062 = vst [vmem:[#allocation16_spill] sm:$0xff] %v2237_v8  ;;  %v2239_v32 = vcvt.s32.f32 %v766_v2  ;;  %v831_v15 = vshra.s32 %v735_v23, 4  ;;  %v2241_v16 = vcvt.s32.f32 %v782_v57  ;;  %v860_v17 = vand.u32 15, %v828_v24 }
  0x55   : > { %v847_v41 = vshra.s32 %v751_v31, 4  ;;  %v754_v12 = vadd.s32 %v2011_v27, %v721_v28  ;;  %v2246_v7 = vsel %vm2033_vm5, %v894_v40, 0.0  ;;  %v764_v56 = vand.u32 15, %v732_v35 }
  0x56   : > { %3063 = vst [vmem:[#allocation17_spill] sm:$0xff] %v2239_v32  ;;  %3064 = vst [vmem:[#allocation18_spill] sm:$0xff] %v2241_v16  ;;  %v829_v6 = vshra.s32 %v733_v50, 4  ;;  %v2251_v22 = vsel %vm2033_vm5, %v910_v33, 0.0  ;;  %v876_v2 = vand.u32 15, %v844_v63  ;;  %v845_v34 = vshra.s32 %v749_v26, 4 }
  0x57   : > { %3065 = vst [vmem:[#allocation19_spill] sm:$0xff] %v2246_v7  ;;  %3066 = vst [vmem:[#allocation20_spill] sm:$0xff] %v2251_v22  ;;  %v834_v57 = vshra.s32 %v738_v46, 4  ;;  %v780_v28 = vand.u32 15, %v748_v14  ;;  %v863_v40 = vand.u32 15, %v831_v15  ;;  %v892_v63 = vcvt.s32.f32 %v860_v17 }
  0x58   : > { %v879_v42 = vand.u32 15, %v847_v41  ;;  %v850_v1 = vshra.s32 %v754_v12, 4  ;;  %v2269_v29 = vcvt.s32.f32 %v764_v56  ;;  %v861_v19 = vand.u32 15, %v829_v6 }
  0x59   : > { %v736_v35 = vadd.s32 %v2011_v27, %v703_v60  ;;  %v908_v14 = vcvt.s32.f32 %v876_v2  ;;  %v767_v15 = vand.u32 15, %v735_v23  ;;  %v877_v8 = vand.u32 15, %v845_v34 }
  0x5a   : > { %3067 = vst [vmem:[#allocation21_spill] sm:$0xff] %v2269_v29  ;;  %v866_v37 = vand.u32 15, %v834_v57  ;;  %v2272_v21 = vcvt.s32.f32 %v780_v28  ;;  %v895_v33 = vcvt.s32.f32 %v863_v40  ;;  %v783_v17 = vand.u32 15, %v751_v31 }
  0x5b   : > { %v719_v41 = vadd.s32 224, %v2008_v25  ;;  %v2277_v7 = vsel %vm2033_vm5, %v892_v63, 0.0  ;;  %v911_v24 = vcvt.s32.f32 %v879_v42  ;;  %v765_v56 = vand.u32 15, %v733_v50 }
  0x5c   : > { %3068 = vst [vmem:[#allocation22_spill] sm:$0xff] %v2272_v21  ;;  %3069 = vst [vmem:[#allocation23_spill] sm:$0xff] %v2277_v7  ;;  %v882_v22 = vand.u32 15, %v850_v1  ;;  %v893_v6 = vcvt.s32.f32 %v861_v19  ;;  %v781_v16 = vand.u32 15, %v749_v26  ;;  %v770_v60 = vand.u32 15, %v738_v46 }
  0x5d   : > { %v832_v2 = vshra.s32 %v736_v35, 4  ;;  %v2281_v34 = vsel %vm2033_vm5, %v908_v14, 0.0  ;;  %v2283_v23 = vcvt.s32.f32 %v767_v15  ;;  %v909_v31 = vcvt.s32.f32 %v877_v8 }
  0x5e   : > { %3070 = vst [vmem:[#allocation24_spill] sm:$0xff] %v2281_v34  ;;  %v898_v57 = vcvt.s32.f32 %v866_v37  ;;  %v3072_v28 = vrot.slane %v2030_v48, %v2021_v36  ;;  %v2294_v19 = vsel %vm2033_vm5, %v895_v33, 0.0  ;;  %v2296_v1 = vcvt.s32.f32 %v783_v17 }
  0x5f   : > { %3071 = vst [vmem:[#allocation25_spill] sm:$0xff] %v2283_v23  ;;  %3075 = vst [vmem:[#allocation26_spill] sm:$0xff] %v2294_v19  ;;  %v786_v42 = vand.u32 15, %v754_v12  ;;  %v2299_v50 = vadd.s32 %v2011_v27, %v719_v41  ;;  %v2303_v8 = vsel %vm2033_vm5, %v911_v24, 0.0  ;;  %v2305_v37 = vcvt.s32.f32 %v765_v56 }
  0x60   : > { %vm2288_vm8 = vcmp.eq.s32.totalorder %v3072_v28, 1  ;;  %3076 = vst [vmem:[#allocation27_spill] sm:$0xff] %v2296_v1  ;;  %3077 = vst [vmem:[#allocation28_spill] sm:$0xff] %v2303_v8  ;;  %v914_v48 = vcvt.s32.f32 %v882_v22  ;;  %v706_v26 = vadd.s32 120, %v2008_v25  ;;  %v2310_v46 = vsel %vm2033_vm5, %v893_v6, 0.0 }
  0x61   : > { %3078 = vst [vmem:[#allocation29_spill] sm:$0xff] %v2305_v37  ;;  %3079 = vst [vmem:[#allocation30_spill] sm:$0xff] %v2310_v46  ;;  %v2312_v33 = vcvt.s32.f32 %v781_v16  ;;  %v2314_v63 = vcvt.s32.f32 %v770_v60  ;;  %v2316_v12 = vand.u32 15, %v832_v2  ;;  %v2324_v22 = vsel %vm2033_vm5, %v909_v31, 0.0  ;;  %v2333_v16 = vld [vmem:[%s2996_s2] ss:$0 sm:$0xff] }
  0x62   : > { %3082 = vst [vmem:[#allocation33_spill] sm:$0xff] %v2324_v22  ;;  %v2328_v14 = vsel %vm2033_vm5, %v898_v57, 0.0  ;;  %v768_v15 = vand.u32 15, %v736_v35  ;;  %v2343_v56 = vcvt.s32.f32 %v786_v42  ;;  %v848_v6 = vshra.s32 %v2299_v50, 4  ;;  %v2364_v28 = vld [vmem:[%s2997_s3] ss:$0 sm:$0xff] }
  0x63   : > { %3080 = vst [vmem:[#allocation31_spill] sm:$0xff] %v2312_v33  ;;  %3081 = vst [vmem:[#allocation32_spill] sm:$0xff] %v2314_v63  ;;  %v2356_v2 = vsel %vm2033_vm5, %v914_v48, 0.0  ;;  %v2359_v31 = vadd.s32 %v2011_v27, %v706_v26  ;;  %v896_v26 = vcvt.s32.f32 %v2316_v12  ;;  %v722_v60 = vadd.s32 248, %v2008_v25 }
  0x64   : > { %3083 = vst [vmem:[#allocation34_spill] sm:$0xff] %v2328_v14  ;;  %3084 = vst [vmem:[#allocation35_spill] sm:$0xff] %v2343_v56  ;;  %v2378_v37 = vcvt.s32.f32 %v768_v15  ;;  %v784_v8 = vand.u32 15, %v2299_v50  ;;  %v3096_v32 = vrot.slane %v2053_v0, %v2021_v36 }
  0x65   : > { %3085 = vst [vmem:[#allocation36_spill] sm:$0xff] %v2356_v2  ;;  %3086 = vst [vmem:[#allocation37_spill] sm:$0xff] %v2359_v31  ;;  %v2397_v12 = vadd.s32 %v2011_v27, %v722_v60 }
  0x66   : > { %3087 = vst [vmem:[#allocation38_spill] sm:$0xff] %v2378_v37  ;;  %v2410_v23 = vcvt.s32.f32 %v784_v8  ;;  %vm2480_vm9 = vcmp.eq.s32.totalorder %v3096_v32, 1 }
  0x67   : > { %3089 = vst [vmem:[#allocation40_spill] sm:$0xff] %v2397_v12 }
  0x68   : > { %3090 = vst [vmem:[#allocation41_spill] sm:$0xff] %v2410_v23 }
 0x101   : > { %v1633_v57 = vpop.f32.mrb[0].mxu0  ;;  %v1649_v42 = vpop.f32.mrb[0].mxu1 }
 0x102   : > { %v618_v41 = vmul.f32 %v1633_v57, %v2333_v16  ;;  %v634_v17 = vmul.f32 %v1649_v42, %v2333_v16  ;;  %v482_v24 = vpop.f32.mrb[1].mxu0  ;;  %v546_v46 = vpop.f32.mrb[1].mxu1  ;;  %v2387_v57 = vand.u32 15, %v848_v6 }
 0x103   : > { %v616_v35 = vmul.f32 %v2333_v16, %v482_v24  ;;  %v632_v22 = vmul.f32 %v2333_v16, %v546_v46  ;;  %v1634_v33 = vpop.f32.mrb[2].mxu0  ;;  %v1650_v48 = vpop.f32.mrb[2].mxu1  ;;  %v835_v24 = vshra.s32 %v2359_v31, 4 }
 0x104   : > { %3088 = vst [vmem:[#allocation39_spill] sm:$0xff] %v2387_v57  ;;  %v657_v42 = vadd.f32 %v2364_v28, %v618_v41  ;;  %v673_v15 = vadd.f32 %v2364_v28, %v634_v17  ;;  %v619_v14 = vmul.f32 %v1634_v33, %v2333_v16  ;;  %v485_v50 = vpop.f32.mrb[3].mxu0  ;;  %v549_v63 = vpop.f32.mrb[3].mxu1  ;;  %v635_v19 = vmul.f32 %v1650_v48, %v2333_v16 }
 0x105   : > { %v655_v46 = vadd.f32 %v2364_v28, %v616_v35  ;;  %v671_v1 = vadd.f32 %v2364_v28, %v632_v22  ;;  %v617_v35 = vmul.f32 %v2333_v16, %v485_v50  ;;  %v633_v27 = vmul.f32 %v2333_v16, %v549_v63 }
 0x106   : > { %v1558_v6 = vmul.f32 -1.442695, %v657_v42  ;;  %v1119_v41 = vsel %vm2288_vm8, %v657_v42, 0.0  ;;  %v1574_v17 = vmul.f32 -1.442695, %v673_v15  ;;  %v1135_v33 = vsel %vm2288_vm8, %v673_v15, 0.0 }
 0x107   : > { %v1153_v2 = vmul.f32 1.442695, %v1119_v41  ;;  %v1185_v56 = vmul.f32 1.442695, %v1135_v33  ;;  %v658_v31 = vadd.f32 %v2364_v28, %v619_v14  ;;  %v1556_v22 = vmul.f32 -1.442695, %v655_v46 }
 0x108   : > { %1712 = vpow2.f32 %v1558_v6  ;;  %v1117_v60 = vsel %vm2288_vm8, %v655_v46, 0.0  ;;  %v1133_v48 = vsel %vm2288_vm8, %v671_v1, 0.0  ;;  %v1572_v15 = vmul.f32 -1.442695, %v671_v1 }
 0x109   : > { %1714 = vpow2.f32 %v1153_v2  ;;  %v1149_v42 = vmul.f32 1.442695, %v1117_v60  ;;  %v1120_v14 = vsel %vm2288_vm8, %v658_v31, 0.0  ;;  %v674_v50 = vadd.f32 %v2364_v28, %v635_v19  ;;  %v1637_v6 = vpop.f32.mrb[4].mxu0  ;;  %v1653_v41 = vpop.f32.mrb[4].mxu1 }
 0x10a   : > { %1716 = vpow2.f32 %v1574_v17  ;;  %v1181_v46 = vmul.f32 1.442695, %v1133_v48  ;;  %v656_v33 = vadd.f32 %v2364_v28, %v617_v35  ;;  %v622_v2 = vmul.f32 %v1637_v6, %v2333_v16  ;;  %v498_v60 = vpop.f32.mrb[5].mxu0  ;;  %v562_v34 = vpop.f32.mrb[5].mxu1 }
 0x10b   : > { %1718 = vpow2.f32 %v1185_v56  ;;  %v1559_v8 = vmul.f32 -1.442695, %v658_v31  ;;  %v1136_v1 = vsel %vm2288_vm8, %v674_v50, 0.0  ;;  %v1638_v63 = vpop.f32.mrb[6].mxu0  ;;  %v2421_v17 = vsel %vm2033_vm5, %v896_v26, 0.0  ;;  %v1654_v48 = vpop.f32.mrb[6].mxu1 }
 0x10c   : > { %1720 = vpow2.f32 %v1556_v22  ;;  %3091 = vst [vmem:[#allocation42_spill] sm:$0xff] %v2421_v17  ;;  %v1155_v19 = vmul.f32 1.442695, %v1120_v14  ;;  %v672_v56 = vadd.f32 %v2364_v28, %v633_v27  ;;  %v2424_v35 = vand.u32 15, %v835_v24  ;;  %v2426_v22 = vpop.f32.mrb[7].mxu0  ;;  %v2428_v31 = vpop.f32.mrb[7].mxu1 }
 0x10d   : > { %1722 = vpow2.f32 %v1149_v42  ;;  %v1575_v6 = vmul.f32 -1.442695, %v674_v50  ;;  %v1187_v23 = vmul.f32 1.442695, %v1136_v1  ;;  %v1118_v26 = vsel %vm2288_vm8, %v656_v33, 0.0 }
 0x10e   : > { %3092 = vst [vmem:[#allocation43_spill] sm:$0xff] %v2424_v35  ;;  %1724 = vpow2.f32 %v1572_v15  ;;  %v661_v42 = vadd.f32 %v2364_v28, %v622_v2  ;;  %v638_v27 = vmul.f32 %v1653_v41, %v2333_v16  ;;  %v1557_v24 = vmul.f32 -1.442695, %v656_v33 }
 0x10f   : > { %1726 = vpow2.f32 %v1181_v46  ;;  %v620_v15 = vmul.f32 %v2333_v16, %v498_v60  ;;  %v1134_v50 = vsel %vm2288_vm8, %v672_v56, 0.0  ;;  %v636_v46 = vmul.f32 %v2333_v16, %v562_v34 }
 0x110   : > { %1728 = vpow2.f32 %v1559_v8  ;;  %v677_v1 = vadd.f32 %v2364_v28, %v638_v27  ;;  %v1151_v41 = vmul.f32 1.442695, %v1118_v26  ;;  %v1123_v14 = vsel %vm2288_vm8, %v661_v42, 0.0 }
 0x111   : > { %1730 = vpow2.f32 %v1155_v19  ;;  %v2441_v21 = vpop.f32.mrb[8].mxu0  ;;  %v2443_v51 = vpop.f32.mrb[8].mxu1  ;;  %v2454_v19 = vadd.s32 104, %v2008_v25  ;;  %v1573_v35 = vmul.f32 -1.442695, %v672_v56  ;;  %v659_v8 = vadd.f32 %v2364_v28, %v620_v15 }
 0x112   : > { %v1713_v2 = vpop.eup %1712  ;;  %1732 = vpow2.f32 %v1575_v6  ;;  %v2445_v33 = vpop.f32.mrb[9].mxu0  ;;  %v623_v6 = vmul.f32 %v1638_v63, %v2333_v16  ;;  %v1183_v7 = vmul.f32 1.442695, %v1134_v50  ;;  %v675_v56 = vadd.f32 %v2364_v28, %v636_v46 }
 0x113   : > { %v2447_v60 = vpop.f32.mrb[9].mxu1  ;;  %3093 = vst [vmem:[#allocation44_spill] sm:$0xff] %v2454_v19  ;;  %v1715_v34 = vpop.eup %1714  ;;  %v1014_v27 = vadd.f32 1.0, %v1713_v2  ;;  %1734 = vpow2.f32 %v1187_v23  ;;  %v2471_v2 = vld [vmem:[%s2999_s5] ss:$0 sm:$0xff]  ;;  %v1139_v19 = vsel %vm2288_vm8, %v677_v1, 0.0  ;;  %v639_v25 = vmul.f32 %v1654_v48, %v2333_v16 }
 0x114   : > { %v2459_v26 = vpop.f32.mrb[10].mxu0  ;;  %v2461_v12 = vpop.f32.mrb[10].mxu1  ;;  %1736 = vpow2.f32 %v1557_v24  ;;  %v1562_v15 = vmul.f32 -1.442695, %v661_v42  ;;  %v1161_v50 = vmul.f32 1.442695, %v1123_v14  ;;  %v662_v5 = vadd.f32 %v2364_v28, %v623_v6 }
 0x115   : > { %v1717_v57 = vpop.eup %1716  ;;  %v2464_v17 = vpop.f32.mrb[11].mxu0  ;;  %1738 = vrcp.f32 %v1014_v27  ;;  %v1578_v27 = vmul.f32 -1.442695, %v677_v1  ;;  %v1193_v42 = vmul.f32 1.442695, %v1139_v19  ;;  %v1121_v48 = vsel %vm2288_vm8, %v659_v8, 0.0 }
 0x116   : > { %3094 = vst [vmem:[#allocation45_spill] sm:$0xff] %v2464_v17  ;;  %v2466_v37 = vpop.f32.mrb[11].mxu1  ;;  %v1719_v23 = vpop.eup %1718  ;;  %v1030_v63 = vadd.f32 1.0, %v1717_v57  ;;  %1740 = vpow2.f32 %v1151_v41  ;;  %v1221_v41 = vmul.f32 %v1715_v34, %v2471_v2  ;;  %v1137_v0 = vsel %vm2288_vm8, %v675_v56, 0.0 }
 0x117   : > { %3095 = vst [vmem:[#allocation46_spill] sm:$0xff] %v2466_v37  ;;  %v1721_v24 = vpop.eup %1720  ;;  %v621_v32 = vmul.f32 %v2333_v16, %v2426_v22  ;;  %v2496_v19 = vmul.f32 -1.442695, %v675_v56  ;;  %v678_v34 = vadd.f32 %v2364_v28, %v639_v25  ;;  %v1237_v37 = vmul.f32 %v1719_v23, %v2471_v2 }
 0x118   : > { %v1723_v29 = vpop.eup %1722  ;;  %1742 = vrcp.f32 %v1030_v63  ;;  %v1012_v57 = vadd.f32 1.0, %v1721_v24  ;;  %v1157_v56 = vmul.f32 1.442695, %v1121_v48 }
 0x119   : > { %v1725_v46 = vpop.eup %1724  ;;  %1744 = vpow2.f32 %v1573_v35  ;;  %v2492_v1 = vpop.f32.mrb[12].mxu0  ;;  %v1560_v35 = vmul.f32 -1.442695, %v659_v8  ;;  %v1219_v25 = vmul.f32 %v1723_v29, %v2471_v2  ;;  %v660_v3 = vadd.f32 %v2364_v28, %v621_v32 }
 0x11a   : > { %v1727_v14 = vpop.eup %1726  ;;  %1746 = vrcp.f32 %v1012_v57  ;;  %v1028_v36 = vadd.f32 1.0, %v1725_v46  ;;  %3099 = vst [vmem:[#allocation47_spill] sm:$0xff] %v2492_v1  ;;  %v2494_v6 = vpop.f32.mrb[12].mxu1  ;;  %v1140_v29 = vsel %vm2288_vm8, %v678_v34, 0.0 }
 0x11b   : > { %3100 = vst [vmem:[#allocation48_spill] sm:$0xff] %v2494_v6  ;;  %v1729_v63 = vpop.eup %1728  ;;  %1748 = vpow2.f32 %v1183_v7  ;;  %v2499_v24 = vpop.f32.mrb[13].mxu0  ;;  %v1124_v6 = vsel %vm2288_vm8, %v662_v5, 0.0 }
 0x11c   : > { %3101 = vst [vmem:[#allocation49_spill] sm:$0xff] %v2499_v24  ;;  %v2501_v57 = vpop.f32.mrb[13].mxu1  ;;  %v1731_v46 = vpop.eup %1730  ;;  %1750 = vrcp.f32 %v1028_v36  ;;  %v1015_v22 = vadd.f32 1.0, %v1729_v63  ;;  %v1189_v24 = vmul.f32 1.442695, %v1137_v0 }
 0x11d   : > { %3102 = vst [vmem:[#allocation50_spill] sm:$0xff] %v2501_v57  ;;  %v2506_v1 = vpop.f32.mrb[14].mxu0  ;;  %v2508_v7 = vpop.f32.mrb[14].mxu1  ;;  %1752 = vpow2.f32 %v1562_v15  ;;  %v1563_v63 = vmul.f32 -1.442695, %v662_v5 }
 0x11e   : > { %3103 = vst [vmem:[#allocation51_spill] sm:$0xff] %v2506_v1  ;;  %3104 = vst [vmem:[#allocation52_spill] sm:$0xff] %v2508_v7  ;;  %v1733_v8 = vpop.eup %1732  ;;  %v2511_v57 = vpop.f32.mrb[15].mxu0  ;;  %1754 = vrcp.f32 %v1015_v22  ;;  %v1235_v7 = vmul.f32 %v1727_v14, %v2471_v2  ;;  %v2518_v17 = vmul.f32 1.442695, %v1124_v6  ;;  %v637_v22 = vmul.f32 %v2333_v16, %v2428_v31 }
 0x11f   : > { %v2513_v4 = vpop.f32.mrb[15].mxu1  ;;  %v1735_v23 = vpop.eup %1734  ;;  %v1031_v36 = vadd.f32 1.0, %v1733_v8  ;;  %1756 = vpow2.f32 %v1161_v50  ;;  %v2522_v0 = vmul.f32 -1.442695, %v678_v34  ;;  %v3105_v50 = vsel %vm2049_vm7, %v2041_v58, %v2047_v61 }
 0x120   : > { %v1737_v1 = vpop.eup %1736  ;;  %v2539_v6 = vmul.f32 1.442695, %v1140_v29  ;;  %v2541_v34 = vmul.f32 -1.442695, %v660_v3  ;;  %v1122_v8 = vsel %vm2288_vm8, %v660_v3, 0.0  ;;  %v3106_v61 = vsel %vm2049_vm7, %v2060_v9, %v2068_v13 }
 0x121   : > { %v1739_v15 = vpop.eup %1738  ;;  %1758 = vrcp.f32 %v1031_v36  ;;  %v1013_v48 = vadd.f32 1.0, %v1737_v1  ;;  %v1222_v1 = vmul.f32 %v1731_v46, %v2471_v2  ;;  %v676_v3 = vadd.f32 %v2364_v28, %v637_v22 }
 0x122   : > { %v1741_v5 = vpop.eup %1740  ;;  %v1332_v14 = vadd.f32 %v1739_v15, %v3105_v50  ;;  %v1364_v32 = vsel %vm2288_vm8, %v1221_v41, %v1739_v15  ;;  %1760 = vpow2.f32 %v1578_v27  ;;  %v626_v15 = vmul.f32 %v2441_v21, %v2333_v16 }
 0x123   : > { %v1743_v31 = vpop.eup %1742  ;;  %1762 = vrcp.f32 %v1013_v48  ;;  %v3107_v9 = vsel %vm2049_vm7, %v2072_v20, %v2087_v39  ;;  %v2569_v21 = vmul.f32 1.442695, %v1122_v8  ;;  %v642_v22 = vmul.f32 %v2443_v51, %v2333_v16 }
 0x124   : > { %v1745_v36 = vpop.eup %1744  ;;  %v1402_v58 = vsel %vm2480_vm9, %v1332_v14, %v1364_v32  ;;  %v1348_v27 = vadd.f32 %v1743_v31, %v3106_v61  ;;  %v1380_v41 = vsel %vm2288_vm8, %v1237_v37, %v1743_v31  ;;  %1764 = vpow2.f32 %v1193_v42 }
 0x125   : > { %v1747_v46 = vpop.eup %1746  ;;  %1434 = vst [vmem:[%s2529_s9 + $0x10] sm:$0xff] %v1402_v58  ;;  %v1029_v29 = vadd.f32 1.0, %v1745_v36  ;;  %1766 = vpow2.f32 %v1560_v35  ;;  %v1238_v35 = vmul.f32 %v1735_v23, %v2471_v2  ;;  %v3108_v39 = vsel %vm2049_vm7, %v2081_v30, %v2092_v43 }
 0x126   : > { %v1749_v48 = vpop.eup %1748  ;;  %v1418_v50 = vsel %vm2480_vm9, %v1348_v27, %v1380_v41  ;;  %v1330_v13 = vadd.f32 %v1747_v46, %v3107_v9  ;;  %v1362_v37 = vsel %vm2288_vm8, %v1219_v25, %v1747_v46  ;;  %1768 = vpow2.f32 %v1157_v56 }
 0x127   : > { %v1751_v42 = vpop.eup %1750  ;;  %1450 = vst [vmem:[%s2529_s9 + $0x90] sm:$0xff] %v1418_v50  ;;  %1770 = vrcp.f32 %v1029_v29  ;;  %v1138_v51 = vsel %vm2288_vm8, %v676_v3, 0.0  ;;  %v665_v31 = vadd.f32 %v2364_v28, %v626_v15  ;;  %v3109_v43 = vsel %vm2049_vm7, %v2095_v47, %v2101_v53 }
 0x128   : > { %v1753_v14 = vpop.eup %1752  ;;  %v1400_v20 = vsel %vm2480_vm9, %v1330_v13, %v1362_v37  ;;  %v1346_v25 = vadd.f32 %v1751_v42, %v3108_v39  ;;  %v1378_v56 = vsel %vm2288_vm8, %v1235_v7, %v1751_v42  ;;  %1772 = vpow2.f32 %v2496_v19 }
 0x129   : > { %v1755_v23 = vpop.eup %1754  ;;  %1432 = vst [vmem:[%s2529_s9] sm:$0xff] %v1400_v20  ;;  %v1018_v32 = vadd.f32 1.0, %v1753_v14  ;;  %1774 = vpow2.f32 %v1189_v24  ;;  %v1220_v36 = vmul.f32 %v1741_v5, %v2471_v2  ;;  %v1577_v58 = vmul.f32 -1.442695, %v676_v3 }
 0x12a   : > { %v1757_v8 = vpop.eup %1756  ;;  %v1416_v30 = vsel %vm2480_vm9, %v1346_v25, %v1378_v56  ;;  %v1333_v19 = vadd.f32 %v1755_v23, %v3109_v43  ;;  %v1365_v7 = vsel %vm2288_vm8, %v1222_v1, %v1755_v23  ;;  %1776 = vpow2.f32 %v1563_v63 }
 0x12b   : > { %v1759_v24 = vpop.eup %1758  ;;  %1448 = vst [vmem:[%s2529_s9 + $0x80] sm:$0xff] %v1416_v30  ;;  %1778 = vrcp.f32 %v1018_v32  ;;  %v681_v61 = vadd.f32 %v2364_v28, %v642_v22  ;;  %v3110_v47 = vsel %vm2049_vm7, %v2097_v49, %v2105_v54  ;;  %v624_v5 = vmul.f32 %v2333_v16, %v2445_v33 }
 0x12c   : > { %v1761_v27 = vpop.eup %1760  ;;  %v1403_v41 = vsel %vm2480_vm9, %v1333_v19, %v1365_v7  ;;  %v1349_v53 = vadd.f32 %v1759_v24, %v3110_v47  ;;  %v1381_v63 = vsel %vm2288_vm8, %v1238_v35, %v1759_v24  ;;  %1780 = vpow2.f32 %v2522_v0 }
 0x12d   : > { %v1763_v1 = vpop.eup %1762  ;;  %1435 = vst [vmem:[%s2529_s9 + $0x18] sm:$0xff] %v1403_v41  ;;  %v1034_v46 = vadd.f32 1.0, %v1761_v27  ;;  %v1191_v29 = vmul.f32 1.442695, %v1138_v51  ;;  %v1127_v3 = vsel %vm2288_vm8, %v665_v31, 0.0  ;;  %v3111_v54 = vsel %vm2049_vm7, %v2107_v55, %v2115_v59 }
 0x12e   : > { %v1765_v15 = vpop.eup %1764  ;;  %v1419_v49 = vsel %vm2480_vm9, %v1349_v53, %v1381_v63  ;;  %v1331_v33 = vadd.f32 %v1763_v1, %v3111_v54  ;;  %v1363_v50 = vsel %vm2288_vm8, %v1220_v36, %v1763_v1  ;;  %1782 = vpow2.f32 %v2518_v17 }
 0x12f   : > { %v1767_v0 = vpop.eup %1766  ;;  %1451 = vst [vmem:[%s2529_s9 + $0x98] sm:$0xff] %v1419_v49  ;;  %v1236_v9 = vmul.f32 %v1749_v48, %v2471_v2  ;;  %1784 = vrcp.f32 %v1034_v46  ;;  %v1566_v13 = vmul.f32 -1.442695, %v665_v31  ;;  %v1143_v37 = vsel %vm2288_vm8, %v681_v61, 0.0 }
 0x130   : > { %v1769_v42 = vpop.eup %1768  ;;  %v1401_v55 = vsel %vm2480_vm9, %v1331_v33, %v1363_v50  ;;  %v1016_v59 = vadd.f32 1.0, %v1767_v0  ;;  %1786 = vpow2.f32 %v2541_v34  ;;  %v663_v35 = vadd.f32 %v2364_v28, %v624_v5  ;;  %v3115_v50 = vld [vmem:[#allocation45_spill] sm:$0xff] }
 0x131   : > { %v1771_v22 = vpop.eup %1770  ;;  %1433 = vst [vmem:[%s2529_s9 + $0x8] sm:$0xff] %v1401_v55  ;;  %1788 = vpow2.f32 %v2539_v6  ;;  %v1169_v17 = vmul.f32 1.442695, %v1127_v3  ;;  %v1582_v48 = vmul.f32 -1.442695, %v681_v61  ;;  %v640_v14 = vmul.f32 %v2333_v16, %v2447_v60  ;;  %v3117_v55 = vld [vmem:[#allocation6_spill] sm:$0xff] }
 0x132   : > { %v1773_v20 = vpop.eup %1772  ;;  %v3112_v39 = vsel %vm2049_vm7, %v2130_v10, %v2140_v18  ;;  %v1379_v34 = vsel %vm2288_vm8, %v1236_v9, %v1771_v22  ;;  %1790 = vrcp.f32 %v1016_v59  ;;  %v627_v6 = vmul.f32 %v2459_v26, %v2333_v16 }
 0x133   : > { %v1347_v25 = vadd.f32 %v1771_v22, %v3112_v39  ;;  %v1775_v56 = vpop.eup %1774  ;;  %v1225_v23 = vmul.f32 %v1757_v8, %v2471_v2  ;;  %v1032_v32 = vadd.f32 1.0, %v1773_v20  ;;  %1792 = vpow2.f32 %v1577_v58 }
 0x134   : > { %v1201_v60 = vmul.f32 1.442695, %v1143_v37  ;;  %v1777_v51 = vpop.eup %1776  ;;  %1794 = vpow2.f32 %v2569_v21  ;;  %v1125_v10 = vsel %vm2288_vm8, %v663_v35, 0.0  ;;  %v679_v18 = vadd.f32 %v2364_v28, %v640_v14 }
 0x135   : > { %v1417_v31 = vsel %vm2480_vm9, %v1347_v25, %v1379_v34  ;;  %v1779_v30 = vpop.eup %1778  ;;  %v1241_v26 = vmul.f32 %v1765_v15, %v2471_v2  ;;  %1796 = vrcp.f32 %v1032_v32  ;;  %v1019_v8 = vadd.f32 1.0, %v1777_v51  ;;  %v3120_v51 = vld [vmem:[#allocation7_spill] sm:$0xff] }
 0x136   : > { %1449 = vst [vmem:[%s2529_s9 + $0x88] sm:$0xff] %v1417_v31  ;;  %v643_v43 = vmul.f32 %v2461_v12, %v2333_v16  ;;  %v3113_v19 = vsel %vm2049_vm7, %v2150_v44, %v2156_v38  ;;  %v1368_v7 = vsel %vm2288_vm8, %v1225_v23, %v1779_v30  ;;  %1798 = vpow2.f32 %v1566_v13  ;;  %v1781_v36 = vpop.eup %1780  ;;  %v3121_v31 = vld [vmem:[#allocation8_spill] sm:$0xff] }
 0x137   : > { %v1336_v21 = vadd.f32 %v1779_v30, %v3113_v19  ;;  %v666_v24 = vadd.f32 %v2364_v28, %v627_v6  ;;  %v1223_v58 = vmul.f32 %v1769_v42, %v2471_v2  ;;  %1800 = vrcp.f32 %v1019_v8  ;;  %v3116_v42 = vld [vmem:[#allocation5_spill] sm:$0xff]  ;;  %v3123_v19 = vld [vmem:[#allocation47_spill] sm:$0xff] }
 0x138   : > { %v1564_v61 = vmul.f32 -1.442695, %v663_v35  ;;  %v1165_v27 = vmul.f32 1.442695, %v1125_v10  ;;  %v1783_v12 = vpop.eup %1782  ;;  %v1035_v47 = vadd.f32 1.0, %v1781_v36  ;;  %1802 = vpow2.f32 %v1191_v29  ;;  %v3124_v36 = vld [vmem:[#allocation9_spill] sm:$0xff] }
 0x139   : > { %v1406_v41 = vsel %vm2480_vm9, %v1336_v21, %v1368_v7  ;;  %v1141_v44 = vsel %vm2288_vm8, %v679_v18, 0.0  ;;  %v1785_v38 = vpop.eup %1784  ;;  %v1239_v53 = vmul.f32 %v1775_v56, %v2471_v2  ;;  %1804 = vpow2.f32 %v1582_v48  ;;  %v3119_v56 = vld [vmem:[#allocation46_spill] sm:$0xff] }
 0x13a   : > { %1438 = vst [vmem:[%s2529_s9 + $0x30] sm:$0xff] %v1406_v41  ;;  %v1580_v63 = vmul.f32 -1.442695, %v679_v18  ;;  %v682_v5 = vadd.f32 %v2364_v28, %v643_v43  ;;  %v1787_v1 = vpop.eup %1786  ;;  %v3114_v46 = vsel %vm2049_vm7, %v2152_v45, %v2160_v52  ;;  %v1384_v29 = vsel %vm2288_vm8, %v1241_v26, %v1785_v38 }
 0x13b   : > { %v1352_v3 = vadd.f32 %v1785_v38, %v3114_v46  ;;  %1806 = vrcp.f32 %v1035_v47  ;;  %v1128_v15 = vsel %vm2288_vm8, %v666_v24, 0.0  ;;  %v1789_v49 = vpop.eup %1788  ;;  %v1017_v54 = vadd.f32 1.0, %v1787_v1 }
 0x13c   : > { %1808 = vpow2.f32 %v1169_v17  ;;  %v1197_v33 = vmul.f32 1.442695, %v1141_v44  ;;  %v625_v0 = vmul.f32 %v2333_v16, %v3115_v50  ;;  %v1791_v9 = vpop.eup %1790  ;;  %v1226_v52 = vmul.f32 %v1783_v12, %v2471_v2 }
 0x13d   : > { %v1422_v45 = vsel %vm2480_vm9, %v1352_v3, %v1384_v29  ;;  %1810 = vpow2.f32 %v1564_v61  ;;  %v1567_v13 = vmul.f32 -1.442695, %v666_v24  ;;  %v1793_v37 = vpop.eup %1792  ;;  %v3118_v59 = vsel %vm2049_vm7, %v3116_v42, %v3117_v55  ;;  %v3127_v3 = vld [vmem:[#allocation11_spill] sm:$0xff]  ;;  %v3128_v29 = vld [vmem:[#allocation12_spill] sm:$0xff] }
 0x13e   : > { %1454 = vst [vmem:[%s2529_s9 + $0xb0] sm:$0xff] %v1422_v45  ;;  %v1334_v35 = vadd.f32 %v1791_v9, %v3118_v59  ;;  %v1366_v22 = vsel %vm2288_vm8, %v1223_v58, %v1791_v9  ;;  %1812 = vrcp.f32 %v1017_v54  ;;  %v1171_v17 = vmul.f32 1.442695, %v1128_v15  ;;  %v1795_v48 = vpop.eup %1794  ;;  %v3125_v58 = vld [vmem:[#allocation10_spill] sm:$0xff]  ;;  %v3130_v45 = vld [vmem:[#allocation48_spill] sm:$0xff] }
 0x13f   : > { %v1242_v14 = vmul.f32 %v1789_v49, %v2471_v2  ;;  %v1033_v20 = vadd.f32 1.0, %v1793_v37  ;;  %1814 = vpow2.f32 %v1201_v60  ;;  %v1144_v39 = vsel %vm2288_vm8, %v682_v5, 0.0  ;;  %v1797_v25 = vpop.eup %1796 }
 0x140   : > { %v1404_v34 = vsel %vm2480_vm9, %v1334_v35, %v1366_v22  ;;  %1816 = vpow2.f32 %v1580_v63  ;;  %v664_v6 = vadd.f32 %v2364_v28, %v625_v0  ;;  %v641_v23 = vmul.f32 %v2333_v16, %v3119_v56  ;;  %v1799_v32 = vpop.eup %1798  ;;  %v3131_v35 = vld [vmem:[#allocation13_spill] sm:$0xff]  ;;  %v3132_v22 = vld [vmem:[#allocation15_spill] sm:$0xff] }
 0x141   : > { %1436 = vst [vmem:[%s2529_s9 + $0x20] sm:$0xff] %v1404_v34  ;;  %v3122_v60 = vsel %vm2049_vm7, %v3120_v51, %v3121_v31  ;;  %v1382_v18 = vsel %vm2288_vm8, %v1239_v53, %v1797_v25  ;;  %1818 = vrcp.f32 %v1033_v20  ;;  %v1583_v30 = vmul.f32 -1.442695, %v682_v5  ;;  %v1801_v26 = vpop.eup %1800 }
 0x142   : > { %v1350_v10 = vadd.f32 %v1797_v25, %v3122_v60  ;;  %v1022_v8 = vadd.f32 1.0, %v1799_v32  ;;  %1820 = vpow2.f32 %v1165_v27  ;;  %v1203_v43 = vmul.f32 1.442695, %v1144_v39  ;;  %v1803_v7 = vpop.eup %1802  ;;  %v3134_v39 = vld [vmem:[#allocation49_spill] sm:$0xff] }
 0x143   : > { %v630_v21 = vmul.f32 %v3123_v19, %v2333_v16  ;;  %v3126_v61 = vsel %vm2049_vm7, %v3124_v36, %v3125_v58  ;;  %v1369_v41 = vsel %vm2288_vm8, %v1226_v52, %v1801_v26  ;;  %1822 = vpow2.f32 %v1567_v13  ;;  %v1805_v27 = vpop.eup %1804  ;;  %v3138_v19 = vld [vmem:[#allocation50_spill] sm:$0xff] }
 0x144   : > { %v1420_v24 = vsel %vm2480_vm9, %v1350_v10, %v1382_v18  ;;  %v1337_v12 = vadd.f32 %v1801_v26, %v3126_v61  ;;  %v1224_v47 = vmul.f32 %v1795_v48, %v2471_v2  ;;  %1824 = vrcp.f32 %v1022_v8  ;;  %v3135_v10 = vld [vmem:[#allocation14_spill] sm:$0xff]  ;;  %v3136_v18 = vld [vmem:[#allocation16_spill] sm:$0xff] }
 0x145   : > { %1452 = vst [vmem:[%s2529_s9 + $0xa0] sm:$0xff] %v1420_v24  ;;  %v1126_v44 = vsel %vm2288_vm8, %v664_v6, 0.0  ;;  %v680_v38 = vadd.f32 %v2364_v28, %v641_v23  ;;  %v1807_v53 = vpop.eup %1806  ;;  %v1038_v5 = vadd.f32 1.0, %v1805_v27  ;;  %1826 = vpow2.f32 %v1197_v33 }
 0x146   : > { %v1407_v63 = vsel %vm2480_vm9, %v1337_v12, %v1369_v41  ;;  %v1565_v1 = vmul.f32 -1.442695, %v664_v6  ;;  %v1809_v46 = vpop.eup %1808  ;;  %v3129_v15 = vsel %vm2049_vm7, %v3127_v3, %v3128_v29  ;;  %v1385_v54 = vsel %vm2288_vm8, %v1242_v14, %v1807_v53 }
 0x147   : > { %1439 = vst [vmem:[%s2529_s9 + $0x38] sm:$0xff] %v1407_v63  ;;  %v1353_v49 = vadd.f32 %v1807_v53, %v3129_v15  ;;  %1828 = vpow2.f32 %v1583_v30  ;;  %v669_v50 = vadd.f32 %v2364_v28, %v630_v21  ;;  %v1811_v0 = vpop.eup %1810  ;;  %v1240_v9 = vmul.f32 %v1803_v7, %v2471_v2  ;;  %v3142_v15 = vld [vmem:[#allocation51_spill] sm:$0xff] }
 0x148   : > { %1830 = vrcp.f32 %v1038_v5  ;;  %v1167_v33 = vmul.f32 1.442695, %v1126_v44  ;;  %v646_v52 = vmul.f32 %v3130_v45, %v2333_v16  ;;  %v1813_v13 = vpop.eup %1812  ;;  %v1020_v42 = vadd.f32 1.0, %v1811_v0  ;;  %v3139_v44 = vld [vmem:[#allocation17_spill] sm:$0xff] }
 0x149   : > { %v1423_v37 = vsel %vm2480_vm9, %v1353_v49, %v1385_v54  ;;  %1832 = vpow2.f32 %v1171_v17  ;;  %v1581_v55 = vmul.f32 -1.442695, %v680_v38  ;;  %v1815_v59 = vpop.eup %1814  ;;  %v3133_v48 = vsel %vm2049_vm7, %v3131_v35, %v3132_v22 }
 0x14a   : > { %1455 = vst [vmem:[%s2529_s9 + $0xb8] sm:$0xff] %v1423_v37  ;;  %v1335_v14 = vadd.f32 %v1813_v13, %v3133_v48  ;;  %v1367_v20 = vsel %vm2288_vm8, %v1224_v47, %v1813_v13  ;;  %1834 = vpow2.f32 %v1565_v1  ;;  %v628_v25 = vmul.f32 %v2333_v16, %v3134_v39  ;;  %v1817_v34 = vpop.eup %1816  ;;  %v3144_v13 = vld [vmem:[#allocation20_spill] sm:$0xff] }
 0x14b   : > { %1836 = vrcp.f32 %v1020_v42  ;;  %v1142_v17 = vsel %vm2288_vm8, %v680_v38, 0.0  ;;  %v1570_v6 = vmul.f32 -1.442695, %v669_v50  ;;  %v685_v56 = vadd.f32 %v2364_v28, %v646_v52  ;;  %v1819_v23 = vpop.eup %1818  ;;  %v3140_v38 = vld [vmem:[#allocation19_spill] sm:$0xff]  ;;  %v3143_v52 = vld [vmem:[#allocation18_spill] sm:$0xff] }
 0x14c   : > { %v1405_v32 = vsel %vm2480_vm9, %v1335_v14, %v1367_v20  ;;  %v1036_v51 = vadd.f32 1.0, %v1817_v34  ;;  %1838 = vpow2.f32 %v1203_v43  ;;  %v1131_v31 = vsel %vm2288_vm8, %v669_v50, 0.0  ;;  %v1821_v60 = vpop.eup %1820 }
 0x14d   : > { %1437 = vst [vmem:[%s2529_s9 + $0x28] sm:$0xff] %v1405_v32  ;;  %v3137_v30 = vsel %vm2049_vm7, %v3135_v10, %v3136_v18  ;;  %v1383_v8 = vsel %vm2288_vm8, %v1240_v9, %v1819_v23  ;;  %1840 = vpow2.f32 %v1581_v55  ;;  %v644_v21 = vmul.f32 %v2333_v16, %v3138_v19  ;;  %v1823_v43 = vpop.eup %1822 }
 0x14e   : > { %v1351_v26 = vadd.f32 %v1819_v23, %v3137_v30  ;;  %v1229_v7 = vmul.f32 %v1809_v46, %v2471_v2  ;;  %1842 = vrcp.f32 %v1036_v51  ;;  %v1199_v24 = vmul.f32 1.442695, %v1142_v17  ;;  %v1825_v58 = vpop.eup %1824  ;;  %v3148_v23 = vld [vmem:[#allocation23_spill] sm:$0xff] }
 0x14f   : > { %v667_v36 = vadd.f32 %v2364_v28, %v628_v25  ;;  %v1245_v12 = vmul.f32 %v1815_v59, %v2471_v2  ;;  %v1023_v41 = vadd.f32 1.0, %v1823_v43  ;;  %v1586_v27 = vmul.f32 -1.442695, %v685_v56  ;;  %v1827_v47 = vpop.eup %1826  ;;  %v3146_v59 = vld [vmem:[#allocation52_spill] sm:$0xff]  ;;  %v3150_v43 = vld [vmem:[#allocation22_spill] sm:$0xff] }
 0x150   : > { %v1421_v61 = vsel %vm2480_vm9, %v1351_v26, %v1383_v8  ;;  %v3141_v53 = vsel %vm2049_vm7, %v3139_v44, %v3140_v38  ;;  %v1372_v5 = vsel %vm2288_vm8, %v1229_v7, %v1825_v58  ;;  %1844 = vpow2.f32 %v1570_v6  ;;  %v3147_v6 = vld [vmem:[#allocation21_spill] sm:$0xff]  ;;  %v3151_v7 = vld [vmem:[#allocation24_spill] sm:$0xff] }
 0x151   : > { %1453 = vst [vmem:[%s2529_s9 + $0xa8] sm:$0xff] %v1421_v61  ;;  %v1340_v63 = vadd.f32 %v1825_v58, %v3141_v53  ;;  %v1177_v1 = vmul.f32 1.442695, %v1131_v31  ;;  %v1829_v46 = vpop.eup %1828  ;;  %v1227_v3 = vmul.f32 %v1821_v60, %v2471_v2  ;;  %1846 = vrcp.f32 %v1023_v41 }
 0x152   : > { %v683_v29 = vadd.f32 %v2364_v28, %v644_v21  ;;  %v631_v49 = vmul.f32 %v3142_v15, %v2333_v16  ;;  %v1831_v54 = vpop.eup %1830  ;;  %v1039_v0 = vadd.f32 1.0, %v1829_v46  ;;  %1848 = vpow2.f32 %v1167_v33  ;;  %v3154_v46 = vld [vmem:[#allocation26_spill] sm:$0xff] }
 0x153   : > { %v1410_v50 = vsel %vm2480_vm9, %v1340_v63, %v1372_v5  ;;  %v1568_v9 = vmul.f32 -1.442695, %v667_v36  ;;  %v1833_v45 = vpop.eup %1832  ;;  %v3145_v37 = vsel %vm2049_vm7, %v3143_v52, %v3144_v13  ;;  %v1388_v55 = vsel %vm2288_vm8, %v1245_v12, %v1831_v54 }
 0x154   : > { %1442 = vst [vmem:[%s2529_s9 + $0x50] sm:$0xff] %v1410_v50  ;;  %v1356_v42 = vadd.f32 %v1831_v54, %v3145_v37  ;;  %1850 = vpow2.f32 %v1586_v27  ;;  %v647_v35 = vmul.f32 %v3146_v59, %v2333_v16  ;;  %v1835_v22 = vpop.eup %1834  ;;  %v1147_v33 = vsel %vm2288_vm8, %v685_v56, 0.0 }
 0x155   : > { %1852 = vrcp.f32 %v1039_v0  ;;  %v1129_v48 = vsel %vm2288_vm8, %v667_v36, 0.0  ;;  %v670_v14 = vadd.f32 %v2364_v28, %v631_v49  ;;  %v1837_v20 = vpop.eup %1836  ;;  %v1021_v25 = vadd.f32 1.0, %v1835_v22 }
 0x156   : > { %v1426_v39 = vsel %vm2480_vm9, %v1356_v42, %v1388_v55  ;;  %1854 = vpow2.f32 %v1199_v24  ;;  %v1584_v34 = vmul.f32 -1.442695, %v683_v29  ;;  %v1839_v17 = vpop.eup %1838  ;;  %v3149_v56 = vsel %vm2049_vm7, %v3147_v6, %v3148_v23  ;;  %v3156_v42 = vld [vmem:[#allocation27_spill] sm:$0xff]  ;;  %v3157_v55 = vld [vmem:[#allocation28_spill] sm:$0xff]  ;;  %v3160_v23 = vld [vmem:[#allocation29_spill] sm:$0xff] }
 0x157   : > { %1458 = vst [vmem:[%s2529_s9 + $0xd0] sm:$0xff] %v1426_v39  ;;  %v1338_v32 = vadd.f32 %v1837_v20, %v3149_v56  ;;  %v1370_v51 = vsel %vm2288_vm8, %v1227_v3, %v1837_v20  ;;  %v1243_v31 = vmul.f32 %v1827_v47, %v2471_v2  ;;  %1856 = vpow2.f32 %v1568_v9  ;;  %v1841_v60 = vpop.eup %1840  ;;  %v3161_v56 = vld [vmem:[#allocation30_spill] sm:$0xff] }
 0x158   : > { %1858 = vrcp.f32 %v1021_v25  ;;  %v1209_v10 = vmul.f32 1.442695, %v1147_v33  ;;  %v1173_v18 = vmul.f32 1.442695, %v1129_v48  ;;  %v686_v30 = vadd.f32 %v2364_v28, %v647_v35  ;;  %v1843_v26 = vpop.eup %1842 }
 0x159   : > { %v1408_v8 = vsel %vm2480_vm9, %v1338_v32, %v1370_v51  ;;  %v1037_v19 = vadd.f32 1.0, %v1841_v60  ;;  %1860 = vpow2.f32 %v1177_v1  ;;  %v1571_v21 = vmul.f32 -1.442695, %v670_v14  ;;  %v3153_v1 = vld [vmem:[#allocation25_spill] sm:$0xff] }
 0x15a   : > { %1440 = vst [vmem:[%s2529_s9 + $0x40] sm:$0xff] %v1408_v8  ;;  %v3152_v24 = vsel %vm2049_vm7, %v3150_v43, %v3151_v7  ;;  %v1386_v58 = vsel %vm2288_vm8, %v1243_v31, %v1843_v26  ;;  %v1230_v61 = vmul.f32 %v1833_v45, %v2471_v2  ;;  %1862 = vpow2.f32 %v1584_v34  ;;  %v1845_v12 = vpop.eup %1844  ;;  %v3159_v34 = vld [vmem:[#allocation2_spill] sm:$0xff] }
 0x15b   : > { %v1354_v36 = vadd.f32 %v1843_v26, %v3152_v24  ;;  %v1246_v41 = vmul.f32 %v1839_v17, %v2471_v2  ;;  %1864 = vrcp.f32 %v1037_v19  ;;  %v1145_v27 = vsel %vm2288_vm8, %v683_v29, 0.0  ;;  %v1847_v44 = vpop.eup %1846  ;;  %v3164_v26 = vld [vmem:[#allocation3_spill] sm:$0xff] }
 0x15c   : > { %v629_v47 = vmul.f32 %v2333_v16, %v2511_v57  ;;  %v1026_v53 = vadd.f32 1.0, %v1845_v12  ;;  %1866 = vpow2.f32 %v1209_v10  ;;  %v1587_v63 = vmul.f32 -1.442695, %v686_v30  ;;  %v1849_v5 = vpop.eup %1848 }
 0x15d   : > { %v1424_v38 = vsel %vm2480_vm9, %v1354_v36, %v1386_v58  ;;  %v3155_v3 = vsel %vm2049_vm7, %v3153_v1, %v3154_v46  ;;  %v1373_v29 = vsel %vm2288_vm8, %v1230_v61, %v1847_v44  ;;  %1868 = vpow2.f32 %v1571_v21  ;;  %v3165_v36 = vld [vmem:[#allocation31_spill] sm:$0xff]  ;;  %v3166_v58 = vld [vmem:[#allocation33_spill] sm:$0xff] }
 0x15e   : > { %1456 = vst [vmem:[%s2529_s9 + $0xc0] sm:$0xff] %v1424_v38  ;;  %v1341_v15 = vadd.f32 %v1847_v44, %v3155_v3  ;;  %v668_v57 = vadd.f32 %v2364_v28, %v629_v47  ;;  %v1851_v49 = vpop.eup %1850  ;;  %1870 = vrcp.f32 %v1026_v53  ;;  %v1205_v54 = vmul.f32 1.442695, %v1145_v27  ;;  %v3168_v27 = vld [vmem:[#allocation37_spill] sm:$0xff]  ;;  %v3169_v53 = vld [vmem:[#allocation43_spill] sm:$0xff] }
 0x15f   : > { %v1132_v50 = vsel %vm2288_vm8, %v670_v14, 0.0  ;;  %v645_v0 = vmul.f32 %v2333_v16, %v2513_v4  ;;  %v1853_v9 = vpop.eup %1852  ;;  %v1042_v52 = vadd.f32 1.0, %v1851_v49  ;;  %1872 = vpow2.f32 %v1173_v18  ;;  %v3170_v49 = vld [vmem:[#allocation32_spill] sm:$0xff] }
 0x160   : > { %v1411_v45 = vsel %vm2480_vm9, %v1341_v15, %v1373_v29  ;;  %v1569_v13 = vmul.f32 -1.442695, %v668_v57  ;;  %v1855_v37 = vpop.eup %1854  ;;  %v3158_v59 = vsel %vm2049_vm7, %v3156_v42, %v3157_v55  ;;  %v1389_v22 = vsel %vm2288_vm8, %v1246_v41, %v1853_v9 }
 0x161   : > { %1443 = vst [vmem:[%s2529_s9 + $0x58] sm:$0xff] %v1411_v45  ;;  %v1357_v35 = vadd.f32 %v1853_v9, %v3158_v59  ;;  %v1228_v4 = vmul.f32 %v1849_v5, %v2471_v2  ;;  %1874 = vpow2.f32 %v1587_v63  ;;  %v1857_v16 = vpop.eup %1856  ;;  %v1179_v33 = vmul.f32 1.442695, %v1132_v50 }
 0x162   : > { %1876 = vrcp.f32 %v1042_v52  ;;  %v1148_v48 = vsel %vm2288_vm8, %v686_v30, 0.0  ;;  %v684_v14 = vadd.f32 %v2364_v28, %v645_v0  ;;  %v1859_v20 = vpop.eup %1858  ;;  %v1024_v25 = vadd.f32 1.0, %v1857_v16  ;;  %v3163_v30 = vld [vmem:[#allocation44_spill] sm:$0xff] }
 0x163   : > { %v1427_v39 = vsel %vm2480_vm9, %v1357_v35, %v1389_v22  ;;  %1878 = vpow2.f32 %v1205_v54  ;;  %v720_v17 = vadd.s32 232, %v3159_v34  ;;  %v1861_v6 = vpop.eup %1860  ;;  %v3162_v32 = vsel %vm2049_vm7, %v3160_v23, %v3161_v56  ;;  %v3171_v54 = vld [vmem:[#allocation34_spill] sm:$0xff]  ;;  %v3176_v35 = vld [vmem:[#allocation40_spill] sm:$0xff] }
 0x164   : > { %1459 = vst [vmem:[%s2529_s9 + $0xd8] sm:$0xff] %v1427_v39  ;;  %v1339_v51 = vadd.f32 %v1859_v20, %v3162_v32  ;;  %v1371_v28 = vsel %vm2288_vm8, %v1228_v4, %v1859_v20  ;;  %1880 = vpow2.f32 %v1569_v13  ;;  %v1585_v31 = vmul.f32 -1.442695, %v684_v14  ;;  %v1863_v60 = vpop.eup %1862  ;;  %v3179_v34 = vld [vmem:[#allocation36_spill] sm:$0xff] }
 0x165   : > { %v1244_v10 = vmul.f32 %v1855_v37, %v2471_v2  ;;  %1882 = vrcp.f32 %v1024_v25  ;;  %v1211_v18 = vmul.f32 1.442695, %v1148_v48  ;;  %v2874_v8 = vadd.s32 %v3164_v26, %v3163_v30  ;;  %v1865_v19 = vpop.eup %1864  ;;  %v3173_v37 = vld [vmem:[#allocation39_spill] sm:$0xff] }
 0x166   : > { %v1409_v21 = vsel %vm2480_vm9, %v1339_v51, %v1371_v28  ;;  %v1040_v43 = vadd.f32 1.0, %v1863_v60  ;;  %1884 = vpow2.f32 %v1179_v33  ;;  %v1130_v7 = vsel %vm2288_vm8, %v668_v57, 0.0  ;;  %v1867_v24 = vpop.eup %1866  ;;  %v3178_v25 = vld [vmem:[#allocation35_spill] sm:$0xff] }
 0x167   : > { %1441 = vst [vmem:[%s2529_s9 + $0x48] sm:$0xff] %v1409_v21  ;;  %v3167_v61 = vsel %vm2049_vm7, %v3165_v36, %v3166_v58  ;;  %v1387_v41 = vsel %vm2288_vm8, %v1244_v10, %v1865_v19  ;;  %v771_v47 = vand.u32 15, %v3168_v27  ;;  %1886 = vpow2.f32 %v1585_v31  ;;  %v1869_v44 = vpop.eup %1868 }
 0x168   : > { %v1355_v12 = vadd.f32 %v1865_v19, %v3167_v61  ;;  %v1233_v38 = vmul.f32 %v1861_v6, %v2471_v2  ;;  %1888 = vrcp.f32 %v1040_v43  ;;  %v899_v63 = vcvt.s32.f32 %v3169_v53  ;;  %v1871_v1 = vpop.eup %1870  ;;  %v3182_v43 = vld [vmem:[#allocation38_spill] sm:$0xff] }
 0x169   : > { %v2892_v5 = vadd.s32 %v3164_v26, %v720_v17  ;;  %v1027_v3 = vadd.f32 1.0, %v1869_v44  ;;  %v1175_v15 = vmul.f32 1.442695, %v1130_v7  ;;  %v1146_v29 = vsel %vm2288_vm8, %v684_v14, 0.0  ;;  %v1873_v57 = vpop.eup %1872  ;;  %v3183_v7 = vld [vmem:[#allocation42_spill] sm:$0xff] }
 0x16a   : > { %v1425_v46 = vsel %vm2480_vm9, %v1355_v12, %v1387_v41  ;;  %v3172_v50 = vsel %vm2049_vm7, %v3170_v49, %v3171_v54  ;;  %v1376_v9 = vsel %vm2288_vm8, %v1233_v38, %v1871_v1  ;;  %1890 = vpow2.f32 %v1211_v18  ;;  %v3181_v18 = vld [vmem:[#allocation41_spill] sm:$0xff] }
 0x16b   : > { %1457 = vst [vmem:[%s2529_s9 + $0xc8] sm:$0xff] %v1425_v46  ;;  %v1344_v0 = vadd.f32 %v1871_v1, %v3172_v50  ;;  %v833_v45 = vshra.s32 %v2874_v8, 4  ;;  %v1875_v52 = vpop.eup %1874  ;;  %v1249_v13 = vmul.f32 %v1867_v24, %v2471_v2  ;;  %v3174_v42 = vcvt.s32.f32 %v3173_v37 }
 0x16c   : > { %1892 = vrcp.f32 %v1027_v3  ;;  %v3177_v22 = vshra.s32 %v3176_v35, 4  ;;  %v1877_v16 = vpop.eup %1876  ;;  %v803_v48 = vcvt.s32.f32 %v771_v47  ;;  %v1043_v14 = vadd.f32 1.0, %v1875_v52 }
 0x16d   : > { %v1287_v59 = vsel %vm2033_vm5, %v3174_v42, 0.0  ;;  %v1414_v33 = vsel %vm2480_vm9, %v1344_v0, %v1376_v9  ;;  %v1207_v20 = vmul.f32 1.442695, %v1146_v29  ;;  %v1879_v39 = vpop.eup %1878  ;;  %v3180_v17 = vsel %vm2049_vm7, %v3178_v25, %v3179_v34 }
 0x16e   : > { %v883_v4 = vand.u32 15, %v3177_v22  ;;  %1446 = vst [vmem:[%s2529_s9 + $0x70] sm:$0xff] %v1414_v33  ;;  %v1360_v6 = vadd.f32 %v1877_v16, %v3180_v17  ;;  %v1392_v23 = vsel %vm2288_vm8, %v1249_v13, %v1877_v16  ;;  %1894 = vpow2.f32 %v1175_v15  ;;  %v1881_v32 = vpop.eup %1880 }
 0x16f   : > { %v849_v56 = vshra.s32 %v2892_v5, 4  ;;  %v1231_v51 = vmul.f32 %v1873_v57, %v2471_v2  ;;  %v787_v28 = vand.u32 15, %v3176_v35  ;;  %1896 = vrcp.f32 %v1043_v14  ;;  %v1883_v60 = vpop.eup %1882 }
 0x170   : > { %v865_v31 = vand.u32 15, %v833_v45  ;;  %v1430_v10 = vsel %vm2480_vm9, %v1360_v6, %v1392_v23  ;;  %v1325_v30 = vsel %vm2049_vm7, %v3181_v18, %v1287_v59  ;;  %v915_v26 = vcvt.s32.f32 %v883_v4  ;;  %v1885_v21 = vpop.eup %1884 }
 0x171   : > { %v1025_v19 = vadd.f32 1.0, %v1881_v32  ;;  %1462 = vst [vmem:[%s2529_s9 + $0xf0] sm:$0xff] %v1430_v10  ;;  %v3184_v24 = vsel %vm2049_vm7, %v3182_v43, %v3183_v7  ;;  %v1374_v58 = vsel %vm2288_vm8, %v1231_v51, %v1883_v60  ;;  %v1274_v61 = vsel %vm2033_vm5, %v899_v63, 0.0  ;;  %v1887_v12 = vpop.eup %1886 }
 0x172   : > { %v1342_v36 = vadd.f32 %v1883_v60, %v3184_v24  ;;  %1898 = vpow2.f32 %v1207_v20  ;;  %v1247_v41 = vmul.f32 %v1879_v39, %v2471_v2  ;;  %v769_v27 = vand.u32 15, %v2874_v8  ;;  %v1889_v44 = vpop.eup %1888 }
 0x173   : > { %1900 = vrcp.f32 %v1025_v19  ;;  %v881_v47 = vand.u32 15, %v849_v56  ;;  %v819_v53 = vcvt.s32.f32 %v787_v28  ;;  %v897_v1 = vcvt.s32.f32 %v865_v31 }
 0x174   : > { %v1412_v38 = vsel %vm2480_vm9, %v1342_v36, %v1374_v58  ;;  %v1041_v46 = vadd.f32 1.0, %v1887_v12  ;;  %v1358_v3 = vadd.f32 %v1889_v44, %v1325_v30  ;;  %v1390_v63 = vsel %vm2288_vm8, %v1247_v41, %v1889_v44  ;;  %v1891_v29 = vpop.eup %1890 }
 0x175   : > { %1444 = vst [vmem:[%s2529_s9 + $0x60] sm:$0xff] %v1412_v38  ;;  %v1312_v15 = vsel %vm2049_vm7, %v803_v48, %v1274_v61  ;;  %v1290_v8 = vsel %vm2033_vm5, %v915_v26, 0.0  ;;  %v1234_v57 = vmul.f32 %v1885_v21, %v2471_v2  ;;  %v785_v49 = vand.u32 15, %v2892_v5 }
 0x176   : > { %1902 = vrcp.f32 %v1041_v46  ;;  %v1893_v54 = vpop.eup %1892  ;;  %v1428_v50 = vsel %vm2480_vm9, %v1358_v3, %v1390_v63  ;;  %v801_v0 = vcvt.s32.f32 %v769_v27  ;;  %v913_v9 = vcvt.s32.f32 %v881_v47 }
 0x177   : > { %1460 = vst [vmem:[%s2529_s9 + $0xe0] sm:$0xff] %v1428_v50  ;;  %v1345_v45 = vadd.f32 %v1893_v54, %v1312_v15  ;;  %v1377_v52 = vsel %vm2288_vm8, %v1234_v57, %v1893_v54  ;;  %v1328_v13 = vsel %vm2049_vm7, %v819_v53, %v1290_v8  ;;  %v1272_v5 = vsel %vm2033_vm5, %v897_v1, 0.0 }
 0x178   : > { %v1895_v37 = vpop.eup %1894  ;;  %v1250_v42 = vmul.f32 %v1891_v29, %v2471_v2  ;;  %v817_v22 = vcvt.s32.f32 %v785_v49  ;;  %v1310_v33 = vsel %vm2049_vm7, %v801_v0, %v1272_v5  ;;  %v1288_v48 = vsel %vm2033_vm5, %v913_v9, 0.0 }
 0x179   : > { %v1897_v59 = vpop.eup %1896  ;;  %v1415_v35 = vsel %vm2480_vm9, %v1345_v45, %v1377_v52  ;;  %v1232_v20 = vmul.f32 %v1895_v37, %v2471_v2 }
 0x17a   : > { %1447 = vst [vmem:[%s2529_s9 + $0x78] sm:$0xff] %v1415_v35  ;;  %v1361_v4 = vadd.f32 %v1897_v59, %v1328_v13  ;;  %v1393_v16 = vsel %vm2288_vm8, %v1250_v42, %v1897_v59  ;;  %v1326_v6 = vsel %vm2049_vm7, %v817_v22, %v1288_v48 }
 0x17c   : > { %v1899_v14 = vpop.eup %1898  ;;  %v1431_v25 = vsel %vm2480_vm9, %v1361_v4, %v1393_v16 }
 0x17d   : > { %v1901_v39 = vpop.eup %1900  ;;  %1463 = vst [vmem:[%s2529_s9 + $0xf8] sm:$0xff] %v1431_v25  ;;  %v1248_v23 = vmul.f32 %v1899_v14, %v2471_v2 }
 0x17e   : > { %v1343_v34 = vadd.f32 %v1901_v39, %v1310_v33  ;;  %v1375_v17 = vsel %vm2288_vm8, %v1232_v20, %v1901_v39 }
 0x180   : > { %v1903_v55 = vpop.eup %1902  ;;  %v1413_v56 = vsel %vm2480_vm9, %v1343_v34, %v1375_v17 }
 0x181   : > { %1445 = vst [vmem:[%s2529_s9 + $0x68] sm:$0xff] %v1413_v56  ;;  %v1359_v32 = vadd.f32 %v1903_v55, %v1326_v6  ;;  %v1391_v51 = vsel %vm2288_vm8, %v1248_v23, %v1903_v55 }
 0x183   : > { %v1429_v28 = vsel %vm2480_vm9, %v1359_v32, %v1391_v51 }
 0x184   : > { %1461 = vst [vmem:[%s2529_s9 + $0xe8] sm:$0xff] %v1429_v28 }
 0x185 PF: > { %s16_s21 = sadd.s32 1, %s1910_s21  }
 0x186   : > { %p13_p4 = scmp.ge.s32.totalorder %s16_s21, 4  }
 0x188   :  { %15 = sbr.rel (!%p13_p4) target bundleno = 1 (0x1), region = 74 }

</bundles_post_ra>
